<compile_context>
chip_gen: v7x
topology: tpu7x:2x2x1
jax: 0.10.0
libtpu: 0.0.40
codegen_flags: <defaults>
</compile_context>

<pallas_src>
import functools

import numpy as np

import jax
import jax.numpy as jnp
from jax.experimental import pallas as pl
from jax.experimental.pallas import tpu as pltpu

LEAKY_SLOPE = 0.01
SELU_ALPHA = 1.6732632423543772
SELU_SCALE = 1.0507009873554805
MXU_DTYPE = jnp.bfloat16       # matmul operand dtype (accumulation is f32)


# ----------------------------- fused Pallas kernel --------------------------

def _fused_forward_kernel(dims,
                          x1_ref, pool_ref, w1_ref, b1_ref, w2_ref, b2_ref,
                          w3_ref, wl1_ref, bl1_ref, wl2_ref, bl2_ref,
                          o_ref,
                          y1_scr, p_scr, patch2_scr, y2_scr,
                          patch3_scr, y3_scr, patchl1_scr):
    (B, PH, PW, M2, M3, ML1) = dims
    f32 = jnp.float32

    def leaky(v):
        return jnp.where(v >= 0.0, v, LEAKY_SLOPE * v)

    def mm(a, b):
        return jnp.dot(a, b, preferred_element_type=f32)

    # ---- c1: Conv2d(cin, 128, (2,3), bias) + leaky — ONE matmul ------------
    y1 = leaky(mm(x1_ref[...], w1_ref[...]) + b1_ref[...])     # (B*OH1*OW1,128)
    y1_scr[...] = y1.astype(MXU_DTYPE)

    # ---- AvgPool2d(2): ONE constant 0.25-selection matmul ------------------
    # output rows are in padded "tall image" order: row = (b*PH + ph)*PW + pw
    p_scr[...] = mm(pool_ref[...], y1_scr[...]).astype(MXU_DTYPE)

    # ---- c2: Conv2d(128,128,3,bias) + leaky — 9 block copies + ONE matmul --
    for dh in range(3):
        for dw in range(3):
            t = dh * 3 + dw
            s = dh * PW + dw
            patch2_scr[:, t * 128:(t + 1) * 128] = p_scr[s:s + M2, :]
    y2 = leaky(mm(patch2_scr[...], w2_ref[...]) + b2_ref[...])  # (M2, 128) f32
    y2_scr[...] = y2.astype(MXU_DTYPE)

    # ---- c3: Conv2d(128,32,3,bias=False) + leaky — same scheme -------------
    for dh in range(3):
        for dw in range(3):
            t = dh * 3 + dw
            s = dh * PW + dw
            patch3_scr[:, t * 128:(t + 1) * 128] = y2_scr[s:s + M3, :]
    y3 = leaky(mm(patch3_scr[...], w3_ref[...]))                 # (M3, 32) f32
    y3_scr[...] = y3.astype(MXU_DTYPE)

    # ---- flatten + l1: a (3,5)-kernel "conv" over the padded layout --------
    # 15 block copies + ONE matmul; valid output rows are b*PH*PW (one per b).
    for dh in range(3):
        for dw in range(5):
            t = dh * 5 + dw
            s = dh * PW + dw
            patchl1_scr[:, t * 32:(t + 1) * 32] = y3_scr[s:s + ML1, :]
    hm = mm(patchl1_scr[...], wl1_ref[...])                      # (ML1, 256) f32

    h = jnp.concatenate([hm[b * PH * PW: b * PH * PW + 1, :] for b in range(B)],
                        axis=0)                                  # (B, 256)
    h = h + bl1_ref[...]
    h = SELU_SCALE * jnp.where(
        h > 0.0, h, SELU_ALPHA * (jnp.exp(jnp.minimum(h, 0.0)) - 1.0))

    y = mm(h.astype(MXU_DTYPE), wl2_ref[...]) + bl2_ref[...]     # (B, 10)

    # per-column activations: cols 0-1,5-6 tanh; 2-3,7-8 sigmoid; 4,9 identity
    col = jax.lax.broadcasted_iota(jnp.int32, y.shape, 1)
    tanh_m = (col < 2) | ((col >= 5) & (col < 7))
    sigm_m = ((col >= 2) & (col < 4)) | ((col >= 7) & (col < 9))
    t = jnp.tanh(jnp.where(sigm_m, 0.5 * y, y))   # sigmoid(x)=0.5*(1+tanh(x/2))
    o_ref[...] = jnp.where(tanh_m, t, jnp.where(sigm_m, 0.5 * (t + 1.0), y))


# ----------------------------- wrapper ---------------------------------------

def _pool_select_matrix(B, OH1, OW1):
    """Constant (B*PH*PW, B*OH1*OW1) 2x2 average-pool selection matrix."""
    PH, PW = OH1 // 2, OW1 // 2
    sel = np.zeros((B * PH * PW, B * OH1 * OW1), np.float32)
    for b in range(B):
        for ph in range(PH):
            for pw in range(PW):
                r = (b * PH + ph) * PW + pw
                for dh in range(2):
                    for dw in range(2):
                        c = (b * OH1 + 2 * ph + dh) * OW1 + 2 * pw + dw
                        sel[r, c] = 0.25
    return jnp.asarray(sel, MXU_DTYPE)


def regression_forward(prepped, x_nchw, alpha):
    del alpha  # alpha is unused in the reference forward()
    B, CIN, H, W = x_nchw.shape
    OH1, OW1 = H - 1, W - 2          # conv1 kernel (2, 3)
    assert OH1 % 2 == 0 and OW1 % 2 == 0, "AvgPool2d(2) expects even dims here"
    PH, PW = OH1 // 2, OW1 // 2      # AvgPool2d(2)
    OH2, OW2 = PH - 2, PW - 2        # conv2 kernel 3
    OH3, OW3 = OH2 - 2, OW2 - 2      # conv3 kernel 3
    assert (OH3, OW3) == (3, 5), "module hard-codes a 32*3*5 flatten into l1"

    NP1 = B * OH1 * OW1                         # conv1 / pool-input rows
    NPOOL = B * PH * PW                         # pooled tall-image rows
    M2 = (B * PH - 2) * PW - 2                  # conv2 padded output rows
    M3 = ((B - 1) * PH + OH3 - 1) * PW + OW3    # conv3 padded output rows
    ML1 = (B - 1) * PH * PW + 1                 # l1 padded output rows
    dims = (B, PH, PW, M2, M3, ML1)

    # conv1 im2col precomputed by XLA (K order = (dh, dw, cin)), bf16.
    x = jnp.transpose(x_nchw, (0, 2, 3, 1)).astype(jnp.float32)
    cols = [x[:, dh:dh + OH1, dw:dw + OW1, :]
            for dh in range(2) for dw in range(3)]
    x1 = jnp.concatenate(cols, axis=-1).reshape(NP1, 6 * CIN).astype(MXU_DTYPE)

    pool = _pool_select_matrix(B, OH1, OW1)     # (NPOOL, NP1) bf16 constant

    kernel = functools.partial(_fused_forward_kernel, dims)

    inputs = (x1, pool, prepped['w1'], prepped['b1'], prepped['w2'],
              prepped['b2'], prepped['w3'], prepped['l1w'], prepped['l1b'],
              prepped['l2w'], prepped['l2b'])

    def _fs(shape):
        zeros = (0,) * len(shape)
        return pl.BlockSpec(shape, lambda i: zeros)

    flops = 2 * (NP1 * 6 * CIN * 128 + NPOOL * NP1 * 128
                 + M2 * 1152 * 128 + M3 * 1152 * 32
                 + ML1 * 480 * 256 + B * 256 * 10)
    bytes_accessed = (sum(int(a.size) * a.dtype.itemsize for a in inputs)
                      + B * 10 * 4)

    return pl.pallas_call(
        kernel,
        out_shape=jax.ShapeDtypeStruct((B, 10), jnp.float32),
        grid=(1,),
        in_specs=[_fs(a.shape) for a in inputs],
        out_specs=_fs((B, 10)),
        scratch_shapes=[
            pltpu.VMEM((NP1, 128), MXU_DTYPE),     # conv1 output
            pltpu.VMEM((NPOOL, 128), MXU_DTYPE),   # pooled (padded tall layout)
            pltpu.VMEM((M2, 1152), MXU_DTYPE),     # conv2 batched im2col
            pltpu.VMEM((M2, 128), MXU_DTYPE),      # conv2 output
            pltpu.VMEM((M3, 1152), MXU_DTYPE),     # conv3 batched im2col
            pltpu.VMEM((M3, 32), MXU_DTYPE),       # conv3 output
            pltpu.VMEM((ML1, 480), MXU_DTYPE),     # flatten/l1 "im2col"
        ],
        compiler_params=pltpu.CompilerParams(
            dimension_semantics=("arbitrary",)),
        cost_estimate=pl.CostEstimate(flops=flops,
                                      transcendentals=B * (256 + 10),
                                      bytes_accessed=bytes_accessed),
    )(*inputs)


# ----------------------------- parameters -----------------------------------

def init_params(key, cin):
    ks = jax.random.split(key, 9)
    s = 0.05
    return dict(
        w1=jax.random.normal(ks[0], (2, 3, cin, 128), jnp.float32) * s,  # HWIO
        b1=jax.random.normal(ks[1], (128,), jnp.float32) * s,
        w2=jax.random.normal(ks[2], (3, 3, 128, 128), jnp.float32) * s,
        b2=jax.random.normal(ks[3], (128,), jnp.float32) * s,
        w3=jax.random.normal(ks[4], (3, 3, 128, 32), jnp.float32) * s,   # no bias
        l1w=jax.random.normal(ks[5], (32 * 3 * 5, 256), jnp.float32) * s,
        l1b=jax.random.normal(ks[6], (256,), jnp.float32) * s,
        l2w=jax.random.normal(ks[7], (256, 10), jnp.float32) * s,
        l2b=jax.random.normal(ks[8], (10,), jnp.float32) * s,
    )


def prepare_params(params, cin):
    """One-time repack (outside the hot path): flatten conv weights to
    (kh*kw*cin, cout), permute l1 rows from the PyTorch NCHW (c,h,w) flatten
    order to the kernel's (h,w,c) order, cast matmul weights to bf16
    (biases stay f32)."""
    l1w = (params['l1w'].reshape(32, 3, 5, 256)
           .transpose(1, 2, 0, 3).reshape(32 * 3 * 5, 256))
    return dict(
        w1=params['w1'].reshape(2 * 3 * cin, 128).astype(MXU_DTYPE),
        b1=params['b1'].reshape(1, 128).astype(jnp.float32),
        w2=params['w2'].reshape(3 * 3 * 128, 128).astype(MXU_DTYPE),
        b2=params['b2'].reshape(1, 128).astype(jnp.float32),
        w3=params['w3'].reshape(3 * 3 * 128, 32).astype(MXU_DTYPE),
        l1w=l1w.astype(MXU_DTYPE),
        l1b=params['l1b'].reshape(1, 256).astype(jnp.float32),
        l2w=params['l2w'].astype(MXU_DTYPE),
        l2b=params['l2b'].reshape(1, 10).astype(jnp.float32),
    )


if __name__ == "__main__":
    key = jax.random.PRNGKey(0)
    k_x, k_p = jax.random.split(key)

    # inChannels = sizes['enc']['op'][-1] -> pick 4; spatial 15x20 gives a
    # 3x5 feature map after c3, matching the hard-coded 32*3*5 flatten.
    B, CIN, H, W = 2, 4, 15, 20
    x = jax.random.normal(k_x, (B, CIN, H, W), jnp.float32)
    alpha = jnp.float32(0.5)          # unused by the reference forward
    params = prepare_params(init_params(k_p, CIN), CIN)

    fwd = jax.jit(functools.partial(regression_forward, params))
    out = fwd(x, alpha)
    jax.block_until_ready(out)

    assert out.shape == (B, 10), out.shape
    assert bool(jnp.all(jnp.isfinite(out)))
    print("KERNEL_OK")
</pallas_src>

<mosaic_0001>
module attributes {stable_mosaic.version = 11 : i64} {
  func.func @_fused_forward_kernel(%arg0: i32, %arg1: memref<504x24xbf16, #tpu.memory_space<vmem>>, %arg2: memref<126x504xbf16, #tpu.memory_space<vmem>>, %arg3: memref<24x128xbf16, #tpu.memory_space<vmem>>, %arg4: memref<1x128xf32, #tpu.memory_space<vmem>>, %arg5: memref<1152x128xbf16, #tpu.memory_space<vmem>>, %arg6: memref<1x128xf32, #tpu.memory_space<vmem>>, %arg7: memref<1152x32xbf16, #tpu.memory_space<vmem>>, %arg8: memref<480x256xbf16, #tpu.memory_space<vmem>>, %arg9: memref<1x256xf32, #tpu.memory_space<vmem>>, %arg10: memref<256x10xbf16, #tpu.memory_space<vmem>>, %arg11: memref<1x10xf32, #tpu.memory_space<vmem>>, %arg12: memref<2x10xf32, #tpu.memory_space<vmem>>, %arg13: memref<504x128xbf16, #tpu.memory_space<vmem>>, %arg14: memref<126x128xbf16, #tpu.memory_space<vmem>>, %arg15: memref<106x1152xbf16, #tpu.memory_space<vmem>>, %arg16: memref<106x128xbf16, #tpu.memory_space<vmem>>, %arg17: memref<86x1152xbf16, #tpu.memory_space<vmem>>, %arg18: memref<86x32xbf16, #tpu.memory_space<vmem>>, %arg19: memref<64x480xbf16, #tpu.memory_space<vmem>>) attributes {dimension_semantics = [#tpu.dimension_semantics<arbitrary>], iteration_bounds = array<i64: 1>, scalar_prefetch = 0 : i64, scratch_operands = 7 : i64, tpu.core_type = #tpu.core_type<tc>, window_params = [{pipeline_mode = #tpu.pipeline_mode<synchronous>, transform_indices = @transform_0, window_bounds = array<i64: 504, 24>}, {pipeline_mode = #tpu.pipeline_mode<synchronous>, transform_indices = @transform_1, window_bounds = array<i64: 126, 504>}, {pipeline_mode = #tpu.pipeline_mode<synchronous>, transform_indices = @transform_2, window_bounds = array<i64: 24, 128>}, {pipeline_mode = #tpu.pipeline_mode<synchronous>, transform_indices = @transform_3, window_bounds = array<i64: 1, 128>}, {pipeline_mode = #tpu.pipeline_mode<synchronous>, transform_indices = @transform_4, window_bounds = array<i64: 1152, 128>}, {pipeline_mode = #tpu.pipeline_mode<synchronous>, transform_indices = @transform_5, window_bounds = array<i64: 1, 128>}, {pipeline_mode = #tpu.pipeline_mode<synchronous>, transform_indices = @transform_6, window_bounds = array<i64: 1152, 32>}, {pipeline_mode = #tpu.pipeline_mode<synchronous>, transform_indices = @transform_7, window_bounds = array<i64: 480, 256>}, {pipeline_mode = #tpu.pipeline_mode<synchronous>, transform_indices = @transform_8, window_bounds = array<i64: 1, 256>}, {pipeline_mode = #tpu.pipeline_mode<synchronous>, transform_indices = @transform_9, window_bounds = array<i64: 256, 10>}, {pipeline_mode = #tpu.pipeline_mode<synchronous>, transform_indices = @transform_10, window_bounds = array<i64: 1, 10>}, {pipeline_mode = #tpu.pipeline_mode<synchronous>, transform_indices = @transform_11, window_bounds = array<i64: 2, 10>}]} {
    %c0 = arith.constant 0 : index
    %c0_0 = arith.constant 0 : index
    %0 = vector.load %arg1[%c0, %c0_0] : memref<504x24xbf16, #tpu.memory_space<vmem>>, vector<504x24xbf16>
    %c0_1 = arith.constant 0 : index
    %c0_2 = arith.constant 0 : index
    %1 = vector.load %arg3[%c0_1, %c0_2] : memref<24x128xbf16, #tpu.memory_space<vmem>>, vector<24x128xbf16>
    %cst = arith.constant dense<0.000000e+00> : vector<504x128xf32>
    %2 = tpu.matmul %0, %1, %cst {dimension_numbers = #tpu.dot_dimension_numbers<[1], [0], [0], [1], [0, 0, 1, 1], [], []>} : vector<504x24xbf16>, vector<24x128xbf16>, vector<504x128xf32> -> vector<504x128xf32>
    %c0_3 = arith.constant 0 : index
    %c0_4 = arith.constant 0 : index
    %3 = vector.load %arg4[%c0_3, %c0_4] : memref<1x128xf32, #tpu.memory_space<vmem>>, vector<1x128xf32>
    %4 = vector.broadcast %3 : vector<1x128xf32> to vector<504x128xf32>
    %5 = arith.addf %2, %4 : vector<504x128xf32>
    %cst_5 = arith.constant 0.000000e+00 : f32
    %6 = vector.broadcast %cst_5 : f32 to vector<504x128xf32>
    %7 = arith.cmpf oge, %5, %6 : vector<504x128xf32>
    %cst_6 = arith.constant 0.00999999977 : f32
    %8 = vector.broadcast %cst_6 : f32 to vector<504x128xf32>
    %9 = arith.mulf %8, %5 : vector<504x128xf32>
    %10 = arith.select %7, %5, %9 : vector<504x128xi1>, vector<504x128xf32>
    %11 = arith.truncf %10 : vector<504x128xf32> to vector<504x128xbf16>
    %c0_7 = arith.constant 0 : index
    %c0_8 = arith.constant 0 : index
    %12 = vector.load %arg13[%c0_7, %c0_8] : memref<504x128xbf16, #tpu.memory_space<vmem>>, vector<504x128xbf16>
    tpu.vector_store %arg13[%c0_7, %c0_8], %11 {strides = array<i32>} : memref<504x128xbf16, #tpu.memory_space<vmem>>, vector<504x128xbf16>,
    %c0_9 = arith.constant 0 : index
    %c0_10 = arith.constant 0 : index
    %13 = vector.load %arg2[%c0_9, %c0_10] : memref<126x504xbf16, #tpu.memory_space<vmem>>, vector<126x504xbf16>
    %c0_11 = arith.constant 0 : index
    %c0_12 = arith.constant 0 : index
    %14 = vector.load %arg13[%c0_11, %c0_12] : memref<504x128xbf16, #tpu.memory_space<vmem>>, vector<504x128xbf16>
    %cst_13 = arith.constant dense<0.000000e+00> : vector<126x128xf32>
    %15 = tpu.matmul %13, %14, %cst_13 {dimension_numbers = #tpu.dot_dimension_numbers<[1], [0], [0], [1], [0, 0, 1, 1], [], []>} : vector<126x504xbf16>, vector<504x128xbf16>, vector<126x128xf32> -> vector<126x128xf32>
    %16 = arith.truncf %15 : vector<126x128xf32> to vector<126x128xbf16>
    %c0_14 = arith.constant 0 : index
    %c0_15 = arith.constant 0 : index
    %17 = vector.load %arg14[%c0_14, %c0_15] : memref<126x128xbf16, #tpu.memory_space<vmem>>, vector<126x128xbf16>
    tpu.vector_store %arg14[%c0_14, %c0_15], %16 {strides = array<i32>} : memref<126x128xbf16, #tpu.memory_space<vmem>>, vector<126x128xbf16>,
    %c0_16 = arith.constant 0 : index
    %c0_17 = arith.constant 0 : index
    %18 = vector.load %arg14[%c0_16, %c0_17] : memref<126x128xbf16, #tpu.memory_space<vmem>>, vector<106x128xbf16>
    %c0_18 = arith.constant 0 : index
    %c0_19 = arith.constant 0 : index
    %19 = vector.load %arg15[%c0_18, %c0_19] : memref<106x1152xbf16, #tpu.memory_space<vmem>>, vector<106x128xbf16>
    tpu.vector_store %arg15[%c0_18, %c0_19], %18 {strides = array<i32>} : memref<106x1152xbf16, #tpu.memory_space<vmem>>, vector<106x128xbf16>,
    %c1 = arith.constant 1 : index
    %c0_20 = arith.constant 0 : index
    %20 = vector.load %arg14[%c1, %c0_20] : memref<126x128xbf16, #tpu.memory_space<vmem>>, vector<106x128xbf16>
    %c0_21 = arith.constant 0 : index
    %c128 = arith.constant 128 : index
    %21 = vector.load %arg15[%c0_21, %c128] : memref<106x1152xbf16, #tpu.memory_space<vmem>>, vector<106x128xbf16>
    tpu.vector_store %arg15[%c0_21, %c128], %20 {strides = array<i32>} : memref<106x1152xbf16, #tpu.memory_space<vmem>>, vector<106x128xbf16>,
    %c2 = arith.constant 2 : index
    %c0_22 = arith.constant 0 : index
    %22 = vector.load %arg14[%c2, %c0_22] : memref<126x128xbf16, #tpu.memory_space<vmem>>, vector<106x128xbf16>
    %c0_23 = arith.constant 0 : index
    %c256 = arith.constant 256 : index
    %23 = vector.load %arg15[%c0_23, %c256] : memref<106x1152xbf16, #tpu.memory_space<vmem>>, vector<106x128xbf16>
    tpu.vector_store %arg15[%c0_23, %c256], %22 {strides = array<i32>} : memref<106x1152xbf16, #tpu.memory_space<vmem>>, vector<106x128xbf16>,
    %c9 = arith.constant 9 : index
    %c0_24 = arith.constant 0 : index
    %24 = vector.load %arg14[%c9, %c0_24] : memref<126x128xbf16, #tpu.memory_space<vmem>>, vector<106x128xbf16>
    %c0_25 = arith.constant 0 : index
    %c384 = arith.constant 384 : index
    %25 = vector.load %arg15[%c0_25, %c384] : memref<106x1152xbf16, #tpu.memory_space<vmem>>, vector<106x128xbf16>
    tpu.vector_store %arg15[%c0_25, %c384], %24 {strides = array<i32>} : memref<106x1152xbf16, #tpu.memory_space<vmem>>, vector<106x128xbf16>,
    %c10 = arith.constant 10 : index
    %c0_26 = arith.constant 0 : index
    %26 = vector.load %arg14[%c10, %c0_26] : memref<126x128xbf16, #tpu.memory_space<vmem>>, vector<106x128xbf16>
    %c0_27 = arith.constant 0 : index
    %c512 = arith.constant 512 : index
    %27 = vector.load %arg15[%c0_27, %c512] : memref<106x1152xbf16, #tpu.memory_space<vmem>>, vector<106x128xbf16>
    tpu.vector_store %arg15[%c0_27, %c512], %26 {strides = array<i32>} : memref<106x1152xbf16, #tpu.memory_space<vmem>>, vector<106x128xbf16>,
    %c11 = arith.constant 11 : index
    %c0_28 = arith.constant 0 : index
    %28 = vector.load %arg14[%c11, %c0_28] : memref<126x128xbf16, #tpu.memory_space<vmem>>, vector<106x128xbf16>
    %c0_29 = arith.constant 0 : index
    %c640 = arith.constant 640 : index
    %29 = vector.load %arg15[%c0_29, %c640] : memref<106x1152xbf16, #tpu.memory_space<vmem>>, vector<106x128xbf16>
    tpu.vector_store %arg15[%c0_29, %c640], %28 {strides = array<i32>} : memref<106x1152xbf16, #tpu.memory_space<vmem>>, vector<106x128xbf16>,
    %c18 = arith.constant 18 : index
    %c0_30 = arith.constant 0 : index
    %30 = vector.load %arg14[%c18, %c0_30] : memref<126x128xbf16, #tpu.memory_space<vmem>>, vector<106x128xbf16>
    %c0_31 = arith.constant 0 : index
    %c768 = arith.constant 768 : index
    %31 = vector.load %arg15[%c0_31, %c768] : memref<106x1152xbf16, #tpu.memory_space<vmem>>, vector<106x128xbf16>
    tpu.vector_store %arg15[%c0_31, %c768], %30 {strides = array<i32>} : memref<106x1152xbf16, #tpu.memory_space<vmem>>, vector<106x128xbf16>,
    %c19 = arith.constant 19 : index
    %c0_32 = arith.constant 0 : index
    %32 = vector.load %arg14[%c19, %c0_32] : memref<126x128xbf16, #tpu.memory_space<vmem>>, vector<106x128xbf16>
    %c0_33 = arith.constant 0 : index
    %c896 = arith.constant 896 : index
    %33 = vector.load %arg15[%c0_33, %c896] : memref<106x1152xbf16, #tpu.memory_space<vmem>>, vector<106x128xbf16>
    tpu.vector_store %arg15[%c0_33, %c896], %32 {strides = array<i32>} : memref<106x1152xbf16, #tpu.memory_space<vmem>>, vector<106x128xbf16>,
    %c20 = arith.constant 20 : index
    %c0_34 = arith.constant 0 : index
    %34 = vector.load %arg14[%c20, %c0_34] : memref<126x128xbf16, #tpu.memory_space<vmem>>, vector<106x128xbf16>
    %c0_35 = arith.constant 0 : index
    %c1024 = arith.constant 1024 : index
    %35 = vector.load %arg15[%c0_35, %c1024] : memref<106x1152xbf16, #tpu.memory_space<vmem>>, vector<106x128xbf16>
    tpu.vector_store %arg15[%c0_35, %c1024], %34 {strides = array<i32>} : memref<106x1152xbf16, #tpu.memory_space<vmem>>, vector<106x128xbf16>,
    %c0_36 = arith.constant 0 : index
    %c0_37 = arith.constant 0 : index
    %36 = vector.load %arg15[%c0_36, %c0_37] : memref<106x1152xbf16, #tpu.memory_space<vmem>>, vector<106x1152xbf16>
    %c0_38 = arith.constant 0 : index
    %c0_39 = arith.constant 0 : index
    %37 = vector.load %arg5[%c0_38, %c0_39] : memref<1152x128xbf16, #tpu.memory_space<vmem>>, vector<1152x128xbf16>
    %cst_40 = arith.constant dense<0.000000e+00> : vector<106x128xf32>
    %38 = tpu.matmul %36, %37, %cst_40 {dimension_numbers = #tpu.dot_dimension_numbers<[1], [0], [0], [1], [0, 0, 1, 1], [], []>} : vector<106x1152xbf16>, vector<1152x128xbf16>, vector<106x128xf32> -> vector<106x128xf32>
    %c0_41 = arith.constant 0 : index
    %c0_42 = arith.constant 0 : index
    %39 = vector.load %arg6[%c0_41, %c0_42] : memref<1x128xf32, #tpu.memory_space<vmem>>, vector<1x128xf32>
    %40 = vector.broadcast %39 : vector<1x128xf32> to vector<106x128xf32>
    %41 = arith.addf %38, %40 : vector<106x128xf32>
    %cst_43 = arith.constant 0.000000e+00 : f32
    %42 = vector.broadcast %cst_43 : f32 to vector<106x128xf32>
    %43 = arith.cmpf oge, %41, %42 : vector<106x128xf32>
    %cst_44 = arith.constant 0.00999999977 : f32
    %44 = vector.broadcast %cst_44 : f32 to vector<106x128xf32>
    %45 = arith.mulf %44, %41 : vector<106x128xf32>
    %46 = arith.select %43, %41, %45 : vector<106x128xi1>, vector<106x128xf32>
    %47 = arith.truncf %46 : vector<106x128xf32> to vector<106x128xbf16>
    %c0_45 = arith.constant 0 : index
    %c0_46 = arith.constant 0 : index
    %48 = vector.load %arg16[%c0_45, %c0_46] : memref<106x128xbf16, #tpu.memory_space<vmem>>, vector<106x128xbf16>
    tpu.vector_store %arg16[%c0_45, %c0_46], %47 {strides = array<i32>} : memref<106x128xbf16, #tpu.memory_space<vmem>>, vector<106x128xbf16>,
    %c0_47 = arith.constant 0 : index
    %c0_48 = arith.constant 0 : index
    %49 = vector.load %arg16[%c0_47, %c0_48] : memref<106x128xbf16, #tpu.memory_space<vmem>>, vector<86x128xbf16>
    %c0_49 = arith.constant 0 : index
    %c0_50 = arith.constant 0 : index
    %50 = vector.load %arg17[%c0_49, %c0_50] : memref<86x1152xbf16, #tpu.memory_space<vmem>>, vector<86x128xbf16>
    tpu.vector_store %arg17[%c0_49, %c0_50], %49 {strides = array<i32>} : memref<86x1152xbf16, #tpu.memory_space<vmem>>, vector<86x128xbf16>,
    %c1_51 = arith.constant 1 : index
    %c0_52 = arith.constant 0 : index
    %51 = vector.load %arg16[%c1_51, %c0_52] : memref<106x128xbf16, #tpu.memory_space<vmem>>, vector<86x128xbf16>
    %c0_53 = arith.constant 0 : index
    %c128_54 = arith.constant 128 : index
    %52 = vector.load %arg17[%c0_53, %c128_54] : memref<86x1152xbf16, #tpu.memory_space<vmem>>, vector<86x128xbf16>
    tpu.vector_store %arg17[%c0_53, %c128_54], %51 {strides = array<i32>} : memref<86x1152xbf16, #tpu.memory_space<vmem>>, vector<86x128xbf16>,
    %c2_55 = arith.constant 2 : index
    %c0_56 = arith.constant 0 : index
    %53 = vector.load %arg16[%c2_55, %c0_56] : memref<106x128xbf16, #tpu.memory_space<vmem>>, vector<86x128xbf16>
    %c0_57 = arith.constant 0 : index
    %c256_58 = arith.constant 256 : index
    %54 = vector.load %arg17[%c0_57, %c256_58] : memref<86x1152xbf16, #tpu.memory_space<vmem>>, vector<86x128xbf16>
    tpu.vector_store %arg17[%c0_57, %c256_58], %53 {strides = array<i32>} : memref<86x1152xbf16, #tpu.memory_space<vmem>>, vector<86x128xbf16>,
    %c9_59 = arith.constant 9 : index
    %c0_60 = arith.constant 0 : index
    %55 = vector.load %arg16[%c9_59, %c0_60] : memref<106x128xbf16, #tpu.memory_space<vmem>>, vector<86x128xbf16>
    %c0_61 = arith.constant 0 : index
    %c384_62 = arith.constant 384 : index
    %56 = vector.load %arg17[%c0_61, %c384_62] : memref<86x1152xbf16, #tpu.memory_space<vmem>>, vector<86x128xbf16>
    tpu.vector_store %arg17[%c0_61, %c384_62], %55 {strides = array<i32>} : memref<86x1152xbf16, #tpu.memory_space<vmem>>, vector<86x128xbf16>,
    %c10_63 = arith.constant 10 : index
    %c0_64 = arith.constant 0 : index
    %57 = vector.load %arg16[%c10_63, %c0_64] : memref<106x128xbf16, #tpu.memory_space<vmem>>, vector<86x128xbf16>
    %c0_65 = arith.constant 0 : index
    %c512_66 = arith.constant 512 : index
    %58 = vector.load %arg17[%c0_65, %c512_66] : memref<86x1152xbf16, #tpu.memory_space<vmem>>, vector<86x128xbf16>
    tpu.vector_store %arg17[%c0_65, %c512_66], %57 {strides = array<i32>} : memref<86x1152xbf16, #tpu.memory_space<vmem>>, vector<86x128xbf16>,
    %c11_67 = arith.constant 11 : index
    %c0_68 = arith.constant 0 : index
    %59 = vector.load %arg16[%c11_67, %c0_68] : memref<106x128xbf16, #tpu.memory_space<vmem>>, vector<86x128xbf16>
    %c0_69 = arith.constant 0 : index
    %c640_70 = arith.constant 640 : index
    %60 = vector.load %arg17[%c0_69, %c640_70] : memref<86x1152xbf16, #tpu.memory_space<vmem>>, vector<86x128xbf16>
    tpu.vector_store %arg17[%c0_69, %c640_70], %59 {strides = array<i32>} : memref<86x1152xbf16, #tpu.memory_space<vmem>>, vector<86x128xbf16>,
    %c18_71 = arith.constant 18 : index
    %c0_72 = arith.constant 0 : index
    %61 = vector.load %arg16[%c18_71, %c0_72] : memref<106x128xbf16, #tpu.memory_space<vmem>>, vector<86x128xbf16>
    %c0_73 = arith.constant 0 : index
    %c768_74 = arith.constant 768 : index
    %62 = vector.load %arg17[%c0_73, %c768_74] : memref<86x1152xbf16, #tpu.memory_space<vmem>>, vector<86x128xbf16>
    tpu.vector_store %arg17[%c0_73, %c768_74], %61 {strides = array<i32>} : memref<86x1152xbf16, #tpu.memory_space<vmem>>, vector<86x128xbf16>,
    %c19_75 = arith.constant 19 : index
    %c0_76 = arith.constant 0 : index
    %63 = vector.load %arg16[%c19_75, %c0_76] : memref<106x128xbf16, #tpu.memory_space<vmem>>, vector<86x128xbf16>
    %c0_77 = arith.constant 0 : index
    %c896_78 = arith.constant 896 : index
    %64 = vector.load %arg17[%c0_77, %c896_78] : memref<86x1152xbf16, #tpu.memory_space<vmem>>, vector<86x128xbf16>
    tpu.vector_store %arg17[%c0_77, %c896_78], %63 {strides = array<i32>} : memref<86x1152xbf16, #tpu.memory_space<vmem>>, vector<86x128xbf16>,
    %c20_79 = arith.constant 20 : index
    %c0_80 = arith.constant 0 : index
    %65 = vector.load %arg16[%c20_79, %c0_80] : memref<106x128xbf16, #tpu.memory_space<vmem>>, vector<86x128xbf16>
    %c0_81 = arith.constant 0 : index
    %c1024_82 = arith.constant 1024 : index
    %66 = vector.load %arg17[%c0_81, %c1024_82] : memref<86x1152xbf16, #tpu.memory_space<vmem>>, vector<86x128xbf16>
    tpu.vector_store %arg17[%c0_81, %c1024_82], %65 {strides = array<i32>} : memref<86x1152xbf16, #tpu.memory_space<vmem>>, vector<86x128xbf16>,
    %c0_83 = arith.constant 0 : index
    %c0_84 = arith.constant 0 : index
    %67 = vector.load %arg17[%c0_83, %c0_84] : memref<86x1152xbf16, #tpu.memory_space<vmem>>, vector<86x1152xbf16>
    %c0_85 = arith.constant 0 : index
    %c0_86 = arith.constant 0 : index
    %68 = vector.load %arg7[%c0_85, %c0_86] : memref<1152x32xbf16, #tpu.memory_space<vmem>>, vector<1152x32xbf16>
    %cst_87 = arith.constant dense<0.000000e+00> : vector<86x32xf32>
    %69 = tpu.matmul %67, %68, %cst_87 {dimension_numbers = #tpu.dot_dimension_numbers<[1], [0], [0], [1], [0, 0, 1, 1], [], []>} : vector<86x1152xbf16>, vector<1152x32xbf16>, vector<86x32xf32> -> vector<86x32xf32>
    %cst_88 = arith.constant 0.000000e+00 : f32
    %70 = vector.broadcast %cst_88 : f32 to vector<86x32xf32>
    %71 = arith.cmpf oge, %69, %70 : vector<86x32xf32>
    %cst_89 = arith.constant 0.00999999977 : f32
    %72 = vector.broadcast %cst_89 : f32 to vector<86x32xf32>
    %73 = arith.mulf %72, %69 : vector<86x32xf32>
    %74 = arith.select %71, %69, %73 : vector<86x32xi1>, vector<86x32xf32>
    %75 = arith.truncf %74 : vector<86x32xf32> to vector<86x32xbf16>
    %c0_90 = arith.constant 0 : index
    %c0_91 = arith.constant 0 : index
    %76 = vector.load %arg18[%c0_90, %c0_91] : memref<86x32xbf16, #tpu.memory_space<vmem>>, vector<86x32xbf16>
    tpu.vector_store %arg18[%c0_90, %c0_91], %75 {strides = array<i32>} : memref<86x32xbf16, #tpu.memory_space<vmem>>, vector<86x32xbf16>,
    %c0_92 = arith.constant 0 : index
    %c0_93 = arith.constant 0 : index
    %77 = vector.load %arg18[%c0_92, %c0_93] : memref<86x32xbf16, #tpu.memory_space<vmem>>, vector<64x32xbf16>
    %c0_94 = arith.constant 0 : index
    %c0_95 = arith.constant 0 : index
    %78 = vector.load %arg19[%c0_94, %c0_95] : memref<64x480xbf16, #tpu.memory_space<vmem>>, vector<64x32xbf16>
    tpu.vector_store %arg19[%c0_94, %c0_95], %77 {strides = array<i32>} : memref<64x480xbf16, #tpu.memory_space<vmem>>, vector<64x32xbf16>,
    %c1_96 = arith.constant 1 : index
    %c0_97 = arith.constant 0 : index
    %79 = vector.load %arg18[%c1_96, %c0_97] : memref<86x32xbf16, #tpu.memory_space<vmem>>, vector<64x32xbf16>
    %c0_98 = arith.constant 0 : index
    %c32 = arith.constant 32 : index
    %80 = vector.load %arg19[%c0_98, %c32] : memref<64x480xbf16, #tpu.memory_space<vmem>>, vector<64x32xbf16>
    tpu.vector_store %arg19[%c0_98, %c32], %79 {strides = array<i32>} : memref<64x480xbf16, #tpu.memory_space<vmem>>, vector<64x32xbf16>,
    %c2_99 = arith.constant 2 : index
    %c0_100 = arith.constant 0 : index
    %81 = vector.load %arg18[%c2_99, %c0_100] : memref<86x32xbf16, #tpu.memory_space<vmem>>, vector<64x32xbf16>
    %c0_101 = arith.constant 0 : index
    %c64 = arith.constant 64 : index
    %82 = vector.load %arg19[%c0_101, %c64] : memref<64x480xbf16, #tpu.memory_space<vmem>>, vector<64x32xbf16>
    tpu.vector_store %arg19[%c0_101, %c64], %81 {strides = array<i32>} : memref<64x480xbf16, #tpu.memory_space<vmem>>, vector<64x32xbf16>,
    %c3 = arith.constant 3 : index
    %c0_102 = arith.constant 0 : index
    %83 = vector.load %arg18[%c3, %c0_102] : memref<86x32xbf16, #tpu.memory_space<vmem>>, vector<64x32xbf16>
    %c0_103 = arith.constant 0 : index
    %c96 = arith.constant 96 : index
    %84 = vector.load %arg19[%c0_103, %c96] : memref<64x480xbf16, #tpu.memory_space<vmem>>, vector<64x32xbf16>
    tpu.vector_store %arg19[%c0_103, %c96], %83 {strides = array<i32>} : memref<64x480xbf16, #tpu.memory_space<vmem>>, vector<64x32xbf16>,
    %c4 = arith.constant 4 : index
    %c0_104 = arith.constant 0 : index
    %85 = vector.load %arg18[%c4, %c0_104] : memref<86x32xbf16, #tpu.memory_space<vmem>>, vector<64x32xbf16>
    %c0_105 = arith.constant 0 : index
    %c128_106 = arith.constant 128 : index
    %86 = vector.load %arg19[%c0_105, %c128_106] : memref<64x480xbf16, #tpu.memory_space<vmem>>, vector<64x32xbf16>
    tpu.vector_store %arg19[%c0_105, %c128_106], %85 {strides = array<i32>} : memref<64x480xbf16, #tpu.memory_space<vmem>>, vector<64x32xbf16>,
    %c9_107 = arith.constant 9 : index
    %c0_108 = arith.constant 0 : index
    %87 = vector.load %arg18[%c9_107, %c0_108] : memref<86x32xbf16, #tpu.memory_space<vmem>>, vector<64x32xbf16>
    %c0_109 = arith.constant 0 : index
    %c160 = arith.constant 160 : index
    %88 = vector.load %arg19[%c0_109, %c160] : memref<64x480xbf16, #tpu.memory_space<vmem>>, vector<64x32xbf16>
    tpu.vector_store %arg19[%c0_109, %c160], %87 {strides = array<i32>} : memref<64x480xbf16, #tpu.memory_space<vmem>>, vector<64x32xbf16>,
    %c10_110 = arith.constant 10 : index
    %c0_111 = arith.constant 0 : index
    %89 = vector.load %arg18[%c10_110, %c0_111] : memref<86x32xbf16, #tpu.memory_space<vmem>>, vector<64x32xbf16>
    %c0_112 = arith.constant 0 : index
    %c192 = arith.constant 192 : index
    %90 = vector.load %arg19[%c0_112, %c192] : memref<64x480xbf16, #tpu.memory_space<vmem>>, vector<64x32xbf16>
    tpu.vector_store %arg19[%c0_112, %c192], %89 {strides = array<i32>} : memref<64x480xbf16, #tpu.memory_space<vmem>>, vector<64x32xbf16>,
    %c11_113 = arith.constant 11 : index
    %c0_114 = arith.constant 0 : index
    %91 = vector.load %arg18[%c11_113, %c0_114] : memref<86x32xbf16, #tpu.memory_space<vmem>>, vector<64x32xbf16>
    %c0_115 = arith.constant 0 : index
    %c224 = arith.constant 224 : index
    %92 = vector.load %arg19[%c0_115, %c224] : memref<64x480xbf16, #tpu.memory_space<vmem>>, vector<64x32xbf16>
    tpu.vector_store %arg19[%c0_115, %c224], %91 {strides = array<i32>} : memref<64x480xbf16, #tpu.memory_space<vmem>>, vector<64x32xbf16>,
    %c12 = arith.constant 12 : index
    %c0_116 = arith.constant 0 : index
    %93 = vector.load %arg18[%c12, %c0_116] : memref<86x32xbf16, #tpu.memory_space<vmem>>, vector<64x32xbf16>
    %c0_117 = arith.constant 0 : index
    %c256_118 = arith.constant 256 : index
    %94 = vector.load %arg19[%c0_117, %c256_118] : memref<64x480xbf16, #tpu.memory_space<vmem>>, vector<64x32xbf16>
    tpu.vector_store %arg19[%c0_117, %c256_118], %93 {strides = array<i32>} : memref<64x480xbf16, #tpu.memory_space<vmem>>, vector<64x32xbf16>,
    %c13 = arith.constant 13 : index
    %c0_119 = arith.constant 0 : index
    %95 = vector.load %arg18[%c13, %c0_119] : memref<86x32xbf16, #tpu.memory_space<vmem>>, vector<64x32xbf16>
    %c0_120 = arith.constant 0 : index
    %c288 = arith.constant 288 : index
    %96 = vector.load %arg19[%c0_120, %c288] : memref<64x480xbf16, #tpu.memory_space<vmem>>, vector<64x32xbf16>
    tpu.vector_store %arg19[%c0_120, %c288], %95 {strides = array<i32>} : memref<64x480xbf16, #tpu.memory_space<vmem>>, vector<64x32xbf16>,
    %c18_121 = arith.constant 18 : index
    %c0_122 = arith.constant 0 : index
    %97 = vector.load %arg18[%c18_121, %c0_122] : memref<86x32xbf16, #tpu.memory_space<vmem>>, vector<64x32xbf16>
    %c0_123 = arith.constant 0 : index
    %c320 = arith.constant 320 : index
    %98 = vector.load %arg19[%c0_123, %c320] : memref<64x480xbf16, #tpu.memory_space<vmem>>, vector<64x32xbf16>
    tpu.vector_store %arg19[%c0_123, %c320], %97 {strides = array<i32>} : memref<64x480xbf16, #tpu.memory_space<vmem>>, vector<64x32xbf16>,
    %c19_124 = arith.constant 19 : index
    %c0_125 = arith.constant 0 : index
    %99 = vector.load %arg18[%c19_124, %c0_125] : memref<86x32xbf16, #tpu.memory_space<vmem>>, vector<64x32xbf16>
    %c0_126 = arith.constant 0 : index
    %c352 = arith.constant 352 : index
    %100 = vector.load %arg19[%c0_126, %c352] : memref<64x480xbf16, #tpu.memory_space<vmem>>, vector<64x32xbf16>
    tpu.vector_store %arg19[%c0_126, %c352], %99 {strides = array<i32>} : memref<64x480xbf16, #tpu.memory_space<vmem>>, vector<64x32xbf16>,
    %c20_127 = arith.constant 20 : index
    %c0_128 = arith.constant 0 : index
    %101 = vector.load %arg18[%c20_127, %c0_128] : memref<86x32xbf16, #tpu.memory_space<vmem>>, vector<64x32xbf16>
    %c0_129 = arith.constant 0 : index
    %c384_130 = arith.constant 384 : index
    %102 = vector.load %arg19[%c0_129, %c384_130] : memref<64x480xbf16, #tpu.memory_space<vmem>>, vector<64x32xbf16>
    tpu.vector_store %arg19[%c0_129, %c384_130], %101 {strides = array<i32>} : memref<64x480xbf16, #tpu.memory_space<vmem>>, vector<64x32xbf16>,
    %c21 = arith.constant 21 : index
    %c0_131 = arith.constant 0 : index
    %103 = vector.load %arg18[%c21, %c0_131] : memref<86x32xbf16, #tpu.memory_space<vmem>>, vector<64x32xbf16>
    %c0_132 = arith.constant 0 : index
    %c416 = arith.constant 416 : index
    %104 = vector.load %arg19[%c0_132, %c416] : memref<64x480xbf16, #tpu.memory_space<vmem>>, vector<64x32xbf16>
    tpu.vector_store %arg19[%c0_132, %c416], %103 {strides = array<i32>} : memref<64x480xbf16, #tpu.memory_space<vmem>>, vector<64x32xbf16>,
    %c22 = arith.constant 22 : index
    %c0_133 = arith.constant 0 : index
    %105 = vector.load %arg18[%c22, %c0_133] : memref<86x32xbf16, #tpu.memory_space<vmem>>, vector<64x32xbf16>
    %c0_134 = arith.constant 0 : index
    %c448 = arith.constant 448 : index
    %106 = vector.load %arg19[%c0_134, %c448] : memref<64x480xbf16, #tpu.memory_space<vmem>>, vector<64x32xbf16>
    tpu.vector_store %arg19[%c0_134, %c448], %105 {strides = array<i32>} : memref<64x480xbf16, #tpu.memory_space<vmem>>, vector<64x32xbf16>,
    %c0_135 = arith.constant 0 : index
    %c0_136 = arith.constant 0 : index
    %107 = vector.load %arg19[%c0_135, %c0_136] : memref<64x480xbf16, #tpu.memory_space<vmem>>, vector<64x480xbf16>
    %c0_137 = arith.constant 0 : index
    %c0_138 = arith.constant 0 : index
    %108 = vector.load %arg8[%c0_137, %c0_138] : memref<480x256xbf16, #tpu.memory_space<vmem>>, vector<480x256xbf16>
    %cst_139 = arith.constant dense<0.000000e+00> : vector<64x256xf32>
    %109 = tpu.matmul %107, %108, %cst_139 {dimension_numbers = #tpu.dot_dimension_numbers<[1], [0], [0], [1], [0, 0, 1, 1], [], []>} : vector<64x480xbf16>, vector<480x256xbf16>, vector<64x256xf32> -> vector<64x256xf32>
    %110 = vector.extract_strided_slice %109 {offsets = [0, 0], sizes = [1, 256], strides = [1, 1]} : vector<64x256xf32> to vector<1x256xf32>
    %111 = vector.extract_strided_slice %109 {offsets = [63, 0], sizes = [1, 256], strides = [1, 1]} : vector<64x256xf32> to vector<1x256xf32>
    %112 = tpu.concatenate %110, %111 in 0 : vector<1x256xf32>, vector<1x256xf32> -> vector<2x256xf32>
    %c0_140 = arith.constant 0 : index
    %c0_141 = arith.constant 0 : index
    %113 = vector.load %arg9[%c0_140, %c0_141] : memref<1x256xf32, #tpu.memory_space<vmem>>, vector<1x256xf32>
    %114 = vector.broadcast %113 : vector<1x256xf32> to vector<2x256xf32>
    %115 = arith.addf %112, %114 : vector<2x256xf32>
    %cst_142 = arith.constant 0.000000e+00 : f32
    %116 = vector.broadcast %cst_142 : f32 to vector<2x256xf32>
    %117 = arith.cmpf ogt, %115, %116 : vector<2x256xf32>
    %cst_143 = arith.constant 0.000000e+00 : f32
    %118 = vector.broadcast %cst_143 : f32 to vector<2x256xf32>
    %119 = arith.minimumf %115, %118 : vector<2x256xf32>
    %120 = math.exp %119 : vector<2x256xf32>
    %cst_144 = arith.constant 1.000000e+00 : f32
    %121 = vector.broadcast %cst_144 : f32 to vector<2x256xf32>
    %122 = arith.subf %120, %121 : vector<2x256xf32>
    %cst_145 = arith.constant 1.67326319 : f32
    %123 = vector.broadcast %cst_145 : f32 to vector<2x256xf32>
    %124 = arith.mulf %123, %122 : vector<2x256xf32>
    %125 = arith.select %117, %115, %124 : vector<2x256xi1>, vector<2x256xf32>
    %cst_146 = arith.constant 1.05070102 : f32
    %126 = vector.broadcast %cst_146 : f32 to vector<2x256xf32>
    %127 = arith.mulf %126, %125 : vector<2x256xf32>
    %128 = arith.truncf %127 : vector<2x256xf32> to vector<2x256xbf16>
    %c0_147 = arith.constant 0 : index
    %c0_148 = arith.constant 0 : index
    %129 = vector.load %arg10[%c0_147, %c0_148] : memref<256x10xbf16, #tpu.memory_space<vmem>>, vector<256x10xbf16>
    %cst_149 = arith.constant dense<0.000000e+00> : vector<2x10xf32>
    %130 = tpu.matmul %128, %129, %cst_149 {dimension_numbers = #tpu.dot_dimension_numbers<[1], [0], [0], [1], [0, 0, 1, 1], [], []>} : vector<2x256xbf16>, vector<256x10xbf16>, vector<2x10xf32> -> vector<2x10xf32>
    %c0_150 = arith.constant 0 : index
    %c0_151 = arith.constant 0 : index
    %131 = vector.load %arg11[%c0_150, %c0_151] : memref<1x10xf32, #tpu.memory_space<vmem>>, vector<1x10xf32>
    %132 = vector.broadcast %131 : vector<1x10xf32> to vector<2x10xf32>
    %133 = arith.addf %130, %132 : vector<2x10xf32>
    %134 = tpu.iota {dimensions = array<i32: 1>} : vector<2x10xi32>
    %c2_i32 = arith.constant 2 : i32
    %135 = vector.broadcast %c2_i32 : i32 to vector<2x10xi32>
    %136 = arith.cmpi slt, %134, %135 : vector<2x10xi32>
    %c5_i32 = arith.constant 5 : i32
    %137 = vector.broadcast %c5_i32 : i32 to vector<2x10xi32>
    %138 = arith.cmpi sge, %134, %137 : vector<2x10xi32>
    %c7_i32 = arith.constant 7 : i32
    %139 = vector.broadcast %c7_i32 : i32 to vector<2x10xi32>
    %140 = arith.cmpi slt, %134, %139 : vector<2x10xi32>
    %141 = arith.andi %138, %140 : vector<2x10xi1>
    %142 = arith.ori %136, %141 : vector<2x10xi1>
    %c2_i32_152 = arith.constant 2 : i32
    %143 = vector.broadcast %c2_i32_152 : i32 to vector<2x10xi32>
    %144 = arith.cmpi sge, %134, %143 : vector<2x10xi32>
    %c4_i32 = arith.constant 4 : i32
    %145 = vector.broadcast %c4_i32 : i32 to vector<2x10xi32>
    %146 = arith.cmpi slt, %134, %145 : vector<2x10xi32>
    %147 = arith.andi %144, %146 : vector<2x10xi1>
    %c7_i32_153 = arith.constant 7 : i32
    %148 = vector.broadcast %c7_i32_153 : i32 to vector<2x10xi32>
    %149 = arith.cmpi sge, %134, %148 : vector<2x10xi32>
    %c9_i32 = arith.constant 9 : i32
    %150 = vector.broadcast %c9_i32 : i32 to vector<2x10xi32>
    %151 = arith.cmpi slt, %134, %150 : vector<2x10xi32>
    %152 = arith.andi %149, %151 : vector<2x10xi1>
    %153 = arith.ori %147, %152 : vector<2x10xi1>
    %cst_154 = arith.constant 5.000000e-01 : f32
    %154 = vector.broadcast %cst_154 : f32 to vector<2x10xf32>
    %155 = arith.mulf %154, %133 : vector<2x10xf32>
    %156 = arith.select %153, %155, %133 : vector<2x10xi1>, vector<2x10xf32>
    %157 = math.tanh %156 : vector<2x10xf32>
    %cst_155 = arith.constant 1.000000e+00 : f32
    %158 = vector.broadcast %cst_155 : f32 to vector<2x10xf32>
    %159 = arith.addf %157, %158 : vector<2x10xf32>
    %cst_156 = arith.constant 5.000000e-01 : f32
    %160 = vector.broadcast %cst_156 : f32 to vector<2x10xf32>
    %161 = arith.mulf %160, %159 : vector<2x10xf32>
    %162 = arith.select %153, %161, %133 : vector<2x10xi1>, vector<2x10xf32>
    %163 = arith.select %142, %157, %162 : vector<2x10xi1>, vector<2x10xf32>
    %c0_157 = arith.constant 0 : index
    %c0_158 = arith.constant 0 : index
    %164 = vector.load %arg12[%c0_157, %c0_158] : memref<2x10xf32, #tpu.memory_space<vmem>>, vector<2x10xf32>
    tpu.vector_store %arg12[%c0_157, %c0_158], %163 {strides = array<i32>} : memref<2x10xf32, #tpu.memory_space<vmem>>, vector<2x10xf32>,
    return
  }
  func.func @transform_0(%arg0: i32) -> (i32, i32) {
    %c0_i32 = arith.constant 0 : i32
    %c0_i32_0 = arith.constant 0 : i32
    %c0_i32_1 = arith.constant 0 : i32
    return %c0_i32, %c0_i32_0 : i32, i32
  }
  func.func @transform_1(%arg0: i32) -> (i32, i32) {
    %c0_i32 = arith.constant 0 : i32
    %c0_i32_0 = arith.constant 0 : i32
    %c0_i32_1 = arith.constant 0 : i32
    return %c0_i32, %c0_i32_0 : i32, i32
  }
  func.func @transform_2(%arg0: i32) -> (i32, i32) {
    %c0_i32 = arith.constant 0 : i32
    %c0_i32_0 = arith.constant 0 : i32
    %c0_i32_1 = arith.constant 0 : i32
    return %c0_i32, %c0_i32_0 : i32, i32
  }
  func.func @transform_3(%arg0: i32) -> (i32, i32) {
    %c0_i32 = arith.constant 0 : i32
    %c0_i32_0 = arith.constant 0 : i32
    %c0_i32_1 = arith.constant 0 : i32
    return %c0_i32, %c0_i32_0 : i32, i32
  }
  func.func @transform_4(%arg0: i32) -> (i32, i32) {
    %c0_i32 = arith.constant 0 : i32
    %c0_i32_0 = arith.constant 0 : i32
    %c0_i32_1 = arith.constant 0 : i32
    return %c0_i32, %c0_i32_0 : i32, i32
  }
  func.func @transform_5(%arg0: i32) -> (i32, i32) {
    %c0_i32 = arith.constant 0 : i32
    %c0_i32_0 = arith.constant 0 : i32
    %c0_i32_1 = arith.constant 0 : i32
    return %c0_i32, %c0_i32_0 : i32, i32
  }
  func.func @transform_6(%arg0: i32) -> (i32, i32) {
    %c0_i32 = arith.constant 0 : i32
    %c0_i32_0 = arith.constant 0 : i32
    %c0_i32_1 = arith.constant 0 : i32
    return %c0_i32, %c0_i32_0 : i32, i32
  }
  func.func @transform_7(%arg0: i32) -> (i32, i32) {
    %c0_i32 = arith.constant 0 : i32
    %c0_i32_0 = arith.constant 0 : i32
    %c0_i32_1 = arith.constant 0 : i32
    return %c0_i32, %c0_i32_0 : i32, i32
  }
  func.func @transform_8(%arg0: i32) -> (i32, i32) {
    %c0_i32 = arith.constant 0 : i32
    %c0_i32_0 = arith.constant 0 : i32
    %c0_i32_1 = arith.constant 0 : i32
    return %c0_i32, %c0_i32_0 : i32, i32
  }
  func.func @transform_9(%arg0: i32) -> (i32, i32) {
    %c0_i32 = arith.constant 0 : i32
    %c0_i32_0 = arith.constant 0 : i32
    %c0_i32_1 = arith.constant 0 : i32
    return %c0_i32, %c0_i32_0 : i32, i32
  }
  func.func @transform_10(%arg0: i32) -> (i32, i32) {
    %c0_i32 = arith.constant 0 : i32
    %c0_i32_0 = arith.constant 0 : i32
    %c0_i32_1 = arith.constant 0 : i32
    return %c0_i32, %c0_i32_0 : i32, i32
  }
  func.func @transform_11(%arg0: i32) -> (i32, i32) {
    %c0_i32 = arith.constant 0 : i32
    %c0_i32_0 = arith.constant 0 : i32
    %c0_i32_1 = arith.constant 0 : i32
    return %c0_i32, %c0_i32_0 : i32, i32
  }
}

</mosaic_0001>

<bundles_post_ra>
// kernel: regression_forward.1
= control target key start
LH: loop header
LB: loop body
LE: loop exit
PB: predicated region body
PF: predicated region fallthrough
CT: control target
= control target key end

     0   :  { %vm377_vm0 = vcmask 1043456   ;;  %vm280_vm1 = vcmask 195584   ;;  %s14909_s0 = inlined_call_operand.vmem [shape: bf16[504,24], index: 0, kind: input, shape index: {}]   ;;  %s14910_s1 = inlined_call_operand.vmem [shape: bf16[126,504], index: 1, kind: input, shape index: {}]   ;;  %s14911_s2 = inlined_call_operand.vmem [shape: bf16[24,128], index: 2, kind: input, shape index: {}]   ;;  %s14912_s3 = inlined_call_operand.vmem [shape: f32[1,128], index: 3, kind: input, shape index: {}]   ;;  %s14913_s4 = inlined_call_operand.vmem [shape: bf16[1152,128], index: 4, kind: input, shape index: {}]   ;;  %s14914_s5 = inlined_call_operand.vmem [shape: f32[1,128], index: 5, kind: input, shape index: {}]   ;;  %s14915_s6 = inlined_call_operand.vmem [shape: bf16[1152,32], index: 6, kind: input, shape index: {}]   ;;  %s14916_s7 = inlined_call_operand.vmem [shape: bf16[480,256], index: 7, kind: input, shape index: {}]   ;;  %s14917_s8 = inlined_call_operand.vmem [shape: f32[1,256], index: 8, kind: input, shape index: {}]   ;;  %s14918_s9 = inlined_call_operand.vmem [shape: bf16[256,10], index: 9, kind: input, shape index: {}]   ;;  %s14919_s10 = inlined_call_operand.vmem [shape: f32[1,10], index: 10, kind: input, shape index: {}]   ;;  %s14920_s11 = inlined_call_operand.hbm [shape: f32[2,10], index: 11, kind: output, shape index: {}]  }
   0x1   :  { %v10552_v0 = vld [vmem:[%s14911_s2] sm:$0xff]   ;;  %v10553_v1 = vld [vmem:[%s14911_s2 + $0x8] ss:$0 sps:$4 sm:$0xff]   ;;  %v10556_v5 = vld [vmem:[%s14909_s0 + $0x10] sm:$0xff]  }
   0x2   :  { %10391 = vmatprep.subr.bf16.mxu0 %v10552_v0  ;;  %v10554_v2 = vld [vmem:[%s14909_s0] sm:$0xff]   ;;  %10531 = vmatprep.subr.bf16.mxu1 %v10552_v0  ;;  %v379_v3 = vsel %vm377_vm0, %v10553_v1, 0  ;;  %v10555_v4 = vld [vmem:[%s14909_s0 + $0x8] sm:$0xff]   ;;  %v10557_v6 = vld [vmem:[%s14909_s0 + $0x18] sm:$0xff]  }
   0x3   :  { %10392 = vmatpush3.bf16.msra.mxu0 %v10552_v0  ;;  %10533 = vmatpush3.bf16.msra.mxu1 %v10552_v0  ;;  %v10565_v7 = vld [vmem:[%s14909_s0 + $0x90] sm:$0xff]   ;;  %v10558_v8 = vld [vmem:[%s14909_s0 + $0x20] sm:$0xff]   ;;  %v10567_v9 = vld [vmem:[%s14909_s0 + $0x98] sm:$0xff]  }
   0x4   :  { %10543 = vmatprep.subr.msk.bf16.mxu0 %vm377_vm0, %v10553_v1  ;;  %10395 = vmatprep.mubr.msk.bf16.mxu0 %vm280_vm1, %v10554_v2  ;;  %v10569_v10 = vld [vmem:[%s14909_s0 + $0xa0] sm:$0xff]   ;;  %v10559_v11 = vld [vmem:[%s14909_s0 + $0x28] sm:$0xff]   ;;  %v10573_v13 = vld [vmem:[%s14909_s0 + $0xb0] sm:$0xff]  }
   0x5   :  { %10544 = vmatprep.subr.msk.bf16.mxu1 %vm377_vm0, %v10553_v1  ;;  %10431 = vmatprep.mubr.msk.bf16.mxu1 %vm280_vm1, %v10565_v7  ;;  %v10571_v12 = vld [vmem:[%s14909_s0 + $0xa8] sm:$0xff]   ;;  %v10560_v14 = vld [vmem:[%s14909_s0 + $0x30] sm:$0xff]   ;;  %v10561_v15 = vld [vmem:[%s14909_s0 + $0x38] sm:$0xff]  }
   0x6   :  { %v10575_v16 = vld [vmem:[%s14909_s0 + $0xb8] sm:$0xff]   ;;  %v10576_v17 = vld [vmem:[%s14909_s0 + $0xc0] sm:$0xff]   ;;  %v10578_v19 = vld [vmem:[%s14909_s0 + $0xc8] sm:$0xff]  }
   0x7   :  { %10394 = vmatpush3.bf16.msra.mxu0 %v379_v3  ;;  %10534 = vmatpush3.bf16.msra.mxu1 %v379_v3  ;;  %v10562_v18 = vld [vmem:[%s14909_s0 + $0x40] sm:$0xff]   ;;  %v10563_v20 = vld [vmem:[%s14909_s0 + $0x48] sm:$0xff]   ;;  %v10580_v21 = vld [vmem:[%s14909_s0 + $0xd0] sm:$0xff]  }
   0x8   :  { %v10564_v22 = vld [vmem:[%s14909_s0 + $0x50] sm:$0xff]   ;;  %v10581_v23 = vld [vmem:[%s14909_s0 + $0xd8] sm:$0xff]   ;;  %v10582_v25 = vld [vmem:[%s14909_s0 + $0xe0] sm:$0xff]  }
   0x9   :  { %v10566_v24 = vld [vmem:[%s14909_s0 + $0x58] sm:$0xff]   ;;  %v10568_v26 = vld [vmem:[%s14909_s0 + $0x60] sm:$0xff]   ;;  %v10583_v27 = vld [vmem:[%s14909_s0 + $0xe8] sm:$0xff]  }
   0xa   :  { %10396 = vmatmul.mubr.msk.bf16.vlgmr.msra.gmra.mrb[0].mxu0 %vm280_vm1, %v10555_v4  ;;  %10432 = vmatmul.mubr.msk.bf16.vlgmr.msra.gmra.mrb[0].mxu1 %vm280_vm1, %v10567_v9  ;;  %v10570_v28 = vld [vmem:[%s14909_s0 + $0x68] sm:$0xff]   ;;  %v10584_v29 = vld [vmem:[%s14909_s0 + $0xf0] sm:$0xff]   ;;  %v10585_v31 = vld [vmem:[%s14909_s0 + $0xf8] ss:$0 sps:$4 sm:$0xff]  }
   0xb   :  { %10399 = vmatprep.mubr.msk.bf16.mxu0 %vm280_vm1, %v10556_v5  ;;  %10435 = vmatprep.mubr.msk.bf16.mxu1 %vm280_vm1, %v10569_v10  ;;  %v10572_v30 = vld [vmem:[%s14909_s0 + $0x70] sm:$0xff]   ;;  %v10574_v32 = vld [vmem:[%s14909_s0 + $0x78] sm:$0xff]   ;;  %v10577_v33 = vld [vmem:[%s14909_s0 + $0x80] sm:$0xff]  }
   0xc   :  { %v10579_v34 = vld [vmem:[%s14909_s0 + $0x88] sm:$0xff]  }
  0x12   :  { %10400 = vmatmul.mubr.msk.bf16.gmra.mrb[4].mxu0 %vm280_vm1, %v10557_v6  ;;  %10436 = vmatmul.mubr.msk.bf16.gmra.mrb[4].mxu1 %vm280_vm1, %v10571_v12 }
  0x13   :  { %10403 = vmatprep.mubr.msk.bf16.mxu0 %vm280_vm1, %v10558_v8  ;;  %10439 = vmatprep.mubr.msk.bf16.mxu1 %vm280_vm1, %v10573_v13 }
  0x1a   :  { %10404 = vmatmul.mubr.msk.bf16.gmra.mrb[8].mxu0 %vm280_vm1, %v10559_v11  ;;  %10440 = vmatmul.mubr.msk.bf16.gmra.mrb[8].mxu1 %vm280_vm1, %v10575_v16 }
  0x1b   :  { %10407 = vmatprep.mubr.msk.bf16.mxu0 %vm280_vm1, %v10560_v14  ;;  %10443 = vmatprep.mubr.msk.bf16.mxu1 %vm280_vm1, %v10576_v17 }
  0x22   :  { %10408 = vmatmul.mubr.msk.bf16.gmra.mrb[12].mxu0 %vm280_vm1, %v10561_v15  ;;  %10444 = vmatmul.mubr.msk.bf16.gmra.mrb[12].mxu1 %vm280_vm1, %v10578_v19 }
  0x23   :  { %10411 = vmatprep.mubr.msk.bf16.mxu0 %vm280_vm1, %v10562_v18  ;;  %10447 = vmatprep.mubr.msk.bf16.mxu1 %vm280_vm1, %v10580_v21 }
  0x2a   :  { %10412 = vmatmul.mubr.msk.bf16.gmra.mrb[16].mxu0 %vm280_vm1, %v10563_v20  ;;  %10448 = vmatmul.mubr.msk.bf16.gmra.mrb[16].mxu1 %vm280_vm1, %v10581_v23 }
  0x2b   :  { %10415 = vmatprep.mubr.msk.bf16.mxu0 %vm280_vm1, %v10564_v22  ;;  %10451 = vmatprep.mubr.msk.bf16.mxu1 %vm280_vm1, %v10582_v25 }
  0x32   :  { %10416 = vmatmul.mubr.msk.bf16.gmra.mrb[20].mxu0 %vm280_vm1, %v10566_v24  ;;  %10452 = vmatmul.mubr.msk.bf16.gmra.mrb[20].mxu1 %vm280_vm1, %v10583_v27 }
  0x33   :  { %10419 = vmatprep.mubr.msk.bf16.mxu0 %vm280_vm1, %v10568_v26  ;;  %10455 = vmatprep.mubr.msk.bf16.mxu1 %vm280_vm1, %v10584_v29 }
  0x3a   :  { %10420 = vmatmul.mubr.msk.bf16.gmra.mrb[24].mxu0 %vm280_vm1, %v10570_v28  ;;  %10456 = vmatmul.mubr.msk.bf16.gmra.mrb[24].mxu1 %vm280_vm1, %v10585_v31 }
  0x3b   :  { %10423 = vmatprep.mubr.msk.bf16.mxu0 %vm280_vm1, %v10572_v30 }
  0x42   :  { %10424 = vmatmul.mubr.msk.bf16.gmra.mrb[28].mxu0 %vm280_vm1, %v10574_v32 }
  0x43   :  { %10427 = vmatprep.mubr.msk.bf16.mxu0 %vm280_vm1, %v10577_v33 }
  0x4a   :  { %10428 = vmatmul.mubr.msk.bf16.gmra.mrb[32].mxu0 %vm280_vm1, %v10579_v34 }
  0x4b   :  { %16 = vsyncpa [#allocation10], 0  ;;  %v10604_v35 = vld [vmem:[%s14910_s1 + $0x4] ss:$16 sps:$4 sm:$0xff]   ;;  %v11384_v36 = vld [vmem:[%s14912_s3] ss:$0 sm:$0xff] }
  0x4c   :  { %1670 = vmatprep.mubr.bf16.mxu1 %v10604_v35  ;;  %s11177_s23 = smov 64   ;;  %s11178_s24 = smov 32  }
  0x4d   :  { %s11179_s2 = smov 96  }
  0xdd   :  { %v10397_v37 = vpop.f32.mrb[0].mxu0  ;;  %v10433_v51 = vpop.f32.mrb[0].mxu1 }
  0xde   :  { %v424_v38 = vadd.f32 %v10397_v37, %v11384_v36  ;;  %v415_v39 = vpop.f32.mrb[1].mxu0  ;;  %v568_v56 = vadd.f32 %v10433_v51, %v11384_v36  ;;  %v559_v57 = vpop.f32.mrb[1].mxu1 }
  0xdf   :  { %v416_v40 = vadd.f32 %v11384_v36, %v415_v39  ;;  %v10398_v41 = vpop.f32.mrb[2].mxu0  ;;  %v560_v61 = vadd.f32 %v11384_v36, %v559_v57  ;;  %v10434_v62 = vpop.f32.mrb[2].mxu1 }
  0xe0   :  { %v734_v42 = vmul.f32 0.01, %v424_v38  ;;  %v427_v43 = vadd.f32 %v10398_v41, %v11384_v36  ;;  %v418_v44 = vpop.f32.mrb[3].mxu0  ;;  %vm671_vm2 = vcmp.ge.f32.partialorder %v424_v38, 0.0  ;;  %vm707_vm6 = vcmp.ge.f32.partialorder %v568_v56, 0.0  ;;  %v562_v3 = vpop.f32.mrb[3].mxu1 }
  0xe1   :  { %v732_v45 = vmul.f32 0.01, %v416_v40  ;;  %v419_v46 = vadd.f32 %v11384_v36, %v418_v44  ;;  %vm669_vm3 = vcmp.ge.f32.partialorder %v416_v40, 0.0  ;;  %v770_v1 = vmul.f32 0.01, %v568_v56 }
  0xe2   :  { %vm672_vm4 = vcmp.ge.f32.partialorder %v427_v43, 0.0  ;;  %v735_v47 = vmul.f32 0.01, %v427_v43  ;;  %v797_v49 = vsel %vm671_vm2, %v424_v38, %v734_v42  ;;  %v571_v2 = vadd.f32 %v10434_v62, %v11384_v36 }
  0xe3   :  { %vm670_vm5 = vcmp.ge.f32.partialorder %v419_v46, 0.0  ;;  %v733_v48 = vmul.f32 0.01, %v419_v46  ;;  %v795_v52 = vsel %vm669_vm3, %v416_v40, %v732_v45  ;;  %vm705_vm9 = vcmp.ge.f32.partialorder %v560_v61, 0.0 }
  0xe4   :  { %v798_v50 = vsel %vm672_vm4, %v427_v43, %v735_v47  ;;  %v833_v10 = vsel %vm707_vm6, %v568_v56, %v770_v1  ;;  %v768_v11 = vmul.f32 0.01, %v560_v61  ;;  %vm708_vm12 = vcmp.ge.f32.partialorder %v571_v2, 0.0 }
  0xe5   :  { %v9485_v53 = vpack.c.bf16 %v798_v50, %v797_v49  ;;  %v796_v54 = vsel %vm670_vm5, %v419_v46, %v733_v48  ;;  %v10401_v55 = vpop.f32.mrb[4].mxu0  ;;  %v771_v16 = vmul.f32 0.01, %v571_v2  ;;  %v563_v17 = vadd.f32 %v11384_v36, %v562_v3  ;;  %v10437_v18 = vpop.f32.mrb[4].mxu1 }
  0xe6   :  { %v9480_v58 = vpack.c.bf16 %v796_v54, %v795_v52  ;;  %v440_v59 = vadd.f32 %v10401_v55, %v11384_v36  ;;  %v431_v60 = vpop.f32.mrb[5].mxu0  ;;  %v831_v22 = vsel %vm705_vm9, %v560_v61, %v768_v11  ;;  %v584_v23 = vadd.f32 %v10437_v18, %v11384_v36  ;;  %v575_v24 = vpop.f32.mrb[5].mxu1 }
  0xe7   :  { %9697 = vst [vmem:[#allocation2 + $0x8] sm:$0xff] %v9485_v53   ;;  %v432_v63 = vadd.f32 %v11384_v36, %v431_v60  ;;  %v10402_v0 = vpop.f32.mrb[6].mxu0  ;;  %v834_v28 = vsel %vm708_vm12, %v571_v2, %v771_v16  ;;  %vm706_vm13 = vcmp.ge.f32.partialorder %v563_v17, 0.0  ;;  %v10438_v29 = vpop.f32.mrb[6].mxu1  ;;  %v576_v33 = vadd.f32 %v11384_v36, %v575_v24 }
  0xe8   :  { %9481 = vst [vmem:[#allocation2] sm:$0xff] %v9480_v58   ;;  %vm675_vm7 = vcmp.ge.f32.partialorder %v440_v59, 0.0  ;;  %v738_v4 = vmul.f32 0.01, %v440_v59  ;;  %v443_v5 = vadd.f32 %v10402_v0, %v11384_v36  ;;  %v434_v6 = vpop.f32.mrb[7].mxu0  ;;  %v9575_v32 = vpack.c.bf16 %v834_v28, %v833_v10  ;;  %v578_v45 = vpop.f32.mrb[7].mxu1 }
  0xe9   :  { %vm673_vm8 = vcmp.ge.f32.partialorder %v432_v63, 0.0  ;;  %v736_v7 = vmul.f32 0.01, %v432_v63  ;;  %v435_v8 = vadd.f32 %v11384_v36, %v434_v6  ;;  %v587_v34 = vadd.f32 %v10438_v29, %v11384_v36 }
  0xea   :  { %vm676_vm10 = vcmp.ge.f32.partialorder %v443_v5, 0.0  ;;  %v739_v9 = vmul.f32 0.01, %v443_v5  ;;  %v801_v12 = vsel %vm675_vm7, %v440_v59, %v738_v4  ;;  %v769_v39 = vmul.f32 0.01, %v563_v17  ;;  %9715 = vst [vmem:[#allocation2 + $0x98] sm:$0xff] %v9575_v32  }
  0xeb   :  { %vm674_vm11 = vcmp.ge.f32.partialorder %v435_v8, 0.0  ;;  %v737_v13 = vmul.f32 0.01, %v435_v8  ;;  %v799_v14 = vsel %vm673_vm8, %v432_v63, %v736_v7  ;;  %vm711_vm1 = vcmp.ge.f32.partialorder %v584_v23, 0.0 }
  0xec   :  { %v802_v15 = vsel %vm676_vm10, %v443_v5, %v739_v9  ;;  %v832_v44 = vsel %vm706_vm13, %v563_v17, %v769_v39  ;;  %v774_v50 = vmul.f32 0.01, %v584_v23  ;;  %vm709_vm4 = vcmp.ge.f32.partialorder %v576_v33, 0.0 }
  0xed   :  { %v9495_v19 = vpack.c.bf16 %v802_v15, %v801_v12  ;;  %v800_v20 = vsel %vm674_vm11, %v435_v8, %v737_v13  ;;  %v10405_v21 = vpop.f32.mrb[8].mxu0  ;;  %v9570_v48 = vpack.c.bf16 %v832_v44, %v831_v22  ;;  %v772_v51 = vmul.f32 0.01, %v576_v33  ;;  %v10441_v52 = vpop.f32.mrb[8].mxu1 }
  0xee   :  { %v9490_v25 = vpack.c.bf16 %v800_v20, %v799_v14  ;;  %v456_v26 = vadd.f32 %v10405_v21, %v11384_v36  ;;  %v447_v27 = vpop.f32.mrb[9].mxu0  ;;  %vm712_vm5 = vcmp.ge.f32.partialorder %v587_v34, 0.0  ;;  %v775_v56 = vmul.f32 0.01, %v587_v34  ;;  %v591_v57 = vpop.f32.mrb[9].mxu1 }
  0xef   :  { %9699 = vst [vmem:[#allocation2 + $0x18] sm:$0xff] %v9495_v19   ;;  %v448_v30 = vadd.f32 %v11384_v36, %v447_v27  ;;  %v10406_v31 = vpop.f32.mrb[10].mxu0  ;;  %9714 = vst [vmem:[#allocation2 + $0x90] sm:$0xff] %v9570_v48   ;;  %v837_v61 = vsel %vm711_vm1, %v584_v23, %v774_v50  ;;  %v835_v62 = vsel %vm709_vm4, %v576_v33, %v772_v51  ;;  %v10442_v63 = vpop.f32.mrb[10].mxu1 }
  0xf0   :  { %9698 = vst [vmem:[#allocation2 + $0x10] sm:$0xff] %v9490_v25   ;;  %vm679_vm14 = vcmp.ge.f32.partialorder %v456_v26, 0.0  ;;  %v742_v35 = vmul.f32 0.01, %v456_v26  ;;  %v459_v37 = vadd.f32 %v10406_v31, %v11384_v36  ;;  %v450_v38 = vpop.f32.mrb[11].mxu0  ;;  %v838_v2 = vsel %vm712_vm5, %v587_v34, %v775_v56  ;;  %v594_v9 = vpop.f32.mrb[11].mxu1 }
  0xf1   :  { %vm677_vm15 = vcmp.ge.f32.partialorder %v448_v30, 0.0  ;;  %v740_v40 = vmul.f32 0.01, %v448_v30  ;;  %v451_v41 = vadd.f32 %v11384_v36, %v450_v38  ;;  %v579_v3 = vadd.f32 %v11384_v36, %v578_v45 }
  0xf2   :  { %v805_v42 = vsel %vm679_vm14, %v456_v26, %v742_v35  ;;  %vm680_vm2 = vcmp.ge.f32.partialorder %v459_v37, 0.0  ;;  %v743_v43 = vmul.f32 0.01, %v459_v37  ;;  %v600_v4 = vadd.f32 %v10441_v52, %v11384_v36 }
  0xf3   :  { %v803_v46 = vsel %vm677_vm15, %v448_v30, %v740_v40  ;;  %vm678_vm3 = vcmp.ge.f32.partialorder %v451_v41, 0.0  ;;  %v741_v47 = vmul.f32 0.01, %v451_v41  ;;  %v9585_v8 = vpack.c.bf16 %v838_v2, %v837_v61 }
  0xf4   :  { %v806_v49 = vsel %vm680_vm2, %v459_v37, %v743_v43  ;;  %vm710_vm8 = vcmp.ge.f32.partialorder %v579_v3, 0.0  ;;  %v773_v14 = vmul.f32 0.01, %v579_v3  ;;  %vm715_vm11 = vcmp.ge.f32.partialorder %v600_v4, 0.0 }
  0xf5   :  { %v9505_v53 = vpack.c.bf16 %v806_v49, %v805_v42  ;;  %v804_v54 = vsel %vm678_vm3, %v451_v41, %v741_v47  ;;  %v10409_v55 = vpop.f32.mrb[12].mxu0  ;;  %9717 = vst [vmem:[#allocation2 + $0xa8] sm:$0xff] %v9585_v8   ;;  %v778_v19 = vmul.f32 0.01, %v600_v4  ;;  %v592_v20 = vadd.f32 %v11384_v36, %v591_v57  ;;  %v10445_v21 = vpop.f32.mrb[12].mxu1 }
  0xf6   :  { %v9500_v58 = vpack.c.bf16 %v804_v54, %v803_v46  ;;  %v472_v59 = vadd.f32 %v10409_v55, %v11384_v36  ;;  %v463_v60 = vpop.f32.mrb[13].mxu0  ;;  %v836_v18 = vsel %vm710_vm8, %v579_v3, %v773_v14  ;;  %v603_v26 = vadd.f32 %v10442_v63, %v11384_v36  ;;  %v607_v27 = vpop.f32.mrb[13].mxu1 }
  0xf7   :  { %9701 = vst [vmem:[#allocation2 + $0x28] sm:$0xff] %v9505_v53   ;;  %v464_v0 = vadd.f32 %v11384_v36, %v463_v60  ;;  %v10410_v1 = vpop.f32.mrb[14].mxu0  ;;  %v9580_v25 = vpack.c.bf16 %v836_v18, %v835_v62  ;;  %v841_v31 = vsel %vm715_vm11, %v600_v4, %v778_v19  ;;  %vm713_vm12 = vcmp.ge.f32.partialorder %v592_v20, 0.0  ;;  %v10446_v32 = vpop.f32.mrb[14].mxu1 }
  0xf8   :  { %9700 = vst [vmem:[#allocation2 + $0x20] sm:$0xff] %v9500_v58   ;;  %vm683_vm6 = vcmp.ge.f32.partialorder %v472_v59, 0.0  ;;  %v746_v5 = vmul.f32 0.01, %v472_v59  ;;  %v475_v6 = vadd.f32 %v10410_v1, %v11384_v36  ;;  %v466_v7 = vpop.f32.mrb[15].mxu0  ;;  %vm716_vm13 = vcmp.ge.f32.partialorder %v603_v26, 0.0 }
  0xf9   :  { %vm681_vm7 = vcmp.ge.f32.partialorder %v464_v0, 0.0  ;;  %v744_v10 = vmul.f32 0.01, %v464_v0  ;;  %v467_v11 = vadd.f32 %v11384_v36, %v466_v7  ;;  %9716 = vst [vmem:[#allocation2 + $0xa0] sm:$0xff] %v9580_v25   ;;  %v776_v35 = vmul.f32 0.01, %v592_v20 }
  0xfa   :  { %v809_v12 = vsel %vm683_vm6, %v472_v59, %v746_v5  ;;  %vm684_vm9 = vcmp.ge.f32.partialorder %v475_v6, 0.0  ;;  %v747_v13 = vmul.f32 0.01, %v475_v6  ;;  %v779_v37 = vmul.f32 0.01, %v603_v26  ;;  %v610_v42 = vpop.f32.mrb[15].mxu1 }
  0xfb   :  { %v807_v15 = vsel %vm681_vm7, %v464_v0, %v744_v10  ;;  %vm682_vm10 = vcmp.ge.f32.partialorder %v467_v11, 0.0  ;;  %v745_v16 = vmul.f32 0.01, %v467_v11  ;;  %v595_v41 = vadd.f32 %v11384_v36, %v594_v9 }
  0xfc   :  { %v810_v17 = vsel %vm684_vm9, %v475_v6, %v747_v13  ;;  %v839_v45 = vsel %vm713_vm12, %v592_v20, %v776_v35  ;;  %v842_v48 = vsel %vm716_vm13, %v603_v26, %v779_v37  ;;  %v616_v54 = vadd.f32 %v10445_v21, %v11384_v36 }
  0xfd   :  { %v9515_v22 = vpack.c.bf16 %v810_v17, %v809_v12  ;;  %v808_v23 = vsel %vm682_vm10, %v467_v11, %v745_v16  ;;  %v10413_v24 = vpop.f32.mrb[16].mxu0  ;;  %v9595_v51 = vpack.c.bf16 %v842_v48, %v841_v31  ;;  %vm714_vm3 = vcmp.ge.f32.partialorder %v595_v41, 0.0  ;;  %v10449_v55 = vpop.f32.mrb[16].mxu1 }
  0xfe   :  { %v9510_v28 = vpack.c.bf16 %v808_v23, %v807_v15  ;;  %v488_v29 = vadd.f32 %v10413_v24, %v11384_v36  ;;  %v479_v30 = vpop.f32.mrb[17].mxu0  ;;  %v777_v53 = vmul.f32 0.01, %v595_v41  ;;  %v608_v59 = vadd.f32 %v11384_v36, %v607_v27  ;;  %v623_v61 = vpop.f32.mrb[17].mxu1 }
  0xff   :  { %9703 = vst [vmem:[#allocation2 + $0x38] sm:$0xff] %v9515_v22   ;;  %v480_v33 = vadd.f32 %v11384_v36, %v479_v30  ;;  %v10414_v34 = vpop.f32.mrb[18].mxu0  ;;  %9719 = vst [vmem:[#allocation2 + $0xb8] sm:$0xff] %v9595_v51   ;;  %v619_v60 = vadd.f32 %v10446_v32, %v11384_v36  ;;  %vm719_vm4 = vcmp.ge.f32.partialorder %v616_v54, 0.0  ;;  %v10450_v2 = vpop.f32.mrb[18].mxu1  ;;  %v611_v22 = vadd.f32 %v11384_v36, %v610_v42 }
 0x100   :  { %9702 = vst [vmem:[#allocation2 + $0x30] sm:$0xff] %v9510_v28   ;;  %vm687_vm14 = vcmp.ge.f32.partialorder %v488_v29, 0.0  ;;  %v750_v38 = vmul.f32 0.01, %v488_v29  ;;  %v491_v39 = vadd.f32 %v10414_v34, %v11384_v36  ;;  %v482_v40 = vpop.f32.mrb[19].mxu0  ;;  %v840_v1 = vsel %vm714_vm3, %v595_v41, %v777_v53  ;;  %v626_v7 = vpop.f32.mrb[19].mxu1 }
 0x101   :  { %vm685_vm15 = vcmp.ge.f32.partialorder %v480_v33, 0.0  ;;  %v748_v43 = vmul.f32 0.01, %v480_v33  ;;  %v483_v44 = vadd.f32 %v11384_v36, %v482_v40  ;;  %v9590_v5 = vpack.c.bf16 %v840_v1, %v839_v45  ;;  %v10587_v34 = vld [vmem:[#allocation2] sm:$0xff]  }
 0x102   :  { %v813_v46 = vsel %vm687_vm14, %v488_v29, %v750_v38  ;;  %vm688_vm1 = vcmp.ge.f32.partialorder %v491_v39, 0.0  ;;  %v751_v47 = vmul.f32 0.01, %v491_v39  ;;  %v782_v6 = vmul.f32 0.01, %v616_v54 }
 0x103   :  { %v811_v49 = vsel %vm685_vm15, %v480_v33, %v748_v43  ;;  %vm686_vm2 = vcmp.ge.f32.partialorder %v483_v44, 0.0  ;;  %v749_v50 = vmul.f32 0.01, %v483_v44  ;;  %vm717_vm5 = vcmp.ge.f32.partialorder %v608_v59, 0.0  ;;  %9718 = vst [vmem:[#allocation2 + $0xb0] sm:$0xff] %v9590_v5  }
 0x104   :  { %v814_v52 = vsel %vm688_vm1, %v491_v39, %v751_v47  ;;  %v780_v11 = vmul.f32 0.01, %v608_v59  ;;  %v845_v14 = vsel %vm719_vm4, %v616_v54, %v782_v6  ;;  %vm720_vm10 = vcmp.ge.f32.partialorder %v619_v60, 0.0 }
 0x105   :  { %v9525_v56 = vpack.c.bf16 %v814_v52, %v813_v46  ;;  %v812_v57 = vsel %vm686_vm2, %v483_v44, %v749_v50  ;;  %v10417_v58 = vpop.f32.mrb[20].mxu0  ;;  %v783_v21 = vmul.f32 0.01, %v619_v60  ;;  %v11436_v23 = vadd.f32 %v10449_v55, %v11384_v36  ;;  %v10453_v24 = vpop.f32.mrb[20].mxu1 }
 0x106   :  { %v9520_v62 = vpack.c.bf16 %v812_v57, %v811_v49  ;;  %v504_v63 = vadd.f32 %v10417_v58, %v11384_v36  ;;  %v495_v0 = vpop.f32.mrb[21].mxu0  ;;  %v11432_v17 = vsel %vm717_vm5, %v608_v59, %v780_v11  ;;  %v11439_v28 = vadd.f32 %v11384_v36, %v623_v61  ;;  %v639_v30 = vpop.f32.mrb[21].mxu1  ;;  %v10589_v57 = vld [vmem:[#allocation2 + $0x8] sm:$0xff]  }
 0x107   :  { %9705 = vst [vmem:[#allocation2 + $0x48] sm:$0xff] %v9525_v56   ;;  %v496_v3 = vadd.f32 %v11384_v36, %v495_v0  ;;  %v10418_v4 = vpop.f32.mrb[22].mxu0  ;;  %v11442_v29 = vadd.f32 %v10450_v2, %v11384_v36  ;;  %v846_v35 = vsel %vm720_vm10, %v619_v60, %v783_v21  ;;  %v11447_v37 = vadd.f32 %v11384_v36, %v626_v7  ;;  %v10454_v48 = vpop.f32.mrb[22].mxu1  ;;  %v10591_v7 = vld [vmem:[#allocation2 + $0x10] sm:$0xff]  }
 0x108   :  { %9704 = vst [vmem:[#allocation2 + $0x40] sm:$0xff] %v9520_v62   ;;  %vm691_vm6 = vcmp.ge.f32.partialorder %v504_v63, 0.0  ;;  %v754_v8 = vmul.f32 0.01, %v504_v63  ;;  %v507_v9 = vadd.f32 %v10418_v4, %v11384_v36  ;;  %v498_v10 = vpop.f32.mrb[23].mxu0  ;;  %v9605_v42 = vpack.c.bf16 %v846_v35, %v845_v14  ;;  %v642_v52 = vpop.f32.mrb[23].mxu1 }
 0x109   :  { %vm689_vm7 = vcmp.ge.f32.partialorder %v496_v3, 0.0  ;;  %v752_v12 = vmul.f32 0.01, %v496_v3  ;;  %v499_v13 = vadd.f32 %v11384_v36, %v498_v10  ;;  %v11451_v43 = vadd.f32 %v10453_v24, %v11384_v36 }
 0x10a   :  { %v817_v15 = vsel %vm691_vm6, %v504_v63, %v754_v8  ;;  %vm692_vm8 = vcmp.ge.f32.partialorder %v507_v9, 0.0  ;;  %v755_v16 = vmul.f32 0.01, %v507_v9  ;;  %v11454_v44 = vadd.f32 %v11384_v36, %v639_v30  ;;  %9721 = vst [vmem:[#allocation2 + $0xc8] sm:$0xff] %v9605_v42  }
 0x10b   :  { %v815_v18 = vsel %vm689_vm7, %v496_v3, %v752_v12  ;;  %vm690_vm9 = vcmp.ge.f32.partialorder %v499_v13, 0.0  ;;  %v753_v19 = vmul.f32 0.01, %v499_v13  ;;  %vm718_vm12 = vcmp.ge.f32.partialorder %v611_v22, 0.0 }
 0x10c   :  { %v818_v20 = vsel %vm692_vm8, %v507_v9, %v755_v16  ;;  %v781_v51 = vmul.f32 0.01, %v611_v22  ;;  %vm723_vm15 = vcmp.ge.f32.partialorder %v11436_v23, 0.0  ;;  %v786_v61 = vmul.f32 0.01, %v11436_v23 }
 0x10d   :  { %v9535_v25 = vpack.c.bf16 %v818_v20, %v817_v15  ;;  %v816_v26 = vsel %vm690_vm9, %v499_v13, %v753_v19  ;;  %v10421_v27 = vpop.f32.mrb[24].mxu0  ;;  %vm721_vm2 = vcmp.ge.f32.partialorder %v11439_v28, 0.0  ;;  %v10457_v62 = vpop.f32.mrb[24].mxu1  ;;  %v784_v2 = vmul.f32 0.01, %v11439_v28 }
 0x10e   :  { %v9530_v31 = vpack.c.bf16 %v816_v26, %v815_v18  ;;  %v520_v32 = vadd.f32 %v10421_v27, %v11384_v36  ;;  %v511_v33 = vpop.f32.mrb[25].mxu0  ;;  %v10588_v41 = vld [vmem:[#allocation2 + $0x48] sm:$0xff]   ;;  %v844_v58 = vsel %vm718_vm12, %v611_v22, %v781_v51  ;;  %vm724_vm3 = vcmp.ge.f32.partialorder %v11442_v29, 0.0  ;;  %v11465_v3 = vpop.f32.mrb[25].mxu1 }
 0x10f   :  { %9707 = vst [vmem:[#allocation2 + $0x58] sm:$0xff] %v9535_v25   ;;  %v512_v38 = vadd.f32 %v11384_v36, %v511_v33  ;;  %v10422_v39 = vpop.f32.mrb[26].mxu0  ;;  %v10586_v40 = vld [vmem:[#allocation2 + $0x40] sm:$0xff]   ;;  %v9600_v60 = vpack.c.bf16 %v844_v58, %v11432_v17  ;;  %v849_v8 = vsel %vm723_vm15, %v11436_v23, %v786_v61  ;;  %v11472_v9 = vadd.f32 %v10454_v48, %v11384_v36 }
 0x110   :  { %9706 = vst [vmem:[#allocation2 + $0x50] sm:$0xff] %v9530_v31   ;;  %vm695_vm11 = vcmp.ge.f32.partialorder %v520_v32, 0.0  ;;  %v758_v45 = vmul.f32 0.01, %v520_v32  ;;  %v523_v46 = vadd.f32 %v10422_v39, %v11384_v36  ;;  %v514_v47 = vpop.f32.mrb[27].mxu0  ;;  %9772 = vmatprep.subr.bf16.mxu1 %v10586_v40  ;;  %v847_v14 = vsel %vm721_vm2, %v11439_v28, %v784_v2  ;;  %v10593_v28 = vld [vmem:[#allocation2 + $0x18] sm:$0xff]  }
 0x111   :  { %vm693_vm13 = vcmp.ge.f32.partialorder %v512_v38, 0.0  ;;  %v756_v49 = vmul.f32 0.01, %v512_v38  ;;  %v515_v50 = vadd.f32 %v11384_v36, %v514_v47  ;;  %9773 = vmatpush3.bf16.msra.mxu1 %v10587_v34  ;;  %9720 = vst [vmem:[#allocation2 + $0xc0] sm:$0xff] %v9600_v60   ;;  %v11479_v15 = vadd.f32 %v11384_v36, %v642_v52  ;;  %v10458_v31 = vpop.f32.mrb[26].mxu1 }
 0x112   :  { %v821_v53 = vsel %vm695_vm11, %v520_v32, %v758_v45  ;;  %vm696_vm14 = vcmp.ge.f32.partialorder %v523_v46, 0.0  ;;  %v759_v54 = vmul.f32 0.01, %v523_v46  ;;  %9774 = vmatprep.subr.bf16.mxu1 %v10588_v41  ;;  %v11482_v16 = vadd.f32 %v10457_v62, %v11384_v36  ;;  %v658_v35 = vpop.f32.mrb[27].mxu1 }
 0x113   :  { %v819_v55 = vsel %vm693_vm13, %v512_v38, %v756_v49  ;;  %vm694_vm1 = vcmp.ge.f32.partialorder %v515_v50, 0.0  ;;  %v757_v56 = vmul.f32 0.01, %v515_v50  ;;  %v787_v20 = vmul.f32 0.01, %v11442_v29 }
 0x114   :  { %v822_v59 = vsel %vm696_vm14, %v523_v46, %v759_v54  ;;  %vm722_vm6 = vcmp.ge.f32.partialorder %v11447_v37, 0.0  ;;  %v785_v33 = vmul.f32 0.01, %v11447_v37  ;;  %vm727_vm9 = vcmp.ge.f32.partialorder %v11451_v43, 0.0 }
 0x115   :  { %v9545_v63 = vpack.c.bf16 %v822_v59, %v821_v53  ;;  %v820_v0 = vsel %vm694_vm1, %v515_v50, %v757_v56  ;;  %v10425_v1 = vpop.f32.mrb[28].mxu0  ;;  %9775 = vmatpush3.bf16.msra.mxu1 %v10589_v57  ;;  %v850_v25 = vsel %vm724_vm3, %v11442_v29, %v787_v20  ;;  %v790_v34 = vmul.f32 0.01, %v11451_v43 }
 0x116   :  { %v9540_v4 = vpack.c.bf16 %v820_v0, %v819_v55  ;;  %v536_v5 = vadd.f32 %v10425_v1, %v11384_v36  ;;  %v527_v6 = vpop.f32.mrb[29].mxu0  ;;  %v10592_v13 = vld [vmem:[#allocation2 + $0x58] sm:$0xff]   ;;  %v9615_v30 = vpack.c.bf16 %v850_v25, %v849_v8  ;;  %vm725_vm10 = vcmp.ge.f32.partialorder %v11454_v44, 0.0  ;;  %v10597_v1 = vld [vmem:[#allocation2 + $0x28] sm:$0xff]  }
 0x117   :  { %9709 = vst [vmem:[#allocation2 + $0x68] sm:$0xff] %v9545_v63   ;;  %v528_v10 = vadd.f32 %v11384_v36, %v527_v6  ;;  %v10426_v11 = vpop.f32.mrb[30].mxu0  ;;  %v10590_v12 = vld [vmem:[#allocation2 + $0x50] sm:$0xff]   ;;  %v788_v29 = vmul.f32 0.01, %v11454_v44  ;;  %v848_v46 = vsel %vm722_vm6, %v11447_v37, %v785_v33  ;;  %v853_v47 = vsel %vm727_vm9, %v11451_v43, %v790_v34  ;;  %v10595_v37 = vld [vmem:[#allocation2 + $0x20] sm:$0xff]  }
 0x118   :  { %9708 = vst [vmem:[#allocation2 + $0x60] sm:$0xff] %v9540_v4   ;;  %vm699_vm4 = vcmp.ge.f32.partialorder %v536_v5, 0.0  ;;  %v762_v17 = vmul.f32 0.01, %v536_v5  ;;  %v539_v18 = vadd.f32 %v10426_v11, %v11384_v36  ;;  %v530_v19 = vpop.f32.mrb[31].mxu0  ;;  %9776 = vmatprep.subr.bf16.mxu1 %v10590_v12  ;;  %9723 = vst [vmem:[#allocation2 + $0xd8] sm:$0xff] %v9615_v30   ;;  %v9610_v51 = vpack.c.bf16 %v848_v46, %v847_v14 }
 0x119   :  { %vm697_vm5 = vcmp.ge.f32.partialorder %v528_v10, 0.0  ;;  %v760_v21 = vmul.f32 0.01, %v528_v10  ;;  %v531_v22 = vadd.f32 %v11384_v36, %v530_v19  ;;  %9777 = vmatpush3.bf16.msra.mxu1 %v10591_v7  ;;  %v851_v52 = vsel %vm725_vm10, %v11454_v44, %v788_v29  ;;  %v10616_v30 = vld [vmem:[%s14910_s1 + $0x44] ss:$16 sps:$4 sm:$0xff]   ;;  %v10615_v34 = vld [vmem:[#allocation2 + $0x98] sm:$0xff]  }
 0x11a   :  { %v825_v23 = vsel %vm699_vm4, %v536_v5, %v762_v17  ;;  %vm700_vm7 = vcmp.ge.f32.partialorder %v539_v18, 0.0  ;;  %v763_v24 = vmul.f32 0.01, %v539_v18  ;;  %9778 = vmatprep.subr.bf16.mxu1 %v10592_v13  ;;  %v656_v53 = vadd.f32 %v11384_v36, %v11465_v3  ;;  %9722 = vst [vmem:[#allocation2 + $0xd0] sm:$0xff] %v9610_v51   ;;  %v10599_v13 = vld [vmem:[#allocation2 + $0x30] sm:$0xff]  }
 0x11b   :  { %v823_v26 = vsel %vm697_vm5, %v528_v10, %v760_v21  ;;  %vm698_vm8 = vcmp.ge.f32.partialorder %v531_v22, 0.0  ;;  %v761_v27 = vmul.f32 0.01, %v531_v22  ;;  %vm728_vm12 = vcmp.ge.f32.partialorder %v11472_v9, 0.0  ;;  %v10635_v51 = vld [vmem:[%s14910_s1 + $0xa0] ss:$16 sps:$4 sm:$0xff]  }
 0x11c   :  { %v826_v32 = vsel %vm700_vm7, %v539_v18, %v763_v24  ;;  %v791_v44 = vmul.f32 0.01, %v11472_v9  ;;  %vm726_vm15 = vcmp.ge.f32.partialorder %v11479_v15, 0.0  ;;  %v789_v3 = vmul.f32 0.01, %v11479_v15  ;;  %v10607_v24 = vld [vmem:[#allocation2 + $0xc8] sm:$0xff]  }
 0x11d   :  { %v9555_v38 = vpack.c.bf16 %v826_v32, %v825_v23  ;;  %v824_v39 = vsel %vm698_vm8, %v531_v22, %v761_v27  ;;  %v10429_v40 = vpop.f32.mrb[32].mxu0  ;;  %9779 = vmatpush3.bf16.msra.mxu1 %v10593_v28  ;;  %vm731_vm2 = vcmp.ge.f32.partialorder %v11482_v16, 0.0  ;;  %v794_v6 = vmul.f32 0.01, %v11482_v16  ;;  %v10601_v22 = vld [vmem:[#allocation2 + $0x38] sm:$0xff]   ;;  %v10613_v32 = vld [vmem:[#allocation2 + $0x90] sm:$0xff]  }
 0x11e   :  { %v9550_v41 = vpack.c.bf16 %v824_v39, %v823_v26  ;;  %v552_v42 = vadd.f32 %v10429_v40, %v11384_v36  ;;  %v543_v45 = vpop.f32.mrb[33].mxu0  ;;  %v10596_v58 = vld [vmem:[#allocation2 + $0x68] sm:$0xff]   ;;  %v854_v63 = vsel %vm728_vm12, %v11472_v9, %v791_v44  ;;  %v852_v8 = vsel %vm726_vm15, %v11479_v15, %v789_v3  ;;  %v10609_v23 = vld [vmem:[%s14910_s1 + $0x24] ss:$16 sps:$4 sm:$0xff]   ;;  %v10611_v28 = vld [vmem:[%s14910_s1 + $0x20] ss:$16 sps:$4 sm:$0xff]  }
 0x11f   :  { %9711 = vst [vmem:[#allocation2 + $0x78] sm:$0xff] %v9555_v38   ;;  %v544_v48 = vadd.f32 %v11384_v36, %v543_v45  ;;  %v10430_v49 = vpop.f32.mrb[34].mxu0  ;;  %v10594_v50 = vld [vmem:[#allocation2 + $0x60] sm:$0xff]   ;;  %v9625_v2 = vpack.c.bf16 %v854_v63, %v853_v47  ;;  %v659_v9 = vadd.f32 %v11384_v36, %v658_v35  ;;  %v9620_v11 = vpack.c.bf16 %v852_v8, %v851_v52  ;;  %v10614_v31 = vld [vmem:[#allocation2 + $0xd8] sm:$0xff]   ;;  %v10627_v47 = vld [vmem:[#allocation2 + $0xb0] sm:$0xff]  }
 0x120   :  { %9710 = vst [vmem:[#allocation2 + $0x70] sm:$0xff] %v9550_v41   ;;  %vm703_vm11 = vcmp.ge.f32.partialorder %v552_v42, 0.0  ;;  %v766_v54 = vmul.f32 0.01, %v552_v42  ;;  %v555_v55 = vadd.f32 %v10430_v49, %v11384_v36  ;;  %v546_v56 = vpop.f32.mrb[35].mxu0  ;;  %9780 = vmatprep.subr.bf16.mxu1 %v10594_v50  ;;  %v857_v12 = vsel %vm731_vm2, %v11482_v16, %v794_v6  ;;  %v10620_v40 = vld [vmem:[#allocation2 + $0xa0] sm:$0xff]  }
 0x121   :  { %vm701_vm13 = vcmp.ge.f32.partialorder %v544_v48, 0.0  ;;  %v764_v43 = vmul.f32 0.01, %v544_v48  ;;  %v547_v57 = vadd.f32 %v11384_v36, %v546_v56  ;;  %9781 = vmatpush3.bf16.msra.mxu1 %v10595_v37  ;;  %9725 = vst [vmem:[#allocation2 + $0xe8] sm:$0xff] %v9625_v2   ;;  %vm729_vm3 = vcmp.ge.f32.partialorder %v656_v53, 0.0  ;;  %9724 = vst [vmem:[#allocation2 + $0xe0] sm:$0xff] %v9620_v11  }
 0x122   :  { %v829_v59 = vsel %vm703_vm11, %v552_v42, %v766_v54  ;;  %vm704_vm14 = vcmp.ge.f32.partialorder %v555_v55, 0.0  ;;  %v767_v60 = vmul.f32 0.01, %v555_v55  ;;  %9782 = vmatprep.subr.bf16.mxu1 %v10596_v58  ;;  %v9435_v14 = vpack.c.bf16 %v857_v12, %v857_v12  ;;  %v10605_v36 = vld [vmem:[#allocation2 + $0xc0] sm:$0xff]   ;;  %v10612_v27 = vld [vmem:[#allocation2 + $0xd0] sm:$0xff]   ;;  %v10622_v41 = vld [vmem:[#allocation2 + $0xa8] sm:$0xff]  }
 0x123   :  { %v827_v61 = vsel %vm701_vm13, %v544_v48, %v764_v43  ;;  %vm702_vm1 = vcmp.ge.f32.partialorder %v547_v57, 0.0  ;;  %v765_v62 = vmul.f32 0.01, %v547_v57  ;;  %v792_v17 = vmul.f32 0.01, %v656_v53  ;;  %v10629_v48 = vld [vmem:[#allocation2 + $0xb8] sm:$0xff]  }
 0x124   :  { %v830_v0 = vsel %vm704_vm14, %v555_v55, %v767_v60  ;;  %vm730_vm4 = vcmp.ge.f32.partialorder %v659_v9, 0.0  ;;  %v793_v18 = vmul.f32 0.01, %v659_v9  ;;  %1173 = vst [vmem:[#allocation2 + $0xf8] sm:$0xf] %v9435_v14  ;;  %v10667_v6 = vld [vmem:[%s14913_s4] sm:$0xff]  }
 0x125   :  { %v9565_v4 = vpack.c.bf16 %v830_v0, %v829_v59  ;;  %v828_v5 = vsel %vm702_vm1, %v547_v57, %v765_v62  ;;  %9783 = vmatpush3.bf16.msra.mxu1 %v10597_v1  ;;  %v855_v15 = vsel %vm729_vm3, %v656_v53, %v792_v17  ;;  %v10602_v16 = vld [vmem:[%s14910_s1] ss:$16 sps:$4 sm:$0xff]   ;;  %v10623_v38 = vld [vmem:[%s14910_s1 + $0x64] ss:$16 sps:$4 sm:$0xff]   ;;  %v10644_v56 = vld [vmem:[%s14910_s1 + $0xc] ss:$16 sps:$4 sm:$0xff]  }
 0x126   :  { %v9560_v7 = vpack.c.bf16 %v828_v5, %v827_v61  ;;  %v10600_v19 = vld [vmem:[#allocation2 + $0x78] sm:$0xff]   ;;  %v856_v20 = vsel %vm730_vm4, %v659_v9, %v793_v18  ;;  %v10618_v35 = vld [vmem:[%s14910_s1 + $0x40] ss:$16 sps:$4 sm:$0xff]   ;;  %v10630_v45 = vld [vmem:[%s14910_s1 + $0x84] ss:$16 sps:$4 sm:$0xff]   ;;  %vm2152_vm7 = vcmask 1042432  }
 0x127   :  { %9713 = vst [vmem:[#allocation2 + $0x88] sm:$0xff] %v9565_v4   ;;  %v10598_v10 = vld [vmem:[#allocation2 + $0x70] sm:$0xff]   ;;  %v9630_v21 = vpack.c.bf16 %v856_v20, %v855_v15  ;;  %v10642_v37 = vld [vmem:[%s14910_s1 + $0x8] ss:$16 sps:$4 sm:$0xff]   ;;  %v10645_v43 = vld [vmem:[%s14910_s1 + $0x2c] ss:$16 sps:$4 sm:$0xff]  }
 0x128   :  { %9712 = vst [vmem:[#allocation2 + $0x80] sm:$0xff] %v9560_v7   ;;  %9784 = vmatprep.subr.bf16.mxu1 %v10598_v10  ;;  %v10619_v33 = vld [vmem:[#allocation2 + $0xe0] sm:$0xff]   ;;  %v10621_v39 = vld [vmem:[#allocation2 + $0xe8] sm:$0xff]   ;;  %v10670_v11 = vld [vmem:[%s14913_s4 + $0x50] sm:$0xff]   ;;  %vm1954_vm5 = vsmask.f32 3328 }
 0x129   :  { %9785 = vmatpush3.bf16.msra.mxu1 %v10599_v13  ;;  %9726 = vst [vmem:[#allocation2 + $0xf0] sm:$0xff] %v9630_v21   ;;  %v10625_v42 = vld [vmem:[%s14910_s1 + $0x60] ss:$16 sps:$4 sm:$0xff]   ;;  %v10633_v50 = vld [vmem:[%s14910_s1 + $0xa4] ss:$16 sps:$4 sm:$0xff]   ;;  %v10668_v7 = vld [vmem:[%s14913_s4 + $0x48] sm:$0xff]  }
 0x12a   :  { %9786 = vmatprep.subr.bf16.mxu1 %v10600_v19  ;;  %v10632_v49 = vld [vmem:[%s14910_s1 + $0x80] ss:$16 sps:$4 sm:$0xff]   ;;  %v10636_v52 = vld [vmem:[%s14910_s1 + $0xc4] ss:$16 sps:$4 sm:$0xff]   ;;  %v10647_v57 = vld [vmem:[%s14910_s1 + $0x28] ss:$16 sps:$4 sm:$0xff]  }
 0x12b   :  { %v10628_v46 = vld [vmem:[#allocation2 + $0xf8] ss:$0 sps:$4 sm:$0xff]   ;;  %v10638_v53 = vld [vmem:[%s14910_s1 + $0xc0] ss:$16 sps:$4 sm:$0xff]   ;;  %v10648_v58 = vld [vmem:[%s14910_s1 + $0x4c] ss:$16 sps:$4 sm:$0xff]  }
 0x12c   :  { %v10639_v54 = vld [vmem:[%s14910_s1 + $0xe4] ss:$16 sps:$4 sm:$0x7f]   ;;  %v10641_v55 = vld [vmem:[%s14910_s1 + $0xe0] ss:$16 sps:$4 sm:$0x7f]  }
 0x12d   :  { %9787 = vmatpush3.bf16.msra.mxu1 %v10601_v22  ;;  %v10650_v44 = vld [vmem:[%s14910_s1 + $0x48] ss:$16 sps:$4 sm:$0xff]   ;;  %v10651_v59 = vld [vmem:[%s14910_s1 + $0x6c] ss:$16 sps:$4 sm:$0xff]   ;;  %v10666_v5 = vld [vmem:[%s14913_s4 + $0x40] sm:$0xff]   ;;  %vm2153_vm8 = vcmask 1046532  }
 0x12e   :  { %9836 = vmatprep.subr.bf16.mxu1 %v10605_v36  ;;  %v10608_v26 = vld [vmem:[#allocation2 + $0x88] sm:$0xff]   ;;  %9900 = vmatprep.subr.bf16.mxu0 %v10666_v5  ;;  %v10672_v9 = vld [vmem:[%s14913_s4 + $0xc0] sm:$0xff]   ;;  %v10671_v13 = vld [vmem:[%s14913_s4 + $0x10] sm:$0xff]   ;;  %vm1955_vm6 = vsmask.f32 7440  ;;  %vm2992_vm11 = vcmask 1041408  }
 0x12f   :  { %v10606_v25 = vld [vmem:[#allocation2 + $0x80] sm:$0xff]   ;;  %v10653_v60 = vld [vmem:[%s14910_s1 + $0x68] ss:$16 sps:$4 sm:$0xff]   ;;  %v10654_v61 = vld [vmem:[%s14910_s1 + $0x8c] ss:$16 sps:$4 sm:$0xff]   ;;  %9901 = vmatpush3.bf16.msra.mxu0 %v10667_v6  ;;  %vm2993_vm12 = vcmask 1045508  }
 0x130   :  { %1671 = vmatmul.mubr.bf16.vlgmr.msra.gmra.mrb[28].mxu1 %v10602_v16  ;;  %v10626_v29 = vld [vmem:[#allocation2 + $0xf0] sm:$0xff]   ;;  %v10656_v62 = vld [vmem:[%s14910_s1 + $0x88] ss:$16 sps:$4 sm:$0xff]   ;;  %v10657_v63 = vld [vmem:[%s14910_s1 + $0xac] ss:$16 sps:$4 sm:$0xff]   ;;  %9902 = vmatprep.subr.bf16.mxu0 %v10668_v7  ;;  %vm11176_vm2 = vmmov 0  }
 0x131   :  { %9837 = vmatpush3.bf16.msra.mxu1 %v10606_v25  ;;  %1678 = vmatprep.mubr.bf16.mxu1 %v10609_v23  ;;  %v10659_v0 = vld [vmem:[%s14910_s1 + $0xa8] ss:$16 sps:$4 sm:$0xff]   ;;  %v10660_v1 = vld [vmem:[%s14910_s1 + $0xcc] ss:$16 sps:$4 sm:$0xff]   ;;  %v10673_v10 = vld [vmem:[%s14913_s4 + $0x80] sm:$0xff]  }
 0x132   :  { %9838 = vmatprep.subr.bf16.mxu1 %v10607_v24  ;;  %v10662_v2 = vld [vmem:[%s14910_s1 + $0xc8] ss:$16 sps:$4 sm:$0xff]   ;;  %v10663_v3 = vld [vmem:[%s14910_s1 + $0xec] ss:$16 sps:$4 sm:$0x7f]   ;;  %v10678_v18 = vld [vmem:[%s14913_s4 + $0xd0] sm:$0xff]  }
 0x133   :  { %v10665_v4 = vld [vmem:[%s14910_s1 + $0xe8] ss:$16 sps:$4 sm:$0x7f]   ;;  %v10679_v15 = vld [vmem:[%s14913_s4 + $0x90] sm:$0xff]   ;;  %v10680_v20 = vld [vmem:[%s14913_s4 + $0x60] sm:$0xff]  }
 0x134   :  { %v10669_v8 = vld [vmem:[%s14913_s4 + $0x8] sm:$0xff]   ;;  %v10676_v17 = vld [vmem:[%s14913_s4 + $0x58] sm:$0xff]   ;;  %v10682_v16 = vld [vmem:[%s14913_s4 + $0x20] sm:$0xff]   ;;  %vm2516_vm14 = vsmask.f32 2304 }
 0x135   :  { %9839 = vmatpush3.bf16.msra.mxu1 %v10608_v26  ;;  %9903 = vmatpush3.bf16.msra.mxu0 %v10669_v8  ;;  %v10674_v12 = vld [vmem:[%s14913_s4 + $0xc8] sm:$0xff]   ;;  %v10677_v19 = vld [vmem:[%s14913_s4 + $0x18] sm:$0xff]   ;;  %vm11759_vm9 = vmor %vm2152_vm7, %vm2153_vm8  ;;  %vm2517_vm15 = vsmask.f32 6416 }
 0x136   :  { %9840 = vmatprep.subr.bf16.mxu1 %v10612_v27  ;;  %9904 = vmatprep.subr.bf16.mxu0 %v10670_v11  ;;  %v10675_v14 = vld [vmem:[%s14913_s4 + $0x88] sm:$0xff]   ;;  %v10681_v36 = vld [vmem:[%s14913_s4 + $0xd8] sm:$0xff]   ;;  %vm11772_vm10 = vmor %vm1954_vm5, %vm1955_vm6 }
 0x137   :  { %v10683_v23 = vld [vmem:[%s14913_s4 + $0x98] sm:$0xff]   ;;  %vm11855_vm13 = vmor %vm2992_vm11, %vm2993_vm12 }
 0x138   :  { %1679 = vmatmul.mubr.bf16.gmra.mrb[32].mxu1 %v10611_v28  ;;  %v10684_v28 = vld [vmem:[%s14913_s4 + $0x68] sm:$0xff]   ;;  %vm12031_vm1 = vmor %vm2516_vm14, %vm2517_vm15 }
 0x139   :  { %9841 = vmatpush3.bf16.msra.mxu1 %v10613_v32  ;;  %1686 = vmatprep.mubr.bf16.mxu1 %v10616_v30  ;;  %v10685_v30 = vld [vmem:[%s14913_s4 + $0xe0] sm:$0xff]  }
 0x13a   :  { %9842 = vmatprep.subr.bf16.mxu1 %v10614_v31  ;;  %9905 = vmatpush3.bf16.msra.mxu0 %v10671_v13  ;;  %v10686_v31 = vld [vmem:[%s14913_s4 + $0x28] sm:$0xff]   ;;  %v10687_v32 = vld [vmem:[%s14913_s4 + $0xa0] sm:$0xff]  }
 0x13b   :  { %9906 = vmatprep.subr.bf16.mxu0 %v10676_v17 }
 0x13d   :  { %9843 = vmatpush3.bf16.msra.mxu1 %v10615_v34  ;;  %v10688_v34 = vld [vmem:[%s14913_s4 + $0x70] sm:$0xff]  }
 0x13e   :  { %9844 = vmatprep.subr.bf16.mxu1 %v10619_v33  ;;  %9907 = vmatpush3.bf16.msra.mxu0 %v10677_v19 }
 0x13f   :  { %9908 = vmatprep.subr.bf16.mxu0 %v10680_v20 }
 0x140   :  { %1687 = vmatmul.mubr.bf16.gmra.mrb[36].mxu1 %v10618_v35  ;;  %v10689_v35 = vld [vmem:[%s14913_s4 + $0xe8] sm:$0xff]  }
 0x141   :  { %9845 = vmatpush3.bf16.msra.mxu1 %v10620_v40  ;;  %1694 = vmatprep.mubr.bf16.mxu1 %v10623_v38 }
 0x142   :  { %9846 = vmatprep.subr.bf16.mxu1 %v10621_v39  ;;  %9909 = vmatpush3.bf16.msra.mxu0 %v10682_v16 }
 0x143   :  { %9910 = vmatprep.subr.bf16.mxu0 %v10684_v28 }
 0x145   :  { %9847 = vmatpush3.bf16.msra.mxu1 %v10622_v41 }
 0x146   :  { %9848 = vmatprep.subr.bf16.mxu1 %v10626_v29  ;;  %9911 = vmatpush3.bf16.msra.mxu0 %v10686_v31 }
 0x147   :  { %9912 = vmatprep.subr.bf16.mxu0 %v10688_v34 }
 0x148   :  { %1695 = vmatmul.mubr.bf16.gmra.mrb[40].mxu1 %v10625_v42 }
 0x149   :  { %9849 = vmatpush3.bf16.msra.mxu1 %v10627_v47  ;;  %1702 = vmatprep.mubr.bf16.mxu1 %v10630_v45  ;;  %v10691_v47 = vld [vmem:[%s14913_s4 + $0xa8] sm:$0xff]  }
 0x14a   :  { %10545 = vmatprep.subr.msk.bf16.mxu1 %vm377_vm0, %v10628_v46  ;;  %vm1610_vm0 = vcmask 982016   ;;  %v10690_v46 = vld [vmem:[%s14913_s4 + $0x30] sm:$0xff]  }
 0x14b   :  { %9913 = vmatpush3.bf16.msra.mxu0 %v10690_v46 }
 0x14d   :  { %9851 = vmatpush3.bf16.msra.mxu1 %v10629_v48 }
 0x14e   :  { %9958 = vmatprep.subr.bf16.mxu1 %v10672_v9 }
 0x150   :  { %1703 = vmatmul.mubr.bf16.gmra.mrb[44].mxu1 %v10632_v49 }
 0x151   :  { %1710 = vmatprep.mubr.bf16.mxu1 %v10633_v50 }
 0x158   :  { %1711 = vmatmul.mubr.bf16.gmra.mrb[48].mxu1 %v10635_v51 }
 0x159   :  { %1718 = vmatprep.mubr.bf16.mxu1 %v10636_v52  ;;  %v10692_v52 = vld [vmem:[%s14913_s4 + $0x78] sm:$0xff]  }
 0x15a   :  { %9914 = vmatprep.subr.bf16.mxu0 %v10692_v52 }
 0x160   :  { %1719 = vmatmul.mubr.bf16.gmra.mrb[52].mxu1 %v10638_v53  ;;  %v10693_v53 = vld [vmem:[%s14913_s4 + $0xf0] sm:$0xff]  }
 0x161   :  { %1726 = vmatprep.mubr.bf16.mxu1 %v10639_v54  ;;  %v10694_v54 = vld [vmem:[%s14913_s4 + $0x38] sm:$0xff]  }
 0x162   :  { %9915 = vmatpush3.bf16.msra.mxu0 %v10694_v54 }
 0x168   :  { %1727 = vmatmul.mubr.bf16.gmra.mrb[56].mxu1 %v10641_v55  ;;  %v10695_v55 = vld [vmem:[%s14913_s4 + $0xb0] sm:$0xff]  }
 0x169   :  { %8897 = vmatprep.mubr.msk.bf16.mxu1 %vm1610_vm0, %v10644_v56 }
 0x170   :  { %1768 = vmatmul.mubr.bf16.vlgmr.msra.gmra.mrb[60].mxu1 %v10642_v37 }
 0x171   :  { %8898 = vmatprep.mubr.msk.bf16.mxu1 %vm1610_vm0, %v10645_v43  ;;  %9959 = vmatpush3.bf16.msra.mxu1 %v10673_v10 }
 0x172   :  { %9960 = vmatprep.subr.bf16.mxu1 %v10674_v12 }
 0x175   :  { %9961 = vmatpush3.bf16.msra.mxu1 %v10675_v14 }
 0x176   :  { %9962 = vmatprep.subr.bf16.mxu1 %v10678_v18 }
 0x178   :  { %1776 = vmatmul.mubr.bf16.gmra.mrb[64].mxu1 %v10647_v57 }
 0x179   :  { %8899 = vmatprep.mubr.msk.bf16.mxu1 %vm1610_vm0, %v10648_v58  ;;  %9963 = vmatpush3.bf16.msra.mxu1 %v10679_v15 }
 0x17a   :  { %9964 = vmatprep.subr.bf16.mxu1 %v10681_v36 }
 0x17d   :  { %9965 = vmatpush3.bf16.msra.mxu1 %v10683_v23 }
 0x17e   :  { %9966 = vmatprep.subr.bf16.mxu1 %v10685_v30 }
 0x180   :  { %1784 = vmatmul.mubr.bf16.gmra.mrb[68].mxu1 %v10650_v44 }
 0x181   :  { %8900 = vmatprep.mubr.msk.bf16.mxu1 %vm1610_vm0, %v10651_v59  ;;  %9967 = vmatpush3.bf16.msra.mxu1 %v10687_v32 }
 0x182   :  { %9968 = vmatprep.subr.bf16.mxu1 %v10689_v35 }
 0x185   :  { %9969 = vmatpush3.bf16.msra.mxu1 %v10691_v47 }
 0x186   :  { %9970 = vmatprep.subr.bf16.mxu1 %v10693_v53 }
 0x188   :  { %1792 = vmatmul.mubr.bf16.gmra.mrb[72].mxu1 %v10653_v60 }
 0x189   :  { %8901 = vmatprep.mubr.msk.bf16.mxu1 %vm1610_vm0, %v10654_v61  ;;  %9971 = vmatpush3.bf16.msra.mxu1 %v10695_v55 }
 0x190   :  { %1800 = vmatmul.mubr.bf16.gmra.mrb[76].mxu1 %v10656_v62 }
 0x191   :  { %8902 = vmatprep.mubr.msk.bf16.mxu1 %vm1610_vm0, %v10657_v63 }
 0x198   :  { %1808 = vmatmul.mubr.bf16.gmra.mrb[80].mxu1 %v10659_v0 }
 0x199   :  { %8903 = vmatprep.mubr.msk.bf16.mxu1 %vm1610_vm0, %v10660_v1  ;;  %v10699_v1 = vld [vmem:[%s14913_s4 + $0xf8] sm:$0xff]  }
 0x19a   :  { %9972 = vmatprep.subr.bf16.mxu1 %v10699_v1 }
 0x1a0   :  { %1816 = vmatmul.mubr.bf16.gmra.mrb[84].mxu1 %v10662_v2  ;;  %v10700_v2 = vld [vmem:[%s14913_s4 + $0xb8] sm:$0xff]  }
 0x1a1   :  { %8904 = vmatprep.mubr.msk.bf16.mxu1 %vm1610_vm0, %v10663_v3  ;;  %9973 = vmatpush3.bf16.msra.mxu1 %v10700_v2 }
 0x1a8   :  { %1824 = vmatmul.mubr.bf16.gmra.mrb[88].mxu1 %v10665_v4 }
 0x203   :  { %v9788_v21 = vpop.f32.mrb[28].mxu1 }
 0x204   :  { %v9789_v22 = vpop.f32.mrb[29].mxu1 }
 0x205   :  { %v11677_v24 = vadd.f32 %v9789_v22, %v9788_v21  ;;  %v9791_v25 = vpop.f32.mrb[30].mxu1 }
 0x206   :  { %v9792_v26 = vpop.f32.mrb[31].mxu1 }
 0x207   :  { %v11679_v27 = vadd.f32 %v9792_v26, %v9791_v25 }
 0x20b   :  { %v9794_v33 = vpop.f32.mrb[32].mxu1 }
 0x20c   :  { %v9795_v38 = vpop.f32.mrb[33].mxu1 }
 0x20d   :  { %v11699_v39 = vadd.f32 %v9795_v38, %v9794_v33  ;;  %v9797_v40 = vpop.f32.mrb[34].mxu1 }
 0x20e   :  { %v9798_v29 = vpop.f32.mrb[35].mxu1 }
 0x20f   :  { %v11701_v41 = vadd.f32 %v9798_v29, %v9797_v40 }
 0x213   :  { %v9800_v42 = vpop.f32.mrb[36].mxu1 }
 0x214   :  { %v9801_v45 = vpop.f32.mrb[37].mxu1 }
 0x215   :  { %v11709_v48 = vadd.f32 %v9801_v45, %v9800_v42  ;;  %v9803_v49 = vpop.f32.mrb[38].mxu1 }
 0x216   :  { %v9804_v50 = vpop.f32.mrb[39].mxu1 }
 0x217   :  { %v11711_v51 = vadd.f32 %v9804_v50, %v9803_v49 }
 0x21b   :  { %v9806_v56 = vpop.f32.mrb[40].mxu1 }
 0x21c   :  { %v9807_v37 = vpop.f32.mrb[41].mxu1 }
 0x21d   :  { %v11725_v43 = vadd.f32 %v9807_v37, %v9806_v56  ;;  %v9809_v57 = vpop.f32.mrb[42].mxu1 }
 0x21e   :  { %v9810_v58 = vpop.f32.mrb[43].mxu1 }
 0x21f   :  { %v11727_v44 = vadd.f32 %v9810_v58, %v9809_v57 }
 0x223   :  { %v9812_v59 = vpop.f32.mrb[44].mxu1 }
 0x224   :  { %v9813_v60 = vpop.f32.mrb[45].mxu1 }
 0x225   :  { %v11729_v61 = vadd.f32 %v9813_v60, %v9812_v59  ;;  %v9815_v62 = vpop.f32.mrb[46].mxu1 }
 0x226   :  { %v9816_v63 = vpop.f32.mrb[47].mxu1 }
 0x227   :  { %v11731_v0 = vadd.f32 %v9816_v63, %v9815_v62 }
 0x22b   :  { %v9818_v3 = vpop.f32.mrb[48].mxu1 }
 0x22c   :  { %v9819_v4 = vpop.f32.mrb[49].mxu1 }
 0x22d   :  { %v11739_v5 = vadd.f32 %v9819_v4, %v9818_v3  ;;  %v9821_v6 = vpop.f32.mrb[50].mxu1 }
 0x22e   :  { %v9822_v7 = vpop.f32.mrb[51].mxu1 }
 0x22f   :  { %v11741_v8 = vadd.f32 %v9822_v7, %v9821_v6 }
 0x233   :  { %v9824_v9 = vpop.f32.mrb[52].mxu1 }
 0x234   :  { %v9825_v10 = vpop.f32.mrb[53].mxu1 }
 0x235   :  { %v11743_v11 = vadd.f32 %v9825_v10, %v9824_v9  ;;  %v9827_v12 = vpop.f32.mrb[54].mxu1 }
 0x236   :  { %v9828_v13 = vpop.f32.mrb[55].mxu1 }
 0x237   :  { %v11745_v14 = vadd.f32 %v9828_v13, %v9827_v12 }
 0x23b   :  { %v9830_v17 = vpop.f32.mrb[56].mxu1 }
 0x23c   :  { %v9831_v18 = vpop.f32.mrb[57].mxu1 }
 0x23d   :  { %v11747_v19 = vadd.f32 %v9831_v18, %v9830_v17  ;;  %v9833_v15 = vpop.f32.mrb[58].mxu1  ;;  %v10719_v18 = vld [vmem:[%s14913_s4 + $0x140] sm:$0xff]  }
 0x23e   :  { %v9834_v20 = vpop.f32.mrb[59].mxu1  ;;  %10016 = vmatprep.subr.bf16.mxu0 %v10719_v18 }
 0x23f   :  { %15016 = vst [vmem:[#allocation12_spill] sm:$0xff] %v11747_v19  ;;  %v11749_v36 = vadd.f32 %v9834_v20, %v9833_v15 }
 0x241   :  { %15017 = vst [vmem:[#allocation13_spill] sm:$0xff] %v11749_v36 }
 0x243   :  { %v9852_v21 = vpop.f32.mrb[60].mxu1 }
 0x244   :  { %v9853_v22 = vpop.f32.mrb[61].mxu1 }
 0x245   :  { %v9854_v16 = vadd.f32 %v9853_v22, %v9852_v21  ;;  %v9855_v23 = vpop.f32.mrb[62].mxu1 }
 0x246   :  { %v9856_v25 = vpop.f32.mrb[63].mxu1 }
 0x247   :  { %v1770_v26 = vadd.f32 %v9854_v16, %v11677_v24  ;;  %v9857_v28 = vadd.f32 %v9856_v25, %v9855_v23  ;;  %v10899_v16 = vld [vmem:[%s14915_s6 + $0x198] sm:$0xff]  }
 0x249   :  { %v1773_v30 = vadd.f32 %v9857_v28, %v11679_v27 }
 0x24b   :  { %v9635_v31 = vpack.c.bf16 %v1773_v30, %v1770_v26  ;;  %v9858_v32 = vpop.f32.mrb[64].mxu1 }
 0x24c   :  { %v9859_v33 = vpop.f32.mrb[65].mxu1 }
 0x24d   :  { %9636 = vst [vmem:[#allocation3] sm:$0xff] %v9635_v31   ;;  %v9860_v34 = vadd.f32 %v9859_v33, %v9858_v32  ;;  %v9861_v35 = vpop.f32.mrb[66].mxu1 }
 0x24e   :  { %v9862_v38 = vpop.f32.mrb[67].mxu1 }
 0x24f   :  { %v1778_v40 = vadd.f32 %v9860_v34, %v11699_v39  ;;  %v9863_v29 = vadd.f32 %v9862_v38, %v9861_v35 }
 0x251   :  { %v1781_v42 = vadd.f32 %v9863_v29, %v11701_v41 }
 0x253   :  { %v9640_v45 = vpack.c.bf16 %v1781_v42, %v1778_v40  ;;  %v9864_v46 = vpop.f32.mrb[68].mxu1 }
 0x254   :  { %v1912_v24 = vld [vmem:[#allocation3] sm:$0xf]  ;;  %v1913_v27 = vld [vmem:[#allocation3 + $0x4] sm:$0xf]  ;;  %v9865_v56 = vpop.f32.mrb[69].mxu1 }
 0x255   :  { %v1940_v47 = vld [vmem:[#allocation3] sm:$0xf]  ;;  %v1941_v49 = vld [vmem:[#allocation3 + $0x4] sm:$0xf]  ;;  %1926 = vst [vmem:[#allocation4] sm:$0xf] %v1912_v24  ;;  %v9866_v60 = vadd.f32 %v9865_v56, %v9864_v46 }
 0x256   :  { %v1958_v50 = vshrl.u32 %v1940_v47, 16  ;;  %v1961_v52 = vshll.u32 %v1940_v47, 16  ;;  %v2124_v53 = vld [vmem:[#allocation3] sm:$0xe]  ;;  %1927 = vst [vmem:[#allocation4 + $0x24] sm:$0xf] %v1913_v27 }
 0x257   :  { %9727 = vst [vmem:[#allocation3 + $0x8] sm:$0xff] %v9640_v45   ;;  %v1967_v39 = vshll.u32 %v1941_v49, 16  ;;  %v1971_v54 = vshrl.u32 %v1941_v49, 16  ;;  %v2125_v55 = vld [vmem:[#allocation3 + $0x4] sm:$0xf]  ;;  %v8921_v41 = vrot.slane %v2124_v53, 9  ;;  %v1786_v13 = vadd.f32 %v9866_v60, %v11709_v48 }
 0x258   :  { %v1960_v37 = vrot.slane %v1958_v50, 4  ;;  %v1963_v57 = vrot.slane %v1961_v52, 5  ;;  %v2157_v58 = vrot.slane %v2125_v55, 5  ;;  %v2224_v59 = vld [vmem:[#allocation3 + $0x4] sm:$0xf]  ;;  %v9867_v62 = vpop.f32.mrb[70].mxu1 }
 0x259   :  { %v1969_v63 = vrot.slane %v1967_v39, 5  ;;  %v1973_v1 = vrot.slane %v1971_v54, 4  ;;  %v2239_v2 = vshrl.u32 %v2224_v59, 16  ;;  %v2242_v3 = vshll.u32 %v2224_v59, 16  ;;  %v11755_v4 = vld [vmem:[#allocation3 + $0x4] sm:$0xe] }
 0x25a   :  { %15018 = vst [vmem:[#allocation14_spill] sm:$0xff] %v11755_v4  ;;  %v1964_v7 = vor.u32 %v1963_v57, %v1960_v37  ;;  %v11763_v9 = vrot.slane %v2157_v58, 4  ;;  %v2502_v12 = vld [vmem:[#allocation3 + $0x4] sm:$0xe]  ;;  %v9868_v17 = vpop.f32.mrb[71].mxu1  ;;  %v2158_v48 = vsel %vm11759_vm9, %v8921_v41, %v2157_v58 }
 0x25b   :  { %v1974_v15 = vor.u32 %v1973_v1, %v1969_v63  ;;  %v2241_v20 = vrot.slane %v2239_v2, 4  ;;  %v2244_v21 = vrot.slane %v2242_v3, 5  ;;  %v2520_v22 = vshrl.u32 %v2502_v12, 16  ;;  %v11776_v28 = vpop.f32.mrb[72].mxu1  ;;  %2210 = vst [vmem:[#allocation4 + $0x8] sm:$0xf] %v2158_v48 }
 0x25c   :  { %v1965_v23 = vrot.slane %v1964_v7, 4  ;;  %v2523_v25 = vshll.u32 %v2502_v12, 16  ;;  %v9869_v26 = vadd.f32 %v9868_v17, %v9867_v62  ;;  %v11783_v42 = vpop.f32.mrb[73].mxu1 }
 0x25d   :  { %v11780_v30 = vrot.slane %v1974_v15, 4  ;;  %v2245_v31 = vor.u32 %v2244_v21, %v2241_v20  ;;  %v2522_v32 = vrot.slane %v2520_v22, 5 }
 0x25e   :  { %v1914_v33 = vld [vmem:[#allocation3 + $0x8] sm:$0xf]  ;;  %v1915_v34 = vld [vmem:[#allocation3 + $0xc] sm:$0xf]  ;;  %v2525_v35 = vrot.slane %v2523_v25, 6  ;;  %v1789_v29 = vadd.f32 %v9869_v26, %v11711_v51  ;;  %v1970_v45 = vsel %vm11772_vm10, %v1965_v23, %v1969_v63 }
 0x25f   :  { %v1942_v38 = vld [vmem:[#allocation3 + $0x8] sm:$0xf]  ;;  %v1943_v40 = vld [vmem:[#allocation3 + $0xc] sm:$0xf]  ;;  %1928 = vst [vmem:[#allocation4 + $0x48] sm:$0xf] %v1914_v33 }
 0x260   :  { %1929 = vst [vmem:[#allocation4 + $0x6c] sm:$0xf] %v1915_v34  ;;  %v11787_v46 = vrot.slane %v2245_v31, 4  ;;  %v1977_v24 = vshll.u32 %v1942_v38, 16  ;;  %v1981_v27 = vshrl.u32 %v1942_v38, 16  ;;  %v1987_v47 = vshll.u32 %v1943_v40, 16 }
 0x261   :  { %v11789_v49 = vld [vmem:[#allocation3 + $0x8] sm:$0xf]  ;;  %2110 = vst [vmem:[#allocation4 + $0x4] sm:$0xf] %v1970_v45  ;;  %v2526_v50 = vor.u32 %v2525_v35, %v2522_v32  ;;  %v1991_v52 = vshrl.u32 %v1943_v40, 16  ;;  %v9645_v54 = vpack.c.bf16 %v1789_v29, %v1786_v13  ;;  %v9873_v13 = vpop.f32.mrb[74].mxu1 }
 0x262   :  { %v11791_v53 = vld [vmem:[#allocation3 + $0xc] sm:$0xf]  ;;  %v14925_v39 = vrot.slane %v11789_v49, 5  ;;  %v2225_v51 = vld [vmem:[#allocation3 + $0x8] sm:$0xf]  ;;  %v11794_v55 = vrot.slane %v1977_v24, 5 }
 0x263   :  { %v1983_v41 = vrot.slane %v1981_v27, 4  ;;  %v11796_v56 = vrot.slane %v1987_v47, 5  ;;  %v14923_v37 = vrot.slane %v11791_v53, 5  ;;  %v2226_v57 = vld [vmem:[#allocation3 + $0xc] sm:$0xf]  ;;  %v11799_v58 = vrot.slane %v2526_v50, 4 }
 0x264   :  { %v1993_v59 = vrot.slane %v1991_v52, 4  ;;  %v11803_v60 = vrot.slane %v14925_v39, 4  ;;  %v2248_v62 = vshll.u32 %v2225_v51, 16  ;;  %v11805_v63 = vld [vmem:[#allocation3 + $0x8] sm:$0xf]  ;;  %9728 = vst [vmem:[#allocation3 + $0x10] sm:$0xff] %v9645_v54  }
 0x265   :  { %15023 = vst [vmem:[#allocation15_spill] sm:$0xff] %v11799_v58  ;;  %15024 = vst [vmem:[#allocation16_spill] sm:$0xff] %v11805_v63  ;;  %v1984_v1 = vor.u32 %v1983_v41, %v11794_v55  ;;  %v11810_v2 = vrot.slane %v14923_v37, 4  ;;  %v2252_v3 = vshrl.u32 %v2225_v51, 16  ;;  %v2258_v7 = vshll.u32 %v2226_v57, 16  ;;  %v9874_v22 = vpop.f32.mrb[75].mxu1 }
 0x266   :  { %v11812_v12 = vld [vmem:[#allocation3 + $0xc] sm:$0xf]  ;;  %v1994_v17 = vor.u32 %v1993_v59, %v11796_v56  ;;  %v11815_v18 = vrot.slane %v2248_v62, 5  ;;  %v2262_v15 = vshrl.u32 %v2226_v57, 16  ;;  %v14922_v20 = vrot.slane %v11805_v63, 5  ;;  %v9876_v47 = vpop.f32.mrb[76].mxu1 }
 0x267   :  { %15025 = vst [vmem:[#allocation17_spill] sm:$0xff] %v11812_v12  ;;  %v2503_v21 = vld [vmem:[#allocation3 + $0x8] sm:$0xf]  ;;  %v11818_v23 = vrot.slane %v1984_v1, 4  ;;  %v2254_v25 = vrot.slane %v2252_v3, 4  ;;  %v11820_v26 = vrot.slane %v2258_v7, 5 }
 0x268   :  { %v14921_v48 = vrot.slane %v11812_v12, 5  ;;  %v2504_v31 = vld [vmem:[#allocation3 + $0xc] sm:$0xf]  ;;  %v11823_v32 = vrot.slane %v1994_v17, 4  ;;  %v2264_v33 = vrot.slane %v2262_v15, 4  ;;  %v11827_v34 = vrot.slane %v14922_v20, 4 }
 0x269   :  { %v2529_v35 = vshrl.u32 %v2503_v21, 16  ;;  %v11829_v38 = vld [vmem:[#allocation3 + $0x8] sm:$0xe]  ;;  %v2255_v40 = vor.u32 %v2254_v25, %v11815_v18  ;;  %v2532_v45 = vshll.u32 %v2503_v21, 16  ;;  %v2539_v24 = vshrl.u32 %v2504_v31, 16  ;;  %v9877_v57 = vpop.f32.mrb[77].mxu1 }
 0x26a   :  { %15026 = vst [vmem:[#allocation18_spill] sm:$0xff] %v11827_v34  ;;  %15027 = vst [vmem:[#allocation19_spill] sm:$0xff] %v11829_v38  ;;  %v11834_v29 = vrot.slane %v14921_v48, 4  ;;  %v11836_v27 = vld [vmem:[#allocation3 + $0xc] sm:$0xf]  ;;  %v2265_v50 = vor.u32 %v2264_v33, %v11820_v26  ;;  %v2542_v51 = vshll.u32 %v2504_v31, 16 }
 0x26b   :  { %15029 = vst [vmem:[#allocation21_spill] sm:$0xff] %v11836_v27  ;;  %v2531_v52 = vrot.slane %v2529_v35, 5  ;;  %v2783_v41 = vld [vmem:[#allocation3 + $0x8] sm:$0xe]  ;;  %v11840_v59 = vrot.slane %v2255_v40, 4  ;;  %v2534_v62 = vrot.slane %v2532_v45, 6 }
 0x26c   :  { %15028 = vst [vmem:[#allocation20_spill] sm:$0xff] %v11834_v29  ;;  %v11842_v1 = vrot.slane %v2539_v24, 5  ;;  %v14924_v3 = vrot.slane %v11836_v27, 5  ;;  %v2784_v7 = vld [vmem:[#allocation3 + $0xc] sm:$0xf]  ;;  %v11845_v17 = vrot.slane %v2265_v50, 4 }
 0x26d   :  { %v11847_v15 = vrot.slane %v2542_v51, 6  ;;  %v2798_v21 = vshrl.u32 %v2783_v41, 16  ;;  %v2801_v25 = vshll.u32 %v2783_v41, 16  ;;  %v2964_v33 = vld [vmem:[#allocation3 + $0x8] sm:$0xc]  ;;  %v2807_v35 = vshrl.u32 %v2784_v7, 16 }
 0x26e   :  { %v11851_v31 = vrot.slane %v14924_v3, 4  ;;  %v2810_v40 = vshll.u32 %v2784_v7, 16  ;;  %v2965_v54 = vld [vmem:[#allocation3 + $0xc] sm:$0xf]  ;;  %v9879_v45 = vpop.f32.mrb[78].mxu1  ;;  %v15031_v50 = vmov 0  ;;  %v11865_v7 = vadd.f32 %v11783_v42, %v11776_v28 }
 0x26f   :  { %v2800_v24 = vrot.slane %v2798_v21, 5  ;;  %v2803_v48 = vrot.slane %v2801_v25, 6  ;;  %v15032_v50 = vsel %vm11855_vm13, 4294967295, %v15031_v50  ;;  %v8924_v51 = vrot.slane %v2964_v33, 10  ;;  %v1916_v10 = vld [vmem:[#allocation3 + $0x10] sm:$0xf] }
 0x270   :  { %15030 = vst [vmem:[#allocation22_spill] sm:$0xff] %v11851_v31  ;;  %15033 = vst [vmem:[#allocation23_spill] sm:$0xff] %v15032_v50  ;;  %v9880_v41 = vpop.f32.mrb[79].mxu1  ;;  %v11859_v20 = vrot.slane %v2807_v35, 5  ;;  %v11861_v37 = vrot.slane %v2810_v40, 6  ;;  %v2997_v3 = vrot.slane %v2965_v54, 6  ;;  %v11871_v33 = vadd.f32 %v9874_v22, %v9873_v13 }
 0x271   :  { %v1917_v39 = vld [vmem:[#allocation3 + $0x14] sm:$0xf]  ;;  %1930 = vst [vmem:[#allocation4 + $0x90] sm:$0xf] %v1916_v10  ;;  %v11867_v21 = vpop.f32.mrb[80].mxu1  ;;  %v2804_v25 = vor.u32 %v2803_v48, %v2800_v24  ;;  %v11873_v35 = vadd.f32 %v9877_v57, %v9876_v47  ;;  %v11875_v40 = vadd.f32 %v9880_v41, %v9879_v45  ;;  %v11877_v54 = vor.u32 %v2534_v62, %v2531_v52 }
 0x272   :  { %v1944_v29 = vld [vmem:[#allocation3 + $0x10] sm:$0xf]  ;;  %v1945_v31 = vld [vmem:[#allocation3 + $0x14] sm:$0xf]  ;;  %1931 = vst [vmem:[#allocation4 + $0xb4] sm:$0xf] %v1917_v39  ;;  %v2998_v10 = vsel %vm11855_vm13, %v8924_v51, %v2997_v3 }
 0x273   :  { %v11869_v38 = vld [vmem:[#allocation3 + $0x10] sm:$0xf]  ;;  %15034 = vst [vmem:[#allocation24_spill] sm:$0xff] %v11877_v54  ;;  %v11881_v28 = vrot.slane %v2997_v3, 4  ;;  %v1997_v42 = vshll.u32 %v1944_v29, 16  ;;  %v11885_v27 = vrot.slane %v2804_v25, 4 }
 0x274   :  { %v11883_v48 = vld [vmem:[#allocation3 + $0x14] sm:$0xf]  ;;  %v2227_v24 = vld [vmem:[#allocation3 + $0x10] sm:$0xf]  ;;  %3050 = vst [vmem:[#allocation4 + $0x20] sm:$0xf] %v2998_v10 }
 0x275   :  { %15035 = vst [vmem:[#allocation25_spill] sm:$0xff] %v11883_v48  ;;  %15036 = vst [vmem:[#allocation26_spill] sm:$0xff] %v11885_v27  ;;  %v2001_v39 = vshrl.u32 %v1944_v29, 16  ;;  %v2007_v13 = vshll.u32 %v1945_v31, 16  ;;  %v2011_v22 = vshrl.u32 %v1945_v31, 16  ;;  %v11887_v57 = vrot.slane %v1997_v42, 5 }
 0x276   :  { %v2228_v47 = vld [vmem:[#allocation3 + $0x14] sm:$0xf]  ;;  %v14929_v52 = vrot.slane %v11869_v38, 5  ;;  %v14930_v62 = vrot.slane %v11883_v48, 5  ;;  %v2268_v45 = vshll.u32 %v2227_v24, 16  ;;  %v2272_v25 = vshrl.u32 %v2227_v24, 16 }
 0x277   :  { %v11891_v3 = vld [vmem:[#allocation3 + $0x10] sm:$0xf]  ;;  %v2003_v51 = vrot.slane %v2001_v39, 4  ;;  %v11893_v41 = vrot.slane %v2007_v13, 5  ;;  %v2013_v36 = vrot.slane %v2011_v22, 4  ;;  %v2278_v42 = vshll.u32 %v2228_v47, 16 }
 0x278   :  { %15037 = vst [vmem:[#allocation27_spill] sm:$0xff] %v11891_v3  ;;  %v11895_v27 = vld [vmem:[#allocation3 + $0x14] sm:$0xf]  ;;  %v11899_v29 = vrot.slane %v14929_v52, 4  ;;  %v11903_v31 = vrot.slane %v14930_v62, 4  ;;  %v11905_v10 = vrot.slane %v2268_v45, 5 }
 0x279   :  { %15038 = vst [vmem:[#allocation28_spill] sm:$0xff] %v11893_v41  ;;  %15039 = vst [vmem:[#allocation29_spill] sm:$0xff] %v11895_v27  ;;  %v2505_v58 = vld [vmem:[#allocation3 + $0x10] sm:$0xf]  ;;  %v2004_v39 = vor.u32 %v2003_v51, %v11887_v57  ;;  %v2014_v13 = vor.u32 %v2013_v36, %v11893_v41  ;;  %v2274_v22 = vrot.slane %v2272_v25, 4  ;;  %v2282_v24 = vshrl.u32 %v2228_v47, 16 }
 0x27a   :  { %15040 = vst [vmem:[#allocation30_spill] sm:$0xff] %v11899_v29  ;;  %15041 = vst [vmem:[#allocation31_spill] sm:$0xff] %v11903_v31  ;;  %v2506_v54 = vld [vmem:[#allocation3 + $0x14] sm:$0xf]  ;;  %v11909_v19 = vld [vmem:[#allocation3 + $0x10] sm:$0xf] }
 0x27b   :  { %v11911_v34 = vrot.slane %v2278_v42, 5  ;;  %v14937_v52 = vrot.slane %v11891_v3, 5  ;;  %v14938_v62 = vrot.slane %v11895_v27, 5  ;;  %v2549_v31 = vshrl.u32 %v2505_v58, 16  ;;  %v11915_v45 = vld [vmem:[#allocation3 + $0x14] sm:$0xf] }
 0x27c   :  { %v11917_v12 = vrot.slane %v2004_v39, 4  ;;  %v11919_v4 = vrot.slane %v2014_v13, 4  ;;  %v2275_v36 = vor.u32 %v2274_v22, %v11905_v10  ;;  %v2284_v51 = vrot.slane %v2282_v24, 4  ;;  %v2785_v47 = vld [vmem:[#allocation3 + $0x10] sm:$0xf]  ;;  %v9883_v25 = vpop.f32.mrb[81].mxu1 }
 0x27d   :  { %v11924_v42 = vrot.slane %v14937_v52, 4  ;;  %v11928_v63 = vrot.slane %v14938_v62, 4  ;;  %v2551_v29 = vrot.slane %v2549_v31, 5  ;;  %v2552_v48 = vshll.u32 %v2505_v58, 16  ;;  %v2786_v3 = vld [vmem:[#allocation3 + $0x14] sm:$0xf] }
 0x27e   :  { %15042 = vst [vmem:[#allocation32_spill] sm:$0xff] %v11917_v12  ;;  %15043 = vst [vmem:[#allocation33_spill] sm:$0xff] %v11919_v4  ;;  %v11930_v41 = vrot.slane %v2275_v36, 4  ;;  %v2285_v39 = vor.u32 %v2284_v51, %v11911_v34  ;;  %v2559_v13 = vshrl.u32 %v2506_v54, 16  ;;  %v2562_v4 = vshll.u32 %v2506_v54, 16  ;;  %v9885_v51 = vpop.f32.mrb[82].mxu1 }
 0x27f   :  { %15044 = vst [vmem:[#allocation34_spill] sm:$0xff] %v11924_v42  ;;  %15045 = vst [vmem:[#allocation35_spill] sm:$0xff] %v11928_v63  ;;  %v2554_v22 = vrot.slane %v2552_v48, 6  ;;  %v2817_v52 = vshrl.u32 %v2785_v47, 16  ;;  %v11937_v62 = vor.u32 %v11847_v15, %v11842_v1  ;;  %v2820_v36 = vshll.u32 %v2785_v47, 16  ;;  %v9886_v27 = vpop.f32.mrb[83].mxu1 }
 0x280   :  { %v2561_v58 = vrot.slane %v2559_v13, 5  ;;  %v2564_v31 = vrot.slane %v2562_v4, 6  ;;  %v2966_v63 = vld [vmem:[#allocation3 + $0x10] sm:$0xf]  ;;  %v11941_v54 = vor.u32 %v11861_v37, %v11859_v20  ;;  %v11943_v48 = vrot.slane %v2285_v39, 4  ;;  %v10725_v1 = vld [vmem:[%s14913_s4 + $0x1c0] sm:$0xff]  }
 0x281   :  { %15046 = vst [vmem:[#allocation36_spill] sm:$0xff] %v11937_v62  ;;  %v11945_v12 = vor.u32 %v2554_v22, %v2551_v29  ;;  %v2819_v24 = vrot.slane %v2817_v52, 5  ;;  %v11947_v42 = vld [vmem:[#allocation3 + $0x14] sm:$0xf]  ;;  %v15050_v4 = vrot.slane %v11909_v19, 5  ;;  %v2822_v47 = vrot.slane %v2820_v36, 6  ;;  %10074 = vmatprep.subr.bf16.mxu1 %v10725_v1 }
 0x282   :  { %15047 = vst [vmem:[#allocation37_spill] sm:$0xff] %v11943_v48  ;;  %15049 = vst [vmem:[#allocation39_spill] sm:$0xff] %v11947_v42  ;;  %v2827_v13 = vshrl.u32 %v2786_v3, 16  ;;  %v2830_v37 = vshll.u32 %v2786_v3, 16  ;;  %v9888_v20 = vpop.f32.mrb[84].mxu1  ;;  %v15051_v39 = vrot.slane %v11915_v45, 5  ;;  %v1794_v22 = vadd.f32 %v11865_v7, %v11725_v43 }
 0x283   :  { %15048 = vst [vmem:[#allocation38_spill] sm:$0xff] %v11945_v12  ;;  %v11954_v15 = vrot.slane %v15050_v4, 4  ;;  %v3000_v52 = vrot.slane %v2966_v63, 6  ;;  %v1797_v12 = vadd.f32 %v11871_v33, %v11727_v44  ;;  %v9889_v48 = vpop.f32.mrb[85].mxu1  ;;  %v11964_v62 = vor.u32 %v2564_v31, %v2561_v58 }
 0x284   :  { %v11958_v29 = vrot.slane %v15051_v39, 4  ;;  %v11966_v4 = vor.u32 %v2822_v47, %v2819_v24  ;;  %v14943_v3 = vrot.slane %v11947_v42, 6  ;;  %v1802_v36 = vadd.f32 %v11873_v35, %v11729_v61  ;;  %v9891_v39 = vpop.f32.mrb[86].mxu1  ;;  %v15066_v47 = vld [vmem:[#allocation16_spill] sm:$0xff] }
 0x285   :  { %15053 = vst [vmem:[#allocation41_spill] sm:$0xff] %v11964_v62  ;;  %v11973_v63 = vrot.slane %v2830_v37, 6  ;;  %v3001_v43 = vsel %vm11855_vm13, %v11881_v28, %v3000_v52  ;;  %v9650_v44 = vpack.c.bf16 %v1797_v12, %v1794_v22  ;;  %v9892_v7 = vpop.f32.mrb[87].mxu1  ;;  %v11978_v33 = vrot.slane %v3000_v52, 4  ;;  %v15070_v52 = vld [vmem:[#allocation17_spill] sm:$0xff] }
 0x286   :  { %15052 = vst [vmem:[#allocation40_spill] sm:$0xff] %v11958_v29  ;;  %v11971_v29 = vrot.slane %v2827_v13, 5  ;;  %3051 = vst [vmem:[#allocation4 + $0x44] sm:$0xf] %v3001_v43  ;;  %v1805_v24 = vadd.f32 %v11875_v40, %v11731_v0  ;;  %v9884_v58 = vadd.f32 %v9883_v25, %v11867_v21  ;;  %v1980_v61 = vsel %vm11772_vm10, %v11780_v30, %v11794_v55  ;;  %v9894_v35 = vpop.f32.mrb[88].mxu1 }
 0x287   :  { %15054 = vst [vmem:[#allocation42_spill] sm:$0xff] %v11978_v33  ;;  %9729 = vst [vmem:[#allocation3 + $0x18] sm:$0xff] %v9650_v44   ;;  %v9887_v31 = vadd.f32 %v9886_v27, %v9885_v51  ;;  %v15055_v12 = vrot.slane %v11789_v49, 5  ;;  %v2251_v0 = vsel %vm11772_vm10, %v11787_v46, %v11815_v18  ;;  %v2261_v30 = vsel %vm11772_vm10, %v11840_v59, %v11820_v26  ;;  %v9895_v55 = vpop.f32.mrb[89].mxu1  ;;  %v15073_v44 = vld [vmem:[#allocation12_spill] sm:$0xff] }
 0x288   :  { %2111 = vst [vmem:[#allocation4 + $0x28] sm:$0xf] %v1980_v61  ;;  %v9655_v21 = vpack.c.bf16 %v1805_v24, %v1802_v36  ;;  %v1810_v27 = vadd.f32 %v9884_v58, %v11739_v5  ;;  %2391 = vst [vmem:[#allocation4 + $0xc] sm:$0xf] %v2251_v0  ;;  %v9890_v49 = vadd.f32 %v9889_v48, %v9888_v20  ;;  %v9897_v40 = vpop.f32.mrb[90].mxu1  ;;  %v15056_v5 = vrot.slane %v11791_v53, 5 }
 0x289   :  { %v2161_v28 = vsel %vm11759_vm9, %v11763_v9, %v15055_v12  ;;  %2392 = vst [vmem:[#allocation4 + $0x30] sm:$0xf] %v2261_v30  ;;  %v1990_v9 = vsel %vm11772_vm10, %v11818_v23, %v11796_v56  ;;  %v1813_v46 = vadd.f32 %v9887_v31, %v11741_v8  ;;  %v2000_v18 = vsel %vm11772_vm10, %v11823_v32, %v11887_v57  ;;  %v9898_v25 = vpop.f32.mrb[91].mxu1  ;;  %v15061_v57 = vld [vmem:[#allocation28_spill] sm:$0xff]  ;;  %v15065_v48 = vld [vmem:[#allocation30_spill] sm:$0xff]  ;;  %v15075_v58 = vld [vmem:[#allocation15_spill] sm:$0xff] }
 0x28a   :  { %2211 = vst [vmem:[#allocation4 + $0x2c] sm:$0xf] %v2161_v28  ;;  %2112 = vst [vmem:[#allocation4 + $0x4c] sm:$0xf] %v1990_v9  ;;  %v9893_v26 = vadd.f32 %v9892_v7, %v9891_v39  ;;  %v2164_v59 = vsel %vm11759_vm9, %v11803_v60, %v15056_v5  ;;  %v1818_v56 = vadd.f32 %v9890_v49, %v11743_v11  ;;  %v15057_v8 = vrot.slane %v11869_v38, 5  ;;  %v15072_v36 = vld [vmem:[#allocation18_spill] sm:$0xff] }
 0x28b   :  { %9730 = vst [vmem:[#allocation3 + $0x20] sm:$0xff] %v9655_v21   ;;  %2113 = vst [vmem:[#allocation4 + $0x70] sm:$0xf] %v2000_v18  ;;  %v2271_v53 = vsel %vm11772_vm10, %v11845_v17, %v11905_v10  ;;  %v2281_v60 = vsel %vm11772_vm10, %v11930_v41, %v11911_v34  ;;  %v15058_v11 = vmov 0  ;;  %v9660_v32 = vpack.c.bf16 %v1813_v46, %v1810_v27  ;;  %v15062_v17 = vld [vmem:[#allocation32_spill] sm:$0xff]  ;;  %v15063_v41 = vld [vmem:[#allocation25_spill] sm:$0xff] }
 0x28c   :  { %v2167_v23 = vsel %vm11759_vm9, %v11810_v2, %v15057_v8  ;;  %2212 = vst [vmem:[#allocation4 + $0x50] sm:$0xf] %v2164_v59  ;;  %v15059_v11 = vsel %vm12031_vm1, 4294967295, %v15058_v11  ;;  %v1821_v2 = vadd.f32 %v9893_v26, %v11745_v14  ;;  %2393 = vst [vmem:[#allocation4 + $0x54] sm:$0xf] %v2271_v53  ;;  %v9896_v38 = vadd.f32 %v9895_v55, %v9894_v35  ;;  %v15068_v14 = vld [vmem:[#allocation14_spill] sm:$0xff] }
 0x28d   :  { %15060 = vst [vmem:[#allocation43_spill] sm:$0xff] %v15059_v11  ;;  %2213 = vst [vmem:[#allocation4 + $0x74] sm:$0xf] %v2167_v23  ;;  %v2010_v10 = vsel %vm11772_vm10, %v15062_v17, %v15061_v57  ;;  %v9899_v34 = vadd.f32 %v9898_v25, %v9897_v40  ;;  %v15064_v51 = vrot.slane %v15063_v41, 5  ;;  %v15067_v13 = vrot.slane %v15066_v47, 5  ;;  %v15074_v24 = vld [vmem:[#allocation24_spill] sm:$0xff] }
 0x28e   :  { %2394 = vst [vmem:[#allocation4 + $0x78] sm:$0xf] %v2281_v60  ;;  %2114 = vst [vmem:[#allocation4 + $0x94] sm:$0xf] %v2010_v10  ;;  %v15069_v37 = vrot.slane %v15068_v14, 9  ;;  %v15071_v22 = vrot.slane %v15070_v52, 5  ;;  %v9665_v43 = vpack.c.bf16 %v1821_v2, %v1818_v56  ;;  %v1826_v7 = vadd.f32 %v9896_v38, %v15073_v44 }
 0x28f   :  { %v2170_v1 = vsel %vm11759_vm9, %v15065_v48, %v15064_v51  ;;  %9731 = vst [vmem:[#allocation3 + $0x28] sm:$0xff] %v9660_v32   ;;  %v2536_v61 = vsel %vm12031_vm1, %v15075_v58, %v15074_v24  ;;  %v2537_v35 = vrot.slane %v15074_v24, 4  ;;  %v1918_v31 = vld [vmem:[#allocation3 + $0x18] sm:$0xf]  ;;  %v1919_v12 = vld [vmem:[#allocation3 + $0x1c] sm:$0xf] }
 0x290   :  { %v2436_v20 = vsel %vm11759_vm9, %v15069_v37, %v15067_v13  ;;  %v2439_v39 = vsel %vm11759_vm9, %v15072_v36, %v15071_v22  ;;  %2214 = vst [vmem:[#allocation4 + $0x98] sm:$0xf] %v2170_v1  ;;  %v1946_v28 = vld [vmem:[#allocation3 + $0x18] sm:$0xf]  ;;  %2672 = vst [vmem:[#allocation4 + $0x14] sm:$0xf] %v2536_v61  ;;  %v9450_v23 = vpack.c.bf16 %v1826_v7, %v1826_v7 }
 0x291   :  { %2488 = vst [vmem:[#allocation4 + $0x10] sm:$0xf] %v2436_v20  ;;  %2489 = vst [vmem:[#allocation4 + $0x34] sm:$0xf] %v2439_v39  ;;  %v15076_v0 = vld [vmem:[#allocation13_spill] sm:$0xff]  ;;  %v15079_v27 = vld [vmem:[#allocation19_spill] sm:$0xff] }
 0x292   :  { %v1829_v30 = vadd.f32 %v9899_v34, %v15076_v0  ;;  %v15077_v55 = vld [vmem:[#allocation21_spill] sm:$0xff]  ;;  %v15080_v49 = vrot.slane %v15079_v27, 9  ;;  %v15081_v40 = vrot.slane %v11909_v19, 5  ;;  %v15082_v46 = vld [vmem:[#allocation22_spill] sm:$0xff]  ;;  %v2017_v25 = vshll.u32 %v1946_v28, 16  ;;  %9732 = vst [vmem:[#allocation3 + $0x30] sm:$0xff] %v9665_v43  }
 0x293   :  { %v15078_v21 = vrot.slane %v15077_v55, 5  ;;  %v15083_v26 = vld [vmem:[#allocation26_spill] sm:$0xff]  ;;  %v2021_v56 = vshrl.u32 %v1946_v28, 16  ;;  %1932 = vst [vmem:[#allocation4 + $0xd8] sm:$0xf] %v1918_v31  ;;  %v15084_v53 = vld [vmem:[#allocation36_spill] sm:$0xff] }
 0x294   :  { %v2720_v18 = vsel %vm11759_vm9, %v15082_v46, %v15081_v40  ;;  %v2814_v5 = vsel %vm12031_vm1, %v15083_v26, %v11941_v54  ;;  %v1947_v59 = vld [vmem:[#allocation3 + $0x1c] sm:$0xf]  ;;  %v12078_v8 = vld [vmem:[#allocation3 + $0x18] sm:$0xf]  ;;  %1933 = vst [vmem:[#allocation4 + $0xfc] sm:$0xf] %v1919_v12  ;;  %v2546_v19 = vsel %vm12031_vm1, %v2537_v35, %v15084_v53  ;;  %v9451_v57 = vpack.c.bf16 %v1829_v30, %v1829_v30 }
 0x295   :  { %v2717_v9 = vsel %vm11759_vm9, %v15080_v49, %v15078_v21  ;;  %2770 = vst [vmem:[#allocation4 + $0x3c] sm:$0xf] %v2720_v18  ;;  %2950 = vst [vmem:[#allocation4 + $0x1c] sm:$0xf] %v2814_v5  ;;  %v2027_v60 = vshll.u32 %v1947_v59, 16  ;;  %v2031_v32 = vshrl.u32 %v1947_v59, 16 }
 0x296   :  { %2769 = vst [vmem:[#allocation4 + $0x18] sm:$0xf] %v2717_v9  ;;  %v12083_v2 = vld [vmem:[#allocation3 + $0x1c] sm:$0xf]  ;;  %v2172_v38 = vrot.slane %v12078_v8, 5  ;;  %v12086_v17 = vrot.slane %v2017_v25, 5 }
 0x297   :  { %2673 = vst [vmem:[#allocation4 + $0x38] sm:$0xf] %v2546_v19  ;;  %v2023_v10 = vrot.slane %v2021_v56, 4  ;;  %v14950_v34 = vrot.slane %v12083_v2, 5  ;;  %v2229_v41 = vld [vmem:[#allocation3 + $0x18] sm:$0xf] }
 0x298   :  { %1910 = vst [vmem:[#allocation3 + $0x38] sm:$0xf] %v9450_v23  ;;  %v15085_v51 = vld [vmem:[#allocation27_spill] sm:$0xff]  ;;  %v15087_v1 = vld [vmem:[#allocation20_spill] sm:$0xff]  ;;  %v12096_v13 = vrot.slane %v14943_v3, 4  ;;  %v12098_v14 = vrot.slane %v2027_v60, 5 }
 0x299   :  { %v15086_v48 = vrot.slane %v15085_v51, 5  ;;  %v2033_v37 = vrot.slane %v2031_v32, 4  ;;  %v2230_v20 = vld [vmem:[#allocation3 + $0x1c] sm:$0xf]  ;;  %v2288_v52 = vshll.u32 %v2229_v41, 16  ;;  %v2024_v22 = vor.u32 %v2023_v10, %v12086_v17 }
 0x29a   :  { %15088 = vst [vmem:[#allocation28_spill] sm:$0xff] %v12096_v13  ;;  %1911 = vst [vmem:[#allocation3 + $0x3c] sm:$0x7] %v9451_v57  ;;  %v12103_v36 = vrot.slane %v2172_v38, 4  ;;  %v2292_v39 = vshrl.u32 %v2229_v41, 16  ;;  %v2298_v43 = vshll.u32 %v2230_v20, 16 }
 0x29b   :  { %v2442_v47 = vsel %vm11759_vm9, %v15087_v1, %v15086_v48  ;;  %v12105_v44 = vld [vmem:[#allocation3 + $0x18] sm:$0xf]  ;;  %v2034_v7 = vor.u32 %v2033_v37, %v12098_v14  ;;  %v12108_v24 = vrot.slane %v2288_v52, 5  ;;  %v2302_v58 = vshrl.u32 %v2230_v20, 16  ;;  %v12110_v61 = vld [vmem:[#allocation3 + $0x1c] sm:$0xf] }
 0x29c   :  { %2490 = vst [vmem:[#allocation4 + $0x58] sm:$0xf] %v2442_v47  ;;  %v14947_v35 = vrot.slane %v12105_v44, 5  ;;  %v12115_v31 = vrot.slane %v14950_v34, 4  ;;  %v2294_v12 = vrot.slane %v2292_v39, 4  ;;  %v12117_v28 = vrot.slane %v2298_v43, 5 }
 0x29d   :  { %v14946_v0 = vrot.slane %v12110_v61, 5  ;;  %v2507_v30 = vld [vmem:[#allocation3 + $0x18] sm:$0xf]  ;;  %v12120_v55 = vrot.slane %v2024_v22, 4  ;;  %v12122_v21 = vrot.slane %v2034_v7, 4  ;;  %v2304_v27 = vrot.slane %v2302_v58, 4 }
 0x29e   :  { %v2508_v49 = vld [vmem:[#allocation3 + $0x1c] sm:$0xf]  ;;  %v2569_v9 = vshrl.u32 %v2507_v30, 16  ;;  %v2295_v40 = vor.u32 %v2294_v12, %v12108_v24  ;;  %v12127_v46 = vrot.slane %v14947_v35, 4  ;;  %v2572_v18 = vshll.u32 %v2507_v30, 16 }
 0x29f   :  { %v2579_v26 = vshrl.u32 %v2508_v49, 16  ;;  %v12129_v5 = vld [vmem:[#allocation3 + $0x18] sm:$0xf]  ;;  %v2305_v59 = vor.u32 %v2304_v27, %v12117_v28  ;;  %v2582_v56 = vshll.u32 %v2508_v49, 16  ;;  %v12132_v23 = vld [vmem:[#allocation3 + $0x1c] sm:$0xf]  ;;  %v12144_v20 = vor.u32 %v11973_v63, %v11971_v29 }
 0x2a0   :  { %v2571_v25 = vrot.slane %v2569_v9, 5  ;;  %v14948_v19 = vrot.slane %v12129_v5, 5  ;;  %v2296_v60 = vrot.slane %v2295_v40, 4  ;;  %v12137_v32 = vrot.slane %v14946_v0, 4  ;;  %v2787_v41 = vld [vmem:[#allocation3 + $0x18] sm:$0xf] }
 0x2a1   :  { %v2574_v57 = vrot.slane %v2572_v18, 6  ;;  %v14944_v10 = vrot.slane %v12132_v23, 5  ;;  %v12140_v51 = vrot.slane %v2305_v59, 4  ;;  %v2581_v48 = vrot.slane %v2579_v26, 5  ;;  %v2788_v47 = vld [vmem:[#allocation3 + $0x1c] sm:$0xf] }
 0x2a2   :  { %v2584_v1 = vrot.slane %v2582_v56, 6  ;;  %v2837_v37 = vshrl.u32 %v2787_v41, 16  ;;  %15089 = vst [vmem:[#allocation32_spill] sm:$0xff] %v12144_v20  ;;  %v12148_v52 = vrot.slane %v14948_v19, 4  ;;  %v2840_v22 = vshll.u32 %v2787_v41, 16  ;;  %v15093_v40 = vld [vmem:[#allocation33_spill] sm:$0xff] }
 0x2a3   :  { %v2847_v39 = vshrl.u32 %v2788_v47, 16  ;;  %v12150_v43 = vld [vmem:[#allocation3 + $0x18] sm:$0xf]  ;;  %v12152_v7 = vor.u32 %v2574_v57, %v2571_v25  ;;  %v2850_v12 = vshll.u32 %v2788_v47, 16  ;;  %v12154_v30 = vld [vmem:[#allocation3 + $0x1c] sm:$0xf]  ;;  %v2020_v18 = vsel %vm11772_vm10, %v15093_v40, %v12086_v17 }
 0x2a4   :  { %15090 = vst [vmem:[#allocation25_spill] sm:$0xff] %v12150_v43  ;;  %v2839_v58 = vrot.slane %v2837_v37, 5  ;;  %15092 = vst [vmem:[#allocation16_spill] sm:$0xff] %v12154_v30  ;;  %v14942_v27 = vrot.slane %v12150_v43, 6  ;;  %v12159_v29 = vrot.slane %v14944_v10, 4  ;;  %v2842_v63 = vrot.slane %v2840_v22, 6 }
 0x2a5   :  { %15091 = vst [vmem:[#allocation30_spill] sm:$0xff] %v12152_v7  ;;  %v2849_v49 = vrot.slane %v2847_v39, 5  ;;  %v1920_v9 = vld [vmem:[#allocation3 + $0x20] sm:$0xf]  ;;  %v2852_v26 = vrot.slane %v2850_v12, 6  ;;  %v14945_v59 = vrot.slane %v12154_v30, 6  ;;  %v12175_v22 = vor.u32 %v2584_v1, %v2581_v48 }
 0x2a6   :  { %v1921_v25 = vld [vmem:[#allocation3 + $0x24] sm:$0xf]  ;;  %v1948_v56 = vld [vmem:[#allocation3 + $0x20] sm:$0xf]  ;;  %1934 = vst [vmem:[#allocation4 + $0x120] sm:$0xf] %v1920_v9  ;;  %v12181_v8 = vor.u32 %v2842_v63, %v2839_v58 }
 0x2a7   :  { %2115 = vst [vmem:[#allocation4 + $0xb8] sm:$0xf] %v2020_v18  ;;  %v15094_v57 = vld [vmem:[#allocation31_spill] sm:$0xff]  ;;  %v15095_v47 = vld [vmem:[#allocation37_spill] sm:$0xff]  ;;  %15096 = vst [vmem:[#allocation14_spill] sm:$0xff] %v12175_v22  ;;  %v12179_v17 = vrot.slane %v14942_v27, 4  ;;  %v12221_v19 = vor.u32 %v2852_v26, %v2849_v49 }
 0x2a8   :  { %v2173_v41 = vsel %vm11759_vm9, %v15094_v57, %v2172_v38  ;;  %v2291_v37 = vsel %vm11772_vm10, %v15095_v47, %v12108_v24  ;;  %v1949_v39 = vld [vmem:[#allocation3 + $0x24] sm:$0xf]  ;;  %v2037_v12 = vshll.u32 %v1948_v56, 16  ;;  %v2041_v9 = vshrl.u32 %v1948_v56, 16  ;;  %1935 = vst [vmem:[#allocation4 + $0x144] sm:$0xf] %v1921_v25 }
 0x2a9   :  { %15097 = vst [vmem:[#allocation17_spill] sm:$0xff] %v12179_v17  ;;  %2215 = vst [vmem:[#allocation4 + $0xbc] sm:$0xf] %v2173_v41  ;;  %v2047_v38 = vshll.u32 %v1949_v39, 16  ;;  %v2051_v40 = vshrl.u32 %v1949_v39, 16  ;;  %v2301_v24 = vsel %vm11772_vm10, %v2296_v60, %v12117_v28  ;;  %v12198_v27 = vrot.slane %v14945_v59, 4 }
 0x2aa   :  { %2395 = vst [vmem:[#allocation4 + $0x9c] sm:$0xf] %v2291_v37  ;;  %15098 = vst [vmem:[#allocation18_spill] sm:$0xff] %v12181_v8  ;;  %v12183_v18 = vld [vmem:[#allocation3 + $0x20] sm:$0xf]  ;;  %v12190_v48 = vrot.slane %v2037_v12, 5 }
 0x2ab   :  { %v12185_v57 = vld [vmem:[#allocation3 + $0x24] sm:$0xf]  ;;  %v2043_v1 = vrot.slane %v2041_v9, 4  ;;  %v14949_v56 = vrot.slane %v12183_v18, 5  ;;  %v2231_v41 = vld [vmem:[#allocation3 + $0x20] sm:$0xf] }
 0x2ac   :  { %v14951_v25 = vrot.slane %v12185_v57, 5  ;;  %2396 = vst [vmem:[#allocation4 + $0xc0] sm:$0xf] %v2301_v24  ;;  %v12194_v58 = vrot.slane %v2047_v38, 5  ;;  %v2053_v63 = vrot.slane %v2051_v40, 4  ;;  %v2308_v37 = vshll.u32 %v2231_v41, 16 }
 0x2ad   :  { %v2232_v47 = vld [vmem:[#allocation3 + $0x24] sm:$0xf]  ;;  %v2312_v39 = vshrl.u32 %v2231_v41, 16  ;;  %15099 = vst [vmem:[#allocation12_spill] sm:$0xff] %v12198_v27  ;;  %v2044_v28 = vor.u32 %v2043_v1, %v12190_v48  ;;  %v12203_v60 = vrot.slane %v14949_v56, 4  ;;  %15100 = vst [vmem:[#allocation24_spill] sm:$0xff] %v12221_v19 }
 0x2ae   :  { %v2318_v12 = vshll.u32 %v2232_v47, 16  ;;  %v12205_v9 = vld [vmem:[#allocation3 + $0x20] sm:$0xf]  ;;  %v2054_v38 = vor.u32 %v2053_v63, %v12194_v58  ;;  %v12208_v24 = vrot.slane %v2308_v37, 5  ;;  %v2322_v3 = vshrl.u32 %v2232_v47, 16 }
 0x2af   :  { %v2314_v40 = vrot.slane %v2312_v39, 4  ;;  %v12210_v41 = vld [vmem:[#allocation3 + $0x24] sm:$0xf]  ;;  %v12212_v10 = vrot.slane %v2044_v28, 4  ;;  %v12216_v1 = vrot.slane %v14951_v25, 4  ;;  %v14956_v0 = vrot.slane %v12205_v9, 5 }
 0x2b0   :  { %v12218_v59 = vrot.slane %v2318_v12, 5  ;;  %v2509_v35 = vld [vmem:[#allocation3 + $0x20] sm:$0xf]  ;;  %v2324_v63 = vrot.slane %v2322_v3, 4  ;;  %v2510_v39 = vld [vmem:[#allocation3 + $0x24] sm:$0xf] }
 0x2b1   :  { %v2589_v47 = vshrl.u32 %v2509_v35, 16  ;;  %v12224_v56 = vrot.slane %v2054_v38, 4  ;;  %v2315_v28 = vor.u32 %v2314_v40, %v12208_v24  ;;  %v2592_v34 = vshll.u32 %v2509_v35, 16  ;;  %v12227_v25 = vld [vmem:[#allocation3 + $0x20] sm:$0xf] }
 0x2b2   :  { %v2599_v27 = vshrl.u32 %v2510_v39, 16  ;;  %v2325_v12 = vor.u32 %v2324_v63, %v12218_v59  ;;  %v12232_v22 = vrot.slane %v14956_v0, 4  ;;  %v2602_v3 = vshll.u32 %v2510_v39, 16  ;;  %v12234_v26 = vld [vmem:[#allocation3 + $0x24] sm:$0xf] }
 0x2b3   :  { %v2591_v49 = vrot.slane %v2589_v47, 5  ;;  %v2594_v37 = vrot.slane %v2592_v34, 6  ;;  %v14961_v38 = vrot.slane %v12227_v25, 5  ;;  %v2789_v35 = vld [vmem:[#allocation3 + $0x20] sm:$0xf]  ;;  %v15101_v8 = vrot.slane %v12210_v41, 5 }
 0x2b4   :  { %v2601_v19 = vrot.slane %v2599_v27, 5  ;;  %v2604_v63 = vrot.slane %v2602_v3, 6  ;;  %v2790_v30 = vld [vmem:[#allocation3 + $0x24] sm:$0xf]  ;;  %v2857_v13 = vshrl.u32 %v2789_v35, 16  ;;  %v2860_v0 = vshll.u32 %v2789_v35, 16 }
 0x2b5   :  { %v12240_v17 = vrot.slane %v15101_v8, 4  ;;  %v2316_v43 = vrot.slane %v2315_v28, 4  ;;  %v12242_v47 = vrot.slane %v2325_v12, 4  ;;  %v12244_v39 = vor.u32 %v2594_v37, %v2591_v49  ;;  %v12246_v27 = vld [vmem:[#allocation3 + $0x20] sm:$0xf] }
 0x2b6   :  { %v2867_v34 = vshrl.u32 %v2790_v30, 16  ;;  %15103 = vst [vmem:[#allocation13_spill] sm:$0xff] %v12246_v27  ;;  %v12250_v40 = vrot.slane %v14961_v38, 4  ;;  %v2859_v7 = vrot.slane %v2857_v13, 5  ;;  %v2862_v20 = vrot.slane %v2860_v0, 6  ;;  %v10720_v13 = vld [vmem:[%s14913_s4 + $0x100] sm:$0xff]  }
 0x2b7   :  { %15102 = vst [vmem:[#allocation15_spill] sm:$0xff] %v12244_v39  ;;  %v2870_v8 = vshll.u32 %v2790_v30, 16  ;;  %v12252_v62 = vld [vmem:[#allocation3 + $0x24] sm:$0xf]  ;;  %v12254_v3 = vor.u32 %v2604_v63, %v2601_v19  ;;  %v15106_v28 = vrot.slane %v12234_v26, 5  ;;  %v2030_v35 = vsel %vm11772_vm10, %v12120_v55, %v12098_v14  ;;  %v10724_v0 = vld [vmem:[%s14913_s4 + $0x148] sm:$0xff]  }
 0x2b8   :  { %15104 = vst [vmem:[#allocation21_spill] sm:$0xff] %v12252_v62  ;;  %v10696_v49 = vld [vmem:[#allocation4] ss:$36 sps:$4 sm:$0xff]   ;;  %v12271_v19 = vrot.slane %v2867_v34, 5  ;;  %v2040_v38 = vsel %vm11772_vm10, %v12122_v21, %v12190_v48  ;;  %2116 = vst [vmem:[#allocation4 + $0xdc] sm:$0xf] %v2030_v35  ;;  %v12298_v21 = vor.u32 %v2862_v20, %v2859_v7  ;;  %v2050_v7 = vsel %vm11772_vm10, %v12212_v10, %v12194_v58 }
 0x2b9   :  { %15105 = vst [vmem:[#allocation19_spill] sm:$0xff] %v12254_v3  ;;  %v12258_v12 = vrot.slane %v15106_v28, 4  ;;  %v10698_v63 = vld [vmem:[#allocation4 + $0x4] ss:$36 sps:$4 sm:$0xff]   ;;  %v15107_v14 = vrot.slane %v12083_v2, 5  ;;  %v12283_v37 = vrot.slane %v2870_v8, 6 }
 0x2ba   :  { %v1922_v28 = vld [vmem:[#allocation3 + $0x28] sm:$0xf]  ;;  %v15108_v34 = vrot.slane %v12246_v27, 6  ;;  %v1923_v30 = vld [vmem:[#allocation3 + $0x2c] sm:$0xf]  ;;  %v15110_v50 = vrot.slane %v12183_v18, 5  ;;  %4071 = vmatprep.mubr.bf16.mxu0 %v10698_v63 }
 0x2bb   :  { %v2176_v55 = vsel %vm11759_vm9, %v12103_v36, %v15107_v14  ;;  %v1950_v39 = vld [vmem:[#allocation3 + $0x28] sm:$0xf]  ;;  %1936 = vst [vmem:[#allocation4 + $0x168] sm:$0xf] %v1922_v28  ;;  %2117 = vst [vmem:[#allocation4 + $0x100] sm:$0xf] %v2040_v38  ;;  %v2311_v36 = vsel %vm11772_vm10, %v12140_v51, %v12208_v24  ;;  %4072 = vmatmul.mubr.bf16.vlgmr.msra.gmra.mrb[36].mxu0 %v10696_v49 }
 0x2bc   :  { %v12287_v3 = vrot.slane %v15108_v34, 4  ;;  %v2179_v2 = vsel %vm11759_vm9, %v12115_v31, %v15110_v50  ;;  %2216 = vst [vmem:[#allocation4 + $0xe0] sm:$0xf] %v2176_v55  ;;  %15111 = vst [vmem:[#allocation26_spill] sm:$0xff] %v12298_v21  ;;  %v1951_v48 = vld [vmem:[#allocation3 + $0x2c] sm:$0xf]  ;;  %v2321_v50 = vsel %vm11772_vm10, %v2316_v43, %v12218_v59  ;;  %10017 = vmatpush3.bf16.msra.mxu0 %v10720_v13 }
 0x2bd   :  { %v2057_v8 = vshll.u32 %v1950_v39, 16  ;;  %v2061_v35 = vshrl.u32 %v1950_v39, 16  ;;  %v12300_v28 = vld [vmem:[#allocation3 + $0x28] sm:$0xf]  ;;  %1937 = vst [vmem:[#allocation4 + $0x18c] sm:$0xf] %v1923_v30  ;;  %10018 = vmatprep.subr.bf16.mxu0 %v10724_v0 }
 0x2be   :  { %15109 = vst [vmem:[#allocation22_spill] sm:$0xff] %v12287_v3  ;;  %2217 = vst [vmem:[#allocation4 + $0x104] sm:$0xf] %v2179_v2  ;;  %v2067_v31 = vshll.u32 %v1951_v48, 16  ;;  %v2071_v18 = vshrl.u32 %v1951_v48, 16  ;;  %v14966_v51 = vrot.slane %v12300_v28, 5 }
 0x2bf   :  { %2397 = vst [vmem:[#allocation4 + $0xe4] sm:$0xf] %v2311_v36  ;;  %v12305_v38 = vld [vmem:[#allocation3 + $0x2c] sm:$0xf]  ;;  %2398 = vst [vmem:[#allocation4 + $0x108] sm:$0xf] %v2321_v50 }
 0x2c0   :  { %v10726_v20 = vld [vmem:[%s14913_s4 + $0x108] sm:$0xff]   ;;  %v12315_v24 = vrot.slane %v2057_v8, 5  ;;  %v2063_v43 = vrot.slane %v2061_v35, 4  ;;  %v14967_v59 = vrot.slane %v12305_v38, 5  ;;  %v2233_v39 = vld [vmem:[#allocation3 + $0x28] sm:$0xf] }
 0x2c1   :  { %2118 = vst [vmem:[#allocation4 + $0x124] sm:$0xf] %v2050_v7  ;;  %v10731_v49 = vld [vmem:[%s14913_s4 + $0x150] sm:$0xff]   ;;  %v15112_v30 = vrot.slane %v12185_v57, 5  ;;  %v15113_v10 = vrot.slane %v12252_v62, 6  ;;  %v12330_v14 = vrot.slane %v2067_v31, 5  ;;  %10019 = vmatpush3.bf16.msra.mxu0 %v10726_v20 }
 0x2c2   :  { %v2073_v55 = vrot.slane %v2071_v18, 4  ;;  %v2234_v34 = vld [vmem:[#allocation3 + $0x2c] sm:$0xf]  ;;  %v2328_v13 = vshll.u32 %v2233_v39, 16  ;;  %v2064_v2 = vor.u32 %v2063_v43, %v12315_v24  ;;  %v12335_v57 = vrot.slane %v14966_v51, 4  ;;  %v10733_v8 = vld [vmem:[%s14913_s4 + $0x110] sm:$0xff]   ;;  %10020 = vmatprep.subr.bf16.mxu0 %v10731_v49 }
 0x2c3   :  { %v2182_v63 = vsel %vm11759_vm9, %v12203_v60, %v15112_v30  ;;  %v12328_v58 = vrot.slane %v15113_v10, 4  ;;  %v2332_v36 = vshrl.u32 %v2233_v39, 16  ;;  %v2338_v48 = vshll.u32 %v2234_v34, 16  ;;  %v12337_v60 = vld [vmem:[#allocation3 + $0x28] sm:$0xf]  ;;  %v10738_v7 = vld [vmem:[%s14913_s4 + $0x158] sm:$0xff]  }
 0x2c4   :  { %2218 = vst [vmem:[#allocation4 + $0x128] sm:$0xf] %v2182_v63  ;;  %v2074_v35 = vor.u32 %v2073_v55, %v12330_v14  ;;  %v12343_v50 = vrot.slane %v2328_v13, 5  ;;  %v2342_v0 = vshrl.u32 %v2234_v34, 16  ;;  %v12345_v31 = vld [vmem:[#allocation3 + $0x2c] sm:$0xf] }
 0x2c5   :  { %15114 = vst [vmem:[#allocation27_spill] sm:$0xff] %v12328_v58  ;;  %v12353_v43 = vrot.slane %v14967_v59, 4  ;;  %v2334_v39 = vrot.slane %v2332_v36, 4  ;;  %v12355_v30 = vrot.slane %v2338_v48, 5  ;;  %v2511_v10 = vld [vmem:[#allocation3 + $0x28] sm:$0xf]  ;;  %10021 = vmatpush3.bf16.msra.mxu0 %v10733_v8 }
 0x2c6   :  { %v12358_v55 = vrot.slane %v2064_v2, 4  ;;  %v12360_v34 = vrot.slane %v2074_v35, 4  ;;  %v2344_v13 = vrot.slane %v2342_v0, 4  ;;  %v2512_v51 = vld [vmem:[#allocation3 + $0x2c] sm:$0xf]  ;;  %v2609_v18 = vshrl.u32 %v2511_v10, 16  ;;  %10022 = vmatprep.subr.bf16.mxu0 %v10738_v7 }
 0x2c7   :  { %v2335_v58 = vor.u32 %v2334_v39, %v12343_v50  ;;  %v15115_v59 = vrot.slane %v12337_v60, 5  ;;  %v2612_v36 = vshll.u32 %v2511_v10, 16  ;;  %v2619_v48 = vshrl.u32 %v2512_v51, 16  ;;  %v12367_v62 = vld [vmem:[#allocation3 + $0x28] sm:$0xf]  ;;  %v10740_v20 = vld [vmem:[%s14913_s4 + $0x118] sm:$0xff]  }
 0x2c8   :  { %v2345_v2 = vor.u32 %v2344_v13, %v12355_v30  ;;  %v2611_v35 = vrot.slane %v2609_v18, 5  ;;  %v2622_v0 = vshll.u32 %v2512_v51, 16  ;;  %v12373_v63 = vld [vmem:[#allocation3 + $0x2c] sm:$0xf]  ;;  %v15117_v10 = vrot.slane %v12345_v31, 5 }
 0x2c9   :  { %v12365_v3 = vrot.slane %v15115_v59, 4  ;;  %v10745_v59 = vld [vmem:[%s14913_s4 + $0x160] sm:$0xff]   ;;  %v2336_v39 = vrot.slane %v2335_v58, 4  ;;  %v2614_v21 = vrot.slane %v2612_v36, 6  ;;  %v2621_v51 = vrot.slane %v2619_v48, 5  ;;  %10023 = vmatpush3.bf16.msra.mxu0 %v10740_v20 }
 0x2ca   :  { %v12381_v27 = vrot.slane %v15117_v10, 4  ;;  %v2791_v42 = vld [vmem:[#allocation3 + $0x28] sm:$0xf]  ;;  %v12384_v18 = vrot.slane %v2345_v2, 4  ;;  %v2624_v13 = vrot.slane %v2622_v0, 6  ;;  %v15120_v58 = vrot.slane %v12367_v62, 5  ;;  %10024 = vmatprep.subr.bf16.mxu0 %v10745_v59 }
 0x2cb   :  { %15116 = vst [vmem:[#allocation20_spill] sm:$0xff] %v12365_v3  ;;  %v2792_v53 = vld [vmem:[#allocation3 + $0x2c] sm:$0xf]  ;;  %v2877_v49 = vshrl.u32 %v2791_v42, 16  ;;  %v12388_v3 = vor.u32 %v12283_v37, %v12271_v19  ;;  %v2880_v36 = vshll.u32 %v2791_v42, 16  ;;  %v12396_v8 = vor.u32 %v2614_v21, %v2611_v35  ;;  %v10727_v37 = vld [vmem:[%s14913_s4 + $0x180] sm:$0xff]  }
 0x2cc   :  { %15118 = vst [vmem:[#allocation33_spill] sm:$0xff] %v12381_v27  ;;  %v12392_v10 = vrot.slane %v15120_v58, 4  ;;  %v2887_v27 = vshrl.u32 %v2792_v53, 16  ;;  %v12394_v33 = vld [vmem:[#allocation3 + $0x28] sm:$0xf]  ;;  %v2890_v48 = vshll.u32 %v2792_v53, 16  ;;  %v2060_v53 = vsel %vm11772_vm10, %v12224_v56, %v12315_v24 }
 0x2cd   :  { %15119 = vst [vmem:[#allocation31_spill] sm:$0xff] %v12388_v3  ;;  %15122 = vst [vmem:[#allocation44_spill] sm:$0xff] %v12394_v33  ;;  %v2879_v2 = vrot.slane %v2877_v49, 5  ;;  %v12398_v0 = vld [vmem:[#allocation3 + $0x2c] sm:$0xf]  ;;  %v15125_v19 = vrot.slane %v12373_v63, 5  ;;  %v2331_v24 = vsel %vm11772_vm10, %v12242_v47, %v12343_v50  ;;  %v12428_v20 = vor.u32 %v2624_v13, %v2621_v51 }
 0x2ce   :  { %15121 = vst [vmem:[#allocation37_spill] sm:$0xff] %v12392_v10  ;;  %15123 = vst [vmem:[#allocation45_spill] sm:$0xff] %v12396_v8  ;;  %v2882_v42 = vrot.slane %v2880_v36, 6  ;;  %v2889_v3 = vrot.slane %v2887_v27, 5  ;;  %v10701_v10 = vld [vmem:[#allocation4 + $0x8] ss:$36 sps:$4 sm:$0xff]  }
 0x2cf   :  { %15124 = vst [vmem:[#allocation46_spill] sm:$0xff] %v12398_v0  ;;  %v12406_v58 = vrot.slane %v15125_v19, 4  ;;  %v10732_v21 = vld [vmem:[%s14913_s4 + $0x1c8] sm:$0xff]   ;;  %v10747_v35 = vld [vmem:[%s14913_s4 + $0x120] sm:$0xff]   ;;  %v2892_v49 = vrot.slane %v2890_v48, 6  ;;  %v15126_v7 = vrot.slane %v12300_v28, 5  ;;  %v2341_v28 = vsel %vm11772_vm10, %v2336_v39, %v12355_v30 }
 0x2d0   :  { %v10703_v36 = vld [vmem:[#allocation4 + $0xc] ss:$36 sps:$4 sm:$0xff]   ;;  %2119 = vst [vmem:[#allocation4 + $0x148] sm:$0xf] %v2060_v53  ;;  %15127 = vst [vmem:[#allocation47_spill] sm:$0xff] %v12428_v20  ;;  %v15128_v48 = vrot.slane %v12394_v33, 6  ;;  %v12444_v50 = vor.u32 %v2882_v42, %v2879_v2  ;;  %10025 = vmatpush3.bf16.msra.mxu0 %v10747_v35 }
 0x2d1   :  { %v10704_v27 = vld [vmem:[#allocation4 + $0x4c] ss:$36 sps:$4 sm:$0xff]   ;;  %v2185_v56 = vsel %vm11759_vm9, %v12216_v1, %v15126_v7  ;;  %2399 = vst [vmem:[#allocation4 + $0x12c] sm:$0xf] %v2331_v24  ;;  %v2070_v1 = vsel %vm11772_vm10, %v12358_v55, %v12330_v14  ;;  %4160 = vmatprep.mubr.bf16.mxu1 %v10703_v36  ;;  %v1925_v59 = vld [vmem:[#allocation3 + $0x34] sm:$0x1] }
 0x2d2   :  { %v12432_v19 = vrot.slane %v15128_v48, 4  ;;  %v10706_v8 = vld [vmem:[#allocation4 + $0x48] ss:$36 sps:$4 sm:$0xff]   ;;  %v1924_v53 = vld [vmem:[#allocation3 + $0x30] sm:$0xf]  ;;  %15130 = vst [vmem:[#allocation49_spill] sm:$0xff] %v12444_v50  ;;  %4079 = vmatprep.mubr.bf16.mxu0 %v10704_v27  ;;  %4161 = vmatmul.mubr.bf16.vlgmr.msra.gmra.mrb[92].mxu1 %v10701_v10 }
 0x2d3   :  { %2219 = vst [vmem:[#allocation4 + $0x14c] sm:$0xf] %v2185_v56  ;;  %v10754_v47 = vld [vmem:[%s14913_s4 + $0x168] sm:$0xff]   ;;  %v1953_v13 = vld [vmem:[#allocation3 + $0x34] sm:$0x3]  ;;  %v15131_v14 = vrot.slane %v12305_v38, 5  ;;  %4080 = vmatmul.mubr.bf16.gmra.mrb[40].mxu0 %v10706_v8  ;;  %10075 = vmatpush3.bf16.msra.mxu1 %v10727_v37 }
 0x2d4   :  { %15129 = vst [vmem:[#allocation48_spill] sm:$0xff] %v12432_v19  ;;  %v1952_v51 = vld [vmem:[#allocation3 + $0x30] sm:$0xf]  ;;  %1938 = vst [vmem:[#allocation4 + $0x1b0] sm:$0xf] %v1924_v53  ;;  %v15134_v42 = vld [vmem:[#allocation34_spill] sm:$0xff]  ;;  %v12467_v53 = vor.u32 %v2892_v49, %v2889_v3  ;;  %10076 = vmatprep.subr.bf16.mxu1 %v10732_v21  ;;  %10026 = vmatprep.subr.bf16.mxu0 %v10754_v47 }
 0x2d5   :  { %v10734_v30 = vld [vmem:[%s14913_s4 + $0x188] sm:$0xff]   ;;  %2400 = vst [vmem:[#allocation4 + $0x150] sm:$0xf] %v2341_v28  ;;  %2120 = vst [vmem:[#allocation4 + $0x16c] sm:$0xf] %v2070_v1  ;;  %v2188_v55 = vsel %vm11759_vm9, %v12335_v57, %v15131_v14  ;;  %v2077_v27 = vshll.u32 %v1952_v51, 16 }
 0x2d6   :  { %v10756_v39 = vld [vmem:[%s14913_s4 + $0x128] sm:$0xff]   ;;  %v2081_v56 = vshrl.u32 %v1952_v51, 16  ;;  %v2087_v24 = vshll.u32 %v1953_v13, 16  ;;  %v2091_v38 = vshrl.u32 %v1953_v13, 16  ;;  %1939 = vst [vmem:[#allocation4 + $0x1d4] sm:$0x1] %v1925_v59 }
 0x2d7   :  { %v15132_v2 = vld [vmem:[#allocation29_spill] sm:$0xff]  ;;  %2220 = vst [vmem:[#allocation4 + $0x170] sm:$0xf] %v2188_v55  ;;  %v15136_v28 = vrot.slane %v12398_v0, 6  ;;  %v15138_v51 = vrot.slane %v11915_v45, 5  ;;  %v15139_v49 = vrot.slane %v12129_v5, 5  ;;  %10077 = vmatpush3.bf16.msra.mxu1 %v10734_v30  ;;  %10027 = vmatpush3.bf16.msra.mxu0 %v10756_v39 }
 0x2d8   :  { %v15133_v7 = vrot.slane %v15132_v2, 5  ;;  %v12462_v48 = vld [vmem:[#allocation3 + $0x30] sm:$0xf]  ;;  %v10739_v57 = vld [vmem:[%s14913_s4 + $0x1d0] sm:$0xff]   ;;  %15135 = vst [vmem:[#allocation29_spill] sm:$0xff] %v12467_v53  ;;  %v2079_v55 = vrot.slane %v2077_v27, 5 }
 0x2d9   :  { %v12471_v1 = vrot.slane %v15136_v28, 4  ;;  %v12473_v10 = vld [vmem:[#allocation3 + $0x34] sm:$0x3]  ;;  %v2235_v8 = vld [vmem:[#allocation3 + $0x30] sm:$0xf]  ;;  %v2723_v3 = vsel %vm11759_vm9, %v11954_v15, %v15138_v51  ;;  %v2083_v2 = vrot.slane %v2081_v56, 4  ;;  %10078 = vmatprep.subr.bf16.mxu1 %v10739_v57 }
 0x2da   :  { %v2445_v36 = vsel %vm11759_vm9, %v15134_v42, %v15133_v7  ;;  %v10761_v59 = vld [vmem:[%s14913_s4 + $0x170] sm:$0xff]   ;;  %v15140_v13 = vld [vmem:[#allocation40_spill] sm:$0xff]  ;;  %v14974_v37 = vrot.slane %v12462_v48, 5  ;;  %2771 = vst [vmem:[#allocation4 + $0x60] sm:$0xf] %v2723_v3  ;;  %v12490_v45 = vrot.slane %v2087_v24, 5 }
 0x2db   :  { %2491 = vst [vmem:[#allocation4 + $0x7c] sm:$0xf] %v2445_v36  ;;  %15137 = vst [vmem:[#allocation34_spill] sm:$0xff] %v12471_v1  ;;  %v2726_v14 = vsel %vm11759_vm9, %v15140_v13, %v15139_v49  ;;  %v2236_v35 = vld [vmem:[#allocation3 + $0x34] sm:$0xf]  ;;  %v12492_v15 = vrot.slane %v2091_v38, 4  ;;  %v2084_v47 = vor.u32 %v2083_v2, %v2079_v55  ;;  %v2080_v2 = vsel %vm11772_vm10, %v12360_v34, %v2079_v55 }
 0x2dc   :  { %2772 = vst [vmem:[#allocation4 + $0x84] sm:$0xf] %v2726_v14  ;;  %v2348_v5 = vshll.u32 %v2235_v8, 16  ;;  %v2352_v42 = vshrl.u32 %v2235_v8, 16  ;;  %v12494_v36 = vld [vmem:[#allocation3 + $0x30] sm:$0xf]  ;;  %10028 = vmatprep.subr.bf16.mxu0 %v10761_v59 }
 0x2dd   :  { %15141 = vst [vmem:[#allocation40_spill] sm:$0xff] %v12494_v36  ;;  %v10741_v27 = vld [vmem:[%s14913_s4 + $0x190] sm:$0xff]   ;;  %v2358_v56 = vshll.u32 %v2236_v35, 16  ;;  %v2362_v28 = vshrl.u32 %v2236_v35, 16  ;;  %v10746_v38 = vld [vmem:[%s14913_s4 + $0x1d8] sm:$0xff]   ;;  %v12519_v35 = vrot.slane %v14974_v37, 4 }
 0x2de   :  { %v10763_v21 = vld [vmem:[%s14913_s4 + $0x130] sm:$0xff]   ;;  %v10769_v8 = vld [vmem:[%s14913_s4 + $0x178] sm:$0xff]   ;;  %v12511_v3 = vrot.slane %v2348_v5, 5  ;;  %v2354_v49 = vrot.slane %v2352_v42, 4  ;;  %v2513_v14 = vld [vmem:[#allocation3 + $0x30] sm:$0xf]  ;;  %10079 = vmatpush3.bf16.msra.mxu1 %v10741_v27 }
 0x2df   :  { %v12502_v51 = vld [vmem:[#allocation3 + $0x34] sm:$0xf]  ;;  %v12522_v24 = vrot.slane %v2358_v56, 5  ;;  %v2364_v5 = vrot.slane %v2362_v28, 4  ;;  %2121 = vst [vmem:[#allocation4 + $0x190] sm:$0xf] %v2080_v2  ;;  %10029 = vmatpush3.bf16.msra.mxu0 %v10763_v21  ;;  %10080 = vmatprep.subr.bf16.mxu1 %v10746_v38 }
 0x2e0   :  { %v2514_v1 = vld [vmem:[#allocation3 + $0x34] sm:$0xf]  ;;  %v2085_v42 = vrot.slane %v2084_v47, 4  ;;  %v2355_v30 = vor.u32 %v2354_v49, %v12511_v3  ;;  %v2629_v13 = vshrl.u32 %v2513_v14, 16  ;;  %v2632_v19 = vshll.u32 %v2513_v14, 16  ;;  %v10748_v39 = vld [vmem:[%s14913_s4 + $0x198] sm:$0xff]   ;;  %10030 = vmatprep.subr.bf16.mxu0 %v10769_v8 }
 0x2e1   :  { %v12525_v34 = vld [vmem:[#allocation3 + $0x30] sm:$0xf]  ;;  %v10771_v55 = vld [vmem:[%s14913_s4 + $0x138] sm:$0xff]   ;;  %v2365_v56 = vor.u32 %v2364_v5, %v12522_v24  ;;  %v2639_v57 = vshrl.u32 %v2514_v1, 16  ;;  %v2642_v28 = vshll.u32 %v2514_v1, 16  ;;  %v10755_v49 = vld [vmem:[%s14913_s4 + $0x1e0] sm:$0xff]  }
 0x2e2   :  { %v12534_v59 = vld [vmem:[#allocation3 + $0x34] sm:$0xf]  ;;  %v15142_v14 = vrot.slane %v12494_v36, 5  ;;  %v15144_v7 = vrot.slane %v12502_v51, 5  ;;  %v2631_v0 = vrot.slane %v2629_v13, 5  ;;  %v2634_v5 = vrot.slane %v2632_v19, 6  ;;  %10081 = vmatpush3.bf16.msra.mxu1 %v10748_v39 }
 0x2e3   :  { %v2793_v33 = vld [vmem:[#allocation3 + $0x30] sm:$0xf]  ;;  %v2356_v1 = vrot.slane %v2355_v30, 4  ;;  %v2641_v20 = vrot.slane %v2639_v57, 5  ;;  %v2644_v47 = vrot.slane %v2642_v28, 6  ;;  %v12549_v36 = vrot.slane %v2365_v56, 4  ;;  %10031 = vmatpush3.bf16.msra.mxu0 %v10771_v55  ;;  %10082 = vmatprep.subr.bf16.mxu1 %v10755_v49 }
 0x2e4   :  { %v12542_v2 = vrot.slane %v15142_v14, 4  ;;  %v12546_v37 = vrot.slane %v15144_v7, 4  ;;  %v2794_v50 = vld [vmem:[#allocation3 + $0x34] sm:$0xf]  ;;  %v15146_v14 = vrot.slane %v12525_v34, 5  ;;  %v2897_v7 = vshrl.u32 %v2793_v33, 16 }
 0x2e5   :  { %v2900_v13 = vshll.u32 %v2793_v33, 16  ;;  %v12555_v19 = vld [vmem:[#allocation3 + $0x30] sm:$0xf]  ;;  %v12557_v27 = vor.u32 %v2634_v5, %v2631_v0  ;;  %v2907_v21 = vshrl.u32 %v2794_v50, 16  ;;  %v2910_v30 = vshll.u32 %v2794_v50, 16  ;;  %v10757_v38 = vld [vmem:[%s14913_s4 + $0x1a0] sm:$0xff]  }
 0x2e6   :  { %15143 = vst [vmem:[#allocation50_spill] sm:$0xff] %v12542_v2  ;;  %15145 = vst [vmem:[#allocation51_spill] sm:$0xff] %v12546_v37  ;;  %v12553_v2 = vrot.slane %v15146_v14, 4  ;;  %v12559_v57 = vld [vmem:[#allocation3 + $0x34] sm:$0xf]  ;;  %v2899_v8 = vrot.slane %v2897_v7, 5  ;;  %v2090_v33 = vsel %vm11772_vm10, %v2085_v42, %v12490_v45  ;;  %v12569_v0 = vor.u32 %v2644_v47, %v2641_v20  ;;  %10083 = vmatpush3.bf16.msra.mxu1 %v10757_v38 }
 0x2e7   :  { %15147 = vst [vmem:[#allocation52_spill] sm:$0xff] %v12557_v27  ;;  %v2902_v56 = vrot.slane %v2900_v13, 6  ;;  %v14982_v14 = vrot.slane %v12559_v57, 6  ;;  %v10707_v53 = vld [vmem:[#allocation4 + $0x54] ss:$36 sps:$4 sm:$0xff]   ;;  %v15148_v50 = vrot.slane %v12534_v59, 5  ;;  %v2351_v49 = vsel %vm11772_vm10, %v12384_v18, %v12511_v3 }
 0x2e8   :  { %v2909_v28 = vrot.slane %v2907_v21, 5  ;;  %v2912_v27 = vrot.slane %v2910_v30, 6  ;;  %v10709_v37 = vld [vmem:[#allocation4 + $0x50] ss:$36 sps:$4 sm:$0xff]   ;;  %2122 = vst [vmem:[#allocation4 + $0x1b4] sm:$0xf] %v2090_v33  ;;  %4168 = vmatprep.mubr.bf16.mxu1 %v10707_v53 }
 0x2e9   :  { %v12573_v5 = vrot.slane %v15148_v50, 4  ;;  %v10762_v39 = vld [vmem:[%s14913_s4 + $0x1e8] sm:$0xff]   ;;  %v15149_v7 = vrot.slane %v12555_v19, 6  ;;  %v12584_v20 = vrot.slane %v14982_v14, 4  ;;  %v2237_v42 = vld [vmem:[#allocation3 + $0x38] sm:$0x3]  ;;  %v12598_v30 = vor.u32 %v2902_v56, %v2899_v8  ;;  %4169 = vmatmul.mubr.bf16.gmra.mrb[96].mxu1 %v10709_v37 }
 0x2ea   :  { %v15152_v55 = vrot.slane %v12462_v48, 5  ;;  %v10767_v21 = vld [vmem:[%s14913_s4 + $0x1a8] sm:$0xff]   ;;  %v2368_v53 = vshll.u32 %v2237_v42, 16  ;;  %v2372_v33 = vshrl.u32 %v2237_v42, 16  ;;  %v12600_v50 = vld [vmem:[#allocation3 + $0x38] sm:$0x3]  ;;  %v2361_v37 = vsel %vm11772_vm10, %v2356_v1, %v12522_v24  ;;  %10084 = vmatprep.subr.bf16.mxu1 %v10762_v39 }
 0x2eb   :  { %v12580_v13 = vrot.slane %v15149_v7, 4  ;;  %15151 = vst [vmem:[#allocation54_spill] sm:$0xff] %v12584_v20  ;;  %v2515_v48 = vld [vmem:[#allocation3 + $0x38] sm:$0x7]  ;;  %2401 = vst [vmem:[#allocation4 + $0x174] sm:$0xf] %v2351_v49  ;;  %10085 = vmatpush3.bf16.msra.mxu1 %v10767_v21 }
 0x2ec   :  { %v2191_v47 = vsel %vm11759_vm9, %v12353_v43, %v15152_v55  ;;  %v2094_v43 = vor.u32 %v12492_v15, %v12490_v45  ;;  %v10770_v18 = vld [vmem:[%s14913_s4 + $0x1f0] sm:$0xff]   ;;  %v2649_v3 = vshrl.u32 %v2515_v48, 16  ;;  %v2652_v7 = vshll.u32 %v2515_v48, 16  ;;  %2402 = vst [vmem:[#allocation4 + $0x198] sm:$0xf] %v2361_v37  ;;  %v15156_v21 = vld [vmem:[#allocation35_spill] sm:$0xff] }
 0x2ed   :  { %15150 = vst [vmem:[#allocation53_spill] sm:$0xff] %v12580_v13  ;;  %2221 = vst [vmem:[#allocation4 + $0x194] sm:$0xf] %v2191_v47  ;;  %v12607_v55 = vld [vmem:[#allocation3 + $0x38] sm:$0xf]  ;;  %v15153_v56 = vrot.slane %v12473_v10, 5  ;;  %v12625_v13 = vor.u32 %v2912_v27, %v2909_v28  ;;  %10086 = vmatprep.subr.bf16.mxu1 %v10770_v18 }
 0x2ee   :  { %v2795_v8 = vld [vmem:[#allocation3 + $0x38] sm:$0xf]  ;;  %v12617_v15 = vrot.slane %v2368_v53, 5  ;;  %v12619_v42 = vrot.slane %v2372_v33, 4  ;;  %v2749_v47 = vrot.slane %v12607_v55, 5  ;;  %v2651_v24 = vrot.slane %v2649_v3, 5 }
 0x2ef   :  { %v2194_v45 = vsel %vm11759_vm9, %v12519_v35, %v15153_v56  ;;  %v2917_v49 = vshrl.u32 %v2795_v8, 16  ;;  %v12622_v48 = vld [vmem:[#allocation3 + $0x38] sm:$0xf]  ;;  %v2654_v1 = vrot.slane %v2652_v7, 6  ;;  %v2920_v38 = vshll.u32 %v2795_v8, 16 }
 0x2f0   :  { %2222 = vst [vmem:[#allocation4 + $0x1b8] sm:$0xf] %v2194_v45  ;;  %v3030_v14 = vrot.slane %v12622_v48, 6  ;;  %v10710_v20 = vld [vmem:[#allocation4 + $0x94] ss:$36 sps:$4 sm:$0xff]   ;;  %v2371_v56 = vsel %vm11772_vm10, %v12549_v36, %v12617_v15  ;;  %v12639_v7 = vrot.slane %v2749_v47, 4  ;;  %v2375_v8 = vor.u32 %v12619_v42, %v12617_v15 }
 0x2f1   :  { %v2919_v53 = vrot.slane %v2917_v49, 5  ;;  %v10712_v33 = vld [vmem:[#allocation4 + $0x90] ss:$36 sps:$4 sm:$0xff]   ;;  %v12635_v3 = vor.u32 %v2654_v1, %v2651_v24  ;;  %v2922_v27 = vrot.slane %v2920_v38, 6  ;;  %4087 = vmatprep.mubr.bf16.mxu0 %v10710_v20  ;;  %v2796_v28 = vld [vmem:[#allocation3 + $0x3c] sm:$0x7] }
 0x2f2   :  { %v10772_v39 = vld [vmem:[%s14913_s4 + $0x1b0] sm:$0xff]   ;;  %2403 = vst [vmem:[#allocation4 + $0x1bc] sm:$0xf] %v2371_v56  ;;  %v10776_v36 = vld [vmem:[%s14913_s4 + $0x1f8] sm:$0xff]   ;;  %4088 = vmatmul.mubr.bf16.gmra.mrb[44].mxu0 %v10712_v33  ;;  %v2927_v45 = vshrl.u32 %v2796_v28, 16  ;;  %v2930_v49 = vshll.u32 %v2796_v28, 16 }
 0x2f3   :  { %v12646_v37 = vld [vmem:[#allocation3 + $0x3c] sm:$0x3]  ;;  %v15154_v20 = vrot.slane %v11941_v54, 4  ;;  %v15155_v15 = vrot.slane %v12105_v44, 5  ;;  %v12658_v38 = vor.u32 %v2922_v27, %v2919_v53  ;;  %v12662_v33 = vrot.slane %v3030_v14, 4  ;;  %10087 = vmatpush3.bf16.msra.mxu1 %v10772_v39 }
 0x2f4   :  { %v10713_v24 = vld [vmem:[#allocation4 + $0x9c] ss:$36 sps:$4 sm:$0xff]   ;;  %v2095_v28 = vrot.slane %v2094_v43, 4  ;;  %v15157_v54 = vrot.slane %v12110_v61, 5  ;;  %v2932_v35 = vrot.slane %v2930_v49, 6  ;;  %v15158_v27 = vrot.slane %v12132_v23, 5  ;;  %10088 = vmatprep.subr.bf16.mxu1 %v10776_v36 }
 0x2f5   :  { %v2824_v1 = vsel %vm12031_vm1, %v15154_v20, %v11966_v4  ;;  %v2448_v42 = vsel %vm11759_vm9, %v15156_v21, %v15155_v15  ;;  %v10715_v56 = vld [vmem:[#allocation4 + $0x98] ss:$36 sps:$4 sm:$0xff]   ;;  %v2929_v20 = vrot.slane %v2927_v45, 5  ;;  %4176 = vmatprep.mubr.bf16.mxu1 %v10713_v24  ;;  %v10721_v53 = vld [vmem:[#allocation4 + $0xe4] ss:$36 sps:$4 sm:$0xff]   ;;  %v15159_v43 = vrot.slane %v12227_v25, 5 }
 0x2f6   :  { %v10716_v18 = vld [vmem:[#allocation4 + $0xdc] ss:$36 sps:$4 sm:$0xff]   ;;  %2951 = vst [vmem:[#allocation4 + $0x40] sm:$0xf] %v2824_v1  ;;  %v2451_v44 = vsel %vm11759_vm9, %v12127_v46, %v15157_v54  ;;  %2492 = vst [vmem:[#allocation4 + $0xa0] sm:$0xf] %v2448_v42  ;;  %v2729_v15 = vsel %vm11759_vm9, %v12148_v52, %v15158_v27  ;;  %4177 = vmatmul.mubr.bf16.gmra.mrb[100].mxu1 %v10715_v56 }
 0x2f7   :  { %2493 = vst [vmem:[#allocation4 + $0xc4] sm:$0xf] %v2451_v44  ;;  %v2732_v61 = vsel %vm11759_vm9, %v12159_v29, %v15159_v43  ;;  %v2752_v46 = vrot.slane %v12646_v37, 5  ;;  %4095 = vmatprep.mubr.bf16.mxu0 %v10716_v18  ;;  %2123 = vst [vmem:[#allocation4 + $0x1d8] sm:$0x1] %v2095_v28  ;;  %v15160_v45 = vrot.slane %v12205_v9, 5  ;;  %v12696_v1 = vor.u32 %v2932_v35, %v2929_v20 }
 0x2f8   :  { %2773 = vst [vmem:[#allocation4 + $0xa8] sm:$0xf] %v2729_v15  ;;  %2774 = vst [vmem:[#allocation4 + $0xcc] sm:$0xf] %v2732_v61  ;;  %v15161_v52 = vrot.slane %v12210_v41, 5  ;;  %v15162_v29 = vrot.slane %v12234_v26, 5  ;;  %4184 = vmatprep.mubr.bf16.mxu1 %v10721_v53 }
 0x2f9   :  { %v2454_v23 = vsel %vm11759_vm9, %v12137_v32, %v15160_v45  ;;  %v2925_v24 = vrot.slane %v12658_v38, 4  ;;  %v10718_v9 = vld [vmem:[#allocation4 + $0xd8] ss:$36 sps:$4 sm:$0xff]   ;;  %v15164_v26 = vrot.slane %v12337_v60, 5  ;;  %v10728_v35 = vld [vmem:[#allocation4 + $0x124] ss:$36 sps:$4 sm:$0xff]  }
 0x2fa   :  { %v2457_v25 = vsel %vm11759_vm9, %v12232_v22, %v15161_v52  ;;  %v2735_v49 = vsel %vm11759_vm9, %v12250_v40, %v15162_v29  ;;  %v10779_v32 = vld [vmem:[%s14913_s4 + $0x1b8] sm:$0xff]   ;;  %2494 = vst [vmem:[#allocation4 + $0xe8] sm:$0xf] %v2454_v23  ;;  %v15163_v22 = vrot.slane %v12367_v62, 5  ;;  %v15165_v39 = vrot.slane %v12473_v10, 5  ;;  %v15167_v62 = vld [vmem:[#allocation20_spill] sm:$0xff]  ;;  %4096 = vmatmul.mubr.bf16.gmra.mrb[48].mxu0 %v10718_v9 }
 0x2fb   :  { %2495 = vst [vmem:[#allocation4 + $0x10c] sm:$0xf] %v2457_v25  ;;  %2775 = vst [vmem:[#allocation4 + $0xf0] sm:$0xf] %v2735_v49  ;;  %v2460_v40 = vsel %vm11759_vm9, %v12240_v17, %v15164_v26  ;;  %v15166_v42 = vrot.slane %v12345_v31, 5  ;;  %v15169_v60 = vld [vmem:[#allocation37_spill] sm:$0xff]  ;;  %10089 = vmatpush3.bf16.msra.mxu1 %v10779_v32  ;;  %v2934_v55 = vsel %vm12031_vm1, %v2925_v24, %v12696_v1  ;;  %4103 = vmatprep.mubr.bf16.mxu0 %v10728_v35 }
 0x2fc   :  { %v2738_v41 = vsel %vm11759_vm9, %v12258_v12, %v15163_v22  ;;  %v2195_v21 = vrot.slane %v15165_v39, 4  ;;  %2496 = vst [vmem:[#allocation4 + $0x130] sm:$0xf] %v2460_v40  ;;  %v15168_v12 = vrot.slane %v12373_v63, 5  ;;  %v15170_v17 = vrot.slane %v12525_v34, 5  ;;  %v15171_v31 = vld [vmem:[#allocation40_spill] sm:$0xff] }
 0x2fd   :  { %2776 = vst [vmem:[#allocation4 + $0x114] sm:$0xf] %v2738_v41  ;;  %v2463_v56 = vsel %vm11759_vm9, %v15167_v62, %v15166_v42  ;;  %v2376_v36 = vrot.slane %v2375_v8, 4  ;;  %v15172_v28 = vrot.slane %v15171_v31, 5  ;;  %v15173_v54 = vld [vmem:[#allocation33_spill] sm:$0xff]  ;;  %v15174_v44 = vrot.slane %v12502_v51, 5 }
 0x2fe   :  { %v2741_v18 = vsel %vm11759_vm9, %v15169_v60, %v15168_v12  ;;  %v2744_v10 = vsel %vm11759_vm9, %v12406_v58, %v15170_v17  ;;  %2497 = vst [vmem:[#allocation4 + $0x154] sm:$0xf] %v2463_v56  ;;  %v15175_v20 = vld [vmem:[#allocation50_spill] sm:$0xff]  ;;  %v15176_v53 = vrot.slane %v12534_v59, 5  ;;  %2223 = vst [vmem:[#allocation4 + $0x1dc] sm:$0x1] %v2195_v21  ;;  %v2750_v51 = vsel %vm11759_vm9, %v12573_v5, %v2749_v47 }
 0x2ff   :  { %2777 = vst [vmem:[#allocation4 + $0x138] sm:$0xf] %v2741_v18  ;;  %2778 = vst [vmem:[#allocation4 + $0x15c] sm:$0xf] %v2744_v10  ;;  %v2466_v63 = vsel %vm11759_vm9, %v15173_v54, %v15172_v28  ;;  %v2469_v34 = vsel %vm11759_vm9, %v15175_v20, %v15174_v44  ;;  %v10723_v8 = vld [vmem:[#allocation4 + $0xe0] ss:$36 sps:$4 sm:$0xff]   ;;  %v2753_v5 = vsel %vm11759_vm9, %v12639_v7, %v2752_v46 }
 0x300   :  { %v2747_v58 = vsel %vm11759_vm9, %v12553_v2, %v15176_v53  ;;  %v15177_v27 = vld [vmem:[#allocation36_spill] sm:$0xff]  ;;  %v15178_v43 = vld [vmem:[#allocation38_spill] sm:$0xff]  ;;  %2498 = vst [vmem:[#allocation4 + $0x178] sm:$0xf] %v2466_v63  ;;  %2499 = vst [vmem:[#allocation4 + $0x19c] sm:$0xf] %v2469_v34  ;;  %4185 = vmatmul.mubr.bf16.gmra.mrb[104].mxu1 %v10723_v8 }
 0x301   :  { %v2547_v15 = vrot.slane %v15177_v27, 4  ;;  %v2557_v61 = vrot.slane %v15178_v43, 4  ;;  %2779 = vst [vmem:[#allocation4 + $0x180] sm:$0xf] %v2747_v58  ;;  %v15179_v59 = vrot.slane %v12600_v50, 5  ;;  %v15180_v45 = vld [vmem:[#allocation51_spill] sm:$0xff] }
 0x302   :  { %v10735_v23 = vld [vmem:[#allocation4 + $0x12c] ss:$36 sps:$4 sm:$0xff]   ;;  %2404 = vst [vmem:[#allocation4 + $0x1e0] sm:$0x1] %v2376_v36  ;;  %v2825_v52 = vrot.slane %v11966_v4, 4  ;;  %v15181_v47 = vld [vmem:[#allocation39_spill] sm:$0xff] }
 0x303   :  { %v2472_v2 = vsel %vm11759_vm9, %v15180_v45, %v15179_v59  ;;  %2780 = vst [vmem:[#allocation4 + $0x1a4] sm:$0xf] %v2750_v51  ;;  %v15182_v25 = vrot.slane %v15181_v47, 6  ;;  %v15183_v29 = vld [vmem:[#allocation42_spill] sm:$0xff]  ;;  %v2556_v4 = vsel %vm12031_vm1, %v2547_v15, %v15178_v43  ;;  %v15185_v32 = vld [vmem:[#allocation41_spill] sm:$0xff]  ;;  %v15186_v7 = vld [vmem:[#allocation32_spill] sm:$0xff]  ;;  %4192 = vmatprep.mubr.bf16.mxu1 %v10735_v23 }
 0x304   :  { %2500 = vst [vmem:[#allocation4 + $0x1c0] sm:$0xf] %v2472_v2  ;;  %v2566_v22 = vsel %vm12031_vm1, %v2557_v61, %v15185_v32  ;;  %v2835_v41 = vrot.slane %v15186_v7, 4  ;;  %v2567_v26 = vrot.slane %v15185_v32, 4  ;;  %2781 = vst [vmem:[#allocation4 + $0x1c8] sm:$0xf] %v2753_v5  ;;  %v2834_v24 = vsel %vm12031_vm1, %v2825_v52, %v15186_v7 }
 0x305   :  { %v3004_v9 = vsel %vm11855_vm13, %v15183_v29, %v15182_v25  ;;  %2962 = vst [vmem:[#allocation4 + $0x1cc] sm:$0xf] %v2934_v55  ;;  %2674 = vst [vmem:[#allocation4 + $0x5c] sm:$0xf] %v2556_v4  ;;  %v15187_v40 = vld [vmem:[#allocation30_spill] sm:$0xff]  ;;  %v15188_v39 = vld [vmem:[#allocation25_spill] sm:$0xff] }
 0x306   :  { %3052 = vst [vmem:[#allocation4 + $0x68] sm:$0xf] %v3004_v9  ;;  %2675 = vst [vmem:[#allocation4 + $0x80] sm:$0xf] %v2566_v22  ;;  %v2577_v35 = vrot.slane %v15187_v40, 4  ;;  %v15189_v21 = vrot.slane %v15188_v39, 6  ;;  %v2576_v36 = vsel %vm12031_vm1, %v2567_v26, %v15187_v40 }
 0x307   :  { %v15190_v42 = vld [vmem:[#allocation28_spill] sm:$0xff]  ;;  %v15193_v60 = vld [vmem:[#allocation17_spill] sm:$0xff]  ;;  %v15194_v17 = vld [vmem:[#allocation18_spill] sm:$0xff]  ;;  %2952 = vst [vmem:[#allocation4 + $0x64] sm:$0xf] %v2834_v24  ;;  %v11175_v55 = vmov 0.0  }
 0x308   :  { %v3007_v62 = vsel %vm11855_vm13, %v15190_v42, %v15189_v21  ;;  %v15191_v56 = vld [vmem:[#allocation16_spill] sm:$0xff]  ;;  %v2844_v10 = vsel %vm12031_vm1, %v2835_v41, %v15194_v17  ;;  %v2845_v31 = vrot.slane %v15194_v17, 4  ;;  %v10730_v63 = vld [vmem:[#allocation4 + $0x120] ss:$36 sps:$4 sm:$0xff]   ;;  %2676 = vst [vmem:[#allocation4 + $0xa4] sm:$0xf] %v2576_v36  ;;  %10459 = vmatprep.subr.bf16.mxu0 %v11175_v55 }
 0x309   :  { %v15192_v12 = vrot.slane %v15191_v56, 6  ;;  %v15195_v28 = vld [vmem:[#allocation24_spill] sm:$0xff]  ;;  %3053 = vst [vmem:[#allocation4 + $0x8c] sm:$0xf] %v3007_v62  ;;  %2953 = vst [vmem:[#allocation4 + $0x88] sm:$0xf] %v2844_v10  ;;  %4104 = vmatmul.mubr.bf16.gmra.mrb[52].mxu0 %v10730_v63 }
 0x30a   :  { %v2855_v54 = vrot.slane %v15195_v28, 4  ;;  %v15196_v44 = vld [vmem:[#allocation14_spill] sm:$0xff]  ;;  %v15197_v53 = vld [vmem:[#allocation15_spill] sm:$0xff]  ;;  %v10742_v15 = vld [vmem:[#allocation4 + $0x16c] ss:$36 sps:$4 sm:$0xff]   ;;  %v2854_v43 = vsel %vm12031_vm1, %v2845_v31, %v15195_v28  ;;  %v2905_v31 = vrot.slane %v12598_v30, 4 }
 0x30b   :  { %v3010_v18 = vsel %vm11855_vm13, %v15193_v60, %v15192_v12  ;;  %v2586_v20 = vsel %vm12031_vm1, %v2577_v35, %v15196_v44  ;;  %v2587_v34 = vrot.slane %v15196_v44, 4  ;;  %v2597_v58 = vrot.slane %v15197_v53, 4  ;;  %v15198_v8 = vld [vmem:[#allocation26_spill] sm:$0xff]  ;;  %v15199_v51 = vld [vmem:[#allocation31_spill] sm:$0xff]  ;;  %2954 = vst [vmem:[#allocation4 + $0xac] sm:$0xf] %v2854_v43  ;;  %4111 = vmatprep.mubr.bf16.mxu0 %v10742_v15 }
 0x30c   :  { %3054 = vst [vmem:[#allocation4 + $0xb0] sm:$0xf] %v3010_v18  ;;  %v2865_v27 = vrot.slane %v15198_v8, 4  ;;  %2677 = vst [vmem:[#allocation4 + $0xc8] sm:$0xf] %v2586_v20  ;;  %v2864_v61 = vsel %vm12031_vm1, %v2855_v54, %v15198_v8  ;;  %v2875_v59 = vrot.slane %v15199_v51, 4 }
 0x30d   :  { %v12812_v45 = vld [vmem:[#allocation3 + $0x3c] sm:$0x7]  ;;  %2955 = vst [vmem:[#allocation4 + $0xd0] sm:$0xf] %v2864_v61  ;;  %v2596_v2 = vsel %vm12031_vm1, %v2587_v34, %v15197_v53  ;;  %v15200_v23 = vld [vmem:[#allocation19_spill] sm:$0xff]  ;;  %v15201_v29 = vld [vmem:[#allocation49_spill] sm:$0xff] }
 0x30e   :  { %v2606_v52 = vsel %vm12031_vm1, %v2597_v58, %v15200_v23  ;;  %v2874_v5 = vsel %vm12031_vm1, %v2865_v27, %v15199_v51  ;;  %v2607_v47 = vrot.slane %v15200_v23, 4  ;;  %v10737_v25 = vld [vmem:[#allocation4 + $0x128] ss:$36 sps:$4 sm:$0xff]   ;;  %2678 = vst [vmem:[#allocation4 + $0xec] sm:$0xf] %v2596_v2  ;;  %v2884_v9 = vsel %vm12031_vm1, %v2875_v59, %v15201_v29  ;;  %v15202_v4 = vld [vmem:[#allocation45_spill] sm:$0xff] }
 0x30f   :  { %2679 = vst [vmem:[#allocation4 + $0x110] sm:$0xf] %v2606_v52  ;;  %2956 = vst [vmem:[#allocation4 + $0xf4] sm:$0xf] %v2874_v5  ;;  %v2617_v32 = vrot.slane %v15202_v4, 4  ;;  %v15203_v22 = vld [vmem:[#allocation13_spill] sm:$0xff]  ;;  %4193 = vmatmul.mubr.bf16.gmra.mrb[108].mxu1 %v10737_v25  ;;  %v2914_v27 = vsel %vm12031_vm1, %v2905_v31, %v12625_v13 }
 0x310   :  { %v15204_v7 = vrot.slane %v15203_v22, 6  ;;  %v15205_v41 = vld [vmem:[#allocation12_spill] sm:$0xff]  ;;  %v15206_v24 = vld [vmem:[#allocation21_spill] sm:$0xff]  ;;  %v15208_v35 = vld [vmem:[#allocation22_spill] sm:$0xff]  ;;  %2957 = vst [vmem:[#allocation4 + $0x118] sm:$0xf] %v2884_v9  ;;  %v2616_v42 = vsel %vm12031_vm1, %v2607_v47, %v15202_v4 }
 0x311   :  { %v15207_v40 = vrot.slane %v15206_v24, 6  ;;  %v10751_v21 = vld [vmem:[#allocation4 + $0x174] ss:$36 sps:$4 sm:$0xff]   ;;  %v2885_v62 = vrot.slane %v15201_v29, 4  ;;  %v15210_v60 = vld [vmem:[#allocation47_spill] sm:$0xff]  ;;  %v15211_v10 = vld [vmem:[#allocation52_spill] sm:$0xff] }
 0x312   :  { %v3013_v26 = vsel %vm11855_vm13, %v15205_v41, %v15204_v7  ;;  %v15209_v56 = vld [vmem:[#allocation29_spill] sm:$0xff]  ;;  %v2627_v18 = vrot.slane %v15210_v60, 4  ;;  %v2626_v17 = vsel %vm12031_vm1, %v2617_v32, %v15210_v60  ;;  %2680 = vst [vmem:[#allocation4 + $0x134] sm:$0xf] %v2616_v42  ;;  %v2637_v36 = vrot.slane %v15211_v10, 4  ;;  %v15212_v28 = vld [vmem:[#allocation44_spill] sm:$0xff]  ;;  %4200 = vmatprep.mubr.bf16.mxu1 %v10751_v21 }
 0x313   :  { %v3016_v39 = vsel %vm11855_vm13, %v15208_v35, %v15207_v40  ;;  %v2895_v12 = vrot.slane %v15209_v56, 4  ;;  %3055 = vst [vmem:[#allocation4 + $0xd4] sm:$0xf] %v3013_v26  ;;  %v15213_v54 = vrot.slane %v15212_v28, 6  ;;  %v15214_v63 = vld [vmem:[#allocation27_spill] sm:$0xff]  ;;  %v3033_v20 = vrot.slane %v12812_v45, 6 }
 0x314   :  { %3056 = vst [vmem:[#allocation4 + $0xf8] sm:$0xf] %v3016_v39  ;;  %2681 = vst [vmem:[#allocation4 + $0x158] sm:$0xf] %v2626_v17  ;;  %v2894_v34 = vsel %vm12031_vm1, %v2885_v62, %v15209_v56  ;;  %v2636_v58 = vsel %vm12031_vm1, %v2627_v18, %v15211_v10  ;;  %v2646_v8 = vsel %vm12031_vm1, %v2637_v36, %v12569_v0  ;;  %v2915_v15 = vrot.slane %v12625_v13, 4  ;;  %v15216_v45 = vld [vmem:[#allocation46_spill] sm:$0xff] }
 0x315   :  { %v3019_v44 = vsel %vm11855_vm13, %v15214_v63, %v15213_v54  ;;  %v2904_v53 = vsel %vm12031_vm1, %v2895_v12, %v12598_v30  ;;  %2958 = vst [vmem:[#allocation4 + $0x13c] sm:$0xf] %v2894_v34  ;;  %2682 = vst [vmem:[#allocation4 + $0x17c] sm:$0xf] %v2636_v58  ;;  %v15215_v30 = vrot.slane %v12600_v50, 5  ;;  %v2647_v59 = vrot.slane %v12569_v0, 4 }
 0x316   :  { %3057 = vst [vmem:[#allocation4 + $0x11c] sm:$0xf] %v3019_v44  ;;  %2959 = vst [vmem:[#allocation4 + $0x160] sm:$0xf] %v2904_v53  ;;  %v10744_v61 = vld [vmem:[#allocation4 + $0x168] ss:$36 sps:$4 sm:$0xff]   ;;  %v2924_v0 = vsel %vm12031_vm1, %v2915_v15, %v12658_v38  ;;  %v3034_v37 = vsel %vm11855_vm13, %v12662_v33, %v3033_v20 }
 0x317   :  { %v2473_v43 = vrot.slane %v15215_v30, 4  ;;  %v10749_v51 = vld [vmem:[#allocation4 + $0x1b4] ss:$36 sps:$4 sm:$0x1f]   ;;  %2683 = vst [vmem:[#allocation4 + $0x1a0] sm:$0xf] %v2646_v8  ;;  %4112 = vmatmul.mubr.bf16.gmra.mrb[56].mxu0 %v10744_v61 }
 0x318   :  { %2960 = vst [vmem:[#allocation4 + $0x184] sm:$0xf] %v2914_v27  ;;  %v15217_v2 = vrot.slane %v15216_v45, 6  ;;  %v15218_v23 = vld [vmem:[#allocation48_spill] sm:$0xff]  ;;  %v15219_v5 = vrot.slane %v12555_v19, 6  ;;  %v15220_v47 = vld [vmem:[#allocation34_spill] sm:$0xff]  ;;  %4119 = vmatprep.mubr.bf16.mxu0 %v10749_v51 }
 0x319   :  { %v15221_v50 = vrot.slane %v12559_v57, 6  ;;  %v15222_v25 = vld [vmem:[#allocation53_spill] sm:$0xff]  ;;  %2501 = vst [vmem:[#allocation4 + $0x1e4] sm:$0x1] %v2473_v43  ;;  %v2657_v9 = vrot.slane %v12635_v3, 4  ;;  %v2754_v19 = vrot.slane %v2752_v46, 4  ;;  %v2656_v57 = vsel %vm12031_vm1, %v2647_v59, %v12635_v3 }
 0x31a   :  { %v3022_v52 = vsel %vm11855_vm13, %v15218_v23, %v15217_v2  ;;  %v3025_v13 = vsel %vm11855_vm13, %v15220_v47, %v15219_v5  ;;  %2961 = vst [vmem:[#allocation4 + $0x1a8] sm:$0xf] %v2924_v0  ;;  %v2935_v4 = vrot.slane %v12696_v1, 4  ;;  %v15223_v32 = vld [vmem:[#allocation54_spill] sm:$0xff]  ;;  %v10753_v22 = vld [vmem:[#allocation4 + $0x170] ss:$36 sps:$4 sm:$0xff]  }
 0x31b   :  { %v3028_v29 = vsel %vm11855_vm13, %v15222_v25, %v15221_v50  ;;  %3058 = vst [vmem:[#allocation4 + $0x140] sm:$0xf] %v3022_v52  ;;  %3059 = vst [vmem:[#allocation4 + $0x164] sm:$0xf] %v3025_v13  ;;  %v3031_v38 = vsel %vm11855_vm13, %v15223_v32, %v3030_v14  ;;  %v3035_v46 = vrot.slane %v3033_v20, 4  ;;  %4201 = vmatmul.mubr.bf16.gmra.mrb[112].mxu1 %v10753_v22  ;;  %v10794_v33 = vld [vmem:[%s14913_s4 + $0x200] sm:$0xff]  }
 0x31c   :  { %3060 = vst [vmem:[#allocation4 + $0x188] sm:$0xf] %v3028_v29  ;;  %2684 = vst [vmem:[#allocation4 + $0x1c4] sm:$0xf] %v2656_v57  ;;  %v10766_v14 = vld [vmem:[#allocation4 + $0x14] ss:$36 sps:$4 sm:$0xff]  }
 0x31d   :  { %2685 = vst [vmem:[#allocation4 + $0x1e8] sm:$0x1] %v2657_v9  ;;  %2782 = vst [vmem:[#allocation4 + $0x1ec] sm:$0x1] %v2754_v19  ;;  %v10775_v7 = vld [vmem:[#allocation4 + $0x1c] ss:$36 sps:$4 sm:$0xff]  }
 0x31e   :  { %3061 = vst [vmem:[#allocation4 + $0x1ac] sm:$0xf] %v3031_v38  ;;  %v10759_v3 = vld [vmem:[#allocation4 + $0x1bc] ss:$36 sps:$4 sm:$0x1f]   ;;  %v10798_v40 = vld [vmem:[%s14913_s4 + $0x208] sm:$0xff]  }
 0x31f   :  { %2963 = vst [vmem:[#allocation4 + $0x1f0] sm:$0x1] %v2935_v4  ;;  %3062 = vst [vmem:[#allocation4 + $0x1d0] sm:$0xf] %v3034_v37  ;;  %4208 = vmatprep.mubr.bf16.mxu1 %v10759_v3  ;;  %v10764_v41 = vld [vmem:[#allocation4 + $0x10] ss:$36 sps:$4 sm:$0xff]  }
 0x320   :  { %3063 = vst [vmem:[#allocation4 + $0x1f4] sm:$0x1] %v3035_v46  ;;  %v10758_v48 = vld [vmem:[#allocation4 + $0x1b0] ss:$36 sps:$4 sm:$0x1f]   ;;  %v3081_v39 = vld [vmem:[#allocation4 + $0x7c] sm:$0xff] }
 0x321   :  { %4120 = vmatmul.mubr.bf16.gmra.mrb[60].mxu0 %v10758_v48  ;;  %v10768_v1 = vld [vmem:[#allocation4 + $0x1b8] ss:$36 sps:$4 sm:$0x1f]   ;;  %v10780_v35 = vld [vmem:[#allocation4 + $0x64] ss:$36 sps:$4 sm:$0xff]   ;;  %v10812_v63 = vld [vmem:[%s14913_s4 + $0x228] sm:$0xff]  }
 0x322   :  { %4249 = vmatprep.mubr.bf16.mxu0 %v10766_v14  ;;  %v10777_v26 = vld [vmem:[#allocation4 + $0x5c] ss:$36 sps:$4 sm:$0xff]   ;;  %v10801_v42 = vld [vmem:[%s14913_s4 + $0x210] sm:$0xff]   ;;  %v10782_v56 = vld [vmem:[#allocation4 + $0xa4] ss:$36 sps:$4 sm:$0xff]  }
 0x323   :  { %4209 = vmatmul.mubr.bf16.gmra.mrb[116].mxu1 %v10768_v1  ;;  %v10773_v24 = vld [vmem:[#allocation4 + $0x18] ss:$36 sps:$4 sm:$0xff]   ;;  %v10784_v12 = vld [vmem:[#allocation4 + $0x60] ss:$36 sps:$4 sm:$0xff]   ;;  %v10785_v18 = vld [vmem:[#allocation4 + $0xac] ss:$36 sps:$4 sm:$0xff]  }
 0x324   :  { %4338 = vmatprep.mubr.bf16.mxu1 %v10775_v7  ;;  %v3076_v21 = vld [vmem:[#allocation4 + $0x58] sm:$0xff]  ;;  %v3091_v17 = vld [vmem:[#allocation4 + $0xc4] sm:$0xff]  ;;  %v10787_v28 = vld [vmem:[#allocation4 + $0xec] ss:$36 sps:$4 sm:$0xff]  }
 0x325   :  { %v8939_v62 = vcombine.low %v3076_v21, %v3081_v39  ;;  %v10805_v60 = vld [vmem:[%s14913_s4 + $0x218] sm:$0xff]   ;;  %v10808_v36 = vld [vmem:[%s14913_s4 + $0x220] sm:$0xff]   ;;  %v10790_v44 = vld [vmem:[#allocation4 + $0xf4] ss:$36 sps:$4 sm:$0xff]  }
 0x326   :  { %v3086_v10 = vld [vmem:[#allocation4 + $0xa0] sm:$0xff]  ;;  %v10789_v54 = vld [vmem:[#allocation4 + $0xa8] ss:$36 sps:$4 sm:$0xff]   ;;  %v10813_v53 = vld [vmem:[%s14913_s4 + $0x230] sm:$0xff]  }
 0x327   :  { %v8948_v31 = vcombine.low %v3086_v10, %v3091_v17  ;;  %v3101_v20 = vld [vmem:[#allocation4 + $0x10c] sm:$0xff]  ;;  %v10792_v8 = vld [vmem:[#allocation4 + $0x134] ss:$36 sps:$4 sm:$0xff]   ;;  %v10815_v15 = vld [vmem:[%s14913_s4 + $0x238] sm:$0xff]  }
 0x328   :  { %v3096_v34 = vld [vmem:[#allocation4 + $0xe8] sm:$0xff]  ;;  %v10795_v27 = vld [vmem:[#allocation4 + $0xf0] ss:$36 sps:$4 sm:$0xff]   ;;  %v10796_v30 = vld [vmem:[#allocation4 + $0x13c] ss:$36 sps:$4 sm:$0xff]  }
 0x329   :  { %4250 = vmatmul.mubr.bf16.vlgmr.msra.gmra.mrb[64].mxu0 %v10764_v41  ;;  %v8957_v58 = vcombine.low %v3096_v34, %v3101_v20  ;;  %v3111_v43 = vld [vmem:[#allocation4 + $0x154] sm:$0xff]  ;;  %v10799_v59 = vld [vmem:[#allocation4 + $0x17c] ss:$36 sps:$4 sm:$0xff]   ;;  %v10803_v2 = vld [vmem:[#allocation4 + $0x184] ss:$36 sps:$4 sm:$0xff]  }
 0x32a   :  { %4257 = vmatprep.mubr.bf16.mxu0 %v10777_v26  ;;  %10460 = vmatpush3.bf16.msra.mxu0 %v10794_v33  ;;  %v3106_v61 = vld [vmem:[#allocation4 + $0x130] sm:$0xff]  ;;  %v10802_v45 = vld [vmem:[#allocation4 + $0x138] ss:$36 sps:$4 sm:$0xff]   ;;  %v10806_v47 = vld [vmem:[#allocation4 + $0x1c4] ss:$36 sps:$4 sm:$0x1f]  }
 0x32b   :  { %10461 = vmatprep.subr.bf16.mxu0 %v11175_v55  ;;  %4339 = vmatmul.mubr.bf16.vlgmr.msra.gmra.mrb[120].mxu1 %v10773_v24  ;;  %v8966_v51 = vcombine.low %v3106_v61, %v3111_v43  ;;  %v3121_v23 = vld [vmem:[#allocation4 + $0x19c] sm:$0xff]  ;;  %v10810_v50 = vld [vmem:[#allocation4 + $0x1cc] ss:$36 sps:$4 sm:$0x1f]   ;;  %v3131_v29 = vld [vmem:[#allocation4 + $0x1e4] sm:$0x11] }
 0x32c   :  { %4346 = vmatprep.mubr.bf16.mxu1 %v10780_v35  ;;  %v3116_v52 = vld [vmem:[#allocation4 + $0x178] sm:$0xff]  ;;  %v10809_v13 = vld [vmem:[#allocation4 + $0x180] ss:$36 sps:$4 sm:$0xff]   ;;  %v10814_v9 = vld [vmem:[#allocation4 + $0x1c8] ss:$36 sps:$4 sm:$0x1f]  }
 0x32d   :  { %v8975_v5 = vcombine.low %v3116_v52, %v3121_v23  ;;  %v3126_v25 = vld [vmem:[#allocation4 + $0x1c0] sm:$0xff]  ;;  %v10817_v57 = vld [vmem:[#allocation4 + $0x68] ss:$36 sps:$4 sm:$0xff]   ;;  %v10818_v4 = vld [vmem:[#allocation4 + $0xb0] ss:$36 sps:$4 sm:$0xff]  }
 0x32e   :  { %10462 = vmatpush3.bf16.msra.mxu0 %v10798_v40  ;;  %v8984_v0 = vcombine.low %v3126_v25, %v3131_v29  ;;  %v10816_v19 = vld [vmem:[#allocation4 + $0x20] ss:$36 sps:$4 sm:$0xff]   ;;  %v10819_v32 = vld [vmem:[#allocation4 + $0xf8] ss:$36 sps:$4 sm:$0xff]   ;;  %v10821_v22 = vld [vmem:[#allocation4 + $0x188] ss:$36 sps:$4 sm:$0xff]  }
 0x32f   :  { %10463 = vmatprep.subr.bf16.mxu0 %v11175_v55  ;;  %v10820_v38 = vld [vmem:[#allocation4 + $0x140] ss:$36 sps:$4 sm:$0xff]   ;;  %v10822_v37 = vld [vmem:[#allocation4 + $0x1d0] ss:$36 sps:$4 sm:$0x1f]  }
 0x330   :  { %v12956_v33 = vld [vmem:[%s14914_s5] ss:$0 sm:$0xff] }
 0x331   :  { %4258 = vmatmul.mubr.bf16.gmra.mrb[68].mxu0 %v8939_v62 }
 0x332   :  { %4265 = vmatprep.mubr.bf16.mxu0 %v10782_v56  ;;  %10464 = vmatpush3.bf16.msra.mxu0 %v10801_v42 }
 0x333   :  { %10465 = vmatprep.subr.bf16.mxu0 %v11175_v55  ;;  %4347 = vmatmul.mubr.bf16.gmra.mrb[124].mxu1 %v10784_v12 }
 0x334   :  { %4354 = vmatprep.mubr.bf16.mxu1 %v10785_v18 }
 0x336   :  { %10466 = vmatpush3.bf16.msra.mxu0 %v10805_v60 }
 0x337   :  { %10467 = vmatprep.subr.bf16.mxu0 %v11175_v55 }
 0x339   :  { %4266 = vmatmul.mubr.bf16.gmra.mrb[72].mxu0 %v8948_v31 }
 0x33a   :  { %4273 = vmatprep.mubr.bf16.mxu0 %v10787_v28  ;;  %10468 = vmatpush3.bf16.msra.mxu0 %v10808_v36 }
 0x33b   :  { %10469 = vmatprep.subr.bf16.mxu0 %v11175_v55  ;;  %4355 = vmatmul.mubr.bf16.gmra.mrb[128].mxu1 %v10789_v54 }
 0x33c   :  { %4362 = vmatprep.mubr.bf16.mxu1 %v10790_v44 }
 0x33e   :  { %10470 = vmatpush3.bf16.msra.mxu0 %v10812_v63 }
 0x33f   :  { %10471 = vmatprep.subr.bf16.mxu0 %v11175_v55 }
 0x341   :  { %4274 = vmatmul.mubr.bf16.gmra.mrb[76].mxu0 %v8957_v58 }
 0x342   :  { %4281 = vmatprep.mubr.bf16.mxu0 %v10792_v8  ;;  %10472 = vmatpush3.bf16.msra.mxu0 %v10813_v53 }
 0x343   :  { %10473 = vmatprep.subr.bf16.mxu0 %v11175_v55  ;;  %4363 = vmatmul.mubr.bf16.gmra.mrb[132].mxu1 %v10795_v27 }
 0x344   :  { %4370 = vmatprep.mubr.bf16.mxu1 %v10796_v30 }
 0x346   :  { %10474 = vmatpush3.bf16.msra.mxu0 %v10815_v15 }
 0x349   :  { %4282 = vmatmul.mubr.bf16.gmra.mrb[80].mxu0 %v8966_v51 }
 0x34a   :  { %4289 = vmatprep.mubr.bf16.mxu0 %v10799_v59 }
 0x34b   :  { %4371 = vmatmul.mubr.bf16.gmra.mrb[136].mxu1 %v10802_v45 }
 0x34c   :  { %4378 = vmatprep.mubr.bf16.mxu1 %v10803_v2 }
 0x351   :  { %4290 = vmatmul.mubr.bf16.gmra.mrb[84].mxu0 %v8975_v5 }
 0x352   :  { %4297 = vmatprep.mubr.bf16.mxu0 %v10806_v47 }
 0x353   :  { %4379 = vmatmul.mubr.bf16.gmra.mrb[140].mxu1 %v10809_v13 }
 0x354   :  { %4386 = vmatprep.mubr.bf16.mxu1 %v10810_v50 }
 0x359   :  { %4298 = vmatmul.mubr.bf16.gmra.mrb[88].mxu0 %v8984_v0  ;;  %v10823_v0 = vld [vmem:[%s14915_s6 + $0x40] sm:$0xff]  }
 0x35a   :  { %10475 = vmatprep.mubr.msk.bf16.mxu0 %vm11176_vm2, %v11175_v55  ;;  %10147 = vmatprep.subr.bf16.mxu1 %v10823_v0 }
 0x35b   :  { %4387 = vmatmul.mubr.bf16.gmra.mrb[144].mxu1 %v10814_v9  ;;  %v10824_v9 = vld [vmem:[%s14915_s6] sm:$0xff]  }
 0x35c   :  { %10148 = vmatpush3.bf16.msra.mxu1 %v10824_v9  ;;  %v10839_v9 = vld [vmem:[%s14915_s6 + $0x20] sm:$0xff]  }
 0x361   :  { %10476 = vmatmul.mubr.bf16.vlgmr.msra.gmra.mrb[92].mxu0 %v10816_v19  ;;  %v10825_v19 = vld [vmem:[%s14915_s6 + $0x48] sm:$0xff]  }
 0x362   :  { %10479 = vmatprep.mubr.msk.bf16.mxu0 %vm11176_vm2, %v11175_v55  ;;  %10149 = vmatprep.subr.bf16.mxu1 %v10825_v19  ;;  %v10840_v19 = vld [vmem:[%s14915_s6 + $0x98] sm:$0xff]  }
 0x369   :  { %10480 = vmatmul.mubr.bf16.gmra.mrb[96].mxu0 %v10817_v57 }
 0x36a   :  { %10483 = vmatprep.mubr.msk.bf16.mxu0 %vm11176_vm2, %v11175_v55 }
 0x371   :  { %10484 = vmatmul.mubr.bf16.gmra.mrb[100].mxu0 %v10818_v4 }
 0x372   :  { %10487 = vmatprep.mubr.msk.bf16.mxu0 %vm11176_vm2, %v11175_v55 }
 0x379   :  { %10488 = vmatmul.mubr.bf16.gmra.mrb[104].mxu0 %v10819_v32  ;;  %v10826_v32 = vld [vmem:[%s14915_s6 + $0xc0] sm:$0xff]  }
 0x37a   :  { %10491 = vmatprep.mubr.msk.bf16.mxu0 %vm11176_vm2, %v11175_v55  ;;  %10199 = vmatprep.subr.bf16.mxu0 %v10826_v32 }
 0x381   :  { %10492 = vmatmul.mubr.bf16.gmra.mrb[108].mxu0 %v10820_v38  ;;  %v10828_v38 = vld [vmem:[%s14915_s6 + $0x80] sm:$0xff]  }
 0x382   :  { %10495 = vmatprep.mubr.msk.bf16.mxu0 %vm11176_vm2, %v11175_v55  ;;  %10200 = vmatpush3.bf16.msra.mxu0 %v10828_v38 }
 0x389   :  { %10496 = vmatmul.mubr.bf16.gmra.mrb[112].mxu0 %v10821_v22 }
 0x38a   :  { %10499 = vmatprep.mubr.msk.bf16.mxu0 %vm11176_vm2, %v11175_v55 }
 0x38e   :  { %v9916_v46 = vpop.f32.mrb[36].mxu0 }
 0x38f   :  { %v9917_v3 = vpop.f32.mrb[37].mxu0 }
 0x390   :  { %v9918_v48 = vadd.f32 %v9917_v3, %v9916_v46  ;;  %v9919_v14 = vpop.f32.mrb[38].mxu0 }
 0x391   :  { %10500 = vmatmul.mubr.bf16.gmra.mrb[116].mxu0 %v10822_v37  ;;  %v9920_v1 = vpop.f32.mrb[39].mxu0 }
 0x392   :  { %v9921_v7 = vadd.f32 %v9920_v1, %v9919_v14  ;;  %v4074_v35 = vadd.f32 %v9918_v48, %v12956_v33  ;;  %v10827_v48 = vld [vmem:[%s14915_s6 + $0x8] sm:$0xff]  }
 0x393   :  { %10150 = vmatpush3.bf16.msra.mxu1 %v10827_v48  ;;  %v10842_v48 = vld [vmem:[%s14915_s6 + $0xe0] sm:$0xff]  }
 0x394   :  { %v4077_v12 = vadd.f32 %v9921_v7, %v12956_v33 }
 0x3a5   :  { %v9974_v41 = vpop.f32.mrb[92].mxu1 }
 0x3a6   :  { %v9922_v26 = vpop.f32.mrb[40].mxu0  ;;  %v9975_v24 = vpop.f32.mrb[93].mxu1 }
 0x3a7   :  { %v9923_v40 = vpop.f32.mrb[41].mxu0  ;;  %v9976_v55 = vadd.f32 %v9975_v24, %v9974_v41  ;;  %v9977_v39 = vpop.f32.mrb[94].mxu1 }
 0x3a8   :  { %v9924_v21 = vadd.f32 %v9923_v40, %v9922_v26  ;;  %v9925_v42 = vpop.f32.mrb[42].mxu0  ;;  %v9978_v62 = vpop.f32.mrb[95].mxu1 }
 0x3a9   :  { %v9926_v56 = vpop.f32.mrb[43].mxu0  ;;  %v12960_v60 = vadd.f32 %v9976_v55, %v4074_v35  ;;  %v9979_v18 = vadd.f32 %v9978_v62, %v9977_v39  ;;  %v10829_v62 = vld [vmem:[%s14915_s6 + $0x50] sm:$0xff]  }
 0x3aa   :  { %v9927_v17 = vadd.f32 %v9926_v56, %v9925_v42  ;;  %v4082_v28 = vadd.f32 %v9924_v21, %v12956_v33  ;;  %v10830_v56 = vld [vmem:[%s14915_s6 + $0xc8] sm:$0xff]   ;;  %10151 = vmatprep.subr.bf16.mxu1 %v10829_v62 }
 0x3ab   :  { %v12962_v10 = vadd.f32 %v9979_v18, %v4077_v12  ;;  %10201 = vmatprep.subr.bf16.mxu0 %v10830_v56 }
 0x3ac   :  { %v4085_v20 = vadd.f32 %v9927_v17, %v12956_v33  ;;  %v10831_v17 = vld [vmem:[%s14915_s6 + $0x10] sm:$0xff]  }
 0x3ad   :  { %10152 = vmatpush3.bf16.msra.mxu1 %v10831_v17 }
 0x3bc   :  { %v9980_v36 = vpop.f32.mrb[96].mxu1 }
 0x3bd   :  { %v9981_v31 = vpop.f32.mrb[97].mxu1 }
 0x3be   :  { %v9982_v54 = vadd.f32 %v9981_v31, %v9980_v36  ;;  %v9983_v63 = vpop.f32.mrb[98].mxu1  ;;  %v10832_v36 = vld [vmem:[%s14915_s6 + $0x88] sm:$0xff]  }
 0x3bf   :  { %v9984_v44 = vpop.f32.mrb[99].mxu1  ;;  %10202 = vmatpush3.bf16.msra.mxu0 %v10832_v36 }
 0x3c0   :  { %v12966_v34 = vadd.f32 %v9982_v54, %v4082_v28  ;;  %v9985_v53 = vadd.f32 %v9984_v44, %v9983_v63 }
 0x3c2   :  { %v12968_v58 = vadd.f32 %v9985_v53, %v4085_v20  ;;  %v10833_v53 = vld [vmem:[%s14915_s6 + $0x58] sm:$0xff]  }
 0x3c3   :  { %10153 = vmatprep.subr.bf16.mxu1 %v10833_v53 }
 0x3c5   :  { %v9928_v8 = vpop.f32.mrb[44].mxu0 }
 0x3c6   :  { %v9929_v27 = vpop.f32.mrb[45].mxu0 }
 0x3c7   :  { %v9930_v15 = vadd.f32 %v9929_v27, %v9928_v8  ;;  %v9931_v30 = vpop.f32.mrb[46].mxu0  ;;  %v10834_v8 = vld [vmem:[%s14915_s6 + $0xd0] sm:$0xff]  }
 0x3c8   :  { %v9932_v43 = vpop.f32.mrb[47].mxu0  ;;  %10203 = vmatprep.subr.bf16.mxu0 %v10834_v8 }
 0x3c9   :  { %v9986_v61 = vpop.f32.mrb[100].mxu1  ;;  %v9933_v51 = vadd.f32 %v9932_v43, %v9931_v30  ;;  %v4090_v45 = vadd.f32 %v9930_v15, %v12956_v33  ;;  %v10835_v43 = vld [vmem:[%s14915_s6 + $0x18] sm:$0xff]  }
 0x3ca   :  { %v9987_v59 = vpop.f32.mrb[101].mxu1  ;;  %10154 = vmatpush3.bf16.msra.mxu1 %v10835_v43  ;;  %v10846_v43 = vld [vmem:[%s14915_s6 + $0xe8] sm:$0xff]  }
 0x3cb   :  { %v9988_v2 = vadd.f32 %v9987_v59, %v9986_v61  ;;  %v9989_v23 = vpop.f32.mrb[102].mxu1  ;;  %v4093_v5 = vadd.f32 %v9933_v51, %v12956_v33  ;;  %v10836_v61 = vld [vmem:[%s14915_s6 + $0x90] sm:$0xff]  }
 0x3cc   :  { %v9990_v52 = vpop.f32.mrb[103].mxu1  ;;  %10204 = vmatpush3.bf16.msra.mxu0 %v10836_v61 }
 0x3cd   :  { %v12972_v47 = vadd.f32 %v9988_v2, %v4090_v45  ;;  %v9991_v13 = vadd.f32 %v9990_v52, %v9989_v23  ;;  %v9934_v50 = vpop.f32.mrb[48].mxu0 }
 0x3ce   :  { %v9935_v29 = vpop.f32.mrb[49].mxu0 }
 0x3cf   :  { %v12974_v25 = vadd.f32 %v9991_v13, %v4093_v5  ;;  %v9936_v57 = vadd.f32 %v9935_v29, %v9934_v50  ;;  %v9937_v4 = vpop.f32.mrb[50].mxu0  ;;  %v10837_v13 = vld [vmem:[%s14915_s6 + $0x60] sm:$0xff]   ;;  %v10838_v50 = vld [vmem:[%s14915_s6 + $0xd8] sm:$0xff]  }
 0x3d0   :  { %v9938_v22 = vpop.f32.mrb[51].mxu0  ;;  %10155 = vmatprep.subr.bf16.mxu1 %v10837_v13  ;;  %10205 = vmatprep.subr.bf16.mxu0 %v10838_v50 }
 0x3d1   :  { %v9939_v46 = vadd.f32 %v9938_v22, %v9937_v4  ;;  %v4098_v14 = vadd.f32 %v9936_v57, %v12956_v33  ;;  %10156 = vmatpush3.bf16.msra.mxu1 %v10839_v9  ;;  %10206 = vmatpush3.bf16.msra.mxu0 %v10840_v19  ;;  %v10851_v19 = vld [vmem:[%s14915_s6 + $0x38] sm:$0xff]  }
 0x3d2   :  { %10207 = vmatprep.subr.bf16.mxu0 %v10842_v48 }
 0x3d3   :  { %v9992_v37 = vpop.f32.mrb[104].mxu1  ;;  %v4101_v26 = vadd.f32 %v9939_v46, %v12956_v33 }
 0x3d4   :  { %v9993_v3 = vpop.f32.mrb[105].mxu1 }
 0x3d5   :  { %v9994_v1 = vadd.f32 %v9993_v3, %v9992_v37  ;;  %v9995_v7 = vpop.f32.mrb[106].mxu1  ;;  %v10841_v3 = vld [vmem:[%s14915_s6 + $0x68] sm:$0xff]  }
 0x3d6   :  { %v9996_v41 = vpop.f32.mrb[107].mxu1  ;;  %10157 = vmatprep.subr.bf16.mxu1 %v10841_v3 }
 0x3d7   :  { %v12996_v24 = vadd.f32 %v9994_v1, %v4098_v14  ;;  %v9997_v40 = vadd.f32 %v9996_v41, %v9995_v7  ;;  %v10843_v1 = vld [vmem:[%s14915_s6 + $0x28] sm:$0xff]   ;;  %v10844_v7 = vld [vmem:[%s14915_s6 + $0xa0] sm:$0xff]  }
 0x3d8   :  { %10158 = vmatpush3.bf16.msra.mxu1 %v10843_v1  ;;  %10208 = vmatpush3.bf16.msra.mxu0 %v10844_v7 }
 0x3d9   :  { %v12998_v55 = vadd.f32 %v9997_v40, %v4101_v26  ;;  %10209 = vmatprep.subr.bf16.mxu0 %v10846_v43 }
 0x3dc   :  { %v9940_v35 = vpop.f32.mrb[52].mxu0 }
 0x3dd   :  { %v9941_v39 = vpop.f32.mrb[53].mxu0 }
 0x3de   :  { %v9942_v21 = vadd.f32 %v9941_v39, %v9940_v35  ;;  %v9943_v42 = vpop.f32.mrb[54].mxu0 }
 0x3df   :  { %v9944_v12 = vpop.f32.mrb[55].mxu0 }
 0x3e0   :  { %v9945_v31 = vadd.f32 %v9944_v12, %v9943_v42  ;;  %v4106_v54 = vadd.f32 %v9942_v21, %v12956_v33 }
 0x3e2   :  { %v9998_v18 = vpop.f32.mrb[108].mxu1  ;;  %v4109_v27 = vadd.f32 %v9945_v31, %v12956_v33 }
 0x3e3   :  { %v9999_v28 = vpop.f32.mrb[109].mxu1 }
 0x3e4   :  { %v10000_v63 = vadd.f32 %v9999_v28, %v9998_v18  ;;  %v10001_v44 = vpop.f32.mrb[110].mxu1 }
 0x3e5   :  { %v10002_v20 = vpop.f32.mrb[111].mxu1 }
 0x3e6   :  { %v13020_v15 = vadd.f32 %v10000_v63, %v4106_v54  ;;  %v10003_v30 = vadd.f32 %v10002_v20, %v10001_v44 }
 0x3e8   :  { %v13028_v59 = vadd.f32 %v10003_v30, %v4109_v27  ;;  %v10845_v30 = vld [vmem:[%s14915_s6 + $0x70] sm:$0xff]  }
 0x3e9   :  { %10159 = vmatprep.subr.bf16.mxu1 %v10845_v30  ;;  %v10856_v30 = vld [vmem:[%s14915_s6 + $0xf8] sm:$0xff]  }
 0x3ea   :  { %v9946_v51 = vpop.f32.mrb[56].mxu0 }
 0x3eb   :  { %v9947_v45 = vpop.f32.mrb[57].mxu0 }
 0x3ec   :  { %v9948_v2 = vadd.f32 %v9947_v45, %v9946_v51  ;;  %v9949_v23 = vpop.f32.mrb[58].mxu0  ;;  %v10847_v45 = vld [vmem:[%s14915_s6 + $0x30] sm:$0xff]  }
 0x3ed   :  { %v9950_v52 = vpop.f32.mrb[59].mxu0  ;;  %10160 = vmatpush3.bf16.msra.mxu1 %v10847_v45 }
 0x3ee   :  { %v10004_v5 = vpop.f32.mrb[112].mxu1  ;;  %v9951_v29 = vadd.f32 %v9950_v52, %v9949_v23  ;;  %v4114_v57 = vadd.f32 %v9948_v2, %v12956_v33  ;;  %v10848_v2 = vld [vmem:[%s14915_s6 + $0xa8] sm:$0xff]  }
 0x3ef   :  { %v10005_v0 = vpop.f32.mrb[113].mxu1  ;;  %10210 = vmatpush3.bf16.msra.mxu0 %v10848_v2 }
 0x3f0   :  { %v10006_v4 = vadd.f32 %v10005_v0, %v10004_v5  ;;  %v10007_v32 = vpop.f32.mrb[114].mxu1  ;;  %v4117_v22 = vadd.f32 %v9951_v29, %v12956_v33  ;;  %v10849_v29 = vld [vmem:[%s14915_s6 + $0x78] sm:$0xff]   ;;  %v10850_v0 = vld [vmem:[%s14915_s6 + $0xf0] sm:$0xff]  }
 0x3f1   :  { %v10008_v38 = vpop.f32.mrb[115].mxu1  ;;  %10161 = vmatprep.subr.bf16.mxu1 %v10849_v29  ;;  %10211 = vmatprep.subr.bf16.mxu0 %v10850_v0 }
 0x3f2   :  { %v13044_v37 = vadd.f32 %v10006_v4, %v4114_v57  ;;  %v10009_v46 = vadd.f32 %v10008_v38, %v10007_v32  ;;  %10162 = vmatpush3.bf16.msra.mxu1 %v10851_v19 }
 0x3f4   :  { %v9952_v14 = vpop.f32.mrb[60].mxu0  ;;  %v13058_v41 = vadd.f32 %v10009_v46, %v4117_v22 }
 0x3f5   :  { %v9953_v26 = vpop.f32.mrb[61].mxu0 }
 0x3f6   :  { %v9954_v40 = vadd.f32 %v9953_v26, %v9952_v14  ;;  %v9955_v35 = vpop.f32.mrb[62].mxu0  ;;  %v10010_v21 = vpop.f32.mrb[116].mxu1 }
 0x3f7   :  { %v9956_v39 = vpop.f32.mrb[63].mxu0  ;;  %v10011_v62 = vpop.f32.mrb[117].mxu1 }
 0x3f8   :  { %v9957_v42 = vadd.f32 %v9956_v39, %v9955_v35  ;;  %v4122_v56 = vadd.f32 %v9954_v40, %v12956_v33  ;;  %v10012_v12 = vadd.f32 %v10011_v62, %v10010_v21  ;;  %v10013_v18 = vpop.f32.mrb[118].mxu1 }
 0x3f9   :  { %v10014_v17 = vpop.f32.mrb[119].mxu1 }
 0x3fa   :  { %v4125_v36 = vadd.f32 %v9957_v42, %v12956_v33  ;;  %v13062_v31 = vadd.f32 %v10012_v12, %v4122_v56  ;;  %v10015_v28 = vadd.f32 %v10014_v17, %v10013_v18 }
 0x3fc   :  { %v10032_v54 = vpop.f32.mrb[64].mxu0  ;;  %v13064_v63 = vadd.f32 %v10015_v28, %v4125_v36 }
 0x3fd   :  { %v10033_v44 = vpop.f32.mrb[65].mxu0 }
 0x3fe   :  { %v10034_v20 = vadd.f32 %v10033_v44, %v10032_v54  ;;  %v10035_v53 = vpop.f32.mrb[66].mxu0  ;;  %v10090_v27 = vpop.f32.mrb[120].mxu1 }
 0x3ff   :  { %v10036_v8 = vpop.f32.mrb[67].mxu0  ;;  %v10091_v51 = vpop.f32.mrb[121].mxu1 }
 0x400   :  { %v4252_v33 = vadd.f32 %v10034_v20, %v12960_v60  ;;  %v10037_v61 = vadd.f32 %v10036_v8, %v10035_v53  ;;  %v10092_v23 = vadd.f32 %v10091_v51, %v10090_v27  ;;  %v10093_v52 = vpop.f32.mrb[122].mxu1 }
 0x401   :  { %v10094_v13 = vpop.f32.mrb[123].mxu1 }
 0x402   :  { %v4255_v5 = vadd.f32 %v10037_v61, %v12962_v10  ;;  %v10095_v60 = vadd.f32 %v10094_v13, %v10093_v52  ;;  %v13080_v50 = vadd.f32 %v10092_v23, %v4252_v33  ;;  %v10852_v10 = vld [vmem:[%s14915_s6 + $0xb0] sm:$0xff]  }
 0x403   :  { %10212 = vmatpush3.bf16.msra.mxu0 %v10852_v10 }
 0x404   :  { %v10038_v9 = vpop.f32.mrb[68].mxu0  ;;  %v13094_v4 = vadd.f32 %v10095_v60, %v4255_v5  ;;  %10213 = vmatprep.subr.bf16.mxu0 %v10856_v30 }
 0x405   :  { %v10039_v57 = vpop.f32.mrb[69].mxu0 }
 0x406   :  { %v10040_v32 = vadd.f32 %v10039_v57, %v10038_v9  ;;  %v10041_v38 = vpop.f32.mrb[70].mxu0  ;;  %v10096_v46 = vpop.f32.mrb[124].mxu1 }
 0x407   :  { %v10042_v22 = vpop.f32.mrb[71].mxu0  ;;  %v10097_v14 = vpop.f32.mrb[125].mxu1 }
 0x408   :  { %v4260_v3 = vadd.f32 %v10040_v32, %v12966_v34  ;;  %v10043_v48 = vadd.f32 %v10042_v22, %v10041_v38  ;;  %v10098_v1 = vadd.f32 %v10097_v14, %v10096_v46  ;;  %v10099_v7 = vpop.f32.mrb[126].mxu1 }
 0x409   :  { %v10100_v40 = vpop.f32.mrb[127].mxu1 }
 0x40a   :  { %v4263_v26 = vadd.f32 %v10043_v48, %v12968_v58  ;;  %v10101_v35 = vadd.f32 %v10100_v40, %v10099_v7  ;;  %v13098_v39 = vadd.f32 %v10098_v1, %v4260_v3 }
 0x40c   :  { %v10044_v21 = vpop.f32.mrb[72].mxu0  ;;  %v13100_v62 = vadd.f32 %v10101_v35, %v4263_v26 }
 0x40d   :  { %v10045_v42 = vpop.f32.mrb[73].mxu0 }
 0x40e   :  { %v10046_v56 = vadd.f32 %v10045_v42, %v10044_v21  ;;  %v10047_v12 = vpop.f32.mrb[74].mxu0  ;;  %v10102_v17 = vpop.f32.mrb[128].mxu1 }
 0x40f   :  { %v10048_v18 = vpop.f32.mrb[75].mxu0  ;;  %v10103_v28 = vpop.f32.mrb[129].mxu1 }
 0x410   :  { %v4268_v34 = vadd.f32 %v10046_v56, %v12972_v47  ;;  %v10049_v36 = vadd.f32 %v10048_v18, %v10047_v12  ;;  %v10104_v54 = vadd.f32 %v10103_v28, %v10102_v17  ;;  %v10105_v44 = vpop.f32.mrb[130].mxu1  ;;  %v10857_v47 = vld [vmem:[%s14915_s6 + $0xb8] sm:$0xff]  }
 0x411   :  { %v10106_v20 = vpop.f32.mrb[131].mxu1  ;;  %10214 = vmatpush3.bf16.msra.mxu0 %v10857_v47 }
 0x412   :  { %v4271_v58 = vadd.f32 %v10049_v36, %v12974_v25  ;;  %v10107_v53 = vadd.f32 %v10106_v20, %v10105_v44  ;;  %v13104_v8 = vadd.f32 %v10104_v54, %v4268_v34 }
 0x414   :  { %v10050_v27 = vpop.f32.mrb[76].mxu0  ;;  %v13109_v33 = vadd.f32 %v10107_v53, %v4271_v58 }
 0x415   :  { %v10051_v43 = vpop.f32.mrb[77].mxu0 }
 0x416   :  { %v10052_v61 = vadd.f32 %v10051_v43, %v10050_v27  ;;  %v10053_v51 = vpop.f32.mrb[78].mxu0  ;;  %v10108_v45 = vpop.f32.mrb[132].mxu1 }
 0x417   :  { %v10054_v25 = vpop.f32.mrb[79].mxu0  ;;  %v10109_v52 = vpop.f32.mrb[133].mxu1 }
 0x418   :  { %v4276_v2 = vadd.f32 %v10052_v61, %v12996_v24  ;;  %v10055_v23 = vadd.f32 %v10054_v25, %v10053_v51  ;;  %v10110_v5 = vadd.f32 %v10109_v52, %v10108_v45  ;;  %v10111_v13 = vpop.f32.mrb[134].mxu1 }
 0x419   :  { %v10112_v29 = vpop.f32.mrb[135].mxu1 }
 0x41a   :  { %v4279_v60 = vadd.f32 %v10055_v23, %v12998_v55  ;;  %v10113_v0 = vadd.f32 %v10112_v29, %v10111_v13  ;;  %v13116_v9 = vadd.f32 %v10110_v5, %v4276_v2  ;;  %v10876_v13 = vld [vmem:[%s14915_s6 + $0x1c0] sm:$0xff]  }
 0x41b   :  { %10303 = vmatprep.subr.bf16.mxu0 %v10876_v13 }
 0x41c   :  { %v10056_v19 = vpop.f32.mrb[80].mxu0  ;;  %v13118_v57 = vadd.f32 %v10113_v0, %v4279_v60 }
 0x41d   :  { %v10057_v10 = vpop.f32.mrb[81].mxu0 }
 0x41e   :  { %v10058_v32 = vadd.f32 %v10057_v10, %v10056_v19  ;;  %v10059_v38 = vpop.f32.mrb[82].mxu0  ;;  %v10114_v46 = vpop.f32.mrb[136].mxu1 }
 0x41f   :  { %v10060_v22 = vpop.f32.mrb[83].mxu0  ;;  %v10115_v48 = vpop.f32.mrb[137].mxu1 }
 0x420   :  { %v4284_v24 = vadd.f32 %v10058_v32, %v13020_v15  ;;  %v10061_v3 = vadd.f32 %v10060_v22, %v10059_v38  ;;  %v10116_v14 = vadd.f32 %v10115_v48, %v10114_v46  ;;  %v10117_v1 = vpop.f32.mrb[138].mxu1 }
 0x421   :  { %v10118_v7 = vpop.f32.mrb[139].mxu1 }
 0x422   :  { %v4287_v55 = vadd.f32 %v10061_v3, %v13028_v59  ;;  %v10119_v26 = vadd.f32 %v10118_v7, %v10117_v1  ;;  %v13122_v40 = vadd.f32 %v10116_v14, %v4284_v24 }
 0x424   :  { %v10062_v35 = vpop.f32.mrb[84].mxu0  ;;  %v13124_v42 = vadd.f32 %v10119_v26, %v4287_v55 }
 0x425   :  { %v10063_v21 = vpop.f32.mrb[85].mxu0 }
 0x426   :  { %v10064_v56 = vadd.f32 %v10063_v21, %v10062_v35  ;;  %v10065_v12 = vpop.f32.mrb[86].mxu0  ;;  %v10120_v17 = vpop.f32.mrb[140].mxu1 }
 0x427   :  { %v10066_v18 = vpop.f32.mrb[87].mxu0  ;;  %v10121_v36 = vpop.f32.mrb[141].mxu1 }
 0x428   :  { %v4292_v15 = vadd.f32 %v10064_v56, %v13044_v37  ;;  %v10067_v34 = vadd.f32 %v10066_v18, %v10065_v12  ;;  %v10122_v28 = vadd.f32 %v10121_v36, %v10120_v17  ;;  %v10123_v54 = vpop.f32.mrb[142].mxu1 }
 0x429   :  { %v10124_v44 = vpop.f32.mrb[143].mxu1 }
 0x42a   :  { %v4295_v59 = vadd.f32 %v10067_v34, %v13058_v41  ;;  %v10125_v58 = vadd.f32 %v10124_v44, %v10123_v54  ;;  %v13128_v20 = vadd.f32 %v10122_v28, %v4292_v15  ;;  %v10870_v41 = vld [vmem:[%s14915_s6 + $0x140] sm:$0xff]  }
 0x42b   :  { %10251 = vmatprep.subr.bf16.mxu1 %v10870_v41 }
 0x42c   :  { %v10068_v53 = vpop.f32.mrb[88].mxu0  ;;  %v13130_v30 = vadd.f32 %v10125_v58, %v4295_v59 }
 0x42d   :  { %v10069_v27 = vpop.f32.mrb[89].mxu0 }
 0x42e   :  { %v10070_v43 = vadd.f32 %v10069_v27, %v10068_v53  ;;  %v10071_v47 = vpop.f32.mrb[90].mxu0  ;;  %v10126_v51 = vpop.f32.mrb[144].mxu1 }
 0x42f   :  { %v10072_v61 = vpop.f32.mrb[91].mxu0  ;;  %v10127_v45 = vpop.f32.mrb[145].mxu1 }
 0x430   :  { %v4300_v37 = vadd.f32 %v10070_v43, %v13062_v31  ;;  %v10073_v25 = vadd.f32 %v10072_v61, %v10071_v47  ;;  %v10128_v2 = vadd.f32 %v10127_v45, %v10126_v51  ;;  %v10129_v23 = vpop.f32.mrb[146].mxu1 }
 0x431   :  { %v10130_v5 = vpop.f32.mrb[147].mxu1 }
 0x432   :  { %v4303_v52 = vadd.f32 %v10073_v25, %v13064_v63  ;;  %v10131_v60 = vadd.f32 %v10130_v5, %v10129_v23  ;;  %v13140_v29 = vadd.f32 %v10128_v2, %v4300_v37 }
 0x434   :  { %v4429_v31 = vpop.f32.mrb[92].mxu0  ;;  %v13143_v10 = vadd.f32 %v10131_v60, %v4303_v52 }
 0x435   :  { %v4430_v0 = vadd.f32 %v4429_v31, %v13080_v50  ;;  %v10477_v19 = vpop.f32.mrb[93].mxu0 }
 0x436   :  { %v4432_v32 = vpop.f32.mrb[94].mxu0 }
 0x437   :  { %v4498_v38 = vmul.f32 0.01, %v4430_v0  ;;  %v4433_v63 = vadd.f32 %v4432_v32, %v13094_v4  ;;  %v10478_v22 = vpop.f32.mrb[95].mxu0  ;;  %vm4484_vm3 = vcmp.ge.f32.partialorder %v4430_v0, 0.0 }
 0x439   :  { %vm4485_vm4 = vcmp.ge.f32.partialorder %v4433_v63, 0.0  ;;  %v4499_v46 = vmul.f32 0.01, %v4433_v63  ;;  %v4512_v24 = vsel %vm4484_vm3, %v4430_v0, %v4498_v38 }
 0x43b   :  { %v4513_v3 = vsel %vm4485_vm4, %v4433_v63, %v4499_v46 }
 0x43c   :  { %v9670_v48 = vpack.c.bf16 %v4513_v3, %v4512_v24  ;;  %v4437_v14 = vpop.f32.mrb[96].mxu0 }
 0x43d   :  { %v4438_v1 = vadd.f32 %v4437_v14, %v13098_v39  ;;  %v10481_v55 = vpop.f32.mrb[97].mxu0 }
 0x43e   :  { %9671 = vst [vmem:[#allocation5] sm:$0xff] %v9670_v48   ;;  %v4440_v50 = vpop.f32.mrb[98].mxu0 }
 0x43f   :  { %v4500_v7 = vmul.f32 0.01, %v4438_v1  ;;  %v4441_v26 = vadd.f32 %v4440_v50, %v13100_v62  ;;  %v10482_v35 = vpop.f32.mrb[99].mxu0  ;;  %vm4486_vm0 = vcmp.ge.f32.partialorder %v4438_v1, 0.0 }
 0x441   :  { %vm4487_vm5 = vcmp.ge.f32.partialorder %v4441_v26, 0.0  ;;  %v4501_v4 = vmul.f32 0.01, %v4441_v26  ;;  %v4514_v21 = vsel %vm4486_vm0, %v4438_v1, %v4500_v7 }
 0x443   :  { %v4515_v56 = vsel %vm4487_vm5, %v4441_v26, %v4501_v4 }
 0x444   :  { %v9675_v12 = vpack.c.bf16 %v4515_v56, %v4514_v21  ;;  %v4445_v18 = vpop.f32.mrb[100].mxu0 }
 0x445   :  { %v4618_v17 = vld [vmem:[#allocation5] sm:$0xf]  ;;  %v4619_v15 = vld [vmem:[#allocation5 + $0x4] sm:$0xf]  ;;  %v4446_v36 = vadd.f32 %v4445_v18, %v13104_v8  ;;  %v10485_v2 = vpop.f32.mrb[101].mxu0 }
 0x446   :  { %v4760_v34 = vld [vmem:[#allocation5] sm:$0xe]  ;;  %v4630_v39 = vshrl.u32 %v4618_v17, 16  ;;  %v4633_v28 = vshll.u32 %v4618_v17, 16  ;;  %v4639_v54 = vshll.u32 %v4619_v15, 16  ;;  %v4643_v59 = vshrl.u32 %v4619_v15, 16 }
 0x447   :  { %v4761_v44 = vld [vmem:[#allocation5 + $0x4] sm:$0xf]  ;;  %9733 = vst [vmem:[#allocation5 + $0x8] sm:$0xff] %v9675_v12   ;;  %v9075_v61 = vrot.slane %v4760_v34, 9  ;;  %v4448_v13 = vpop.f32.mrb[102].mxu0  ;;  %vm4488_vm6 = vcmp.ge.f32.partialorder %v4446_v36, 0.0 }
 0x448   :  { %v4784_v62 = vrot.slane %v4761_v44, 5  ;;  %v4836_v58 = vld [vmem:[#allocation5 + $0x4] sm:$0xf]  ;;  %v4632_v27 = vrot.slane %v4630_v39, 4  ;;  %v4635_v43 = vrot.slane %v4633_v28, 5  ;;  %v13151_v47 = vrot.slane %v4639_v54, 5 }
 0x449   :  { %v13149_v53 = vld [vmem:[#allocation5 + $0x4] sm:$0xe]  ;;  %v13153_v37 = vrot.slane %v4643_v59, 4  ;;  %v4848_v8 = vshrl.u32 %v4836_v58, 16  ;;  %v4851_v45 = vshll.u32 %v4836_v58, 16  ;;  %v10486_v32 = vpop.f32.mrb[103].mxu0  ;;  %v13167_v22 = vadd.f32 %v4448_v13, %v13109_v33 }
 0x44a   :  { %v5054_v51 = vld [vmem:[#allocation5 + $0x4] sm:$0xe]  ;;  %v13155_v25 = vrot.slane %v4784_v62, 4  ;;  %v4636_v23 = vor.u32 %v4635_v43, %v4632_v27  ;;  %v4596_v60 = vld [vmem:[#allocation5] sm:$0xf]  ;;  %v4785_v7 = vsel %vm11759_vm9, %v9075_v61, %v4784_v62 }
 0x44b   :  { %v5067_v52 = vshrl.u32 %v5054_v51, 16  ;;  %v5070_v5 = vshll.u32 %v5054_v51, 16  ;;  %v13158_v31 = vrot.slane %v4848_v8, 4  ;;  %v13160_v0 = vrot.slane %v4851_v45, 5  ;;  %4607 = vst [vmem:[#allocation6] sm:$0xf] %v4596_v60 }
 0x44c   :  { %v4502_v19 = vmul.f32 0.01, %v4446_v36  ;;  %v4453_v46 = vpop.f32.mrb[104].mxu0  ;;  %v4597_v24 = vld [vmem:[#allocation5 + $0x4] sm:$0xf]  ;;  %v13169_v3 = vrot.slane %v4636_v23, 4 }
 0x44d   :  { %v13162_v38 = vrot.slane %v5067_v52, 5  ;;  %v13164_v63 = vrot.slane %v5070_v5, 6  ;;  %v13176_v50 = vadd.f32 %v4453_v46, %v13116_v9  ;;  %4608 = vst [vmem:[#allocation6 + $0x24] sm:$0xf] %v4597_v24  ;;  %v10489_v56 = vpop.f32.mrb[105].mxu0  ;;  %vm4489_vm7 = vcmp.ge.f32.partialorder %v13167_v22, 0.0 }
 0x44e   :  { %v4620_v14 = vld [vmem:[#allocation5 + $0x8] sm:$0xf]  ;;  %v4621_v1 = vld [vmem:[#allocation5 + $0xc] sm:$0xf]  ;;  %4825 = vst [vmem:[#allocation6 + $0x8] sm:$0xf] %v4785_v7  ;;  %v13187_v15 = vsel %vm4488_vm6, %v4446_v36, %v4502_v19 }
 0x44f   :  { %v13173_v55 = vld [vmem:[#allocation5 + $0x8] sm:$0xf]  ;;  %v4649_v26 = vshll.u32 %v4620_v14, 16  ;;  %v4653_v35 = vshrl.u32 %v4620_v14, 16  ;;  %v4659_v4 = vshll.u32 %v4621_v1, 16  ;;  %v4663_v12 = vshrl.u32 %v4621_v1, 16 }
 0x450   :  { %v13182_v21 = vld [vmem:[#allocation5 + $0xc] sm:$0xf]  ;;  %v14986_v18 = vrot.slane %v13173_v55, 5  ;;  %v4837_v17 = vld [vmem:[#allocation5 + $0x8] sm:$0xf]  ;;  %v4456_v2 = vpop.f32.mrb[106].mxu0 }
 0x451   :  { %v14985_v9 = vrot.slane %v13182_v21, 5  ;;  %v13189_v34 = vrot.slane %v4649_v26, 5  ;;  %v13191_v39 = vrot.slane %v4653_v35, 4  ;;  %v13193_v28 = vrot.slane %v4659_v4, 5  ;;  %v4838_v54 = vld [vmem:[#allocation5 + $0xc] sm:$0xf] }
 0x452   :  { %v4857_v59 = vshll.u32 %v4837_v17, 16  ;;  %v13195_v44 = vrot.slane %v4663_v12, 4  ;;  %v13199_v62 = vrot.slane %v14986_v18, 4  ;;  %v4861_v36 = vshrl.u32 %v4837_v17, 16  ;;  %v13205_v27 = vld [vmem:[#allocation5 + $0x8] sm:$0xf] }
 0x453   :  { %v13203_v58 = vrot.slane %v14985_v9, 4  ;;  %v4867_v51 = vshll.u32 %v4838_v54, 16  ;;  %v4871_v8 = vshrl.u32 %v4838_v54, 16  ;;  %v13211_v45 = vld [vmem:[#allocation5 + $0xc] sm:$0xf]  ;;  %v14984_v5 = vrot.slane %v13205_v27, 5 }
 0x454   :  { %v13209_v61 = vrot.slane %v4857_v59, 5  ;;  %v13216_v52 = vrot.slane %v4861_v36, 4  ;;  %v14983_v13 = vrot.slane %v13211_v45, 5  ;;  %v5055_v60 = vld [vmem:[#allocation5 + $0x8] sm:$0xf]  ;;  %v10490_v19 = vpop.f32.mrb[107].mxu0 }
 0x455   :  { %15224 = vst [vmem:[#allocation35_spill] sm:$0xff] %v13203_v58  ;;  %v13220_v32 = vrot.slane %v4867_v51, 5  ;;  %v13222_v46 = vrot.slane %v4871_v8, 4  ;;  %v5056_v24 = vld [vmem:[#allocation5 + $0xc] sm:$0xf]  ;;  %v5076_v14 = vshrl.u32 %v5055_v60, 16 }
 0x456   :  { %v5079_v1 = vshll.u32 %v5055_v60, 16  ;;  %v13228_v26 = vrot.slane %v14984_v5, 4  ;;  %v13232_v35 = vrot.slane %v14983_v13, 4  ;;  %v5086_v4 = vshrl.u32 %v5056_v24, 16  ;;  %v13234_v56 = vld [vmem:[#allocation5 + $0x8] sm:$0xe] }
 0x457   :  { %v4461_v12 = vpop.f32.mrb[108].mxu0  ;;  %v13238_v54 = vrot.slane %v5076_v14, 5  ;;  %v5089_v36 = vshll.u32 %v5056_v24, 16  ;;  %v13242_v51 = vld [vmem:[#allocation5 + $0xc] sm:$0xf]  ;;  %vm4490_vm8 = vcmp.ge.f32.partialorder %v13176_v50, 0.0 }
 0x458   :  { %15225 = vst [vmem:[#allocation20_spill] sm:$0xff] %v13232_v35  ;;  %v13240_v59 = vrot.slane %v5079_v1, 6  ;;  %v10493_v8 = vpop.f32.mrb[109].mxu0  ;;  %v13244_v60 = vrot.slane %v5086_v4, 5  ;;  %v14987_v43 = vrot.slane %v13242_v51, 5  ;;  %v4457_v1 = vadd.f32 %v4456_v2, %v13118_v57 }
 0x459   :  { %v5278_v13 = vld [vmem:[#allocation5 + $0x8] sm:$0xe]  ;;  %v13249_v41 = vrot.slane %v5089_v36, 6  ;;  %v5279_v5 = vld [vmem:[#allocation5 + $0xc] sm:$0xf]  ;;  %v4464_v24 = vpop.f32.mrb[110].mxu0  ;;  %v4462_v23 = vadd.f32 %v4461_v12, %v13122_v40  ;;  %v4874_v40 = vor.u32 %v13222_v46, %v13220_v32 }
 0x45a   :  { %v5291_v14 = vshrl.u32 %v5278_v13, 16  ;;  %v5294_v9 = vshll.u32 %v5278_v13, 16  ;;  %v13254_v8 = vrot.slane %v14987_v43, 4  ;;  %v5300_v4 = vshrl.u32 %v5279_v5, 16  ;;  %v13256_v19 = vld [vmem:[#allocation5 + $0x8] sm:$0xc] }
 0x45b   :  { %v5303_v7 = vshll.u32 %v5279_v5, 16  ;;  %v10494_v17 = vpop.f32.mrb[111].mxu0  ;;  %v13263_v18 = vld [vmem:[#allocation5 + $0xc] sm:$0xf]  ;;  %vm4491_vm11 = vcmp.ge.f32.partialorder %v4457_v1, 0.0  ;;  %vm4492_vm12 = vcmp.ge.f32.partialorder %v4462_v23, 0.0  ;;  %v4465_v57 = vadd.f32 %v4464_v24, %v13124_v42 }
 0x45c   :  { %15226 = vst [vmem:[#allocation37_spill] sm:$0xff] %v13254_v8  ;;  %v13259_v33 = vrot.slane %v5291_v14, 5  ;;  %v13261_v36 = vrot.slane %v5294_v9, 6  ;;  %v13266_v2 = vrot.slane %v5300_v4, 5  ;;  %v14988_v5 = vrot.slane %v13263_v18, 6  ;;  %v4469_v17 = vpop.f32.mrb[112].mxu0 }
 0x45d   :  { %v13268_v13 = vrot.slane %v5303_v7, 6  ;;  %v4503_v43 = vmul.f32 0.01, %v13167_v22  ;;  %v4504_v12 = vmul.f32 0.01, %v13176_v50  ;;  %v10497_v48 = vpop.f32.mrb[113].mxu0  ;;  %v15234_v24 = vor.u32 %v13160_v0, %v13158_v31 }
 0x45e   :  { %15227 = vst [vmem:[#allocation40_spill] sm:$0xff] %v13259_v33  ;;  %15228 = vst [vmem:[#allocation33_spill] sm:$0xff] %v13261_v36  ;;  %v4505_v9 = vmul.f32 0.01, %v4457_v1  ;;  %v13277_v14 = vrot.slane %v14988_v5, 4  ;;  %v4470_v5 = vadd.f32 %v4469_v17, %v13128_v20  ;;  %vm4493_vm14 = vcmp.ge.f32.partialorder %v4465_v57, 0.0 }
 0x45f   :  { %15229 = vst [vmem:[#allocation50_spill] sm:$0xff] %v13266_v2  ;;  %15230 = vst [vmem:[#allocation36_spill] sm:$0xff] %v13268_v13  ;;  %v4517_v7 = vsel %vm4489_vm7, %v13167_v22, %v4503_v43  ;;  %v4506_v4 = vmul.f32 0.01, %v4462_v23  ;;  %v4598_v35 = vld [vmem:[#allocation5 + $0x8] sm:$0xf]  ;;  %v4518_v8 = vsel %vm4490_vm8, %v13176_v50, %v4504_v12  ;;  %v4642_v50 = vsel %vm11772_vm10, %v13169_v3, %v13151_v47 }
 0x460   :  { %15231 = vst [vmem:[#allocation38_spill] sm:$0xff] %v13277_v14  ;;  %v9680_v46 = vpack.c.bf16 %v4517_v7, %v13187_v15  ;;  %v4519_v58 = vsel %vm4491_vm11, %v4457_v1, %v4505_v9  ;;  %v4472_v14 = vpop.f32.mrb[114].mxu0  ;;  %v4599_v13 = vld [vmem:[#allocation5 + $0xc] sm:$0xf]  ;;  %4609 = vst [vmem:[#allocation6 + $0x48] sm:$0xf] %v4598_v35  ;;  %v15232_v20 = vor.u32 %v13153_v37, %v13151_v47 }
 0x461   :  { %v9685_v2 = vpack.c.bf16 %v4519_v58, %v4518_v8  ;;  %v4520_v22 = vsel %vm4492_vm12, %v4462_v23, %v4506_v4  ;;  %v4507_v42 = vmul.f32 0.01, %v4465_v57  ;;  %v10498_v48 = vpop.f32.mrb[115].mxu0  ;;  %4610 = vst [vmem:[#allocation6 + $0x6c] sm:$0xf] %v4599_v13  ;;  %vm4494_vm15 = vcmp.ge.f32.partialorder %v4470_v5, 0.0 }
 0x462   :  { %9734 = vst [vmem:[#allocation5 + $0x10] sm:$0xff] %v9680_v46   ;;  %v4508_v15 = vmul.f32 0.01, %v4470_v5  ;;  %v4647_v43 = vrot.slane %v15232_v20, 4  ;;  %4749 = vst [vmem:[#allocation6 + $0x4] sm:$0xf] %v4642_v50  ;;  %v4473_v23 = vadd.f32 %v4472_v14, %v13130_v30  ;;  %v15235_v30 = vor.u32 %v13216_v52, %v13209_v61 }
 0x463   :  { %9735 = vst [vmem:[#allocation5 + $0x18] sm:$0xff] %v9685_v2   ;;  %v4521_v58 = vsel %vm4493_vm14, %v4465_v57, %v4507_v42  ;;  %v15233_v35 = vrot.slane %v13173_v55, 5  ;;  %v4855_v8 = vrot.slane %v15234_v24, 4  ;;  %v15236_v31 = vor.u32 %v13191_v39, %v13189_v34 }
 0x464   :  { %v9690_v3 = vpack.c.bf16 %v4521_v58, %v4520_v22  ;;  %v4522_v13 = vsel %vm4494_vm15, %v4470_v5, %v4508_v15  ;;  %v4652_v47 = vsel %vm11772_vm10, %v4647_v43, %v13189_v34  ;;  %v4865_v37 = vrot.slane %v15235_v30, 4  ;;  %v4477_v2 = vpop.f32.mrb[116].mxu0 }
 0x465   :  { %v4788_v1 = vsel %vm11759_vm9, %v13155_v25, %v15233_v35  ;;  %4750 = vst [vmem:[#allocation6 + $0x28] sm:$0xf] %v4652_v47  ;;  %vm4495_vm2 = vcmp.ge.f32.partialorder %v4473_v23, 0.0  ;;  %v4509_v55 = vmul.f32 0.01, %v4473_v23  ;;  %v4860_v25 = vsel %vm11772_vm10, %v4855_v8, %v13209_v61 }
 0x466   :  { %4826 = vst [vmem:[#allocation6 + $0x2c] sm:$0xf] %v4788_v1  ;;  %v4657_v0 = vrot.slane %v15236_v31, 4  ;;  %9736 = vst [vmem:[#allocation5 + $0x20] sm:$0xff] %v9690_v3   ;;  %v4870_v57 = vsel %vm11772_vm10, %v4865_v37, %v13220_v32  ;;  %v15237_v52 = vor.u32 %v13195_v44, %v13193_v28  ;;  %v15238_v12 = vrot.slane %v13182_v21, 5  ;;  %v10501_v32 = vpop.f32.mrb[117].mxu0 }
 0x467   :  { %4967 = vst [vmem:[#allocation6 + $0xc] sm:$0xf] %v4860_v25  ;;  %v13331_v34 = vrot.slane %v4874_v40, 4  ;;  %v4523_v39 = vsel %vm4495_vm2, %v4473_v23, %v4509_v55  ;;  %4968 = vst [vmem:[#allocation6 + $0x30] sm:$0xf] %v4870_v57  ;;  %v13334_v9 = vadd.f32 %v4477_v2, %v13140_v29  ;;  %v15239_v17 = vrot.slane %v13205_v27, 5 }
 0x468   :  { %v13324_v5 = vrot.slane %v15237_v52, 4  ;;  %v4791_v61 = vsel %vm11759_vm9, %v13199_v62, %v15238_v12  ;;  %v4662_v44 = vsel %vm11772_vm10, %v4657_v0, %v13193_v28  ;;  %v15240_v21 = vrot.slane %v13149_v53, 9  ;;  %v4480_v14 = vpop.f32.mrb[118].mxu0 }
 0x469   :  { %4827 = vst [vmem:[#allocation6 + $0x50] sm:$0xf] %v4791_v61  ;;  %v9695_v40 = vpack.c.bf16 %v4523_v39, %v4522_v13  ;;  %4751 = vst [vmem:[#allocation6 + $0x4c] sm:$0xf] %v4662_v44  ;;  %v15241_v7 = vrot.slane %v13211_v45, 5  ;;  %v15242_v28 = vor.u32 %v13164_v63, %v13162_v38  ;;  %v13355_v53 = vor.u32 %v13240_v59, %v13238_v54 }
 0x46a   :  { %v5003_v62 = vsel %vm11759_vm9, %v15240_v21, %v15239_v17  ;;  %v4622_v27 = vld [vmem:[#allocation5 + $0x10] sm:$0xf]  ;;  %v4623_v46 = vld [vmem:[#allocation5 + $0x14] sm:$0xf]  ;;  %v13360_v42 = vadd.f32 %v4480_v14, %v13143_v10  ;;  %v15244_v45 = vrot.slane %v13242_v51, 5  ;;  %v15246_v51 = vrot.slane %v13263_v18, 6 }
 0x46b   :  { %v5006_v29 = vsel %vm11759_vm9, %v13228_v26, %v15241_v7  ;;  %5043 = vst [vmem:[#allocation6 + $0x10] sm:$0xf] %v5003_v62  ;;  %v5074_v4 = vrot.slane %v15242_v28, 4  ;;  %15243 = vst [vmem:[#allocation51_spill] sm:$0xff] %v13355_v53  ;;  %v13357_v22 = vld [vmem:[#allocation5 + $0x10] sm:$0xf] }
 0x46c   :  { %5044 = vst [vmem:[#allocation6 + $0x34] sm:$0xf] %v5006_v29  ;;  %v15245_v26 = vrot.slane %v13234_v56, 9  ;;  %v4669_v63 = vshll.u32 %v4622_v27, 16  ;;  %v4673_v48 = vshrl.u32 %v4622_v27, 16  ;;  %v4679_v15 = vshll.u32 %v4623_v46, 16 }
 0x46d   :  { %v4683_v54 = vshrl.u32 %v4623_v46, 16  ;;  %v13368_v59 = vld [vmem:[#allocation5 + $0x14] sm:$0xf]  ;;  %9737 = vst [vmem:[#allocation5 + $0x28] sm:$0xff] %v9695_v40   ;;  %v14995_v50 = vrot.slane %v13357_v22, 5  ;;  %v5083_v56 = vsel %vm12031_vm1, %v5074_v4, %v13355_v53  ;;  %v15247_v58 = vrot.slane %v13256_v19, 10 }
 0x46e   :  { %v5227_v38 = vsel %vm11759_vm9, %v15245_v26, %v15244_v45  ;;  %v14994_v10 = vrot.slane %v13368_v59, 5  ;;  %v4839_v20 = vld [vmem:[#allocation5 + $0x10] sm:$0xf]  ;;  %v4840_v43 = vld [vmem:[#allocation5 + $0x14] sm:$0xf]  ;;  %v13381_v35 = vrot.slane %v4669_v63, 5  ;;  %v13427_v4 = vor.u32 %v13249_v41, %v13244_v60 }
 0x46f   :  { %5267 = vst [vmem:[#allocation6 + $0x18] sm:$0xf] %v5227_v38  ;;  %v5453_v23 = vsel %vm11855_vm13, %v15247_v58, %v15246_v51  ;;  %v13383_v1 = vrot.slane %v4673_v48, 4  ;;  %v13385_v24 = vrot.slane %v4679_v15, 5  ;;  %v13387_v8 = vrot.slane %v4683_v54, 4 }
 0x470   :  { %v13389_v3 = vld [vmem:[#allocation5 + $0x10] sm:$0xf]  ;;  %5191 = vst [vmem:[#allocation6 + $0x14] sm:$0xf] %v5083_v56  ;;  %5495 = vst [vmem:[#allocation6 + $0x20] sm:$0xf] %v5453_v23 }
 0x471   :  { %v13393_v18 = vrot.slane %v14995_v50, 4  ;;  %v13397_v19 = vrot.slane %v14994_v10, 4  ;;  %v4877_v13 = vshll.u32 %v4839_v20, 16  ;;  %v4881_v47 = vshrl.u32 %v4839_v20, 16  ;;  %v13399_v30 = vld [vmem:[#allocation5 + $0x14] sm:$0xf] }
 0x472   :  { %v4887_v37 = vshll.u32 %v4840_v43, 16  ;;  %v4891_v55 = vshrl.u32 %v4840_v43, 16  ;;  %v5057_v25 = vld [vmem:[#allocation5 + $0x10] sm:$0xf]  ;;  %v5058_v31 = vld [vmem:[#allocation5 + $0x14] sm:$0xf] }
 0x473   :  { %v13401_v0 = vrot.slane %v4877_v13, 5  ;;  %v13403_v57 = vrot.slane %v4881_v47, 4  ;;  %v14992_v2 = vrot.slane %v13389_v3, 5  ;;  %v14991_v52 = vrot.slane %v13399_v30, 5  ;;  %v13407_v39 = vld [vmem:[#allocation5 + $0x10] sm:$0xf] }
 0x474   :  { %v5096_v12 = vshrl.u32 %v5057_v25, 16  ;;  %v5099_v61 = vshll.u32 %v5057_v25, 16  ;;  %v13409_v32 = vld [vmem:[#allocation5 + $0x14] sm:$0xf]  ;;  %v13413_v17 = vrot.slane %v4887_v37, 5  ;;  %v13415_v21 = vrot.slane %v4891_v55, 4 }
 0x475   :  { %v5106_v62 = vshrl.u32 %v5058_v31, 16  ;;  %v5280_v40 = vld [vmem:[#allocation5 + $0x10] sm:$0xf]  ;;  %v13419_v14 = vrot.slane %v14992_v2, 4  ;;  %v13423_v7 = vrot.slane %v14991_v52, 4  ;;  %v5109_v29 = vshll.u32 %v5058_v31, 16 }
 0x476   :  { %v5281_v28 = vld [vmem:[#allocation5 + $0x14] sm:$0xf]  ;;  %15249 = vst [vmem:[#allocation42_spill] sm:$0xff] %v13427_v4  ;;  %v13429_v27 = vrot.slane %v5096_v12, 5  ;;  %v14993_v46 = vrot.slane %v13407_v39, 5  ;;  %v14990_v45 = vrot.slane %v13409_v32, 5 }
 0x477   :  { %15248 = vst [vmem:[#allocation39_spill] sm:$0xff] %v13423_v7  ;;  %v5310_v26 = vshrl.u32 %v5280_v40, 16  ;;  %v13433_v38 = vld [vmem:[#allocation5 + $0x10] sm:$0xf]  ;;  %v13435_v63 = vrot.slane %v5099_v61, 6  ;;  %v5313_v48 = vshll.u32 %v5280_v40, 16 }
 0x478   :  { %15250 = vst [vmem:[#allocation41_spill] sm:$0xff] %v13433_v38  ;;  %v5320_v15 = vshrl.u32 %v5281_v28, 16  ;;  %v5323_v54 = vshll.u32 %v5281_v28, 16  ;;  %v5429_v20 = vld [vmem:[#allocation5 + $0x14] sm:$0xf]  ;;  %v13437_v43 = vrot.slane %v5106_v62, 5  ;;  %v4672_v28 = vsel %vm11772_vm10, %v13324_v5, %v13381_v35 }
 0x479   :  { %15251 = vst [vmem:[#allocation32_spill] sm:$0xff] %v13435_v63  ;;  %v13439_v56 = vrot.slane %v5109_v29, 6  ;;  %v13443_v41 = vrot.slane %v14993_v46, 4  ;;  %v14989_v60 = vrot.slane %v13433_v38, 6  ;;  %v4624_v51 = vld [vmem:[#allocation5 + $0x18] sm:$0xf] }
 0x47a   :  { %15252 = vst [vmem:[#allocation30_spill] sm:$0xff] %v13437_v43  ;;  %v13448_v58 = vrot.slane %v14990_v45, 4  ;;  %v13450_v23 = vrot.slane %v5310_v26, 5  ;;  %v13452_v13 = vrot.slane %v5313_v48, 6  ;;  %v5458_v47 = vrot.slane %v5429_v20, 6 }
 0x47b   :  { %15253 = vst [vmem:[#allocation25_spill] sm:$0xff] %v13439_v56  ;;  %v4625_v37 = vld [vmem:[#allocation5 + $0x1c] sm:$0xf]  ;;  %v5457_v55 = vrot.slane %v14989_v60, 4  ;;  %v4689_v25 = vshll.u32 %v4624_v51, 16  ;;  %v4693_v31 = vshrl.u32 %v4624_v51, 16 }
 0x47c   :  { %v4699_v12 = vshll.u32 %v4625_v37, 16  ;;  %v13456_v61 = vld [vmem:[#allocation5 + $0x18] sm:$0xf]  ;;  %v13458_v62 = vrot.slane %v5320_v15, 5  ;;  %v13460_v40 = vrot.slane %v5323_v54, 6  ;;  %v4703_v29 = vshrl.u32 %v4625_v37, 16 }
 0x47d   :  { %v5459_v48 = vsel %vm11855_vm13, %v5457_v55, %v5458_v47  ;;  %v13470_v20 = vld [vmem:[#allocation5 + $0x1c] sm:$0xf]  ;;  %v4841_v15 = vld [vmem:[#allocation5 + $0x18] sm:$0xf]  ;;  %4752 = vst [vmem:[#allocation6 + $0x70] sm:$0xf] %v4672_v28 }
 0x47e   :  { %15254 = vst [vmem:[#allocation28_spill] sm:$0xff] %v13458_v62  ;;  %15255 = vst [vmem:[#allocation16_spill] sm:$0xff] %v13460_v40  ;;  %v15256_v54 = vld [vmem:[#allocation50_spill] sm:$0xff]  ;;  %v15257_v60 = vld [vmem:[#allocation36_spill] sm:$0xff]  ;;  %v13477_v44 = vrot.slane %v4689_v25, 5  ;;  %v13479_v5 = vrot.slane %v4693_v31, 4 }
 0x47f   :  { %v13475_v37 = vor.u32 %v15257_v60, %v15256_v54  ;;  %5497 = vst [vmem:[#allocation6 + $0x68] sm:$0xf] %v5459_v48  ;;  %v13481_v45 = vrot.slane %v4699_v12, 5  ;;  %v4842_v52 = vld [vmem:[#allocation5 + $0x1c] sm:$0xf]  ;;  %v4897_v2 = vshll.u32 %v4841_v15, 16 }
 0x480   :  { %v4901_v46 = vshrl.u32 %v4841_v15, 16  ;;  %v4907_v10 = vshll.u32 %v4842_v52, 16  ;;  %v4911_v26 = vshrl.u32 %v4842_v52, 16  ;;  %v13485_v28 = vld [vmem:[#allocation5 + $0x18] sm:$0xf]  ;;  %v13489_v48 = vrot.slane %v4703_v29, 4 }
 0x481   :  { %15258 = vst [vmem:[#allocation17_spill] sm:$0xff] %v13475_v37  ;;  %15259 = vst [vmem:[#allocation18_spill] sm:$0xff] %v13485_v28  ;;  %v13492_v31 = vrot.slane %v4897_v2, 5  ;;  %v13494_v12 = vld [vmem:[#allocation5 + $0x1c] sm:$0xf]  ;;  %v10502_v54 = vpop.f32.mrb[119].mxu0 }
 0x482   :  { %15260 = vst [vmem:[#allocation24_spill] sm:$0xff] %v13494_v12  ;;  %v13496_v50 = vrot.slane %v4901_v46, 4  ;;  %v13498_v55 = vrot.slane %v4907_v10, 5  ;;  %v13500_v15 = vrot.slane %v4911_v26, 4  ;;  %v5059_v51 = vld [vmem:[#allocation5 + $0x18] sm:$0xf] }
 0x483   :  { %v5460_v38 = vrot.slane %v5458_v47, 4  ;;  %v15261_v29 = vrot.slane %v13456_v61, 5  ;;  %v5060_v25 = vld [vmem:[#allocation5 + $0x1c] sm:$0xf]  ;;  %v5116_v40 = vshrl.u32 %v5059_v51, 16  ;;  %v5119_v26 = vshll.u32 %v5059_v51, 16 }
 0x484   :  { %v5126_v54 = vshrl.u32 %v5060_v25, 16  ;;  %v13512_v62 = vld [vmem:[#allocation5 + $0x18] sm:$0xf]  ;;  %v13514_v52 = vld [vmem:[#allocation5 + $0x1c] sm:$0xf]  ;;  %v5129_v56 = vshll.u32 %v5060_v25, 16 }
 0x485   :  { %v13505_v60 = vrot.slane %v15261_v29, 4  ;;  %15262 = vst [vmem:[#allocation14_spill] sm:$0xff] %v13514_v52  ;;  %v15263_v29 = vrot.slane %v13470_v20, 5  ;;  %v5282_v46 = vld [vmem:[#allocation5 + $0x18] sm:$0xf]  ;;  %v15264_v11 = vrot.slane %v13485_v28, 5 }
 0x486   :  { %v5283_v37 = vld [vmem:[#allocation5 + $0x1c] sm:$0xf]  ;;  %v13536_v25 = vrot.slane %v5116_v40, 5  ;;  %v5330_v43 = vshrl.u32 %v5282_v46, 16  ;;  %v5333_v36 = vshll.u32 %v5282_v46, 16  ;;  %v13538_v10 = vrot.slane %v5119_v26, 6 }
 0x487   :  { %v13520_v2 = vrot.slane %v15263_v29, 4  ;;  %v13529_v4 = vrot.slane %v15264_v11, 4  ;;  %v15266_v29 = vrot.slane %v13494_v12, 5  ;;  %v5430_v53 = vld [vmem:[#allocation5 + $0x18] sm:$0xf]  ;;  %v13540_v7 = vrot.slane %v5126_v54, 5 }
 0x488   :  { %15268 = vst [vmem:[#allocation31_spill] sm:$0xff] %v13536_v25  ;;  %15269 = vst [vmem:[#allocation19_spill] sm:$0xff] %v13538_v10  ;;  %v5340_v51 = vshrl.u32 %v5283_v37, 16  ;;  %v13542_v28 = vld [vmem:[#allocation5 + $0x1c] sm:$0xf]  ;;  %v5461_v11 = vrot.slane %v5430_v53, 6 }
 0x489   :  { %15265 = vst [vmem:[#allocation15_spill] sm:$0xff] %v13529_v4  ;;  %v13534_v33 = vrot.slane %v15266_v29, 4  ;;  %15270 = vst [vmem:[#allocation49_spill] sm:$0xff] %v13540_v7  ;;  %v13544_v4 = vrot.slane %v5129_v56, 6  ;;  %v15273_v47 = vrot.slane %v13512_v62, 5  ;;  %v5343_v29 = vshll.u32 %v5283_v37, 16 }
 0x48a   :  { %15271 = vst [vmem:[#allocation45_spill] sm:$0xff] %v13542_v28  ;;  %v4626_v40 = vld [vmem:[#allocation5 + $0x20] sm:$0xf]  ;;  %v15276_v46 = vld [vmem:[#allocation35_spill] sm:$0xff]  ;;  %v15277_v54 = vrot.slane %v13514_v52, 5  ;;  %v5462_v53 = vsel %vm11855_vm13, %v5460_v38, %v5461_v11  ;;  %v15007_v56 = vrot.slane %v13542_v28, 6 }
 0x48b   :  { %15267 = vst [vmem:[#allocation26_spill] sm:$0xff] %v13534_v33  ;;  %15272 = vst [vmem:[#allocation13_spill] sm:$0xff] %v13544_v4  ;;  %v13548_v12 = vrot.slane %v15273_v47, 4  ;;  %v15275_v33 = vrot.slane %v13357_v22, 5  ;;  %v4627_v4 = vld [vmem:[#allocation5 + $0x24] sm:$0xf] }
 0x48c   :  { %v13557_v7 = vrot.slane %v15277_v54, 4  ;;  %v4709_v47 = vshll.u32 %v4626_v40, 16  ;;  %v13562_v37 = vrot.slane %v5330_v43, 5  ;;  %v13564_v10 = vrot.slane %v5333_v36, 6  ;;  %5498 = vst [vmem:[#allocation6 + $0x8c] sm:$0xf] %v5462_v53 }
 0x48d   :  { %15274 = vst [vmem:[#allocation12_spill] sm:$0xff] %v13548_v12  ;;  %v4794_v26 = vsel %vm11759_vm9, %v15276_v46, %v15275_v33  ;;  %v4713_v22 = vshrl.u32 %v4626_v40, 16  ;;  %v4719_v25 = vshll.u32 %v4627_v4, 16  ;;  %v13566_v33 = vld [vmem:[#allocation5 + $0x20] sm:$0xf]  ;;  %v13568_v46 = vrot.slane %v5340_v51, 5 }
 0x48e   :  { %15278 = vst [vmem:[#allocation21_spill] sm:$0xff] %v13557_v7  ;;  %4828 = vst [vmem:[#allocation6 + $0x74] sm:$0xf] %v4794_v26  ;;  %v4723_v54 = vshrl.u32 %v4627_v4, 16  ;;  %v13570_v7 = vld [vmem:[#allocation5 + $0x24] sm:$0xf]  ;;  %v4880_v43 = vsel %vm11772_vm10, %v13331_v34, %v13401_v0  ;;  %v15284_v51 = vor.u32 %v13403_v57, %v13401_v0 }
 0x48f   :  { %15279 = vst [vmem:[#allocation22_spill] sm:$0xff] %v13562_v37  ;;  %15280 = vst [vmem:[#allocation29_spill] sm:$0xff] %v13564_v10  ;;  %v13577_v26 = vrot.slane %v5343_v29, 6  ;;  %v13579_v36 = vrot.slane %v5461_v11, 4  ;;  %v4843_v53 = vld [vmem:[#allocation5 + $0x20] sm:$0xf] }
 0x490   :  { %15281 = vst [vmem:[#allocation47_spill] sm:$0xff] %v13568_v46  ;;  %v4885_v4 = vrot.slane %v15284_v51, 4  ;;  %4969 = vst [vmem:[#allocation6 + $0x54] sm:$0xf] %v4880_v43  ;;  %v13587_v38 = vrot.slane %v15007_v56, 4  ;;  %v13589_v49 = vrot.slane %v4709_v47, 5 }
 0x491   :  { %15282 = vst [vmem:[#allocation52_spill] sm:$0xff] %v13577_v26  ;;  %15283 = vst [vmem:[#allocation44_spill] sm:$0xff] %v13579_v36  ;;  %v4844_v46 = vld [vmem:[#allocation5 + $0x24] sm:$0xf]  ;;  %v4917_v34 = vshll.u32 %v4843_v53, 16  ;;  %v4921_v29 = vshrl.u32 %v4843_v53, 16 }
 0x492   :  { %15285 = vst [vmem:[#allocation27_spill] sm:$0xff] %v13587_v38  ;;  %v13591_v26 = vrot.slane %v4713_v22, 4  ;;  %v13593_v11 = vrot.slane %v4719_v25, 5  ;;  %v4927_v40 = vshll.u32 %v4844_v46, 16  ;;  %v4931_v36 = vshrl.u32 %v4844_v46, 16 }
 0x493   :  { %v13595_v10 = vld [vmem:[#allocation5 + $0x20] sm:$0xf]  ;;  %v13597_v0 = vrot.slane %v4723_v54, 4  ;;  %v15287_v57 = vrot.slane %v13566_v33, 5  ;;  %v13603_v51 = vld [vmem:[#allocation5 + $0x24] sm:$0xf]  ;;  %v4890_v22 = vsel %vm11772_vm10, %v4885_v4, %v13413_v17 }
 0x494   :  { %15286 = vst [vmem:[#allocation46_spill] sm:$0xff] %v13595_v10  ;;  %15288 = vst [vmem:[#allocation48_spill] sm:$0xff] %v13603_v51  ;;  %v15289_v25 = vrot.slane %v13570_v7, 5  ;;  %v13613_v46 = vrot.slane %v4917_v34, 5  ;;  %v5061_v56 = vld [vmem:[#allocation5 + $0x20] sm:$0xf] }
 0x495   :  { %v13601_v43 = vrot.slane %v15287_v57, 4  ;;  %4970 = vst [vmem:[#allocation6 + $0x78] sm:$0xf] %v4890_v22  ;;  %v15290_v57 = vor.u32 %v13383_v1, %v13381_v35  ;;  %v13619_v28 = vrot.slane %v4921_v29, 4  ;;  %v13621_v47 = vrot.slane %v4927_v40, 5 }
 0x496   :  { %v13611_v53 = vrot.slane %v15289_v25, 4  ;;  %v5062_v37 = vld [vmem:[#allocation5 + $0x24] sm:$0xf]  ;;  %v5136_v4 = vshrl.u32 %v5061_v56, 16  ;;  %v5139_v12 = vshll.u32 %v5061_v56, 16  ;;  %v13623_v52 = vrot.slane %v4931_v36, 4 }
 0x497   :  { %v4677_v38 = vrot.slane %v15290_v57, 4  ;;  %v15291_v34 = vrot.slane %v13595_v10, 5  ;;  %v5146_v54 = vshrl.u32 %v5062_v37, 16  ;;  %v5149_v63 = vshll.u32 %v5062_v37, 16  ;;  %v13629_v22 = vld [vmem:[#allocation5 + $0x20] sm:$0xf] }
 0x498   :  { %v15293_v35 = vrot.slane %v13603_v51, 5  ;;  %v13635_v29 = vrot.slane %v5136_v4, 5  ;;  %v13637_v40 = vld [vmem:[#allocation5 + $0x24] sm:$0xf]  ;;  %v13643_v57 = vrot.slane %v5139_v12, 6  ;;  %v15300_v10 = vrot.slane %v13368_v59, 5 }
 0x499   :  { %v13627_v25 = vrot.slane %v15291_v34, 4  ;;  %v4682_v36 = vsel %vm11772_vm10, %v4677_v38, %v13385_v24  ;;  %v13645_v34 = vrot.slane %v5146_v54, 5  ;;  %v15301_v38 = vrot.slane %v13629_v22, 5 }
 0x49a   :  { %v13633_v1 = vrot.slane %v15293_v35, 4  ;;  %15295 = vst [vmem:[#allocation54_spill] sm:$0xff] %v13635_v29  ;;  %15296 = vst [vmem:[#allocation50_spill] sm:$0xff] %v13643_v57  ;;  %v15298_v35 = vor.u32 %v13387_v8, %v13385_v24  ;;  %v5285_v29 = vld [vmem:[#allocation5 + $0x24] sm:$0xf]  ;;  %v4797_v12 = vsel %vm11759_vm9, %v13393_v18, %v15300_v10  ;;  %vm4496_vm3 = vcmp.ge.f32.partialorder %v13334_v9, 0.0 }
 0x49b   :  { %15292 = vst [vmem:[#allocation34_spill] sm:$0xff] %v13627_v25  ;;  %15297 = vst [vmem:[#allocation36_spill] sm:$0xff] %v13645_v34  ;;  %v5284_v25 = vld [vmem:[#allocation5 + $0x20] sm:$0xf]  ;;  %v13660_v54 = vrot.slane %v15301_v38, 4  ;;  %v5360_v37 = vshrl.u32 %v5285_v29, 16 }
 0x49c   :  { %15294 = vst [vmem:[#allocation53_spill] sm:$0xff] %v13633_v1  ;;  %v4687_v4 = vrot.slane %v15298_v35, 4  ;;  %4753 = vst [vmem:[#allocation6 + $0x94] sm:$0xf] %v4682_v36  ;;  %v13651_v1 = vrot.slane %v5149_v63, 6  ;;  %v5350_v56 = vshrl.u32 %v5284_v25, 16 }
 0x49d   :  { %v5353_v51 = vshll.u32 %v5284_v25, 16  ;;  %v5363_v34 = vshll.u32 %v5285_v29, 16  ;;  %v13662_v24 = vld [vmem:[#allocation5 + $0x20] sm:$0xf]  ;;  %4829 = vst [vmem:[#allocation6 + $0x98] sm:$0xf] %v4797_v12 }
 0x49e   :  { %15299 = vst [vmem:[#allocation35_spill] sm:$0xff] %v13651_v1  ;;  %15302 = vst [vmem:[#allocation55_spill] sm:$0xff] %v13662_v24  ;;  %v4692_v8 = vsel %vm11772_vm10, %v4687_v4, %v13477_v44  ;;  %v15303_v63 = vrot.slane %v13637_v40, 5  ;;  %v13671_v25 = vrot.slane %v5350_v56, 5  ;;  %v13673_v18 = vld [vmem:[#allocation5 + $0x24] sm:$0xf] }
 0x49f   :  { %15305 = vst [vmem:[#allocation57_spill] sm:$0xff] %v13673_v18  ;;  %4754 = vst [vmem:[#allocation6 + $0xb8] sm:$0xf] %v4692_v8  ;;  %v10871_v29 = vld [vmem:[%s14915_s6 + $0x100] sm:$0xff]   ;;  %v15306_v36 = vrot.slane %v13456_v61, 5  ;;  %v13684_v4 = vrot.slane %v5353_v51, 6  ;;  %v15308_v8 = vor.u32 %v13415_v21, %v13413_v17 }
 0x4a0   :  { %v13669_v59 = vrot.slane %v15303_v63, 4  ;;  %v13686_v12 = vrot.slane %v5360_v37, 5  ;;  %v15012_v56 = vrot.slane %v13673_v18, 6  ;;  %v10853_v38 = vld [vmem:[#allocation6] ss:$36 sps:$4 sm:$0xff]   ;;  %v13692_v10 = vrot.slane %v5363_v34, 6 }
 0x4a1   :  { %v4800_v35 = vsel %vm11759_vm9, %v13397_v19, %v15306_v36  ;;  %v4895_v63 = vrot.slane %v15308_v8, 4  ;;  %v10855_v1 = vld [vmem:[#allocation6 + $0x4] ss:$36 sps:$4 sm:$0xff]   ;;  %v13694_v61 = vld [vmem:[#allocation5 + $0x28] sm:$0xf]  ;;  %v15310_v19 = vor.u32 %v13496_v50, %v13492_v31  ;;  %v15311_v37 = vrot.slane %v13470_v20, 5 }
 0x4a2   :  { %15304 = vst [vmem:[#allocation56_spill] sm:$0xff] %v13669_v59  ;;  %15307 = vst [vmem:[#allocation58_spill] sm:$0xff] %v13686_v12  ;;  %v15313_v21 = vrot.slane %v13662_v24, 6  ;;  %v13715_v50 = vrot.slane %v15012_v56, 4  ;;  %v4729_v20 = vshll.u32 %v13694_v61, 16  ;;  %6431 = vmatprep.mubr.bf16.mxu1 %v10855_v1  ;;  %vm4497_vm4 = vcmp.ge.f32.partialorder %v13360_v42, 0.0 }
 0x4a3   :  { %4830 = vst [vmem:[#allocation6 + $0xbc] sm:$0xf] %v4800_v35  ;;  %15309 = vst [vmem:[#allocation59_spill] sm:$0xff] %v13692_v10  ;;  %v4905_v51 = vrot.slane %v15310_v19, 4  ;;  %v4803_v36 = vsel %vm11759_vm9, %v13505_v60, %v15311_v37  ;;  %v15312_v35 = vrot.slane %v13566_v33, 5  ;;  %v4900_v60 = vsel %vm11772_vm10, %v4895_v63, %v13492_v31  ;;  %6432 = vmatmul.mubr.bf16.vlgmr.msra.gmra.mrb[148].mxu1 %v10853_v38  ;;  %v10882_v38 = vld [vmem:[%s14915_s6 + $0x150] sm:$0xff]  }
 0x4a4   :  { %v13711_v34 = vrot.slane %v15313_v21, 4  ;;  %15315 = vst [vmem:[#allocation61_spill] sm:$0xff] %v13715_v50  ;;  %v13718_v8 = vld [vmem:[#allocation5 + $0x28] sm:$0xf]  ;;  %4831 = vst [vmem:[#allocation6 + $0xe0] sm:$0xf] %v4803_v36  ;;  %v15316_v31 = vor.u32 %v13479_v5, %v13477_v44  ;;  %10252 = vmatpush3.bf16.msra.mxu1 %v10871_v29 }
 0x4a5   :  { %v4806_v17 = vsel %vm11759_vm9, %v13520_v2, %v15312_v35  ;;  %v10875_v2 = vld [vmem:[%s14915_s6 + $0x148] sm:$0xff]   ;;  %v4845_v19 = vld [vmem:[#allocation5 + $0x28] sm:$0xf]  ;;  %v13727_v37 = vld [vmem:[#allocation5 + $0x2c] sm:$0xf]  ;;  %v4910_v35 = vsel %vm11772_vm10, %v4905_v51, %v13498_v55  ;;  %v15317_v21 = vrot.slane %v13570_v7, 5 }
 0x4a6   :  { %15314 = vst [vmem:[#allocation60_spill] sm:$0xff] %v13711_v34  ;;  %4832 = vst [vmem:[#allocation6 + $0x104] sm:$0xf] %v4806_v17  ;;  %v4697_v63 = vrot.slane %v15316_v31, 4  ;;  %v13740_v36 = vrot.slane %v4729_v20, 5  ;;  %v4937_v56 = vshll.u32 %v4845_v19, 16  ;;  %10253 = vmatprep.subr.bf16.mxu1 %v10875_v2 }
 0x4a7   :  { %4971 = vst [vmem:[#allocation6 + $0x9c] sm:$0xf] %v4900_v60  ;;  %v4809_v1 = vsel %vm11759_vm9, %v13601_v43, %v15317_v21  ;;  %v4941_v33 = vshrl.u32 %v4845_v19, 16  ;;  %v13743_v50 = vld [vmem:[#allocation5 + $0x28] sm:$0xf]  ;;  %v4947_v44 = vshll.u32 %v13727_v37, 16 }
 0x4a8   :  { %4972 = vst [vmem:[#allocation6 + $0xc0] sm:$0xf] %v4910_v35  ;;  %4833 = vst [vmem:[#allocation6 + $0x128] sm:$0xf] %v4809_v1  ;;  %v5063_v7 = vld [vmem:[#allocation5 + $0x28] sm:$0xf]  ;;  %v4702_v51 = vsel %vm11772_vm10, %v4697_v63, %v13481_v45 }
 0x4a9   :  { %v10877_v43 = vld [vmem:[%s14915_s6 + $0x108] sm:$0xff]   ;;  %v15318_v20 = vrot.slane %v13718_v8, 5  ;;  %v13766_v35 = vrot.slane %v4937_v56, 5  ;;  %v13769_v63 = vld [vmem:[#allocation5 + $0x2c] sm:$0xf]  ;;  %v13772_v1 = vrot.slane %v4941_v33, 4 }
 0x4aa   :  { %v5064_v21 = vld [vmem:[#allocation5 + $0x2c] sm:$0xf]  ;;  %4755 = vst [vmem:[#allocation6 + $0xdc] sm:$0xf] %v4702_v51  ;;  %v13774_v29 = vld [vmem:[#allocation5 + $0x28] sm:$0xf]  ;;  %10254 = vmatpush3.bf16.msra.mxu1 %v10877_v43 }
 0x4ab   :  { %v4812_v60 = vsel %vm11759_vm9, %v13611_v53, %v15318_v20  ;;  %v5156_v53 = vshrl.u32 %v5063_v7, 16  ;;  %v5159_v20 = vshll.u32 %v5063_v7, 16  ;;  %v5166_v17 = vshrl.u32 %v5064_v21, 16  ;;  %v10884_v56 = vld [vmem:[%s14915_s6 + $0x110] sm:$0xff]   ;;  %v13781_v5 = vld [vmem:[#allocation5 + $0x2c] sm:$0xf]  ;;  %10255 = vmatprep.subr.bf16.mxu1 %v10882_v38 }
 0x4ac   :  { %4834 = vst [vmem:[#allocation6 + $0x14c] sm:$0xf] %v4812_v60  ;;  %v5169_v19 = vshll.u32 %v5064_v21, 16  ;;  %15319 = vst [vmem:[#allocation62_spill] sm:$0xff] %v13781_v5  ;;  %v5286_v51 = vld [vmem:[#allocation5 + $0x28] sm:$0xf] }
 0x4ad   :  { %v10889_v33 = vld [vmem:[%s14915_s6 + $0x158] sm:$0xff]   ;;  %v15320_v7 = vrot.slane %v13407_v39, 5  ;;  %v15321_v60 = vld [vmem:[#allocation37_spill] sm:$0xff]  ;;  %v13792_v18 = vrot.slane %v4947_v44, 5  ;;  %v15322_v31 = vrot.slane %v13743_v50, 5  ;;  %v13800_v12 = vrot.slane %v5156_v53, 5 }
 0x4ae   :  { %v5287_v10 = vld [vmem:[#allocation5 + $0x2c] sm:$0xf]  ;;  %v13802_v39 = vrot.slane %v5159_v20, 6  ;;  %v5370_v59 = vshrl.u32 %v5286_v51, 16  ;;  %v5373_v57 = vshll.u32 %v5286_v51, 16  ;;  %v13806_v44 = vrot.slane %v5166_v17, 5  ;;  %10256 = vmatpush3.bf16.msra.mxu1 %v10884_v56 }
 0x4af   :  { %v5230_v34 = vsel %vm11759_vm9, %v15321_v60, %v15320_v7  ;;  %v13796_v21 = vrot.slane %v15322_v31, 4  ;;  %15323 = vst [vmem:[#allocation37_spill] sm:$0xff] %v13800_v12  ;;  %v13804_v7 = vld [vmem:[#allocation5 + $0x28] sm:$0xf]  ;;  %v13808_v31 = vrot.slane %v5169_v19, 6  ;;  %v15327_v60 = vrot.slane %v13774_v29, 5  ;;  %10257 = vmatprep.subr.bf16.mxu1 %v10889_v33 }
 0x4b0   :  { %5268 = vst [vmem:[#allocation6 + $0x3c] sm:$0xf] %v5230_v34  ;;  %15324 = vst [vmem:[#allocation63_spill] sm:$0xff] %v13802_v39  ;;  %v5380_v2 = vshrl.u32 %v5287_v10, 16  ;;  %v13814_v43 = vld [vmem:[#allocation5 + $0x2c] sm:$0xf]  ;;  %v15334_v39 = vor.u32 %v13489_v48, %v13481_v45  ;;  %v13861_v45 = vor.u32 %v13452_v13, %v13450_v23 }
 0x4b1   :  { %15325 = vst [vmem:[#allocation64_spill] sm:$0xff] %v13806_v44  ;;  %15326 = vst [vmem:[#allocation65_spill] sm:$0xff] %v13808_v31  ;;  %v13812_v24 = vrot.slane %v15327_v60, 4  ;;  %v15329_v53 = vrot.slane %v13781_v5, 5  ;;  %v5383_v51 = vshll.u32 %v5287_v10, 16  ;;  %v10878_v19 = vld [vmem:[%s14915_s6 + $0x180] sm:$0xff]  }
 0x4b2   :  { %v10858_v38 = vld [vmem:[#allocation6 + $0x8] ss:$36 sps:$4 sm:$0xff]   ;;  %v13831_v31 = vrot.slane %v5373_v57, 6  ;;  %v10883_v10 = vld [vmem:[%s14915_s6 + $0x1c8] sm:$0xff]   ;;  %v10896_v17 = vld [vmem:[%s14915_s6 + $0x160] sm:$0xff]   ;;  %v13845_v57 = vrot.slane %v5380_v2, 5 }
 0x4b3   :  { %15328 = vst [vmem:[#allocation66_spill] sm:$0xff] %v13812_v24  ;;  %v13820_v20 = vrot.slane %v15329_v53, 4  ;;  %v10891_v60 = vld [vmem:[%s14915_s6 + $0x118] sm:$0xff]   ;;  %v13829_v24 = vrot.slane %v5370_v59, 5  ;;  %v15332_v5 = vld [vmem:[#allocation20_spill] sm:$0xff]  ;;  %v4707_v12 = vrot.slane %v15334_v39, 4 }
 0x4b4   :  { %v10860_v53 = vld [vmem:[#allocation6 + $0xc] ss:$36 sps:$4 sm:$0xff]   ;;  %15333 = vst [vmem:[#allocation20_spill] sm:$0xff] %v13845_v57  ;;  %v4510_v34 = vmul.f32 0.01, %v13334_v9  ;;  %v15335_v56 = vrot.slane %v13399_v30, 5  ;;  %10258 = vmatpush3.bf16.msra.mxu1 %v10891_v60 }
 0x4b5   :  { %15330 = vst [vmem:[#allocation67_spill] sm:$0xff] %v13820_v20  ;;  %v15331_v20 = vrot.slane %v13389_v3, 5  ;;  %v10861_v44 = vld [vmem:[#allocation6 + $0x4c] ss:$36 sps:$4 sm:$0xff]   ;;  %6511 = vmatprep.mubr.bf16.mxu0 %v10860_v53  ;;  %v4511_v2 = vmul.f32 0.01, %v13360_v42  ;;  %v4712_v23 = vsel %vm11772_vm10, %v4707_v12, %v13589_v49  ;;  %10259 = vmatprep.subr.bf16.mxu1 %v10896_v17 }
 0x4b6   :  { %v5012_v3 = vsel %vm11759_vm9, %v13419_v14, %v15335_v56  ;;  %v10864_v57 = vld [vmem:[#allocation6 + $0x54] ss:$36 sps:$4 sm:$0xff]   ;;  %v15336_v30 = vrot.slane %v13409_v32, 5  ;;  %v13868_v48 = vrot.slane %v5383_v51, 6  ;;  %6512 = vmatmul.mubr.bf16.vlgmr.msra.gmra.mrb[120].mxu0 %v10858_v38  ;;  %v4524_v33 = vsel %vm4496_vm3, %v13334_v9, %v4510_v34  ;;  %6439 = vmatprep.mubr.bf16.mxu1 %v10861_v44  ;;  %v4601_v53 = vld [vmem:[#allocation5 + $0x14] sm:$0xf] }
 0x4b7   :  { %v5009_v59 = vsel %vm11759_vm9, %v15332_v5, %v15331_v20  ;;  %v4944_v5 = vor.u32 %v13772_v1, %v13766_v35  ;;  %v10863_v20 = vld [vmem:[#allocation6 + $0x48] ss:$36 sps:$4 sm:$0xff]   ;;  %5046 = vst [vmem:[#allocation6 + $0x7c] sm:$0xf] %v5012_v3  ;;  %v4600_v39 = vld [vmem:[#allocation5 + $0x10] sm:$0xf]  ;;  %v9464_v12 = vpack.c.bf16 %v4524_v33, %v4524_v33  ;;  %v4525_v38 = vsel %vm4497_vm4, %v13360_v42, %v4511_v2 }
 0x4b8   :  { %5045 = vst [vmem:[#allocation6 + $0x58] sm:$0xf] %v5009_v59  ;;  %v5233_v14 = vsel %vm11759_vm9, %v13443_v41, %v15336_v30  ;;  %v10885_v32 = vld [vmem:[%s14915_s6 + $0x188] sm:$0xff]   ;;  %v15337_v41 = vrot.slane %v13512_v62, 5  ;;  %v15338_v9 = vrot.slane %v13804_v7, 6  ;;  %v15339_v34 = vrot.slane %v13814_v43, 6  ;;  %6440 = vmatmul.mubr.bf16.gmra.mrb[152].mxu1 %v10863_v20  ;;  %6519 = vmatprep.mubr.bf16.mxu0 %v10864_v57 }
 0x4b9   :  { %5269 = vst [vmem:[#allocation6 + $0x60] sm:$0xf] %v5233_v14  ;;  %4611 = vst [vmem:[#allocation6 + $0x90] sm:$0xf] %v4600_v39  ;;  %v4602_v62 = vld [vmem:[#allocation5 + $0x18] sm:$0xf]  ;;  %v9465_v42 = vpack.c.bf16 %v4525_v38, %v4525_v38  ;;  %10304 = vmatpush3.bf16.msra.mxu0 %v10878_v19  ;;  %v15340_v2 = vor.u32 %v13500_v15, %v13498_v55  ;;  %v15341_v30 = vor.u32 %v13619_v28, %v13613_v46 }
 0x4ba   :  { %v5236_v13 = vsel %vm11759_vm9, %v13448_v58, %v15337_v41  ;;  %v13886_v44 = vrot.slane %v15338_v9, 4  ;;  %v13890_v51 = vrot.slane %v15339_v34, 4  ;;  %4612 = vst [vmem:[#allocation6 + $0xb4] sm:$0xf] %v4601_v53  ;;  %4756 = vst [vmem:[#allocation6 + $0x100] sm:$0xf] %v4712_v23  ;;  %10305 = vmatprep.subr.bf16.mxu0 %v10883_v10  ;;  %v15343_v23 = vor.u32 %v13591_v26, %v13589_v49 }
 0x4bb   :  { %v10890_v58 = vld [vmem:[%s14915_s6 + $0x1d0] sm:$0xff]   ;;  %v10898_v59 = vld [vmem:[%s14915_s6 + $0x120] sm:$0xff]   ;;  %v10904_v56 = vld [vmem:[%s14915_s6 + $0x168] sm:$0xff]   ;;  %5270 = vst [vmem:[#allocation6 + $0x84] sm:$0xf] %v5236_v13  ;;  %v4915_v20 = vrot.slane %v15340_v2, 4  ;;  %v15344_v15 = vor.u32 %v13597_v0, %v13593_v11 }
 0x4bc   :  { %v10866_v3 = vld [vmem:[#allocation6 + $0x50] ss:$36 sps:$4 sm:$0xff]   ;;  %v4603_v57 = vld [vmem:[#allocation5 + $0x1c] sm:$0xf]  ;;  %4613 = vst [vmem:[#allocation6 + $0xd8] sm:$0xf] %v4602_v62  ;;  %v15352_v62 = vor.u32 %v13623_v52, %v13621_v47  ;;  %10260 = vmatpush3.bf16.msra.mxu1 %v10898_v59 }
 0x4bd   :  { %v4925_v14 = vrot.slane %v15341_v30, 4  ;;  %v4604_v33 = vld [vmem:[#allocation5 + $0x20] sm:$0xf]  ;;  %v15342_v39 = vld [vmem:[#allocation32_spill] sm:$0xff]  ;;  %4594 = vst [vmem:[#allocation5 + $0x30] sm:$0xf] %v9464_v12  ;;  %v4920_v49 = vsel %vm11772_vm10, %v4915_v20, %v13613_v46  ;;  %10306 = vmatpush3.bf16.msra.mxu0 %v10885_v32  ;;  %10261 = vmatprep.subr.bf16.mxu1 %v10904_v56 }
 0x4be   :  { %v13912_v53 = vor.u32 %v15342_v39, %v13429_v27  ;;  %4614 = vst [vmem:[#allocation6 + $0xfc] sm:$0xf] %v4603_v57  ;;  %v4605_v19 = vld [vmem:[#allocation5 + $0x24] sm:$0xf]  ;;  %4615 = vst [vmem:[#allocation6 + $0x120] sm:$0xf] %v4604_v33  ;;  %10307 = vmatprep.subr.bf16.mxu0 %v10890_v58  ;;  %6520 = vmatmul.mubr.bf16.gmra.mrb[124].mxu0 %v10866_v3 }
 0x4bf   :  { %v4717_v55 = vrot.slane %v15343_v23, 4  ;;  %v4727_v28 = vrot.slane %v15344_v15, 4  ;;  %v4606_v60 = vld [vmem:[#allocation5 + $0x28] sm:$0x7]  ;;  %v15348_v34 = vld [vmem:[#allocation24_spill] sm:$0xff]  ;;  %v4930_v26 = vsel %vm11772_vm10, %v4925_v14, %v13621_v47  ;;  %v15351_v0 = vshrl.u32 %v13694_v61, 16 }
 0x4c0   :  { %v15345_v41 = vld [vmem:[#allocation18_spill] sm:$0xff]  ;;  %v15347_v9 = vld [vmem:[#allocation39_spill] sm:$0xff]  ;;  %v15349_v10 = vrot.slane %v15348_v34, 5  ;;  %4595 = vst [vmem:[#allocation5 + $0x34] sm:$0x1] %v9465_v42  ;;  %v4935_v57 = vrot.slane %v15352_v62, 4 }
 0x4c1   :  { %v15346_v13 = vrot.slane %v15345_v41, 5  ;;  %v15350_v12 = vld [vmem:[#allocation15_spill] sm:$0xff]  ;;  %4616 = vst [vmem:[#allocation6 + $0x144] sm:$0xf] %v4605_v19  ;;  %4617 = vst [vmem:[#allocation6 + $0x168] sm:$0x7] %v4606_v60  ;;  %v4722_v46 = vsel %vm11772_vm10, %v4717_v55, %v13593_v11  ;;  %v4732_v2 = vsel %vm11772_vm10, %v4727_v28, %v13740_v36 }
 0x4c2   :  { %v5018_v38 = vsel %vm11759_vm9, %v15350_v12, %v15349_v10  ;;  %v4735_v17 = vrot.slane %v15351_v0, 4  ;;  %v10872_v42 = vld [vmem:[#allocation6 + $0x9c] ss:$36 sps:$4 sm:$0xff]   ;;  %4973 = vst [vmem:[#allocation6 + $0xe4] sm:$0xf] %v4920_v49  ;;  %v4945_v61 = vrot.slane %v4944_v5, 4  ;;  %v4940_v30 = vsel %vm11772_vm10, %v4935_v57, %v13766_v35 }
 0x4c3   :  { %v5015_v27 = vsel %vm11759_vm9, %v15347_v9, %v15346_v13  ;;  %5048 = vst [vmem:[#allocation6 + $0xc4] sm:$0xf] %v5018_v38  ;;  %4974 = vst [vmem:[#allocation6 + $0x108] sm:$0xf] %v4930_v26  ;;  %v15353_v52 = vrot.slane %v13718_v8, 5  ;;  %v10892_v20 = vld [vmem:[%s14915_s6 + $0x190] sm:$0xff]   ;;  %6527 = vmatprep.mubr.bf16.mxu0 %v10872_v42 }
 0x4c4   :  { %5047 = vst [vmem:[#allocation6 + $0xa0] sm:$0xf] %v5015_v27  ;;  %4757 = vst [vmem:[#allocation6 + $0x124] sm:$0xf] %v4722_v46  ;;  %v4736_v11 = vor.u32 %v4735_v17, %v13740_v36  ;;  %v15354_v1 = vshrl.u32 %v13727_v37, 16  ;;  %v15355_v8 = vld [vmem:[#allocation51_spill] sm:$0xff]  ;;  %v4950_v59 = vsel %vm11772_vm10, %v4945_v61, %v13792_v18  ;;  %10308 = vmatpush3.bf16.msra.mxu0 %v10892_v20 }
 0x4c5   :  { %v4813_v47 = vrot.slane %v15353_v52, 4  ;;  %4758 = vst [vmem:[#allocation6 + $0x148] sm:$0xf] %v4732_v2  ;;  %v5084_v14 = vrot.slane %v15355_v8, 4  ;;  %v10897_v32 = vld [vmem:[%s14915_s6 + $0x1d8] sm:$0xff]   ;;  %v10907_v37 = vld [vmem:[%s14915_s6 + $0x128] sm:$0xff]  }
 0x4c6   :  { %v13961_v5 = vrot.slane %v15354_v1, 4  ;;  %4975 = vst [vmem:[#allocation6 + $0x12c] sm:$0xf] %v4940_v30  ;;  %v15356_v36 = vld [vmem:[#allocation33_spill] sm:$0xff]  ;;  %v15357_v35 = vld [vmem:[#allocation40_spill] sm:$0xff]  ;;  %v15360_v23 = vld [vmem:[#allocation42_spill] sm:$0xff]  ;;  %10309 = vmatprep.subr.bf16.mxu0 %v10897_v32  ;;  %10262 = vmatpush3.bf16.msra.mxu1 %v10907_v37 }
 0x4c7   :  { %4835 = vst [vmem:[#allocation6 + $0x170] sm:$0x7] %v4813_v47  ;;  %v15358_v33 = vor.u32 %v15356_v36, %v15357_v35  ;;  %v15359_v58 = vld [vmem:[#allocation17_spill] sm:$0xff]  ;;  %v5094_v55 = vrot.slane %v15360_v23, 4  ;;  %v10867_v15 = vld [vmem:[#allocation6 + $0x94] ss:$36 sps:$4 sm:$0xff]   ;;  %v5093_v60 = vsel %vm12031_vm1, %v5084_v14, %v15360_v23 }
 0x4c8   :  { %v5308_v19 = vrot.slane %v15359_v58, 4  ;;  %v4737_v56 = vrot.slane %v4736_v11, 4  ;;  %4976 = vst [vmem:[#allocation6 + $0x150] sm:$0xf] %v4950_v59  ;;  %v5104_v41 = vrot.slane %v13912_v53, 4  ;;  %v15362_v13 = vld [vmem:[#allocation30_spill] sm:$0xff]  ;;  %6447 = vmatprep.mubr.bf16.mxu1 %v10867_v15  ;;  %v4954_v47 = vor.u32 %v13961_v5, %v13792_v18  ;;  %10310 = vmatpush3.bf16.msra.mxu0 %v10899_v16 }
 0x4c9   :  { %v5298_v39 = vrot.slane %v15358_v33, 4  ;;  %v15363_v9 = vld [vmem:[#allocation25_spill] sm:$0xff]  ;;  %v10869_v34 = vld [vmem:[#allocation6 + $0x90] ss:$36 sps:$4 sm:$0xff]   ;;  %5192 = vst [vmem:[#allocation6 + $0x38] sm:$0xf] %v5093_v60  ;;  %v5103_v49 = vsel %vm12031_vm1, %v5094_v55, %v13912_v53 }
 0x4ca   :  { %v13987_v27 = vor.u32 %v15363_v9, %v15362_v13  ;;  %v10905_v3 = vld [vmem:[%s14915_s6 + $0x1e0] sm:$0xff]   ;;  %v10910_v10 = vld [vmem:[%s14915_s6 + $0x170] sm:$0xff]   ;;  %v5317_v38 = vsel %vm12031_vm1, %v5308_v19, %v13861_v45  ;;  %v5318_v26 = vrot.slane %v13861_v45, 4  ;;  %4759 = vst [vmem:[#allocation6 + $0x16c] sm:$0x7] %v4737_v56  ;;  %6448 = vmatmul.mubr.bf16.gmra.mrb[156].mxu1 %v10869_v34  ;;  %v15369_v5 = vrot.slane %v13629_v22, 5 }
 0x4cb   :  { %v5307_v12 = vsel %vm12031_vm1, %v5298_v39, %v15359_v58  ;;  %v5065_v0 = vld [vmem:[#allocation5 + $0x30] sm:$0x1]  ;;  %5416 = vst [vmem:[#allocation6 + $0x40] sm:$0xf] %v5317_v38  ;;  %5193 = vst [vmem:[#allocation6 + $0x5c] sm:$0xf] %v5103_v49  ;;  %10263 = vmatprep.subr.bf16.mxu1 %v10910_v10  ;;  %10311 = vmatprep.subr.bf16.mxu0 %v10905_v3 }
 0x4cc   :  { %v14005_v17 = vld [vmem:[#allocation5 + $0x30] sm:$0xf]  ;;  %5415 = vst [vmem:[#allocation6 + $0x1c] sm:$0xf] %v5307_v12  ;;  %v5113_v57 = vsel %vm12031_vm1, %v5104_v41, %v13987_v27  ;;  %v5176_v53 = vshll.u32 %v5065_v0, 16  ;;  %v10912_v20 = vld [vmem:[%s14915_s6 + $0x130] sm:$0xff]  }
 0x4cd   :  { %v5288_v62 = vld [vmem:[#allocation5 + $0x30] sm:$0xf]  ;;  %5194 = vst [vmem:[#allocation6 + $0x80] sm:$0xf] %v5113_v57  ;;  %v14022_v30 = vld [vmem:[#allocation5 + $0x34] sm:$0x1]  ;;  %10264 = vmatpush3.bf16.msra.mxu1 %v10912_v20 }
 0x4ce   :  { %v15364_v42 = vld [vmem:[#allocation28_spill] sm:$0xff]  ;;  %v5390_v45 = vshrl.u32 %v5288_v62, 16  ;;  %v5393_v61 = vshll.u32 %v5288_v62, 16  ;;  %v15366_v14 = vld [vmem:[#allocation14_spill] sm:$0xff]  ;;  %v15370_v36 = vld [vmem:[#allocation21_spill] sm:$0xff]  ;;  %v14049_v41 = vrot.slane %v5176_v53, 6 }
 0x4cf   :  { %v15365_v46 = vld [vmem:[#allocation16_spill] sm:$0xff]  ;;  %v15367_v32 = vrot.slane %v15366_v14, 5  ;;  %v5242_v35 = vsel %vm11759_vm9, %v15370_v36, %v15369_v5  ;;  %v10918_v19 = vld [vmem:[%s14915_s6 + $0x178] sm:$0xff]   ;;  %v15372_v55 = vld [vmem:[#allocation29_spill] sm:$0xff]  ;;  %v5253_v13 = vrot.slane %v14005_v17, 5  ;;  %v5400_v9 = vshll.u32 %v14022_v30, 16 }
 0x4d0   :  { %v14012_v2 = vor.u32 %v15365_v46, %v15364_v42  ;;  %v14014_v52 = vld [vmem:[#allocation5 + $0x30] sm:$0xf]  ;;  %v5392_v33 = vrot.slane %v5390_v45, 5  ;;  %v5395_v39 = vrot.slane %v5393_v61, 6  ;;  %v10879_v58 = vld [vmem:[#allocation6 + $0xdc] ss:$36 sps:$4 sm:$0xff]   ;;  %v14083_v36 = vor.u32 %v13684_v4, %v13671_v25  ;;  %10265 = vmatprep.subr.bf16.mxu1 %v10918_v19 }
 0x4d1   :  { %v5479_v11 = vrot.slane %v14014_v52, 6  ;;  %v10874_v1 = vld [vmem:[#allocation6 + $0x98] ss:$36 sps:$4 sm:$0xff]   ;;  %v15371_v23 = vld [vmem:[#allocation22_spill] sm:$0xff]  ;;  %5272 = vst [vmem:[#allocation6 + $0xcc] sm:$0xf] %v5242_v35  ;;  %6455 = vmatprep.mubr.bf16.mxu1 %v10879_v58 }
 0x4d2   :  { %v5327_v8 = vsel %vm12031_vm1, %v5318_v26, %v14012_v2  ;;  %v15368_v59 = vld [vmem:[#allocation12_spill] sm:$0xff]  ;;  %v14045_v15 = vor.u32 %v15372_v55, %v15371_v23  ;;  %v15373_v22 = vld [vmem:[#allocation31_spill] sm:$0xff]  ;;  %v15375_v10 = vld [vmem:[#allocation49_spill] sm:$0xff]  ;;  %6528 = vmatmul.mubr.bf16.gmra.mrb[128].mxu0 %v10874_v1  ;;  %v4955_v3 = vrot.slane %v4954_v47, 4  ;;  %v15385_v35 = vrot.slane %v13637_v40, 5 }
 0x4d3   :  { %v5239_v18 = vsel %vm11759_vm9, %v15368_v59, %v15367_v32  ;;  %v10908_v37 = vld [vmem:[%s14915_s6 + $0x1a0] sm:$0xff]   ;;  %5417 = vst [vmem:[#allocation6 + $0x64] sm:$0xf] %v5327_v8  ;;  %v10911_v34 = vld [vmem:[%s14915_s6 + $0x1e8] sm:$0xff]   ;;  %v14062_v49 = vrot.slane %v5479_v11, 4  ;;  %v15379_v16 = vld [vmem:[#allocation46_spill] sm:$0xff]  ;;  %v14076_v59 = vor.u32 %v5395_v39, %v5392_v33 }
 0x4d4   :  { %v15374_v56 = vld [vmem:[#allocation19_spill] sm:$0xff]  ;;  %5271 = vst [vmem:[#allocation6 + $0xa8] sm:$0xf] %v5239_v18  ;;  %v15376_v12 = vld [vmem:[#allocation13_spill] sm:$0xff]  ;;  %v15378_v57 = vld [vmem:[#allocation52_spill] sm:$0xff]  ;;  %v15380_v46 = vrot.slane %v15379_v16, 5  ;;  %v5245_v33 = vsel %vm11759_vm9, %v13660_v54, %v15385_v35  ;;  %10312 = vmatpush3.bf16.msra.mxu0 %v10908_v37 }
 0x4d5   :  { %v5122_v60 = vor.u32 %v15374_v56, %v15373_v22  ;;  %v14058_v38 = vor.u32 %v15376_v12, %v15375_v10  ;;  %v10881_v26 = vld [vmem:[#allocation6 + $0xd8] ss:$36 sps:$4 sm:$0xff]   ;;  %v10886_v0 = vld [vmem:[#allocation6 + $0xe4] ss:$36 sps:$4 sm:$0xff]   ;;  %v10920_v5 = vld [vmem:[%s14915_s6 + $0x138] sm:$0xff]   ;;  %v5328_v47 = vrot.slane %v14012_v2, 4  ;;  %v14115_v12 = vor.u32 %v13831_v31, %v13829_v24  ;;  %10313 = vmatprep.subr.bf16.mxu0 %v10911_v34 }
 0x4d6   :  { %v15377_v62 = vld [vmem:[#allocation47_spill] sm:$0xff]  ;;  %v15381_v53 = vld [vmem:[#allocation26_spill] sm:$0xff]  ;;  %v15382_v61 = vld [vmem:[#allocation48_spill] sm:$0xff]  ;;  %6535 = vmatprep.mubr.bf16.mxu0 %v10886_v0  ;;  %v5114_v20 = vrot.slane %v13987_v27, 4  ;;  %v15388_v40 = vrot.slane %v13774_v29, 5  ;;  %6456 = vmatmul.mubr.bf16.gmra.mrb[160].mxu1 %v10881_v26  ;;  %v15394_v16 = vrot.slane %v13743_v50, 5 }
 0x4d7   :  { %v5346_v42 = vor.u32 %v15378_v57, %v15377_v62  ;;  %v5021_v45 = vsel %vm11759_vm9, %v15381_v53, %v15380_v46  ;;  %v15383_v8 = vrot.slane %v15382_v61, 5  ;;  %v15384_v14 = vld [vmem:[#allocation34_spill] sm:$0xff]  ;;  %v14095_v1 = vld [vmem:[%s14915_s6 + $0x200] sm:$0xff]   ;;  %5273 = vst [vmem:[#allocation6 + $0xf0] sm:$0xf] %v5245_v33  ;;  %v10916_v27 = vld [vmem:[%s14915_s6 + $0x1a8] sm:$0xff]   ;;  %v5337_v0 = vsel %vm12031_vm1, %v5328_v47, %v14045_v15  ;;  %10266 = vmatpush3.bf16.msra.mxu1 %v10920_v5 }
 0x4d8   :  { %v10893_v18 = vld [vmem:[#allocation6 + $0x124] ss:$36 sps:$4 sm:$0xff]   ;;  %5049 = vst [vmem:[#allocation6 + $0xe8] sm:$0xf] %v5021_v45  ;;  %v15389_v58 = vld [vmem:[#allocation56_spill] sm:$0xff]  ;;  %v5124_v2 = vrot.slane %v5122_v60, 4  ;;  %v5123_v62 = vsel %vm12031_vm1, %v5114_v20, %v5122_v60  ;;  %10503 = vmatprep.subr.bf16.mxu1 %v14095_v1  ;;  %10314 = vmatpush3.bf16.msra.mxu0 %v10916_v27 }
 0x4d9   :  { %v5024_v32 = vsel %vm11759_vm9, %v15384_v14, %v15383_v8  ;;  %v15386_v25 = vld [vmem:[#allocation54_spill] sm:$0xff]  ;;  %v5248_v54 = vsel %vm11759_vm9, %v15389_v58, %v15388_v40  ;;  %4977 = vst [vmem:[#allocation6 + $0x174] sm:$0x7] %v4955_v3  ;;  %v15390_v23 = vld [vmem:[#allocation36_spill] sm:$0xff]  ;;  %v15391_v55 = vld [vmem:[#allocation35_spill] sm:$0xff]  ;;  %v5338_v57 = vrot.slane %v14045_v15, 4  ;;  %6463 = vmatprep.mubr.bf16.mxu1 %v10893_v18 }
 0x4da   :  { %5050 = vst [vmem:[#allocation6 + $0x10c] sm:$0xf] %v5024_v32  ;;  %v15387_v4 = vld [vmem:[#allocation50_spill] sm:$0xff]  ;;  %v5152_v22 = vor.u32 %v15391_v55, %v15390_v23  ;;  %5274 = vst [vmem:[#allocation6 + $0x114] sm:$0xf] %v5248_v54  ;;  %v15393_v29 = vld [vmem:[#allocation59_spill] sm:$0xff]  ;;  %v5133_v34 = vsel %vm12031_vm1, %v5124_v2, %v14058_v38 }
 0x4db   :  { %v5142_v39 = vor.u32 %v15387_v4, %v15386_v25  ;;  %v14104_v19 = vld [vmem:[#allocation6 + $0x168] sm:$0x77]  ;;  %v10888_v31 = vld [vmem:[#allocation6 + $0xe0] ss:$36 sps:$4 sm:$0xff]   ;;  %5418 = vst [vmem:[#allocation6 + $0x88] sm:$0xf] %v5337_v0  ;;  %v5347_v14 = vsel %vm12031_vm1, %v5338_v57, %v5346_v42 }
 0x4dc   :  { %v15392_v56 = vld [vmem:[#allocation58_spill] sm:$0xff]  ;;  %v15395_v46 = vld [vmem:[#allocation53_spill] sm:$0xff]  ;;  %5195 = vst [vmem:[#allocation6 + $0xa4] sm:$0xf] %v5123_v62  ;;  %v5348_v26 = vrot.slane %v5346_v42, 4  ;;  %v15396_v60 = vrot.slane %v13769_v63, 5  ;;  %v9125_v61 = vcombine.high %v14104_v19, %v14104_v19  ;;  %6536 = vmatmul.mubr.bf16.gmra.mrb[132].mxu0 %v10888_v31 }
 0x4dd   :  { %v5366_v10 = vor.u32 %v15393_v29, %v15392_v56  ;;  %v10919_v37 = vld [vmem:[%s14915_s6 + $0x1f0] sm:$0xff]   ;;  %v5027_v24 = vsel %vm11759_vm9, %v15395_v46, %v15394_v16  ;;  %v15398_v53 = vld [vmem:[#allocation63_spill] sm:$0xff]  ;;  %5196 = vst [vmem:[#allocation6 + $0xc8] sm:$0xf] %v5133_v34  ;;  %v5134_v32 = vrot.slane %v14058_v38, 4  ;;  %v5144_v18 = vrot.slane %v5142_v39, 4 }
 0x4de   :  { %v5030_v50 = vsel %vm11759_vm9, %v13796_v21, %v15396_v60  ;;  %5051 = vst [vmem:[#allocation6 + $0x130] sm:$0xf] %v5027_v24  ;;  %v15397_v15 = vld [vmem:[#allocation37_spill] sm:$0xff]  ;;  %v10901_v8 = vld [vmem:[#allocation6 + $0x12c] ss:$36 sps:$4 sm:$0xff]   ;;  %v5357_v5 = vsel %vm12031_vm1, %v5348_v26, %v14083_v36  ;;  %v5358_v42 = vrot.slane %v14083_v36, 4  ;;  %10315 = vmatprep.subr.bf16.mxu0 %v10919_v37  ;;  %v15406_v46 = vmov %v15396_v60 }
 0x4df   :  { %v5162_v45 = vor.u32 %v15398_v53, %v15397_v15  ;;  %5052 = vst [vmem:[#allocation6 + $0x154] sm:$0xf] %v5030_v50  ;;  %v10921_v21 = vld [vmem:[%s14915_s6 + $0x1b0] sm:$0xff]   ;;  %v10925_v3 = vld [vmem:[%s14915_s6 + $0x1f8] sm:$0xff]   ;;  %5419 = vst [vmem:[#allocation6 + $0xac] sm:$0xf] %v5347_v14  ;;  %v5143_v4 = vsel %vm12031_vm1, %v5134_v32, %v5142_v39  ;;  %v5153_v40 = vsel %vm12031_vm1, %v5144_v18, %v5152_v22  ;;  %6543 = vmatprep.mubr.bf16.mxu0 %v10901_v8 }
 0x4e0   :  { %v5368_v35 = vrot.slane %v5366_v10, 4  ;;  %v15399_v38 = vld [vmem:[#allocation64_spill] sm:$0xff]  ;;  %v15400_v33 = vld [vmem:[#allocation65_spill] sm:$0xff]  ;;  %5420 = vst [vmem:[#allocation6 + $0xd0] sm:$0xf] %v5357_v5  ;;  %v5154_v58 = vrot.slane %v5152_v22, 4  ;;  %v5367_v36 = vsel %vm12031_vm1, %v5358_v42, %v5366_v10  ;;  %10316 = vmatpush3.bf16.msra.mxu0 %v10921_v21 }
 0x4e1   :  { %v5172_v47 = vor.u32 %v15400_v33, %v15399_v38  ;;  %v14159_v20 = vld [vmem:[#allocation5 + $0x34] sm:$0x1]  ;;  %v10895_v25 = vld [vmem:[#allocation6 + $0x120] ss:$36 sps:$4 sm:$0xff]   ;;  %v5164_v54 = vrot.slane %v5162_v45, 4  ;;  %v15401_v2 = vld [vmem:[#allocation62_spill] sm:$0xff]  ;;  %10317 = vmatprep.subr.bf16.mxu0 %v10925_v3 }
 0x4e2   :  { %5197 = vst [vmem:[#allocation6 + $0xec] sm:$0xf] %v5143_v4  ;;  %5198 = vst [vmem:[#allocation6 + $0x110] sm:$0xf] %v5153_v40  ;;  %v5377_v27 = vsel %vm12031_vm1, %v5368_v35, %v14115_v12  ;;  %v15402_v23 = vrot.slane %v15401_v2, 5  ;;  %v15403_v55 = vld [vmem:[#allocation66_spill] sm:$0xff]  ;;  %v5163_v29 = vsel %vm12031_vm1, %v5154_v58, %v5162_v45  ;;  %6464 = vmatmul.mubr.bf16.gmra.mrb[164].mxu1 %v10895_v25 }
 0x4e3   :  { %v15404_v22 = vld [vmem:[#allocation67_spill] sm:$0xff]  ;;  %5421 = vst [vmem:[#allocation6 + $0xf4] sm:$0xf] %v5367_v36  ;;  %5422 = vst [vmem:[#allocation6 + $0x118] sm:$0xf] %v5377_v27  ;;  %v5173_v10 = vsel %vm12031_vm1, %v5164_v54, %v5172_v47  ;;  %v5378_v37 = vrot.slane %v14115_v12, 4  ;;  %6471 = vmatprep.mubr.bf16.mxu1 %v9125_v61 }
 0x4e4   :  { %v5251_v39 = vsel %vm11759_vm9, %v15403_v55, %v15402_v23  ;;  %v5254_v56 = vsel %vm11759_vm9, %v15404_v22, %v5253_v13  ;;  %v15405_v0 = vld [vmem:[#allocation20_spill] sm:$0xff]  ;;  %v5402_v6 = vrot.slane %v5400_v9, 6  ;;  %v5482_v57 = vrot.slane %v14159_v20, 6  ;;  %v10928_v16 = vld [vmem:[%s14915_s6 + $0x1b8] sm:$0xff]   ;;  %5199 = vst [vmem:[#allocation6 + $0x134] sm:$0xf] %v5163_v29 }
 0x4e5   :  { %5275 = vst [vmem:[#allocation6 + $0x138] sm:$0xf] %v5251_v39  ;;  %5276 = vst [vmem:[#allocation6 + $0x15c] sm:$0xf] %v5254_v56  ;;  %v5386_v62 = vor.u32 %v13868_v48, %v15405_v0  ;;  %v5031_v24 = vrot.slane %v15406_v46, 4  ;;  %v5174_v31 = vrot.slane %v5172_v47, 4  ;;  %10318 = vmatpush3.bf16.msra.mxu0 %v10928_v16 }
 0x4e6   :  { %5200 = vst [vmem:[#allocation6 + $0x158] sm:$0xf] %v5173_v10  ;;  %v5255_v9 = vrot.slane %v5253_v13, 4  ;;  %v15407_v12 = vld [vmem:[#allocation41_spill] sm:$0xff]  ;;  %v15409_v26 = vld [vmem:[#allocation38_spill] sm:$0xff]  ;;  %v5398_v45 = vrot.slane %v14076_v59, 4  ;;  %v5483_v4 = vsel %vm11855_vm13, %v14062_v49, %v5482_v57 }
 0x4e7   :  { %v5387_v48 = vsel %vm12031_vm1, %v5378_v37, %v5386_v62  ;;  %v5388_v30 = vrot.slane %v5386_v62, 4  ;;  %v15408_v34 = vrot.slane %v15407_v12, 6  ;;  %v10903_v15 = vld [vmem:[#allocation6 + $0x128] ss:$36 sps:$4 sm:$0xff]   ;;  %v5557_v63 = vld [vmem:[#allocation6 + $0x170] sm:$0x77]  ;;  %v5179_v53 = vsel %vm12031_vm1, %v5174_v31, %v14049_v41 }
 0x4e8   :  { %5423 = vst [vmem:[#allocation6 + $0x13c] sm:$0xf] %v5387_v48  ;;  %5053 = vst [vmem:[#allocation6 + $0x178] sm:$0x7] %v5031_v24  ;;  %v15411_v17 = vld [vmem:[#allocation45_spill] sm:$0xff]  ;;  %v15413_v8 = vld [vmem:[#allocation44_spill] sm:$0xff]  ;;  %v9127_v28 = vcombine.high %v5557_v63, %v5557_v63  ;;  %6544 = vmatmul.mubr.bf16.gmra.mrb[136].mxu0 %v10903_v15  ;;  %v9126_v52 = vcombine.low %v5557_v63, %v5557_v63 }
 0x4e9   :  { %v5456_v50 = vsel %vm11855_vm13, %v15409_v26, %v15408_v34  ;;  %v15412_v13 = vrot.slane %v15411_v17, 6  ;;  %v15414_v32 = vld [vmem:[#allocation55_spill] sm:$0xff]  ;;  %v5397_v3 = vsel %vm12031_vm1, %v5388_v30, %v14076_v59  ;;  %5201 = vst [vmem:[#allocation6 + $0x17c] sm:$0x7] %v5179_v53  ;;  %5277 = vst [vmem:[#allocation6 + $0x180] sm:$0x7] %v5255_v9  ;;  %v5403_v59 = vsel %vm12031_vm1, %v5398_v45, %v5402_v6 }
 0x4ea   :  { %5496 = vst [vmem:[#allocation6 + $0x44] sm:$0xf] %v5456_v50  ;;  %v15415_v18 = vrot.slane %v15414_v32, 6  ;;  %v15416_v61 = vld [vmem:[#allocation27_spill] sm:$0xff]  ;;  %v15417_v41 = vld [vmem:[#allocation57_spill] sm:$0xff]  ;;  %v15419_v42 = vld [vmem:[#allocation60_spill] sm:$0xff]  ;;  %6551 = vmatprep.mubr.bf16.mxu0 %v9127_v28 }
 0x4eb   :  { %v5465_v14 = vsel %vm11855_vm13, %v15413_v8, %v15412_v13  ;;  %v15418_v5 = vrot.slane %v15417_v41, 6  ;;  %v15420_v38 = vrot.slane %v13804_v7, 6  ;;  %v15421_v33 = vld [vmem:[#allocation61_spill] sm:$0xff]  ;;  %5424 = vst [vmem:[#allocation6 + $0x160] sm:$0xf] %v5397_v3  ;;  %v15422_v20 = vrot.slane %v13814_v43, 6 }
 0x4ec   :  { %v5468_v21 = vsel %vm11855_vm13, %v15416_v61, %v15415_v18  ;;  %5499 = vst [vmem:[#allocation6 + $0xb0] sm:$0xf] %v5465_v14  ;;  %v5480_v7 = vsel %vm11855_vm13, %v13890_v51, %v5479_v11  ;;  %5425 = vst [vmem:[#allocation6 + $0x184] sm:$0x7] %v5403_v59  ;;  %v9124_v43 = vcombine.low %v14104_v19, %v14104_v19  ;;  %v10924_v40 = vld [vmem:[#allocation6 + $0x1c] ss:$36 sps:$4 sm:$0xff]  }
 0x4ed   :  { %5500 = vst [vmem:[#allocation6 + $0xd4] sm:$0xf] %v5468_v21  ;;  %v5471_v35 = vsel %vm11855_vm13, %v15419_v42, %v15418_v5  ;;  %v5474_v47 = vsel %vm11855_vm13, %v15421_v33, %v15420_v38  ;;  %v5477_v25 = vsel %vm11855_vm13, %v13886_v44, %v15422_v20  ;;  %5504 = vst [vmem:[#allocation6 + $0x164] sm:$0xf] %v5480_v7  ;;  %v10915_v44 = vld [vmem:[#allocation6 + $0x14] ss:$36 sps:$4 sm:$0xff]  }
 0x4ee   :  { %5501 = vst [vmem:[#allocation6 + $0xf8] sm:$0xf] %v5471_v35  ;;  %5502 = vst [vmem:[#allocation6 + $0x11c] sm:$0xf] %v5474_v47  ;;  %6472 = vmatmul.mubr.bf16.gmra.mrb[168].mxu1 %v9124_v43  ;;  %v10913_v51 = vld [vmem:[#allocation6 + $0x10] ss:$36 sps:$4 sm:$0xff]  }
 0x4ef   :  { %5503 = vst [vmem:[#allocation6 + $0x140] sm:$0xf] %v5477_v25  ;;  %5505 = vst [vmem:[#allocation6 + $0x188] sm:$0x7] %v5483_v4  ;;  %6591 = vmatprep.mubr.bf16.mxu1 %v10915_v44  ;;  %v10940_v11 = vld [vmem:[%s14915_s6 + $0x208] sm:$0xff]   ;;  %v10943_v19 = vld [vmem:[%s14915_s6 + $0x210] sm:$0xff]  }
 0x4f0   :  { %6552 = vmatmul.mubr.bf16.gmra.mrb[140].mxu0 %v9126_v52  ;;  %v10926_v49 = vld [vmem:[#allocation6 + $0x5c] ss:$36 sps:$4 sm:$0xff]   ;;  %v10929_v36 = vld [vmem:[#allocation6 + $0x64] ss:$36 sps:$4 sm:$0xff]   ;;  %v10947_v23 = vld [vmem:[%s14915_s6 + $0x218] sm:$0xff]   ;;  %vm6877_vm13 = vcmask 257024  }
 0x4f1   :  { %6671 = vmatprep.mubr.bf16.mxu0 %v10924_v40  ;;  %v10922_v58 = vld [vmem:[#allocation6 + $0x18] ss:$36 sps:$4 sm:$0xff]   ;;  %v10931_v55 = vld [vmem:[#allocation6 + $0xa4] ss:$36 sps:$4 sm:$0xff]   ;;  %v10934_v56 = vld [vmem:[#allocation6 + $0xac] ss:$36 sps:$4 sm:$0xff]  }
 0x4f2   :  { %v5523_v54 = vld [vmem:[#allocation6 + $0x7c] sm:$0xff]  ;;  %v5533_v39 = vld [vmem:[#allocation6 + $0xc4] sm:$0xff]  ;;  %v10937_v0 = vld [vmem:[#allocation6 + $0xec] ss:$36 sps:$4 sm:$0xff]   ;;  %vm6888_vm8 = vcmask 256000   ;;  %vm7045_vm11 = vcmask 1046528  }
 0x4f3   :  { %v5518_v27 = vld [vmem:[#allocation6 + $0x58] sm:$0xff]  ;;  %v10933_v22 = vld [vmem:[#allocation6 + $0x60] ss:$36 sps:$4 sm:$0xff]   ;;  %v5543_v6 = vld [vmem:[#allocation6 + $0x10c] sm:$0xff]  ;;  %vm6959_vm14 = vsmask.f32 7424 }
 0x4f4   :  { %v9092_v2 = vcombine.low %v5518_v27, %v5523_v54  ;;  %v5528_v29 = vld [vmem:[#allocation6 + $0xa0] sm:$0xff]  ;;  %v10939_v57 = vld [vmem:[#allocation6 + $0xa8] ss:$36 sps:$4 sm:$0xff]   ;;  %v10941_v16 = vld [vmem:[#allocation6 + $0xf4] ss:$36 sps:$4 sm:$0xff]  }
 0x4f5   :  { %v9101_v10 = vcombine.low %v5528_v29, %v5533_v39  ;;  %v10953_v37 = vld [vmem:[%s14915_s6 + $0x228] sm:$0xff]   ;;  %v10956_v62 = vld [vmem:[%s14915_s6 + $0x230] sm:$0xff]   ;;  %v10959_v31 = vld [vmem:[%s14915_s6 + $0x238] sm:$0xff]   ;;  %vm7104_vm4 = vsmask.f32 6400 }
 0x4f6   :  { %6592 = vmatmul.mubr.bf16.vlgmr.msra.gmra.mrb[172].mxu1 %v10913_v51  ;;  %v5538_v46 = vld [vmem:[#allocation6 + $0xe8] sm:$0xff]  ;;  %v10944_v48 = vld [vmem:[#allocation6 + $0x134] ss:$36 sps:$4 sm:$0xff]   ;;  %v10948_v12 = vld [vmem:[#allocation6 + $0x13c] ss:$36 sps:$4 sm:$0xff]  }
 0x4f7   :  { %6599 = vmatprep.mubr.bf16.mxu1 %v10926_v49  ;;  %10504 = vmatpush3.bf16.msra.mxu1 %v14095_v1  ;;  %v10950_v1 = vld [vmem:[%s14915_s6 + $0x220] sm:$0xff]   ;;  %v9110_v24 = vcombine.low %v5538_v46, %v5543_v6  ;;  %v5559_v15 = vld [vmem:[#allocation6 + $0x180] sm:$0x77]  ;;  %v10960_v8 = vld [vmem:[#allocation6 + $0x68] ss:$36 sps:$4 sm:$0xff]  }
 0x4f8   :  { %10505 = vmatprep.subr.bf16.mxu1 %v10940_v11  ;;  %6672 = vmatmul.mubr.bf16.vlgmr.msra.gmra.mrb[144].mxu0 %v10922_v58  ;;  %v5553_v30 = vld [vmem:[#allocation6 + $0x154] sm:$0xff]  ;;  %v9131_v53 = vcombine.high %v5559_v15, %v5559_v15  ;;  %v10957_v17 = vld [vmem:[#allocation6 + $0x20] ss:$36 sps:$4 sm:$0xff]   ;;  %v9130_v13 = vcombine.low %v5559_v15, %v5559_v15  ;;  %v10964_v61 = vld [vmem:[#allocation6 + $0x188] ss:$0 sps:$4 sm:$0x77]  }
 0x4f9   :  { %6679 = vmatprep.mubr.bf16.mxu0 %v10929_v36  ;;  %v10946_v9 = vld [vmem:[#allocation6 + $0xf0] ss:$36 sps:$4 sm:$0xff]   ;;  %v5558_v34 = vld [vmem:[#allocation6 + $0x178] sm:$0x77]  ;;  %v10963_v18 = vld [vmem:[#allocation6 + $0x140] ss:$36 sps:$4 sm:$0xff]  }
 0x4fa   :  { %v5548_v26 = vld [vmem:[#allocation6 + $0x130] sm:$0xff]  ;;  %v9129_v50 = vcombine.high %v5558_v34, %v5558_v34  ;;  %v10952_v63 = vld [vmem:[#allocation6 + $0x138] ss:$36 sps:$4 sm:$0xff]   ;;  %v9128_v45 = vcombine.low %v5558_v34, %v5558_v34 }
 0x4fb   :  { %10506 = vmatpush3.bf16.msra.mxu1 %v10940_v11  ;;  %v9119_v60 = vcombine.low %v5548_v26, %v5553_v30  ;;  %v10961_v14 = vld [vmem:[#allocation6 + $0xb0] ss:$36 sps:$4 sm:$0xff]   ;;  %v10962_v32 = vld [vmem:[#allocation6 + $0xf8] ss:$36 sps:$4 sm:$0xff]  }
 0x4fc   :  { %10507 = vmatprep.subr.bf16.mxu1 %v10943_v19 }
 0x4fe   :  { %6600 = vmatmul.mubr.bf16.gmra.mrb[176].mxu1 %v9092_v2 }
 0x4ff   :  { %6607 = vmatprep.mubr.bf16.mxu1 %v10931_v55  ;;  %10508 = vmatpush3.bf16.msra.mxu1 %v10943_v19 }
 0x500   :  { %10509 = vmatprep.subr.bf16.mxu1 %v10947_v23  ;;  %6680 = vmatmul.mubr.bf16.gmra.mrb[148].mxu0 %v10933_v22 }
 0x501   :  { %6687 = vmatprep.mubr.bf16.mxu0 %v10934_v56 }
 0x503   :  { %10510 = vmatpush3.bf16.msra.mxu1 %v10947_v23 }
 0x504   :  { %10511 = vmatprep.subr.bf16.mxu1 %v10950_v1 }
 0x506   :  { %6608 = vmatmul.mubr.bf16.gmra.mrb[180].mxu1 %v9101_v10 }
 0x507   :  { %6615 = vmatprep.mubr.bf16.mxu1 %v10937_v0  ;;  %10512 = vmatpush3.bf16.msra.mxu1 %v10950_v1 }
 0x508   :  { %10513 = vmatprep.subr.bf16.mxu1 %v10953_v37  ;;  %6688 = vmatmul.mubr.bf16.gmra.mrb[152].mxu0 %v10939_v57 }
 0x509   :  { %6695 = vmatprep.mubr.bf16.mxu0 %v10941_v16 }
 0x50b   :  { %10514 = vmatpush3.bf16.msra.mxu1 %v10953_v37 }
 0x50c   :  { %10515 = vmatprep.subr.bf16.mxu1 %v10956_v62 }
 0x50e   :  { %6616 = vmatmul.mubr.bf16.gmra.mrb[184].mxu1 %v9110_v24 }
 0x50f   :  { %6623 = vmatprep.mubr.bf16.mxu1 %v10944_v48  ;;  %10516 = vmatpush3.bf16.msra.mxu1 %v10956_v62 }
 0x510   :  { %10517 = vmatprep.subr.bf16.mxu1 %v10959_v31  ;;  %6696 = vmatmul.mubr.bf16.gmra.mrb[156].mxu0 %v10946_v9 }
 0x511   :  { %6703 = vmatprep.mubr.bf16.mxu0 %v10948_v12 }
 0x513   :  { %10518 = vmatpush3.bf16.msra.mxu1 %v10959_v31 }
 0x516   :  { %6624 = vmatmul.mubr.bf16.gmra.mrb[188].mxu1 %v9119_v60 }
 0x517   :  { %6631 = vmatprep.mubr.bf16.mxu1 %v9129_v50 }
 0x518   :  { %6704 = vmatmul.mubr.bf16.gmra.mrb[160].mxu0 %v10952_v63 }
 0x519   :  { %6711 = vmatprep.mubr.bf16.mxu0 %v9131_v53 }
 0x51e   :  { %6632 = vmatmul.mubr.bf16.gmra.mrb[192].mxu1 %v9128_v45 }
 0x51f   :  { %10519 = vmatprep.mubr.bf16.mxu1 %v10957_v17 }
 0x520   :  { %6712 = vmatmul.mubr.bf16.gmra.mrb[164].mxu0 %v9130_v13 }
 0x526   :  { %10520 = vmatmul.mubr.bf16.vlgmr.msra.gmra.mrb[196].mxu1 %v10960_v8 }
 0x527   :  { %10523 = vmatprep.mubr.bf16.mxu1 %v10961_v14 }
 0x52e   :  { %10524 = vmatmul.mubr.bf16.gmra.mrb[200].mxu1 %v10962_v32 }
 0x52f   :  { %10527 = vmatprep.mubr.bf16.mxu1 %v10963_v18 }
 0x536   :  { %10528 = vmatmul.mubr.bf16.gmra.mrb[204].mxu1 %v10964_v61 }
 0x576   :  { %v10163_v21 = vpop.f32.mrb[148].mxu1 }
 0x577   :  { %v10164_v3 = vpop.f32.mrb[149].mxu1 }
 0x578   :  { %v10165_v41 = vadd.f32 %v10164_v3, %v10163_v21  ;;  %v10166_v5 = vpop.f32.mrb[150].mxu1 }
 0x579   :  { %v10167_v42 = vpop.f32.mrb[151].mxu1 }
 0x57a   :  { %v10168_v35 = vadd.f32 %v10167_v42, %v10166_v5 }
 0x589   :  { %v10215_v38 = vpop.f32.mrb[120].mxu0 }
 0x58a   :  { %v10216_v33 = vpop.f32.mrb[121].mxu0 }
 0x58b   :  { %v10169_v47 = vpop.f32.mrb[152].mxu1  ;;  %v10217_v59 = vadd.f32 %v10216_v33, %v10215_v38  ;;  %v10218_v20 = vpop.f32.mrb[122].mxu0 }
 0x58c   :  { %v10170_v25 = vpop.f32.mrb[153].mxu1  ;;  %v10219_v7 = vpop.f32.mrb[123].mxu0 }
 0x58d   :  { %v10171_v4 = vadd.f32 %v10170_v25, %v10169_v47  ;;  %v10172_v28 = vpop.f32.mrb[154].mxu1  ;;  %v14270_v43 = vadd.f32 %v10217_v59, %v10165_v41  ;;  %v10220_v44 = vadd.f32 %v10219_v7, %v10218_v20 }
 0x58e   :  { %v10173_v52 = vpop.f32.mrb[155].mxu1 }
 0x58f   :  { %v10174_v40 = vadd.f32 %v10173_v52, %v10172_v28  ;;  %v14272_v51 = vadd.f32 %v10220_v44, %v10168_v35 }
 0x591   :  { %v10221_v11 = vpop.f32.mrb[124].mxu0 }
 0x592   :  { %v10222_v49 = vpop.f32.mrb[125].mxu0 }
 0x593   :  { %v10223_v19 = vadd.f32 %v10222_v49, %v10221_v11  ;;  %v10224_v58 = vpop.f32.mrb[126].mxu0 }
 0x594   :  { %v10225_v54 = vpop.f32.mrb[127].mxu0 }
 0x595   :  { %v14274_v27 = vadd.f32 %v10223_v19, %v10171_v4  ;;  %v10226_v2 = vadd.f32 %v10225_v54, %v10224_v58 }
 0x597   :  { %v14276_v39 = vadd.f32 %v10226_v2, %v10174_v40 }
 0x59d   :  { %v10175_v36 = vpop.f32.mrb[156].mxu1 }
 0x59e   :  { %v10176_v23 = vpop.f32.mrb[157].mxu1 }
 0x59f   :  { %v10177_v55 = vadd.f32 %v10176_v23, %v10175_v36  ;;  %v10178_v1 = vpop.f32.mrb[158].mxu1 }
 0x5a0   :  { %v10179_v22 = vpop.f32.mrb[159].mxu1 }
 0x5a1   :  { %v10180_v56 = vadd.f32 %v10179_v22, %v10178_v1 }
 0x5a5   :  { %v10227_v29 = vpop.f32.mrb[128].mxu0 }
 0x5a6   :  { %v10228_v10 = vpop.f32.mrb[129].mxu0 }
 0x5a7   :  { %v10229_v37 = vadd.f32 %v10228_v10, %v10227_v29  ;;  %v10230_v0 = vpop.f32.mrb[130].mxu0 }
 0x5a8   :  { %v10231_v62 = vpop.f32.mrb[131].mxu0 }
 0x5a9   :  { %v10181_v6 = vpop.f32.mrb[160].mxu1  ;;  %v14278_v57 = vadd.f32 %v10229_v37, %v10177_v55  ;;  %v10232_v16 = vadd.f32 %v10231_v62, %v10230_v0 }
 0x5aa   :  { %v10182_v46 = vpop.f32.mrb[161].mxu1 }
 0x5ab   :  { %v10183_v24 = vadd.f32 %v10182_v46, %v10181_v6  ;;  %v10184_v31 = vpop.f32.mrb[162].mxu1  ;;  %v14280_v48 = vadd.f32 %v10232_v16, %v10180_v56 }
 0x5ac   :  { %v10185_v30 = vpop.f32.mrb[163].mxu1 }
 0x5ad   :  { %v10186_v9 = vadd.f32 %v10185_v30, %v10184_v31 }
 0x5af   :  { %v10233_v12 = vpop.f32.mrb[132].mxu0 }
 0x5b0   :  { %v10234_v34 = vpop.f32.mrb[133].mxu0 }
 0x5b1   :  { %v10235_v26 = vadd.f32 %v10234_v34, %v10233_v12  ;;  %v10236_v60 = vpop.f32.mrb[134].mxu0 }
 0x5b2   :  { %v10237_v50 = vpop.f32.mrb[135].mxu0 }
 0x5b3   :  { %v14282_v63 = vadd.f32 %v10235_v26, %v10183_v24  ;;  %v10238_v53 = vadd.f32 %v10237_v50, %v10236_v60 }
 0x5b5   :  { %v10187_v15 = vpop.f32.mrb[164].mxu1  ;;  %v14284_v8 = vadd.f32 %v10238_v53, %v10186_v9  ;;  %v11011_v53 = vld [vmem:[%s14916_s7] ss:$8 sps:$4 sm:$0xff]  }
 0x5b6   :  { %v10188_v45 = vpop.f32.mrb[165].mxu1 }
 0x5b7   :  { %v10189_v17 = vadd.f32 %v10188_v45, %v10187_v15  ;;  %v10190_v13 = vpop.f32.mrb[166].mxu1 }
 0x5b8   :  { %v10191_v14 = vpop.f32.mrb[167].mxu1 }
 0x5b9   :  { %v10192_v32 = vadd.f32 %v10191_v14, %v10190_v13 }
 0x5bb   :  { %v10239_v18 = vpop.f32.mrb[136].mxu0 }
 0x5bc   :  { %v10240_v61 = vpop.f32.mrb[137].mxu0 }
 0x5bd   :  { %v10241_v21 = vadd.f32 %v10240_v61, %v10239_v18  ;;  %v10242_v3 = vpop.f32.mrb[138].mxu0  ;;  %v11016_v61 = vld [vmem:[%s14916_s7 + $0x10] ss:$8 sps:$4 sm:$0xff]  }
 0x5be   :  { %v10243_v41 = vpop.f32.mrb[139].mxu0 }
 0x5bf   :  { %v14286_v42 = vadd.f32 %v10241_v21, %v10189_v17  ;;  %v10244_v35 = vadd.f32 %v10243_v41, %v10242_v3  ;;  %v11018_v21 = vld [vmem:[%s14916_s7 + $0x14] ss:$8 sps:$4 sm:$0xff]  }
 0x5c1   :  { %v10193_v5 = vpop.f32.mrb[168].mxu1  ;;  %v14288_v59 = vadd.f32 %v10244_v35, %v10192_v32 }
 0x5c2   :  { %v10194_v38 = vpop.f32.mrb[169].mxu1 }
 0x5c3   :  { %v10195_v33 = vadd.f32 %v10194_v38, %v10193_v5  ;;  %v10196_v47 = vpop.f32.mrb[170].mxu1  ;;  %v10245_v25 = vpop.f32.mrb[140].mxu0 }
 0x5c4   :  { %v10197_v20 = vpop.f32.mrb[171].mxu1  ;;  %v10246_v7 = vpop.f32.mrb[141].mxu0 }
 0x5c5   :  { %v10247_v4 = vadd.f32 %v10246_v7, %v10245_v25  ;;  %v10248_v28 = vpop.f32.mrb[142].mxu0  ;;  %v11021_v25 = vld [vmem:[%s14916_s7 + $0x20] ss:$8 sps:$4 sm:$0xff]   ;;  %v11023_v7 = vld [vmem:[%s14916_s7 + $0x24] ss:$8 sps:$4 sm:$0xff]  }
 0x5c6   :  { %v10249_v44 = vpop.f32.mrb[143].mxu0 }
 0x5c7   :  { %v14290_v40 = vadd.f32 %v10247_v4, %v10195_v33 }
 0x5c9   :  { %v10267_v52 = vpop.f32.mrb[172].mxu1 }
 0x5ca   :  { %v10268_v11 = vpop.f32.mrb[173].mxu1 }
 0x5cb   :  { %v10269_v49 = vadd.f32 %v10268_v11, %v10267_v52  ;;  %v10270_v19 = vpop.f32.mrb[174].mxu1  ;;  %v10319_v2 = vpop.f32.mrb[144].mxu0 }
 0x5cc   :  { %v10271_v58 = vpop.f32.mrb[175].mxu1  ;;  %v10320_v55 = vpop.f32.mrb[145].mxu0 }
 0x5cd   :  { %v6594_v54 = vadd.f32 %v10269_v49, %v14270_v43  ;;  %v10272_v36 = vadd.f32 %v10271_v58, %v10270_v19  ;;  %v10321_v1 = vadd.f32 %v10320_v55, %v10319_v2  ;;  %v10322_v22 = vpop.f32.mrb[146].mxu0  ;;  %v11026_v19 = vld [vmem:[%s14916_s7 + $0x30] ss:$8 sps:$4 sm:$0xff]   ;;  %v11028_v58 = vld [vmem:[%s14916_s7 + $0x34] ss:$8 sps:$4 sm:$0xff]  }
 0x5ce   :  { %v10323_v56 = vpop.f32.mrb[147].mxu0 }
 0x5cf   :  { %v6597_v23 = vadd.f32 %v10272_v36, %v14272_v51  ;;  %v10324_v10 = vadd.f32 %v10323_v56, %v10322_v22  ;;  %v14294_v0 = vadd.f32 %v10321_v1, %v6594_v54 }
 0x5d1   :  { %v10273_v29 = vpop.f32.mrb[176].mxu1  ;;  %v14296_v46 = vadd.f32 %v10324_v10, %v6597_v23  ;;  %v11033_v10 = vld [vmem:[%s14916_s7 + $0x44] ss:$8 sps:$4 sm:$0xff]  }
 0x5d2   :  { %v10274_v37 = vpop.f32.mrb[177].mxu1 }
 0x5d3   :  { %v10275_v62 = vadd.f32 %v10274_v37, %v10273_v29  ;;  %v10276_v6 = vpop.f32.mrb[178].mxu1  ;;  %v10325_v31 = vpop.f32.mrb[148].mxu0  ;;  %v11031_v29 = vld [vmem:[%s14916_s7 + $0x40] ss:$8 sps:$4 sm:$0xff]  }
 0x5d4   :  { %v10277_v16 = vpop.f32.mrb[179].mxu1  ;;  %v10326_v30 = vpop.f32.mrb[149].mxu0 }
 0x5d5   :  { %v6602_v43 = vadd.f32 %v10275_v62, %v14274_v27  ;;  %v10278_v24 = vadd.f32 %v10277_v16, %v10276_v6  ;;  %v10327_v9 = vadd.f32 %v10326_v30, %v10325_v31  ;;  %v10328_v12 = vpop.f32.mrb[150].mxu0  ;;  %v11013_v27 = vld [vmem:[%s14916_s7 + $0x4] ss:$8 sps:$4 sm:$0xff]   ;;  %v11037_v31 = vld [vmem:[%s14916_s7 + $0x54] ss:$8 sps:$4 sm:$0xff]  }
 0x5d6   :  { %v10329_v34 = vpop.f32.mrb[151].mxu0  ;;  %8328 = vmatprep.subr.bf16.mxu0 %v11013_v27  ;;  %v11040_v30 = vld [vmem:[%s14916_s7 + $0x64] ss:$8 sps:$4 sm:$0xff]  }
 0x5d7   :  { %v6605_v51 = vadd.f32 %v10278_v24, %v14276_v39  ;;  %v10330_v60 = vadd.f32 %v10329_v34, %v10328_v12  ;;  %v14300_v15 = vadd.f32 %v10327_v9, %v6602_v43  ;;  %8329 = vmatpush1.bf16.msra.mxu0 %v11011_v53  ;;  %v11035_v24 = vld [vmem:[%s14916_s7 + $0x50] ss:$8 sps:$4 sm:$0xff]  }
 0x5d8   :  { %8330 = vmatprep.subr.bf16.mxu0 %v11018_v21 }
 0x5d9   :  { %v10279_v26 = vpop.f32.mrb[180].mxu1  ;;  %v14308_v13 = vadd.f32 %v10330_v60, %v6605_v51 }
 0x5da   :  { %v10280_v50 = vpop.f32.mrb[181].mxu1 }
 0x5db   :  { %v10281_v45 = vadd.f32 %v10280_v50, %v10279_v26  ;;  %v10282_v17 = vpop.f32.mrb[182].mxu1  ;;  %v10331_v18 = vpop.f32.mrb[152].mxu0  ;;  %8331 = vmatpush1.bf16.msra.mxu0 %v11016_v61  ;;  %v11038_v50 = vld [vmem:[%s14916_s7 + $0x60] ss:$8 sps:$4 sm:$0xff]   ;;  %v11041_v61 = vld [vmem:[%s14916_s7 + $0x70] ss:$8 sps:$4 sm:$0xff]  }
 0x5dc   :  { %v10283_v39 = vpop.f32.mrb[183].mxu1  ;;  %v10332_v41 = vpop.f32.mrb[153].mxu0  ;;  %8332 = vmatprep.subr.bf16.mxu0 %v11023_v7  ;;  %v11049_v7 = vld [vmem:[%s14916_s7 + $0x94] ss:$8 sps:$4 sm:$0xff]  }
 0x5dd   :  { %v6610_v14 = vadd.f32 %v10281_v45, %v14278_v57  ;;  %v10284_v32 = vadd.f32 %v10283_v39, %v10282_v17  ;;  %v10333_v5 = vadd.f32 %v10332_v41, %v10331_v18  ;;  %v10334_v35 = vpop.f32.mrb[154].mxu0 }
 0x5de   :  { %v10335_v38 = vpop.f32.mrb[155].mxu0 }
 0x5df   :  { %v6613_v3 = vadd.f32 %v10284_v32, %v14280_v48  ;;  %v10336_v57 = vadd.f32 %v10335_v38, %v10334_v35  ;;  %v14318_v20 = vadd.f32 %v10333_v5, %v6610_v14  ;;  %8333 = vmatpush1.bf16.msra.mxu0 %v11021_v25 }
 0x5e0   :  { %8334 = vmatprep.subr.bf16.mxu0 %v11028_v58 }
 0x5e1   :  { %v10285_v33 = vpop.f32.mrb[184].mxu1  ;;  %v14326_v44 = vadd.f32 %v10336_v57, %v6613_v3  ;;  %v11046_v3 = vld [vmem:[%s14916_s7 + $0x84] ss:$8 sps:$4 sm:$0xff]  }
 0x5e2   :  { %v10286_v47 = vpop.f32.mrb[185].mxu1 }
 0x5e3   :  { %v10287_v48 = vadd.f32 %v10286_v47, %v10285_v33  ;;  %v10288_v4 = vpop.f32.mrb[186].mxu1  ;;  %v10337_v49 = vpop.f32.mrb[156].mxu0  ;;  %8335 = vmatpush1.bf16.msra.mxu0 %v11026_v19  ;;  %v11047_v19 = vld [vmem:[%s14916_s7 + $0x90] ss:$8 sps:$4 sm:$0xff]  }
 0x5e4   :  { %v10289_v28 = vpop.f32.mrb[187].mxu1  ;;  %v10338_v36 = vpop.f32.mrb[157].mxu0  ;;  %8336 = vmatprep.subr.bf16.mxu0 %v11033_v10 }
 0x5e5   :  { %v6618_v52 = vadd.f32 %v10287_v48, %v14282_v63  ;;  %v10290_v11 = vadd.f32 %v10289_v28, %v10288_v4  ;;  %v10339_v2 = vadd.f32 %v10338_v36, %v10337_v49  ;;  %v10340_v23 = vpop.f32.mrb[158].mxu0 }
 0x5e6   :  { %v10341_v55 = vpop.f32.mrb[159].mxu0 }
 0x5e7   :  { %v6621_v54 = vadd.f32 %v10290_v11, %v14284_v8  ;;  %v10342_v63 = vadd.f32 %v10341_v55, %v10340_v23  ;;  %v14336_v56 = vadd.f32 %v10339_v2, %v6618_v52  ;;  %8337 = vmatpush1.bf16.msra.mxu0 %v11031_v29 }
 0x5e8   :  { %8338 = vmatprep.subr.bf16.mxu0 %v11037_v31 }
 0x5e9   :  { %v10291_v1 = vpop.f32.mrb[188].mxu1  ;;  %v14344_v6 = vadd.f32 %v10342_v63, %v6621_v54 }
 0x5ea   :  { %v10292_v22 = vpop.f32.mrb[189].mxu1 }
 0x5eb   :  { %v10293_v8 = vadd.f32 %v10292_v22, %v10291_v1  ;;  %v10294_v37 = vpop.f32.mrb[190].mxu1  ;;  %v10343_v51 = vpop.f32.mrb[160].mxu0  ;;  %8339 = vmatpush1.bf16.msra.mxu0 %v11035_v24  ;;  %v11050_v22 = vld [vmem:[%s14916_s7 + $0xa0] ss:$8 sps:$4 sm:$0xff]  }
 0x5ec   :  { %v10295_v62 = vpop.f32.mrb[191].mxu1  ;;  %v10344_v12 = vpop.f32.mrb[161].mxu0  ;;  %8340 = vmatprep.subr.bf16.mxu0 %v11040_v30 }
 0x5ed   :  { %v6626_v16 = vadd.f32 %v10293_v8, %v14286_v42  ;;  %v10296_v43 = vadd.f32 %v10295_v62, %v10294_v37  ;;  %v10345_v42 = vadd.f32 %v10344_v12, %v10343_v51  ;;  %v10346_v34 = vpop.f32.mrb[162].mxu0 }
 0x5ee   :  { %v10347_v26 = vpop.f32.mrb[163].mxu0 }
 0x5ef   :  { %v6629_v9 = vadd.f32 %v10296_v43, %v14288_v59  ;;  %v10348_v53 = vadd.f32 %v10347_v26, %v10346_v34  ;;  %v14360_v45 = vadd.f32 %v10345_v42, %v6626_v16  ;;  %v11043_v59 = vld [vmem:[%s14916_s7 + $0x74] ss:$8 sps:$4 sm:$0xff]   ;;  %8341 = vmatpush1.bf16.msra.mxu0 %v11038_v50 }
 0x5f0   :  { %8342 = vmatprep.subr.bf16.mxu0 %v11043_v59  ;;  %v11055_v16 = vld [vmem:[%s14916_s7 + $0xb4] ss:$8 sps:$4 sm:$0xff]  }
 0x5f1   :  { %v10297_v60 = vpop.f32.mrb[192].mxu1  ;;  %v14365_v32 = vadd.f32 %v10348_v53, %v6629_v9 }
 0x5f2   :  { %v10298_v27 = vpop.f32.mrb[193].mxu1 }
 0x5f3   :  { %v10299_v17 = vadd.f32 %v10298_v27, %v10297_v60  ;;  %v10300_v39 = vpop.f32.mrb[194].mxu1  ;;  %v10349_v21 = vpop.f32.mrb[164].mxu0  ;;  %8343 = vmatpush1.bf16.msra.mxu0 %v11041_v61 }
 0x5f4   :  { %v10301_v14 = vpop.f32.mrb[195].mxu1  ;;  %v10350_v41 = vpop.f32.mrb[165].mxu0  ;;  %8344 = vmatprep.subr.bf16.mxu0 %v11046_v3 }
 0x5f5   :  { %v6634_v18 = vadd.f32 %v10299_v17, %v14290_v40  ;;  %v10351_v5 = vadd.f32 %v10350_v41, %v10349_v21  ;;  %v10352_v35 = vpop.f32.mrb[166].mxu0  ;;  %v11044_v40 = vld [vmem:[%s14916_s7 + $0x80] ss:$8 sps:$4 sm:$0xff]  }
 0x5f6   :  { %v10353_v38 = vpop.f32.mrb[167].mxu0 }
 0x5f7   :  { %v14378_v25 = vadd.f32 %v10351_v5, %v6634_v18  ;;  %8345 = vmatpush1.bf16.msra.mxu0 %v11044_v40 }
 0x5f8   :  { %8346 = vmatprep.subr.bf16.mxu0 %v11049_v7 }
 0x5f9   :  { %v10521_v33 = vpop.f32.mrb[196].mxu1 }
 0x5fa   :  { %v6762_v57 = vadd.f32 %v10521_v33, %v14300_v15  ;;  %v6753_v47 = vpop.f32.mrb[197].mxu1 }
 0x5fb   :  { %v6754_v48 = vadd.f32 %v6753_v47, %v14294_v0  ;;  %v10522_v4 = vpop.f32.mrb[198].mxu1  ;;  %v11052_v0 = vld [vmem:[%s14916_s7 + $0xa4] ss:$8 sps:$4 sm:$0xff]   ;;  %8347 = vmatpush1.bf16.msra.mxu0 %v11047_v19 }
 0x5fc   :  { %vm6801_vm9 = vcmp.ge.f32.partialorder %v6762_v57, 0.0  ;;  %v6812_v28 = vmul.f32 0.01, %v6762_v57  ;;  %v6765_v52 = vadd.f32 %v10522_v4, %v14308_v13  ;;  %v6756_v11 = vpop.f32.mrb[199].mxu1  ;;  %8348 = vmatprep.subr.bf16.mxu0 %v11052_v0 }
 0x5fd   :  { %vm6799_vm10 = vcmp.ge.f32.partialorder %v6754_v48, 0.0  ;;  %v6810_v49 = vmul.f32 0.01, %v6754_v48  ;;  %v6757_v15 = vadd.f32 %v6756_v11, %v14296_v46 }
 0x5fe   :  { %v6823_v58 = vsel %vm6801_vm9, %v6762_v57, %v6812_v28  ;;  %vm6802_vm1 = vcmp.ge.f32.partialorder %v6765_v52, 0.0  ;;  %v6813_v54 = vmul.f32 0.01, %v6765_v52  ;;  %vm7913_vm9 = vcmask 1044480  }
 0x5ff   :  { %v9468_v13 = vpack.c.bf16 %v6823_v58, %v6823_v58  ;;  %v6821_v36 = vsel %vm6799_vm10, %v6754_v48, %v6810_v49  ;;  %vm6800_vm0 = vcmp.ge.f32.partialorder %v6757_v15, 0.0  ;;  %v6811_v2 = vmul.f32 0.01, %v6757_v15  ;;  %8349 = vmatpush1.bf16.msra.mxu0 %v11050_v22 }
 0x600   :  { %v9466_v23 = vpack.c.bf16 %v6821_v36, %v6821_v36  ;;  %v6824_v46 = vsel %vm6802_vm1, %v6765_v52, %v6813_v54  ;;  %8350 = vmatprep.subr.bf16.mxu0 %v11055_v16  ;;  %vm7530_vm10 = vsmask.f32 5376  ;;  %vm7198_vm1 = vcmask 1045504  }
 0x601   :  { %6880 = vst.msk [vmem:[#allocation7 + $0x8] sm:$0xf] %vm6877_vm13, %v9468_v13  ;;  %v9469_v55 = vpack.c.bf16 %v6824_v46, %v6824_v46  ;;  %v6822_v1 = vsel %vm6800_vm0, %v6757_v15, %v6811_v2  ;;  %v10525_v63 = vpop.f32.mrb[200].mxu1  ;;  %vm7008_vm0 = vcmask 523520  }
 0x602   :  { %6878 = vst.msk [vmem:[#allocation7] sm:$0xf] %vm6877_vm13, %v9466_v23  ;;  %v9467_v29 = vpack.c.bf16 %v6822_v1, %v6822_v1  ;;  %v6778_v10 = vadd.f32 %v10525_v63, %v14336_v56  ;;  %v6769_v8 = vpop.f32.mrb[201].mxu1 }
 0x603   :  { %6881 = vst.msk [vmem:[#allocation7 + $0xc] sm:$0xf] %vm6877_vm13, %v9469_v55  ;;  %v6770_v37 = vadd.f32 %v6769_v8, %v14318_v20  ;;  %v10526_v62 = vpop.f32.mrb[202].mxu1  ;;  %v11053_v20 = vld [vmem:[%s14916_s7 + $0xb0] ss:$8 sps:$4 sm:$0xff]  }
 0x604   :  { %6879 = vst.msk [vmem:[#allocation7 + $0x4] sm:$0xf] %vm6877_vm13, %v9467_v29  ;;  %vm6805_vm5 = vcmp.ge.f32.partialorder %v6778_v10, 0.0  ;;  %v6816_v43 = vmul.f32 0.01, %v6778_v10  ;;  %v6781_v24 = vadd.f32 %v10526_v62, %v14344_v6  ;;  %v6772_v31 = vpop.f32.mrb[203].mxu1  ;;  %8351 = vmatpush1.bf16.msra.mxu0 %v11053_v20 }
 0x605   :  { %vm6803_vm6 = vcmp.ge.f32.partialorder %v6770_v37, 0.0  ;;  %v6814_v56 = vmul.f32 0.01, %v6770_v37  ;;  %v6773_v51 = vadd.f32 %v6772_v31, %v14326_v44 }
 0x606   :  { %v6827_v30 = vsel %vm6805_vm5, %v6778_v10, %v6816_v43  ;;  %vm6806_vm7 = vcmp.ge.f32.partialorder %v6781_v24, 0.0  ;;  %v6817_v9 = vmul.f32 0.01, %v6781_v24  ;;  %vm7067_vm5 = vcmask 785920  }
 0x607   :  { %v9472_v12 = vpack.c.bf16 %v6827_v30, %v6827_v30  ;;  %v6825_v42 = vsel %vm6803_vm6, %v6770_v37, %v6814_v56  ;;  %vm6804_vm12 = vcmp.ge.f32.partialorder %v6773_v51, 0.0  ;;  %v6815_v6 = vmul.f32 0.01, %v6773_v51 }
 0x608   :  { %v9470_v34 = vpack.c.bf16 %v6825_v42, %v6825_v42  ;;  %v6828_v26 = vsel %vm6806_vm7, %v6781_v24, %v6817_v9  ;;  %vm7161_vm6 = vcmask 1048320   ;;  %vm8315_vm7 = vcmask 785408  }
 0x609   :  { %6884 = vst.msk [vmem:[#allocation7 + $0x18] sm:$0xf] %vm6877_vm13, %v9472_v12  ;;  %v9473_v44 = vpack.c.bf16 %v6828_v26, %v6828_v26  ;;  %v6826_v60 = vsel %vm6804_vm12, %v6773_v51, %v6815_v6  ;;  %v10529_v50 = vpop.f32.mrb[204].mxu1 }
 0x60a   :  { %6882 = vst.msk [vmem:[#allocation7 + $0x10] sm:$0xf] %vm6877_vm13, %v9470_v34  ;;  %v9471_v53 = vpack.c.bf16 %v6826_v60, %v6826_v60  ;;  %v6794_v27 = vadd.f32 %v10529_v50, %v14378_v25  ;;  %v6785_v59 = vpop.f32.mrb[205].mxu1  ;;  %v14412_v17 = vld [vmem:[#allocation7 + $0x8] sm:$0xff]  }
 0x60b   :  { %6885 = vst.msk [vmem:[#allocation7 + $0x1c] sm:$0xf] %vm6877_vm13, %v9473_v44  ;;  %v6786_v39 = vadd.f32 %v6785_v59, %v14360_v45  ;;  %v10530_v14 = vpop.f32.mrb[206].mxu1  ;;  %v10965_v18 = vld [vmem:[#allocation7] sm:$0xfe]   ;;  %v7047_v41 = vrot.slane %v14412_v17, 1 }
 0x60c   :  { %v10967_v61 = vld [vmem:[#allocation7] sm:$0xff]   ;;  %6883 = vst.msk [vmem:[#allocation7 + $0x14] sm:$0xf] %vm6877_vm13, %v9471_v53  ;;  %vm6809_vm15 = vcmp.ge.f32.partialorder %v6794_v27, 0.0  ;;  %v6820_v21 = vmul.f32 0.01, %v6794_v27 }
 0x60d   :  { %v6788_v3 = vpop.f32.mrb[207].mxu1  ;;  %v14418_v5 = vld [vmem:[#allocation7 + $0x8] sm:$0xff]   ;;  %vm6807_vm2 = vcmp.ge.f32.partialorder %v6786_v39, 0.0  ;;  %v6818_v35 = vmul.f32 0.01, %v6786_v39  ;;  %v7046_v33 = vrot.slane %v10965_v18, 1 }
 0x60e   :  { %v6789_v38 = vadd.f32 %v6788_v3, %v14365_v32  ;;  %v6831_v40 = vsel %vm6809_vm15, %v6794_v27, %v6820_v21  ;;  %v6961_v57 = vshrl.u32 %v10967_v61, 16  ;;  %v6963_v45 = vshll.u32 %v10967_v61, 16  ;;  %v10971_v25 = vld [vmem:[#allocation7 + $0x4] sm:$0xff]  }
 0x60f   :  { %v6968_v47 = vshll.u32 %v14418_v5, 16  ;;  %v9476_v7 = vpack.c.bf16 %v6831_v40, %v6831_v40  ;;  %v6829_v48 = vsel %vm6807_vm2, %v6786_v39, %v6818_v35  ;;  %v10974_v28 = vld [vmem:[#allocation7 + $0x8] sm:$0xff]   ;;  %v7048_v11 = vsel %vm7045_vm11, %v7046_v33, %v7047_v41  ;;  %v10973_v10 = vld [vmem:[#allocation7] sm:$0xfe]  }
 0x610   :  { %vm6808_vm3 = vcmp.ge.f32.partialorder %v6789_v38, 0.0  ;;  %v6819_v4 = vmul.f32 0.01, %v6789_v38  ;;  %v9474_v52 = vpack.c.bf16 %v6829_v48, %v6829_v48  ;;  %v6965_v49 = vrot.slane %v6963_v45, 1  ;;  %v10969_v32 = vld [vmem:[#allocation7 + $0x4] sm:$0xfe]   ;;  %7055 = vrot.lane.b32.xlu1 %v7048_v11, %s11177_s23 }
 0x611   :  { %v14425_v15 = vrot.slane %v6968_v47, 1  ;;  %6889 = vst.msk [vmem:[#allocation7 + $0x28] sm:$0x7] %vm6888_vm8, %v9476_v7  ;;  %v14429_v58 = vld [vmem:[#allocation7 + $0xc] sm:$0xff]   ;;  %v7249_v54 = vshrl.u32 %v10971_v25, 16  ;;  %v7332_v36 = vrot.slane %v10969_v32, 1 }
 0x612   :  { %v6830_v19 = vsel %vm6808_vm3, %v6789_v38, %v6819_v4  ;;  %6886 = vst.msk [vmem:[#allocation7 + $0x20] sm:$0xf] %vm6877_vm13, %v9474_v52  ;;  %v6966_v13 = vor.u32 %v6965_v49, %v6961_v57  ;;  %v14432_v2 = vld [vmem:[#allocation7 + $0xc] sm:$0xff]   ;;  %v7333_v23 = vrot.slane %v14429_v58, 1  ;;  %v7251_v46 = vshll.u32 %v10971_v25, 16  ;;  %v14450_v18 = vld [vmem:[#allocation7 + $0x18] sm:$0xff]  }
 0x613   :  { %v9475_v0 = vpack.c.bf16 %v6830_v19, %v6830_v19  ;;  %v7256_v1 = vshll.u32 %v14432_v2, 16  ;;  %v7114_v63 = vshrl.u32 %v10974_v28, 16  ;;  %v7117_v8 = vshll.u32 %v10974_v28, 16  ;;  %v10976_v56 = vld [vmem:[#allocation7 + $0xc] sm:$0xff]   ;;  %v10975_v51 = vld [vmem:[#allocation7 + $0x4] sm:$0xfe]  }
 0x614   :  { %v6971_v55 = vsel %vm6959_vm14, %v6966_v13, %v14425_v15  ;;  %v7334_v22 = vsel %vm7045_vm11, %v7332_v36, %v7333_v23  ;;  %v7253_v29 = vrot.slane %v7251_v46, 1  ;;  %v7106_v43 = vshrl.u32 %v10973_v10, 16  ;;  %v10977_v42 = vld [vmem:[#allocation7 + $0x10] sm:$0xff]   ;;  %v10980_v40 = vld [vmem:[#allocation7 + $0x8] sm:$0xfe]  }
 0x615   :  { %6887 = vst.msk [vmem:[#allocation7 + $0x24] sm:$0xf] %vm6877_vm13, %v9475_v0  ;;  %6996 = vrot.lane.b32.xlu0 %v6971_v55, %s11178_s24  ;;  %7341 = vrot.lane.b32.xlu1 %v7334_v22, %s11177_s23  ;;  %v7258_v37 = vrot.slane %v7256_v1, 1  ;;  %v7116_v62 = vrot.slane %v7114_v63, 1  ;;  %v7109_v24 = vshll.u32 %v10973_v10, 16  ;;  %v7119_v31 = vrot.slane %v7117_v8, 2 }
 0x616   :  { %v7254_v16 = vor.u32 %v7253_v29, %v7249_v54  ;;  %v7108_v30 = vrot.slane %v7106_v43, 1  ;;  %v14447_v6 = vld [vmem:[#allocation7 + $0x14] sm:$0xff]   ;;  %v7390_v34 = vshrl.u32 %v10975_v51, 16  ;;  %v7393_v26 = vshll.u32 %v10975_v51, 16  ;;  %v10982_v47 = vld [vmem:[#allocation7 + $0x8] sm:$0xf8]  }
 0x617   :  { %v7111_v9 = vrot.slane %v7109_v24, 2  ;;  %v14445_v12 = vor.u32 %v7119_v31, %v7116_v62  ;;  %v7398_v44 = vshrl.u32 %v10976_v56, 16  ;;  %v7401_v60 = vshll.u32 %v10976_v56, 16  ;;  %v14452_v61 = vld [vmem:[#allocation7 + $0x10] sm:$0xff]   ;;  %v10986_v13 = vld [vmem:[#allocation7 + $0x4] sm:$0xfc]  }
 0x618   :  { %v7259_v20 = vsel %vm6959_vm14, %v7254_v16, %v7258_v37  ;;  %v7049_v53 = vrot.slane %v10977_v42, 1  ;;  %v7392_v27 = vrot.slane %v7390_v34, 1  ;;  %v7395_v59 = vrot.slane %v7393_v26, 2  ;;  %v14464_v25 = vld [vmem:[#allocation7 + $0x10] sm:$0xff]  }
 0x619   :  { %7284 = vrot.lane.b32.xlu0 %v7259_v20, %s11178_s24  ;;  %v7112_v50 = vor.u32 %v7111_v9, %v7108_v30  ;;  %v7400_v39 = vrot.slane %v7398_v44, 1  ;;  %v7403_v14 = vrot.slane %v7401_v60, 2  ;;  %v7335_v38 = vrot.slane %v14447_v6, 1  ;;  %v14470_v4 = vld [vmem:[#allocation7 + $0x14] sm:$0xff]   ;;  %v10987_v19 = vld [vmem:[#allocation7 + $0xc] sm:$0xff]  }
 0x61a   :  { %v7396_v3 = vor.u32 %v7395_v59, %v7392_v27  ;;  %v7051_v33 = vrot.slane %v14450_v18, 1  ;;  %v7624_v45 = vrot.slane %v14452_v61, 1  ;;  %v7050_v7 = vsel %vm7045_vm11, %v7047_v41, %v7049_v53  ;;  %v10985_v32 = vld [vmem:[#allocation7 + $0x10] sm:$0xff]   ;;  %v10992_v20 = vld [vmem:[#allocation7 + $0x18] sm:$0xff]  }
 0x61b   :  { %v7121_v21 = vsel %vm7104_vm4, %v7112_v50, %v14445_v12  ;;  %v14457_v35 = vor.u32 %v7403_v14, %v7400_v39  ;;  %v7623_v48 = vrot.slane %v10980_v40, 1  ;;  %v7914_v28 = vrot.slane %v10982_v47, 3  ;;  %v10989_v55 = vld [vmem:[#allocation7 + $0x14] sm:$0xff]   ;;  %v11057_v61 = vld [vmem:[%s14916_s7 + $0xc0] ss:$8 sps:$4 sm:$0xff]  }
 0x61c   :  { %7149 = vrot.lane.b32.xlu1 %v7121_v21, %s11179_s2  ;;  %v7260_v52 = vshrl.u32 %v14432_v2, 16  ;;  %v7915_v11 = vrot.slane %v14464_v25, 3  ;;  %v7264_v49 = vshll.u32 %v14470_v4, 16  ;;  %v7336_v17 = vsel %vm7045_vm11, %v7333_v23, %v7335_v38  ;;  %v10988_v2 = vld [vmem:[#allocation7 + $0x10] sm:$0xff]   ;;  %v14498_v9 = vld [vmem:[#allocation7 + $0x18] sm:$0xff]  }
 0x61d   :  { %v7405_v57 = vsel %vm7104_vm4, %v7396_v3, %v14457_v35  ;;  %v7052_v41 = vsel %vm7045_vm11, %v7049_v53, %v7051_v33  ;;  %v6972_v54 = vshrl.u32 %v14418_v5, 16  ;;  %v6976_v0 = vshll.u32 %v10985_v32, 16  ;;  %v10995_v59 = vld [vmem:[#allocation7 + $0x10] sm:$0xff]   ;;  %v10991_v21 = vld [vmem:[#allocation7 + $0x1c] sm:$0xff]  }
 0x61e   :  { %7433 = vrot.lane.b32.xlu0 %v7405_v57, %s11179_s2  ;;  %v7540_v36 = vshrl.u32 %v10987_v19, 16  ;;  %v7625_v58 = vsel %vm7045_vm11, %v7623_v48, %v7624_v45  ;;  %v7262_v46 = vor.u32 %v7260_v52, %v7258_v37  ;;  %v7543_v23 = vshll.u32 %v10987_v19, 16  ;;  %v14508_v3 = vld [vmem:[#allocation7 + $0x1c] sm:$0xff]  }
 0x61f   :  { %v7916_v1 = vsel %vm7913_vm9, %v7914_v28, %v7915_v11  ;;  %v14493_v63 = vrot.slane %v7264_v49, 1  ;;  %v7532_v5 = vshrl.u32 %v10986_v13, 16  ;;  %v7535_v22 = vshll.u32 %v10986_v13, 16  ;;  %v10994_v49 = vld [vmem:[#allocation7 + $0x8] sm:$0xfc]   ;;  %v10998_v19 = vld [vmem:[#allocation7 + $0x1c] sm:$0xff]  }
 0x620   :  { %7057 = vrot.lane.b32.xlu1 %v7050_v7, %s11177_s23  ;;  %v7542_v29 = vrot.slane %v7540_v36, 2  ;;  %v7545_v10 = vrot.slane %v7543_v23, 3  ;;  %v7123_v8 = vshrl.u32 %v10988_v2, 16  ;;  %v7126_v62 = vshll.u32 %v10988_v2, 16 }
 0x621   :  { %v6978_v16 = vrot.slane %v6976_v0, 1  ;;  %v7534_v43 = vrot.slane %v7532_v5, 2  ;;  %v7537_v24 = vrot.slane %v7535_v22, 3  ;;  %v7407_v37 = vshrl.u32 %v10989_v55, 16 }
 0x622   :  { %7343 = vrot.lane.b32.xlu0 %v7336_v17, %s11177_s23  ;;  %v7125_v31 = vrot.slane %v7123_v8, 1  ;;  %v7128_v56 = vrot.slane %v7126_v62, 2  ;;  %v7410_v51 = vshll.u32 %v10989_v55, 16  ;;  %v6974_v30 = vor.u32 %v6972_v54, %v14425_v15  ;;  %v10997_v55 = vld [vmem:[#allocation7 + $0x20] ss:$0 sps:$4 sm:$0x11]  }
 0x623   :  { %v7267_v42 = vsel %vm6959_vm14, %v7262_v46, %v14493_v63  ;;  %v14502_v34 = vor.u32 %v7545_v10, %v7542_v29  ;;  %v7409_v26 = vrot.slane %v7407_v37, 1  ;;  %v7132_v53 = vshrl.u32 %v10992_v20, 16  ;;  %v10999_v29 = vld [vmem:[#allocation7 + $0x20] ss:$0 sps:$4 sm:$0x11]  }
 0x624   :  { %7059 = vrot.lane.b32.xlu1 %v7052_v41, %s11177_s23  ;;  %v7412_v44 = vrot.slane %v7410_v51, 2  ;;  %v6979_v60 = vsel %vm6959_vm14, %v6974_v30, %v6978_v16  ;;  %v7129_v50 = vor.u32 %v7128_v56, %v7125_v31  ;;  %v7538_v27 = vor.u32 %v7537_v24, %v7534_v43  ;;  %v11001_v37 = vld [vmem:[#allocation7 + $0x20] ss:$0 sps:$4 sm:$0x33]  }
 0x625   :  { %v7135_v15 = vshll.u32 %v10992_v20, 16  ;;  %v6980_v39 = vshrl.u32 %v10985_v32, 16  ;;  %v6984_v14 = vshll.u32 %v14498_v9, 16  ;;  %v7134_v47 = vrot.slane %v7132_v53, 1 }
 0x626   :  { %7632 = vrot.lane.b32.xlu0 %v7625_v58, %s11177_s23  ;;  %v7547_v40 = vsel %vm7530_vm10, %v7538_v27, %v14502_v34  ;;  %v14512_v57 = vor.u32 %v7412_v44, %v7409_v26  ;;  %v7830_v7 = vshrl.u32 %v10995_v59, 16  ;;  %v7130_v48 = vsel %vm7104_vm4, %v14445_v12, %v7129_v50  ;;  %v10996_v58 = vld [vmem:[#allocation7 + $0x24] ss:$0 sps:$4 sm:$0x11]   ;;  %v11003_v26 = vld [vmem:[#allocation7 + $0x14] sm:$0xff]  }
 0x627   :  { %v6982_v28 = vor.u32 %v6980_v39, %v6978_v16  ;;  %v7137_v52 = vrot.slane %v7135_v15, 2  ;;  %v7833_v32 = vshll.u32 %v10995_v59, 16  ;;  %v6986_v17 = vrot.slane %v6984_v14, 1  ;;  %v11002_v30 = vld [vmem:[#allocation7 + $0x24] ss:$0 sps:$4 sm:$0x33]  }
 0x628   :  { %7923 = vrot.lane.b32.xlu1 %v7916_v1, %s11177_s23  ;;  %v7337_v41 = vrot.slane %v10991_v21, 1  ;;  %v7822_v54 = vshrl.u32 %v10994_v49, 16  ;;  %v7825_v0 = vshll.u32 %v10994_v49, 16  ;;  %v7414_v13 = vsel %vm7104_vm4, %v14457_v35, %v14512_v57  ;;  %v11000_v35 = vld [vmem:[#allocation7 + $0x24] ss:$0 sps:$4 sm:$0x11]  }
 0x629   :  { %v7272_v36 = vshll.u32 %v14508_v3, 16  ;;  %v7832_v2 = vrot.slane %v7830_v7, 2  ;;  %v6987_v12 = vsel %vm6959_vm14, %v6982_v28, %v6986_v17  ;;  %v14524_v46 = vor.u32 %v7137_v52, %v7134_v47  ;;  %v11005_v14 = vld [vmem:[#allocation7 + $0x10] sm:$0xff]   ;;  %v11004_v49 = vld [vmem:[#allocation7 + $0x8] sm:$0xfe]  }
 0x62a   :  { %7286 = vrot.lane.b32.xlu0 %v7267_v42, %s11178_s24  ;;  %v7835_v23 = vrot.slane %v7833_v32, 3  ;;  %v7824_v1 = vrot.slane %v7822_v54, 2  ;;  %v7827_v5 = vrot.slane %v7825_v0, 3  ;;  %v7416_v22 = vshrl.u32 %v10998_v19, 16 }
 0x62b   :  { %v7419_v10 = vshll.u32 %v10998_v19, 16  ;;  %v7338_v8 = vsel %vm7045_vm11, %v7335_v38, %v7337_v41  ;;  %v7268_v62 = vshrl.u32 %v14470_v4, 16  ;;  %v7274_v16 = vrot.slane %v7272_v36, 1 }
 0x62c   :  { %6998 = vrot.lane.b32.xlu1 %v6979_v60, %s11178_s24  ;;  %v7139_v43 = vsel %vm7104_vm4, %v7129_v50, %v14524_v46  ;;  %v14534_v24 = vor.u32 %v7835_v23, %v7832_v2  ;;  %v7339_v56 = vrot.slane %v10996_v58, 1  ;;  %v7053_v51 = vrot.slane %v10997_v55, 1 }
 0x62d   :  { %v7270_v31 = vor.u32 %v7268_v62, %v14493_v63  ;;  %v7418_v6 = vrot.slane %v7416_v22, 1  ;;  %v7828_v20 = vor.u32 %v7827_v5, %v7824_v1  ;;  %v7421_v38 = vrot.slane %v7419_v10, 2 }
 0x62e   :  { %7575 = vrot.lane.b32.xlu0 %v7547_v40, %s11178_s24  ;;  %v6992_v42 = vshll.u32 %v10999_v29, 16  ;;  %v7280_v60 = vshll.u32 %v11000_v35, 16  ;;  %v7141_v50 = vshrl.u32 %v11001_v37, 16  ;;  %v7144_v53 = vshll.u32 %v11001_v37, 16 }
 0x62f   :  { %v7275_v4 = vsel %vm6959_vm14, %v7270_v31, %v7274_v16  ;;  %v7837_v44 = vsel %vm7530_vm10, %v7828_v20, %v14534_v24  ;;  %v6988_v63 = vshrl.u32 %v14498_v9, 16  ;;  %v7340_v27 = vsel %vm7045_vm11, %v7337_v41, %v7339_v56  ;;  %v11014_v31 = vld [vmem:[#allocation7 + $0x1c] sm:$0xff]  }
 0x630   :  { %7151 = vrot.lane.b32.xlu1 %v7130_v48, %s11179_s2  ;;  %v7054_v15 = vsel %vm7045_vm11, %v7051_v33, %v7053_v51  ;;  %v7422_v59 = vor.u32 %v7421_v38, %v7418_v6  ;;  %v7276_v39 = vshrl.u32 %v14508_v3, 16  ;;  %v6994_v21 = vrot.slane %v6992_v42, 1  ;;  %v11015_v56 = vld [vmem:[#allocation7 + $0x20] sm:$0xff]   ;;  %v11009_v6 = vld [vmem:[#allocation7 + $0x18] sm:$0xff]  }
 0x631   :  { %v7425_v40 = vshrl.u32 %v11002_v30, 16  ;;  %v7428_v47 = vshll.u32 %v11002_v30, 16  ;;  %v7549_v7 = vshrl.u32 %v11003_v26, 16  ;;  %v7282_v48 = vrot.slane %v7280_v60, 1  ;;  %v11056_v51 = vld [vmem:[#allocation7] sm:$0xff]  }
 0x632   :  { %7435 = vrot.lane.b32.xlu0 %v7414_v13, %s11179_s2  ;;  %v7143_v28 = vrot.slane %v7141_v50, 1  ;;  %v7146_v52 = vrot.slane %v7144_v53, 2  ;;  %v7552_v9 = vshll.u32 %v11003_v26, 16  ;;  %v6990_v18 = vor.u32 %v6988_v63, %v6986_v17  ;;  %v11007_v13 = vld [vmem:[#allocation7 + $0x18] sm:$0xff]   ;;  %v14565_v20 = vld [vmem:[#allocation7 + $0x20] sm:$0xff]  }
 0x633   :  { %v7278_v32 = vor.u32 %v7276_v39, %v7274_v16  ;;  %v7689_v33 = vshrl.u32 %v11005_v14, 16  ;;  %v7692_v19 = vshll.u32 %v11005_v14, 16  ;;  %v7423_v3 = vsel %vm7104_vm4, %v14512_v57, %v7422_v59  ;;  %v11024_v39 = vld [vmem:[#allocation7 + $0x20] sm:$0xff]  }
 0x634   :  { %7000 = vrot.lane.b32.xlu1 %v6987_v12, %s11178_s24  ;;  %v7427_v41 = vrot.slane %v7425_v40, 1  ;;  %v7430_v54 = vrot.slane %v7428_v47, 2  ;;  %v7551_v0 = vrot.slane %v7549_v7, 2  ;;  %v6995_v36 = vsel %vm6959_vm14, %v6990_v18, %v6994_v21  ;;  %v11008_v12 = vld [vmem:[#allocation7 + $0x18] sm:$0xff]  }
 0x635   :  { %v7147_v2 = vor.u32 %v7146_v52, %v7143_v28  ;;  %v7554_v58 = vrot.slane %v7552_v9, 3  ;;  %v7681_v17 = vshrl.u32 %v11004_v49, 16  ;;  %v7684_v23 = vshll.u32 %v11004_v49, 16  ;;  %v14587_v28 = vld [vmem:[#allocation7 + $0x28] ss:$0 sps:$4 sm:$0x11]  }
 0x636   :  { %7345 = vrot.lane.b32.xlu0 %v7338_v8, %s11177_s23  ;;  %vm6922_vm13 = vcmask 261120   ;;  %v7691_v55 = vrot.slane %v7689_v33, 1  ;;  %v7694_v1 = vrot.slane %v7692_v19, 2  ;;  %v7283_v57 = vsel %vm6959_vm14, %v7278_v32, %v7282_v48  ;;  %v14562_v8 = vld [vmem:[#allocation7 + $0x18] sm:$0xff]   ;;  %v14585_v48 = vld [vmem:[#allocation7 + $0x20] sm:$0xff]  }
 0x637   :  { %v7431_v5 = vor.u32 %v7430_v54, %v7427_v41  ;;  %v7839_v22 = vshrl.u32 %v11007_v13, 16  ;;  %v7842_v29 = vshll.u32 %v11007_v13, 16  ;;  %v7148_v10 = vsel %vm7104_vm4, %v14524_v46, %v7147_v2  ;;  %6923 = vst.msk [vmem:[#allocation8] sm:$0xff] %vm6922_vm13, %v11056_v51  ;;  %v11025_v18 = vld [vmem:[#allocation7 + $0x24] ss:$0 sps:$4 sm:$0x77]  }
 0x638   :  { %7153 = vrot.lane.b32.xlu1 %v7139_v43, %s11179_s2  ;;  %v14560_v35 = vor.u32 %v7554_v58, %v7551_v0  ;;  %v7698_v62 = vshrl.u32 %v11008_v12, 16  ;;  %v7701_v16 = vshll.u32 %v11008_v12, 16  ;;  %v7683_v43 = vrot.slane %v7681_v17, 1  ;;  %v14590_v19 = vld [vmem:[#allocation7 + $0x28] ss:$0 sps:$4 sm:$0x77]  }
 0x639   :  { %v7686_v37 = vrot.slane %v7684_v23, 2  ;;  %v7432_v38 = vsel %vm7104_vm4, %v7422_v59, %v7431_v5  ;;  %v7695_v30 = vor.u32 %v7694_v1, %v7691_v55  ;;  %v7841_v46 = vrot.slane %v7839_v22, 2  ;;  %v11060_v13 = vld [vmem:[#allocation7] sm:$0xfc]   ;;  %v14614_v12 = vld [vmem:[#allocation7 + $0x10] sm:$0xff]   ;;  %v11078_v1 = vld [vmem:[#allocation7 + $0x8] sm:$0xff]  }
 0x63a   :  { %7288 = vrot.lane.b32.xlu0 %v7275_v4, %s11178_s24  ;;  %v7844_v4 = vrot.slane %v7842_v29, 3  ;;  %v7556_v42 = vsel %vm7530_vm10, %v14502_v34, %v14560_v35  ;;  %v7626_v26 = vrot.slane %v14562_v8, 1  ;;  %v7703_v60 = vrot.slane %v7701_v16, 2  ;;  %v11061_v34 = vld [vmem:[#allocation7 + $0x8] sm:$0xff]   ;;  %v11064_v58 = vld [vmem:[%s14916_s7 + $0xd4] ss:$8 sps:$4 sm:$0xff]  }
 0x63b   :  { %v7687_v50 = vor.u32 %v7686_v37, %v7683_v43  ;;  %v7558_v53 = vshrl.u32 %v11014_v31, 16  ;;  %v7561_v63 = vshll.u32 %v11014_v31, 16  ;;  %v7851_v59 = vshll.u32 %v11015_v56, 16  ;;  %v11067_v55 = vld [vmem:[%s14916_s7 + $0xe4] ss:$8 sps:$4 sm:$0xff]   ;;  %6924 = vst.msk [vmem:[#allocation8 + $0x20] sm:$0xff] %vm6922_vm13, %v11078_v1 }
 0x63c   :  { %7865 = vrot.lane.b32.xlu1 %v7837_v44, %s11178_s24  ;;  %v7700_v44 = vrot.slane %v7698_v62, 1  ;;  %v7845_v21 = vor.u32 %v7844_v4, %v7841_v46  ;;  %v7919_v40 = vrot.slane %v14565_v20, 3  ;;  %v7627_v47 = vsel %vm7045_vm11, %v7624_v45, %v7626_v26  ;;  %v11059_v45 = vld [vmem:[%s14916_s7 + $0xc4] ss:$8 sps:$4 sm:$0xff]   ;;  %v11065_v31 = vld [vmem:[%s14916_s7 + $0xe0] ss:$8 sps:$4 sm:$0xff]  }
 0x63d   :  { %v7696_v14 = vsel %vm7104_vm4, %v7687_v50, %v7695_v30  ;;  %v7560_v52 = vrot.slane %v7558_v53, 2  ;;  %v7563_v9 = vrot.slane %v7561_v63, 3  ;;  %v7853_v32 = vrot.slane %v7851_v59, 3  ;;  %8352 = vmatprep.subr.bf16.mxu0 %v11059_v45  ;;  %v11087_v50 = vld [vmem:[#allocation7 + $0x10] sm:$0xff]   ;;  %v11091_v59 = vld [vmem:[#allocation7 + $0x18] sm:$0xff]  }
 0x63e   :  { %7347 = vrot.lane.b32.xlu0 %v7340_v27, %s11177_s23  ;;  %v7848_v27 = vshrl.u32 %v11015_v56, 16  ;;  %v14583_v7 = vor.u32 %v7703_v60, %v7700_v44  ;;  %v7707_v33 = vshrl.u32 %v11024_v39, 16  ;;  %v7710_v41 = vshll.u32 %v11024_v39, 16  ;;  %8353 = vmatpush1.bf16.msra.mxu0 %v11057_v61  ;;  %v11070_v56 = vld [vmem:[%s14916_s7 + $0xf4] ss:$8 sps:$4 sm:$0xff]   ;;  %6925 = vst.msk [vmem:[#allocation8 + $0x40] sm:$0xff] %vm6922_vm13, %v11087_v50 }
 0x63f   :  { %v7200_v54 = vrot.slane %v11061_v34, 2  ;;  %v7628_v2 = vrot.slane %v14585_v48, 1  ;;  %v7630_v25 = vrot.slane %v14587_v28, 1  ;;  %v7199_v23 = vrot.slane %v11060_v13, 2  ;;  %8354 = vmatprep.subr.bf16.mxu0 %v11064_v58  ;;  %v11079_v44 = vld [vmem:[#allocation7 + $0x4] sm:$0xfc]  }
 0x640   :  { %7061 = vrot.lane.b32.xlu1 %v7054_v15, %s11177_s23  ;;  %v7917_v15 = vrot.slane %v11009_v6, 3  ;;  %v7850_v49 = vrot.slane %v7848_v27, 2  ;;  %v7705_v0 = vsel %vm7104_vm4, %v7695_v30, %v14583_v7  ;;  %v7712_v5 = vrot.slane %v7710_v41, 2  ;;  %v14641_v6 = vld [vmem:[#allocation7 + $0xc] sm:$0xff]   ;;  %v11111_v41 = vld [vmem:[#allocation7 + $0x14] sm:$0xff]  }
 0x641   :  { %v7567_v22 = vshrl.u32 %v11025_v18, 16  ;;  %v7570_v29 = vshll.u32 %v11025_v18, 16  ;;  %v7857_v16 = vshrl.u32 %v14590_v19, 16  ;;  %v7860_v43 = vshll.u32 %v14590_v19, 16  ;;  %v11073_v27 = vld [vmem:[%s14916_s7 + $0x104] ss:$8 sps:$4 sm:$0xff]  }
 0x642   :  { %7437 = vrot.lane.b32.xlu0 %v7423_v3, %s11179_s2  ;;  %v7846_v3 = vsel %vm7530_vm10, %v14534_v24, %v7845_v21  ;;  %v11062_v24 = vld [vmem:[%s14916_s7 + $0xd0] ss:$8 sps:$4 sm:$0xff]   ;;  %v7920_v17 = vsel %vm7913_vm9, %v7917_v15, %v7919_v40  ;;  %v14626_v62 = vor.u32 %v7853_v32, %v7850_v49  ;;  %v7201_v37 = vsel %vm7198_vm1, %v7199_v23, %v7200_v54  ;;  %v11034_v45 = vld [vmem:[#allocation7 + $0x28] ss:$0 sps:$4 sm:$0x77]  }
 0x643   :  { %7212 = vst.msk [vmem:[#allocation8 + $0x8] sm:$0xff] %vm6922_vm13, %v7201_v37  ;;  %8355 = vmatpush1.bf16.msra.mxu0 %v11062_v24  ;;  %v7202_v51 = vrot.slane %v14614_v12, 2  ;;  %v7569_v4 = vrot.slane %v7567_v22, 2  ;;  %v7482_v60 = vrot.slane %v14641_v6, 2  ;;  %v7629_v39 = vsel %vm7045_vm11, %v7626_v26, %v7628_v2  ;;  %v11095_v26 = vld [vmem:[#allocation7 + $0x8] sm:$0xfc]  }
 0x644   :  { %7002 = vrot.lane.b32.xlu1 %v6995_v36, %s11178_s24  ;;  %v7918_v36 = vsel %vm7913_vm9, %v7915_v11, %v7917_v15  ;;  %v7709_v11 = vrot.slane %v7707_v33, 1  ;;  %8356 = vmatprep.subr.bf16.mxu0 %v11067_v55  ;;  %v7855_v46 = vsel %vm7530_vm10, %v7845_v21, %v14626_v62  ;;  %v7481_v15 = vrot.slane %v11079_v44, 2  ;;  %v11103_v19 = vld [vmem:[#allocation7 + $0x18] sm:$0xff]   ;;  %v11104_v13 = vld [vmem:[#allocation7 + $0x20] ss:$0 sps:$4 sm:$0x33]  }
 0x645   :  { %v7203_v30 = vsel %vm7198_vm1, %v7200_v54, %v7202_v51  ;;  %v7859_v34 = vrot.slane %v7857_v16, 2  ;;  %v7862_v48 = vrot.slane %v7860_v43, 3  ;;  %6926 = vst.msk [vmem:[#allocation8 + $0x60] sm:$0xff] %vm6922_vm13, %v11103_v19  ;;  %v7206_v58 = vrot.slane %v11104_v13, 2  ;;  %v11126_v22 = vld [vmem:[#allocation7 + $0x20] sm:$0xff]  }
 0x646   :  { %7290 = vrot.lane.b32.xlu0 %v7283_v57, %s11178_s24  ;;  %v14623_v57 = vor.u32 %v7563_v9, %v7560_v52  ;;  %7213 = vst.msk [vmem:[#allocation8 + $0x28] sm:$0xff] %vm6922_vm13, %v7203_v30  ;;  %v7713_v21 = vor.u32 %v7712_v5, %v7709_v11  ;;  %v7483_v28 = vsel %vm7198_vm1, %v7481_v15, %v7482_v60  ;;  %v7204_v52 = vrot.slane %v11091_v59, 2  ;;  %v11096_v9 = vld [vmem:[#allocation7 + $0x10] sm:$0xff]   ;;  %v11128_v16 = vld [vmem:[#allocation7 + $0x28] ss:$0 sps:$4 sm:$0x33]  }
 0x647   :  { %8357 = vmatpush1.bf16.msra.mxu0 %v11065_v31  ;;  %7494 = vst.msk [vmem:[#allocation8 + $0x10] sm:$0xff] %vm6922_vm13, %v7483_v28  ;;  %v7773_v33 = vrot.slane %v11096_v9, 2  ;;  %v7863_v54 = vor.u32 %v7862_v48, %v7859_v34  ;;  %v7779_v43 = vrot.slane %v11128_v16, 2  ;;  %v11075_v15 = vld [vmem:[%s14916_s7 + $0x110] ss:$8 sps:$4 sm:$0xff]   ;;  %vm8456_vm8 = vcmask 1040384  }
 0x648   :  { %7155 = vrot.lane.b32.xlu1 %v7148_v10, %s11179_s2  ;;  %v11030_v10 = vld [vmem:[#allocation7 + $0x28] ss:$0 sps:$4 sm:$0x33]   ;;  %8358 = vmatprep.subr.bf16.mxu0 %v11070_v56  ;;  %v7205_v8 = vsel %vm7198_vm1, %v7202_v51, %v7204_v52  ;;  %v7714_v32 = vsel %vm7104_vm4, %v14583_v7, %v7713_v21  ;;  %v7207_v11 = vsel %vm7198_vm1, %v7204_v52, %v7206_v58  ;;  %v11084_v28 = vld [vmem:[%s14916_s7 + $0x130] ss:$8 sps:$4 sm:$0xff]  }
 0x649   :  { %v7716_v53 = vshrl.u32 %v11030_v10, 16  ;;  %v7719_v63 = vshll.u32 %v11030_v10, 16  ;;  %7214 = vst.msk [vmem:[#allocation8 + $0x48] sm:$0xff] %vm6922_vm13, %v7205_v8  ;;  %7215 = vst.msk [vmem:[#allocation8 + $0x68] sm:$0xff] %vm6922_vm13, %v7207_v11  ;;  %v11090_v9 = vld [vmem:[%s14916_s7 + $0x144] ss:$8 sps:$4 sm:$0xff]  }
 0x64a   :  { %7439 = vrot.lane.b32.xlu0 %v7432_v38, %s11179_s2  ;;  %v7565_v38 = vsel %vm7530_vm10, %v14560_v35, %v14623_v57  ;;  %v11068_v35 = vld [vmem:[%s14916_s7 + $0xf0] ss:$8 sps:$4 sm:$0xff]  }
 0x64b   :  { %v7718_v49 = vrot.slane %v7716_v53, 1  ;;  %v7721_v18 = vrot.slane %v7719_v63, 2  ;;  %8359 = vmatpush1.bf16.msra.mxu0 %v11068_v35  ;;  %v11077_v63 = vld [vmem:[%s14916_s7 + $0x114] ss:$8 sps:$4 sm:$0xff]  }
 0x64c   :  { %7577 = vrot.lane.b32.xlu1 %v7556_v42, %s11178_s24  ;;  %v7572_v42 = vrot.slane %v7570_v29, 3  ;;  %8389 = vmatprep.subr.bf16.mxu0 %v11073_v27  ;;  %v11127_v29 = vld [vmem:[#allocation7 + $0x24] ss:$0 sps:$4 sm:$0x33]  }
 0x64d   :  { %v7488_v20 = vrot.slane %v11127_v29, 2  ;;  %v11112_v29 = vld [vmem:[%s14916_s7 + $0x1a0] ss:$8 sps:$4 sm:$0xff]  }
 0x64e   :  { %7724 = vrot.lane.b32.xlu0 %v7696_v14, %s11179_s2  ;;  %v7631_v14 = vsel %vm7045_vm11, %v7628_v2, %v7630_v25  ;;  %v7864_v2 = vsel %vm7530_vm10, %v14626_v62, %v7863_v54  ;;  %v7921_v25 = vrot.slane %v11034_v45, 3  ;;  %v7777_v62 = vrot.slane %v11126_v22, 2  ;;  %v11099_v45 = vld [vmem:[%s14916_s7 + $0x164] ss:$8 sps:$4 sm:$0xff]   ;;  %v11097_v54 = vld [vmem:[%s14916_s7 + $0x160] ss:$8 sps:$4 sm:$0xff]  }
 0x650   :  { %7634 = vrot.lane.b32.xlu1 %v7627_v47, %s11177_s23  ;;  %v7573_v47 = vor.u32 %v7572_v42, %v7569_v4  ;;  %v7922_v55 = vsel %vm7913_vm9, %v7919_v40, %v7921_v25  ;;  %v7780_v31 = vsel %vm7198_vm1, %v7777_v62, %v7779_v43  ;;  %v11110_v25 = vld [vmem:[%s14916_s7 + $0x194] ss:$8 sps:$4 sm:$0xff]  }
 0x651   :  { %7788 = vst.msk [vmem:[#allocation8 + $0x78] sm:$0xff] %vm6922_vm13, %v7780_v31 }
 0x652   :  { %7867 = vrot.lane.b32.xlu0 %v7846_v3, %s11178_s24  ;;  %v7574_v61 = vsel %vm7530_vm10, %v14623_v57, %v7573_v47  ;;  %v7772_v3 = vrot.slane %v11095_v26, 2  ;;  %v11122_v57 = vld [vmem:[#allocation7 + $0x1c] sm:$0xff]  }
 0x653   :  { %v7486_v5 = vrot.slane %v11122_v57, 2  ;;  %v11086_v47 = vld [vmem:[%s14916_s7 + $0x134] ss:$8 sps:$4 sm:$0xff]   ;;  %v11114_v57 = vld [vmem:[%s14916_s7 + $0x1a4] ss:$8 sps:$4 sm:$0xff]  }
 0x654   :  { %7726 = vrot.lane.b32.xlu1 %v7705_v0, %s11179_s2  ;;  %v7722_v0 = vor.u32 %v7721_v18, %v7718_v49  ;;  %v7774_v7 = vsel %vm7198_vm1, %v7772_v3, %v7773_v33  ;;  %v11088_v18 = vld [vmem:[%s14916_s7 + $0x140] ss:$8 sps:$4 sm:$0xff]   ;;  %v11094_v26 = vld [vmem:[%s14916_s7 + $0x154] ss:$8 sps:$4 sm:$0xff]  }
 0x655   :  { %7785 = vst.msk [vmem:[#allocation8 + $0x18] sm:$0xff] %vm6922_vm13, %v7774_v7  ;;  %v7489_v37 = vsel %vm7198_vm1, %v7486_v5, %v7488_v20  ;;  %v11102_v7 = vld [vmem:[%s14916_s7 + $0x174] ss:$8 sps:$4 sm:$0xff]   ;;  %v11116_v20 = vld [vmem:[%s14916_s7 + $0x1b0] ss:$8 sps:$4 sm:$0xff]  }
 0x656   :  { %7925 = vrot.lane.b32.xlu0 %v7918_v36, %s11177_s23  ;;  %v7484_v36 = vrot.slane %v11111_v41, 2  ;;  %v7723_v24 = vsel %vm7104_vm4, %v7713_v21, %v7722_v0  ;;  %7497 = vst.msk [vmem:[#allocation8 + $0x70] sm:$0xff] %vm6922_vm13, %v7489_v37  ;;  %v11081_v21 = vld [vmem:[%s14916_s7 + $0x120] ss:$8 sps:$4 sm:$0xff]   ;;  %v11121_v37 = vld [vmem:[%s14916_s7 + $0x1c4] ss:$8 sps:$4 sm:$0xff]  }
 0x658   :  { %7927 = vrot.lane.b32.xlu1 %v7920_v17, %s11177_s23  ;;  %v7485_v12 = vsel %vm7198_vm1, %v7482_v60, %v7484_v36  ;;  %v11115_v17 = vld [vmem:[#allocation7 + $0x18] sm:$0xff]   ;;  %v7487_v10 = vsel %vm7198_vm1, %v7484_v36, %v7486_v5  ;;  %v11071_v60 = vld [vmem:[%s14916_s7 + $0x100] ss:$8 sps:$4 sm:$0xff]  }
 0x659   :  { %7495 = vst.msk [vmem:[#allocation8 + $0x30] sm:$0xff] %vm6922_vm13, %v7485_v12  ;;  %v7775_v23 = vrot.slane %v11115_v17, 2  ;;  %7496 = vst.msk [vmem:[#allocation8 + $0x50] sm:$0xff] %vm6922_vm13, %v7487_v10  ;;  %v11100_v36 = vld [vmem:[%s14916_s7 + $0x170] ss:$8 sps:$4 sm:$0xff]  }
 0x65a   :  { %7579 = vrot.lane.b32.xlu0 %v7565_v38, %s11178_s24  ;;  %v11105_v12 = vld [vmem:[%s14916_s7 + $0x180] ss:$8 sps:$4 sm:$0xff]  }
 0x65b   :  { %v7776_v1 = vsel %vm7198_vm1, %v7773_v33, %v7775_v23  ;;  %v7778_v40 = vsel %vm7198_vm1, %v7775_v23, %v7777_v62  ;;  %v11092_v33 = vld [vmem:[%s14916_s7 + $0x150] ss:$8 sps:$4 sm:$0xff]   ;;  %v11118_v62 = vld [vmem:[%s14916_s7 + $0x1b4] ss:$8 sps:$4 sm:$0xff]  }
 0x65c   :  { %7869 = vrot.lane.b32.xlu1 %v7855_v46, %s11178_s24  ;;  %7786 = vst.msk [vmem:[#allocation8 + $0x38] sm:$0xff] %vm6922_vm13, %v7776_v1  ;;  %7787 = vst.msk [vmem:[#allocation8 + $0x58] sm:$0xff] %vm6922_vm13, %v7778_v40  ;;  %v11108_v23 = vld [vmem:[%s14916_s7 + $0x190] ss:$8 sps:$4 sm:$0xff]  }
 0x65e   :  { %7636 = vrot.lane.b32.xlu0 %v7629_v39, %s11177_s23  ;;  %v11083_v39 = vld [vmem:[%s14916_s7 + $0x124] ss:$8 sps:$4 sm:$0xff]  }
 0x660   :  { %7638 = vrot.lane.b32.xlu1 %v7631_v14, %s11177_s23 }
 0x662   :  { %7728 = vrot.lane.b32.xlu0 %v7714_v32, %s11179_s2 }
 0x664   :  { %7581 = vrot.lane.b32.xlu1 %v7574_v61, %s11178_s24 }
 0x666   :  { %7871 = vrot.lane.b32.xlu0 %v7864_v2, %s11178_s24 }
 0x668   :  { %7730 = vrot.lane.b32.xlu1 %v7723_v24, %s11179_s2  ;;  %v11107_v24 = vld [vmem:[%s14916_s7 + $0x184] ss:$8 sps:$4 sm:$0xff]  }
 0x66a   :  { %7929 = vrot.lane.b32.xlu0 %v7922_v55, %s11177_s23 }
 0x682   :  { %v7056_v56 = vpop.permute.xlu1 %7055 }
 0x687   :  { %v6997_v51 = vpop.permute.xlu0 %6996  ;;  %v7342_v6 = vpop.permute.xlu1 %7341 }
 0x688   :  { %7009 = vst.msk [vmem:[#allocation8] sm:$0xff] %vm7008_vm0, %v6997_v51 }
 0x689   :  { %7068 = vst.msk [vmem:[#allocation8] sm:$0xff] %vm7067_vm5, %v7056_v56 }
 0x68b   :  { %v7285_v38 = vpop.permute.xlu0 %7284 }
 0x68c   :  { %7296 = vst.msk [vmem:[#allocation8 + $0x8] sm:$0xff] %vm7008_vm0, %v7285_v38 }
 0x68d   :  { %7353 = vst.msk [vmem:[#allocation8 + $0x8] sm:$0xff] %vm7067_vm5, %v7342_v6  ;;  %v11119_v6 = vld [vmem:[%s14916_s7 + $0x1c0] ss:$8 sps:$4 sm:$0xff]  }
 0x68e   :  { %v7150_v30 = vpop.permute.xlu1 %7149 }
 0x68f   :  { %7162 = vst.msk [vmem:[#allocation8] sm:$0xff] %vm7161_vm6, %v7150_v30  ;;  %v11125_v30 = vld [vmem:[%s14916_s7 + $0x1d4] ss:$8 sps:$4 sm:$0xff]  }
 0x690   :  { %v7434_v46 = vpop.permute.xlu0 %7433 }
 0x691   :  { %7445 = vst.msk [vmem:[#allocation8 + $0x8] sm:$0xff] %vm7161_vm6, %v7434_v46 }
 0x692   :  { %v7058_v4 = vpop.permute.xlu1 %7057 }
 0x694   :  { %v7344_v42 = vpop.permute.xlu0 %7343 }
 0x696   :  { %v7060_v44 = vpop.permute.xlu1 %7059  ;;  %v7939_v27 = vld [vmem:[#allocation8] sm:$0xff] }
 0x698   :  { %v7633_v50 = vpop.permute.xlu0 %7632  ;;  %v7940_v53 = vld [vmem:[#allocation8 + $0x8] sm:$0xff] }
 0x699   :  { %8360 = vmatprep.mubr.bf16.mxu0 %v7940_v53 }
 0x69a   :  { %v7924_v35 = vpop.permute.xlu1 %7923  ;;  %8361 = vmatmul.mubr.bf16.vlgmr.msra.gmra.mrb[168].mxu0 %v7939_v27 }
 0x69b   :  { %8390 = vmatpush1.bf16.msra.mxu0 %v11071_v60 }
 0x69c   :  { %v7287_v59 = vpop.permute.xlu0 %7286  ;;  %8391 = vmatprep.subr.bf16.mxu0 %v11077_v63 }
 0x69d   :  { %7297 = vst.msk [vmem:[#allocation8 + $0x28] sm:$0xff] %vm7008_vm0, %v7287_v59 }
 0x69e   :  { %v6999_v14 = vpop.permute.xlu1 %6998  ;;  %7354 = vst.msk [vmem:[#allocation8 + $0x28] sm:$0xff] %vm7067_vm5, %v7344_v42 }
 0x69f   :  { %7010 = vst.msk [vmem:[#allocation8 + $0x20] sm:$0xff] %vm7008_vm0, %v6999_v14  ;;  %8392 = vmatpush1.bf16.msra.mxu0 %v11075_v15 }
 0x6a0   :  { %7069 = vst.msk [vmem:[#allocation8 + $0x20] sm:$0xff] %vm7067_vm5, %v7058_v4  ;;  %v7576_v34 = vpop.permute.xlu0 %7575  ;;  %8393 = vmatprep.subr.bf16.mxu0 %v11083_v39  ;;  %v11123_v4 = vld [vmem:[%s14916_s7 + $0x1d0] ss:$8 sps:$4 sm:$0xff]  }
 0x6a1   :  { %7587 = vst.msk [vmem:[#allocation8 + $0x10] sm:$0xff] %vm7008_vm0, %v7576_v34 }
 0x6a2   :  { %v7152_v48 = vpop.permute.xlu1 %7151  ;;  %7644 = vst.msk [vmem:[#allocation8 + $0x10] sm:$0xff] %vm7067_vm5, %v7633_v50 }
 0x6a3   :  { %7163 = vst.msk [vmem:[#allocation8 + $0x20] sm:$0xff] %vm7161_vm6, %v7152_v48  ;;  %8394 = vmatpush1.bf16.msra.mxu0 %v11081_v21 }
 0x6a4   :  { %v7436_v52 = vpop.permute.xlu0 %7435  ;;  %8395 = vmatprep.subr.bf16.mxu0 %v11086_v47 }
 0x6a5   :  { %7446 = vst.msk [vmem:[#allocation8 + $0x28] sm:$0xff] %vm7161_vm6, %v7436_v52  ;;  %v11130_v52 = vld [vmem:[%s14918_s9] sm:$0xff]  }
 0x6a6   :  { %v7001_v49 = vpop.permute.xlu1 %7000 }
 0x6a7   :  { %7011 = vst.msk [vmem:[#allocation8 + $0x40] sm:$0xff] %vm7008_vm0, %v7001_v49  ;;  %8396 = vmatpush1.bf16.msra.mxu0 %v11084_v28  ;;  %v11129_v28 = vld [vmem:[%s14918_s9 + $0x40] sm:$0xff]   ;;  %v11132_v49 = vld [vmem:[%s14918_s9 + $0x8] sm:$0xff]  }
 0x6a8   :  { %7070 = vst.msk [vmem:[#allocation8 + $0x40] sm:$0xff] %vm7067_vm5, %v7060_v44  ;;  %v7346_v8 = vpop.permute.xlu0 %7345  ;;  %8397 = vmatprep.subr.bf16.mxu0 %v11090_v9  ;;  %v11131_v9 = vld [vmem:[%s14918_s9 + $0x48] sm:$0xff]   ;;  %10369 = vmatprep.subr.bf16.mxu1 %v11129_v28 }
 0x6a9   :  { %10370 = vmatpush3.bf16.msra.mxu1 %v11130_v52 }
 0x6aa   :  { %v7154_v32 = vpop.permute.xlu1 %7153  ;;  %v7943_v41 = vld [vmem:[#allocation8 + $0x20] sm:$0xff]  ;;  %10371 = vmatprep.subr.bf16.mxu1 %v11131_v9 }
 0x6ab   :  { %7164 = vst.msk [vmem:[#allocation8 + $0x40] sm:$0xff] %vm7161_vm6, %v7154_v32  ;;  %8398 = vmatpush1.bf16.msra.mxu0 %v11088_v18  ;;  %v11133_v18 = vld [vmem:[%s14918_s9 + $0x50] sm:$0xff]   ;;  %v11136_v32 = vld [vmem:[%s14918_s9 + $0x18] sm:$0xff]  }
 0x6ac   :  { %v7289_v19 = vpop.permute.xlu0 %7288  ;;  %v7944_v61 = vld [vmem:[#allocation8 + $0x28] sm:$0xff]  ;;  %8399 = vmatprep.subr.bf16.mxu0 %v11094_v26  ;;  %v11135_v26 = vld [vmem:[%s14918_s9 + $0x58] sm:$0xff]  }
 0x6ad   :  { %7298 = vst.msk [vmem:[#allocation8 + $0x48] sm:$0xff] %vm7008_vm0, %v7289_v19  ;;  %8368 = vmatprep.mubr.bf16.mxu0 %v7944_v61  ;;  %10372 = vmatpush3.bf16.msra.mxu1 %v11132_v49  ;;  %v11138_v19 = vld [vmem:[%s14918_s9 + $0x20] sm:$0xff]   ;;  %v11139_v61 = vld [vmem:[%s14918_s9 + $0x68] sm:$0xff]  }
 0x6ae   :  { %v7866_v3 = vpop.permute.xlu1 %7865  ;;  %7355 = vst.msk [vmem:[#allocation8 + $0x48] sm:$0xff] %vm7067_vm5, %v7346_v8  ;;  %8369 = vmatmul.mubr.bf16.gmra.mrb[172].mxu0 %v7943_v41  ;;  %v11134_v8 = vld [vmem:[%s14918_s9 + $0x10] sm:$0xff]   ;;  %10373 = vmatprep.subr.bf16.mxu1 %v11133_v18 }
 0x6af   :  { %7877 = vst.msk [vmem:[#allocation8 + $0x18] sm:$0xff] %vm7008_vm0, %v7866_v3  ;;  %8400 = vmatpush1.bf16.msra.mxu0 %v11092_v33  ;;  %v11137_v33 = vld [vmem:[%s14918_s9 + $0x60] sm:$0xff]   ;;  %v11141_v3 = vld [vmem:[%s14918_s9 + $0x70] sm:$0xff]  }
 0x6b0   :  { %7935 = vst.msk [vmem:[#allocation8 + $0x18] sm:$0xff] %vm7067_vm5, %v7924_v35  ;;  %v7348_v0 = vpop.permute.xlu0 %7347  ;;  %8401 = vmatprep.subr.bf16.mxu0 %v11099_v45  ;;  %v11140_v45 = vld [vmem:[%s14918_s9 + $0x28] sm:$0xff]   ;;  %v11142_v41 = vld [vmem:[%s14918_s9 + $0x30] sm:$0xff]  }
 0x6b1   :  { %10374 = vmatpush3.bf16.msra.mxu1 %v11134_v8 }
 0x6b2   :  { %v7062_v13 = vpop.permute.xlu1 %7061  ;;  %v7947_v22 = vld [vmem:[#allocation8 + $0x40] sm:$0xff]  ;;  %10375 = vmatprep.subr.bf16.mxu1 %v11135_v26 }
 0x6b3   :  { %8402 = vmatpush1.bf16.msra.mxu0 %v11097_v54  ;;  %v11143_v54 = vld [vmem:[%s14918_s9 + $0x78] sm:$0xff]  }
 0x6b4   :  { %v7438_v2 = vpop.permute.xlu0 %7437  ;;  %8403 = vmatprep.subr.bf16.mxu0 %v11102_v7 }
 0x6b5   :  { %7447 = vst.msk [vmem:[#allocation8 + $0x48] sm:$0xff] %vm7161_vm6, %v7438_v2  ;;  %10376 = vmatpush3.bf16.msra.mxu1 %v11136_v32  ;;  %v9356_v32 = vld [vmem:[%s14919_s10] ss:$0 sm:$0xff]  ;;  %s11180_s10 = smov [#allocation9]  }
 0x6b6   :  { %v7003_v58 = vpop.permute.xlu1 %7002  ;;  %10377 = vmatprep.subr.bf16.mxu1 %v11137_v33  ;;  %s8695_s25 = sshll.u32 %s11180_s10, 4  ;;  %s8696_s25 = int_to_ptr.vmem [resolvable:$true] %s8695_s25 }
 0x6b7   :  { %7012 = vst.msk [vmem:[#allocation8 + $0x60] sm:$0xff] %vm7008_vm0, %v7003_v58  ;;  %8404 = vmatpush1.bf16.msra.mxu0 %v11100_v36  ;;  %v7942_v51 = vld [vmem:[#allocation8 + $0x18] sm:$0xff]  ;;  %s11151_s6 = scalar_lea.vmem %s8696_s25, 32  ;;  %p11156_p1 = scmp.lt.s32.totalorder %s8696_s25, %s8696_s25 }
 0x6b8   :  { %7071 = vst.msk [vmem:[#allocation8 + $0x60] sm:$0xff] %vm7067_vm5, %v7062_v13  ;;  %v7291_v17 = vpop.permute.xlu0 %7290  ;;  %8405 = vmatprep.subr.bf16.mxu0 %v11107_v24  ;;  %p11152_p0 = scmp.ne.s32.totalorder %s8696_s25, %s11151_s6  ;;  %p11157_p2 = scmp.lt.s32.totalorder %s11151_s6, %s11151_s6 }
 0x6b9   :  { %7299 = vst.msk [vmem:[#allocation8 + $0x68] sm:$0xff] %vm7008_vm0, %v7291_v17  ;;  %10378 = vmatpush3.bf16.msra.mxu1 %v11138_v19 }
 0x6ba   :  { %v7156_v11 = vpop.permute.xlu1 %7155  ;;  %7356 = vst.msk [vmem:[#allocation8 + $0x68] sm:$0xff] %vm7067_vm5, %v7348_v0  ;;  %10379 = vmatprep.subr.bf16.mxu1 %v11139_v61  ;;  %v11144_v0 = vld [vmem:[%s14918_s9 + $0x38] sm:$0xff]   ;;  %p11158_p3 = por %p11157_p2, %p11156_p1 }
 0x6bb   :  { %7165 = vst.msk [vmem:[#allocation8 + $0x60] sm:$0xff] %vm7161_vm6, %v7156_v11  ;;  %8406 = vmatpush1.bf16.msra.mxu0 %v11105_v12 }
 0x6bc   :  { %v7440_v55 = vpop.permute.xlu0 %7439  ;;  %v7948_v1 = vld [vmem:[#allocation8 + $0x48] sm:$0xff]  ;;  %8407 = vmatprep.subr.bf16.mxu0 %v11110_v25  ;;  %p11159_p4 = pnand %p11158_p3, %p11152_p0 }
 0x6bd   :  { %7448 = vst.msk [vmem:[#allocation8 + $0x68] sm:$0xff] %vm7161_vm6, %v7440_v55  ;;  %8374 = vmatprep.mubr.bf16.mxu0 %v7948_v1  ;;  %10380 = vmatpush3.bf16.msra.mxu1 %v11140_v45 }
 0x6be   :  { %v7578_v5 = vpop.permute.xlu1 %7577  ;;  %8375 = vmatmul.mubr.bf16.gmra.mrb[176].mxu0 %v7947_v22  ;;  %10381 = vmatprep.subr.bf16.mxu1 %v11141_v3 }
 0x6bf   :  { %7588 = vst.msk [vmem:[#allocation8 + $0x30] sm:$0xff] %vm7008_vm0, %v7578_v5  ;;  %8408 = vmatpush1.bf16.msra.mxu0 %v11108_v23 }
 0x6c0   :  { %v7725_v10 = vpop.permute.xlu0 %7724  ;;  %8409 = vmatprep.subr.bf16.mxu0 %v11114_v57 }
 0x6c1   :  { %7736 = vst.msk [vmem:[#allocation8 + $0x10] sm:$0xff] %vm7161_vm6, %v7725_v10  ;;  %10382 = vmatpush3.bf16.msra.mxu1 %v11142_v41 }
 0x6c2   :  { %v7635_v16 = vpop.permute.xlu1 %7634  ;;  %v7951_v56 = vld [vmem:[#allocation8 + $0x60] sm:$0xff]  ;;  %10383 = vmatprep.subr.bf16.mxu1 %v11143_v54 }
 0x6c3   :  { %7645 = vst.msk [vmem:[#allocation8 + $0x30] sm:$0xff] %vm7067_vm5, %v7635_v16  ;;  %8410 = vmatpush1.bf16.msra.mxu0 %v11112_v29  ;;  %v8461_v29 = vlaneseq }
 0x6c4   :  { %v7868_v40 = vpop.permute.xlu0 %7867  ;;  %v7952_v43 = vld [vmem:[#allocation8 + $0x68] sm:$0xff]  ;;  %8411 = vmatprep.subr.bf16.mxu0 %v11118_v62 }
 0x6c5   :  { %7878 = vst.msk [vmem:[#allocation8 + $0x38] sm:$0xff] %vm7008_vm0, %v7868_v40  ;;  %8380 = vmatprep.mubr.bf16.mxu0 %v7952_v43  ;;  %10384 = vmatpush3.bf16.msra.mxu1 %v11144_v0  ;;  %v8667_v8 = vand.u32 127, %v8461_v29 }
 0x6c6   :  { %v7727_v31 = vpop.permute.xlu1 %7726  ;;  %8381 = vmatmul.mubr.bf16.gmra.mrb[180].mxu0 %v7951_v56 }
 0x6c7   :  { %7737 = vst.msk [vmem:[#allocation8 + $0x30] sm:$0xff] %vm7161_vm6, %v7727_v31  ;;  %8412 = vmatpush1.bf16.msra.mxu0 %v11116_v20  ;;  %9350 = vmatprep.mubr.msk.bf16.mxu0 %vm8315_vm7, %v7942_v51  ;;  %v8462_v20 = vshrl.u32 %v8461_v29, 7  ;;  %vm8673_vm14 = vcmp.ge.s32.totalorder %v8667_v8, 2  ;;  %vm8674_vm15 = vcmp.lt.s32.totalorder %v8667_v8, 4  ;;  %vm8676_vm2 = vcmp.ge.s32.totalorder %v8667_v8, 7 }
 0x6c8   :  { %v7926_v38 = vpop.permute.xlu0 %7925  ;;  %8413 = vmatprep.subr.bf16.mxu0 %v11121_v37  ;;  %v7941_v53 = vld [vmem:[#allocation8 + $0x10] sm:$0xff]  ;;  %v8459_v37 = vld [vmem:[%s14917_s8] sm:$0x3]  ;;  %vm8677_vm3 = vcmp.lt.s32.totalorder %v8667_v8, 9  ;;  %vm14885_vm4 = vmand %vm8673_vm14, %vm8674_vm15  ;;  %vm8669_vm13 = vcmp.ge.s32.totalorder %v8667_v8, 5  ;;  %vm8670_vm1 = vcmp.lt.s32.totalorder %v8667_v8, 7 }
 0x6c9   :  { %7936 = vst.msk [vmem:[#allocation8 + $0x38] sm:$0xff] %vm7067_vm5, %v7926_v38  ;;  %v8463_v43 = vsub.s32 0, %v8462_v20  ;;  %v8467_v31 = vsub.s32 1, %v8462_v20  ;;  %vm14889_vm9 = vmand %vm8676_vm2, %vm8677_vm3 }
 0x6ca   :  { %v7928_v46 = vpop.permute.xlu1 %7927  ;;  %vm8679_vm10 = vmor %vm14885_vm4, %vm14889_vm9 }
 0x6cb   :  { %8414 = vmatpush1.bf16.msra.mxu0 %v11119_v6  ;;  %v8464_v38 = vrot.slane %v8459_v37, %v8463_v43 }
 0x6cc   :  { %v7580_v42 = vpop.permute.xlu0 %7579  ;;  %8415 = vmatprep.subr.bf16.mxu0 %v11125_v30 }
 0x6cd   :  { %7589 = vst.msk [vmem:[#allocation8 + $0x50] sm:$0xff] %vm7008_vm0, %v7580_v42 }
 0x6ce   :  { %v7870_v44 = vpop.permute.xlu1 %7869  ;;  %v7945_v59 = vld [vmem:[#allocation8 + $0x30] sm:$0xff] }
 0x6cf   :  { %7879 = vst.msk [vmem:[#allocation8 + $0x58] sm:$0xff] %vm7008_vm0, %v7870_v44  ;;  %8416 = vmatpush1.bf16.msra.mxu0 %v11123_v4  ;;  %v8468_v4 = vrot.slane %v8459_v37, %v8467_v31 }
 0x6d0   :  { %7937 = vst.msk [vmem:[#allocation8 + $0x58] sm:$0xff] %vm7067_vm5, %v7928_v46  ;;  %v7637_v60 = vpop.permute.xlu0 %7636  ;;  %v7946_v50 = vld [vmem:[#allocation8 + $0x38] sm:$0xff] }
 0x6d1   :  { %7646 = vst.msk [vmem:[#allocation8 + $0x50] sm:$0xff] %vm7067_vm5, %v7637_v60 }
 0x6d2   :  { %v7639_v63 = vpop.permute.xlu1 %7638  ;;  %8422 = vmatmul.mubr.bf16.vlgmr.msra.gmra.mrb[168].mxu0 %v7941_v53 }
 0x6d3   :  { %9351 = vmatprep.mubr.msk.bf16.mxu0 %vm8315_vm7, %v7946_v50 }
 0x6d4   :  { %v7729_v35 = vpop.permute.xlu0 %7728 }
 0x6d5   :  { %7738 = vst.msk [vmem:[#allocation8 + $0x50] sm:$0xff] %vm7161_vm6, %v7729_v35 }
 0x6d6   :  { %v7582_v27 = vpop.permute.xlu1 %7581 }
 0x6d7   :  { %7590 = vst.msk [vmem:[#allocation8 + $0x70] sm:$0xff] %vm7008_vm0, %v7582_v27  ;;  %v7950_v14 = vld [vmem:[#allocation8 + $0x58] sm:$0xff] }
 0x6d8   :  { %7647 = vst.msk [vmem:[#allocation8 + $0x70] sm:$0xff] %vm7067_vm5, %v7639_v63  ;;  %v7872_v15 = vpop.permute.xlu0 %7871 }
 0x6d9   :  { %7880 = vst.msk [vmem:[#allocation8 + $0x78] sm:$0xff] %vm7008_vm0, %v7872_v15  ;;  %vm8668_vm0 = vcmp.lt.s32.totalorder %v8667_v8, 2 }
 0x6da   :  { %v7731_v39 = vpop.permute.xlu1 %7730  ;;  %8430 = vmatmul.mubr.bf16.gmra.mrb[184].mxu0 %v7945_v59 }
 0x6db   :  { %7739 = vst.msk [vmem:[#allocation8 + $0x70] sm:$0xff] %vm7161_vm6, %v7731_v39  ;;  %9352 = vmatprep.mubr.msk.bf16.mxu0 %vm8315_vm7, %v7950_v14 }
 0x6dc   :  { %v7930_v21 = vpop.permute.xlu0 %7929  ;;  %v7949_v34 = vld [vmem:[#allocation8 + $0x50] sm:$0xff] }
 0x6dd   :  { %7938 = vst.msk [vmem:[#allocation8 + $0x78] sm:$0xff] %vm7067_vm5, %v7930_v21  ;;  %vm8671_vm5 = vmand %vm8669_vm13, %vm8670_vm1 }
 0x6de   :  { %vm8672_vm6 = vmor %vm8668_vm0, %vm8671_vm5 }
 0x6e2   :  { %8436 = vmatmul.mubr.bf16.gmra.mrb[188].mxu0 %v7949_v34  ;;  %v7953_v48 = vld [vmem:[#allocation8 + $0x70] sm:$0xff] }
 0x6e4   :  { %v7954_v47 = vld [vmem:[#allocation8 + $0x78] sm:$0xff] }
 0x6e5   :  { %9353 = vmatprep.mubr.msk.bf16.mxu0 %vm8315_vm7, %v7954_v47  ;;  %vm8687_vm7 = vcmask 74752  }
 0x6ea   :  { %8442 = vmatmul.mubr.bf16.gmra.mrb[180].mxu0 %v7953_v48 }
 0x781   :  { %v8370_v7 = vpop.f32.mrb[172].mxu0 }
 0x782   :  { %v8371_v13 = vpop.f32.mrb[173].mxu0 }
 0x783   :  { %v8372_v36 = vpop.f32.mrb[174].mxu0 }
 0x784   :  { %v8373_v2 = vpop.f32.mrb[175].mxu0 }
 0x791   :  { %v8376_v24 = vpop.f32.mrb[176].mxu0 }
 0x792   :  { %v8377_v58 = vpop.f32.mrb[177].mxu0 }
 0x793   :  { %v8378_v12 = vpop.f32.mrb[178].mxu0 }
 0x794   :  { %v8379_v17 = vpop.f32.mrb[179].mxu0 }
 0x7a5   :  { %v8423_v25 = vpop.f32.mrb[168].mxu0 }
 0x7a6   :  { %v8425_v11 = vpop.f32.mrb[169].mxu0 }
 0x7a7   :  { %v8427_v23 = vpop.f32.mrb[170].mxu0 }
 0x7a8   :  { %v8428_v55 = vpop.f32.mrb[171].mxu0 }
 0x7ad   :  { %v8431_v1 = vpop.f32.mrb[184].mxu0 }
 0x7ae   :  { %v8432_v57 = vpop.f32.mrb[185].mxu0 }
 0x7af   :  { %v8433_v5 = vpop.f32.mrb[186].mxu0 }
 0x7b0   :  { %v8434_v22 = vpop.f32.mrb[187].mxu0 }
 0x7b5   :  { %v8437_v10 = vpop.f32.mrb[188].mxu0 }
 0x7b6   :  { %v8438_v62 = vpop.f32.mrb[189].mxu0 }
 0x7b7   :  { %v8439_v16 = vpop.f32.mrb[190].mxu0 }
 0x7b8   :  { %v8440_v40 = vpop.f32.mrb[191].mxu0 }
 0x7bd   :  { %v8443_v56 = vpop.f32.mrb[180].mxu0 }
 0x7be   :  { %v8444_v51 = vpop.f32.mrb[181].mxu0 }
 0x7bf   :  { %v8445_v6 = vpop.f32.mrb[182].mxu0 }
 0x7c0   :  { %v8452_v30 = vrot.slane %v8445_v6, 6  ;;  %v8447_v46 = vpop.f32.mrb[183].mxu0 }
 0x7c1   :  { %v8453_v42 = vrot.slane %v8447_v46, 6 }
 0x7c2   :  { %v8457_v44 = vsel %vm8456_vm8, %v8423_v25, %v8452_v30 }
 0x7c3   :  { %v8471_v60 = vadd.f32 %v8464_v38, %v8457_v44  ;;  %v8458_v50 = vsel %vm8456_vm8, %v8425_v11, %v8453_v42 }
 0x7c4   :  { %v8472_v53 = vadd.f32 %v8468_v4, %v8458_v50 }
 0x7c5   :  { %v8475_v63 = vmin.f32 %v8471_v60, 0.0  ;;  %vm8473_vm11 = vcmp.gt.f32.partialorder %v8471_v60, 0.0 }
 0x7c6   :  { %v8476_v35 = vmin.f32 %v8472_v53, 0.0  ;;  %vm8474_vm12 = vcmp.gt.f32.partialorder %v8472_v53, 0.0 }
 0x7c7   :  { %v8477_v27 = vmul.f32 1.442695, %v8475_v63 }
 0x7c8   :  { %v8479_v15 = vmul.f32 1.442695, %v8476_v35 }
 0x7c9   :  { %11145 = vpow2.f32 %v8477_v27 }
 0x7ca   :  { %11147 = vpow2.f32 %v8479_v15 }
 0x7d3   :  { %v11146_v59 = vpop.eup %11145 }
 0x7d4   :  { %v11148_v39 = vpop.eup %11147  ;;  %v9354_v14 = vadd.f32 -1.0, %v11146_v59 }
 0x7d5   :  { %v9355_v21 = vadd.f32 -1.0, %v11148_v39 }
 0x7d6   :  { %v8483_v34 = vmul.f32 1.6732632, %v9354_v14 }
 0x7d7   :  { %v8484_v47 = vmul.f32 1.6732632, %v9355_v21 }
 0x7d8   :  { %v8485_v48 = vsel %vm8473_vm11, %v8471_v60, %v8483_v34 }
 0x7d9   :  { %v8487_v28 = vmul.f32 1.050701, %v8485_v48  ;;  %v8486_v52 = vsel %vm8474_vm12, %v8472_v53, %v8484_v47 }
 0x7da   :  { %v8488_v9 = vmul.f32 1.050701, %v8486_v52 }
 0x7db   :  { %v8489_v18 = vpack.c.bf16 %v8487_v28, %v8487_v28 }
 0x7dc   :  { %v8490_v49 = vpack.c.bf16 %v8488_v9, %v8488_v9 }
 0x7de   :  { %8658 = vmatprep.mubr.bf16.mxu1 %v8490_v49 }
 0x7df   :  { %8659 = vmatmul.mubr.bf16.vlgmr.msra.gmra.mrb[208].mxu1 %v8489_v18 }
 0x8b2   :  { %v10385_v26 = vpop.f32.mrb[208].mxu1 }
 0x8b3   :  { %v10386_v33 = vpop.f32.mrb[209].mxu1 }
 0x8b4   :  { %v10387_v61 = vadd.f32 %v10386_v33, %v10385_v26  ;;  %v10388_v3 = vpop.f32.mrb[210].mxu1 }
 0x8b5   :  { %v10389_v41 = vpop.f32.mrb[211].mxu1 }
 0x8b6   :  { %v8661_v54 = vadd.f32 %v10387_v61, %v9356_v32 }
 0x8b8   :  { %v8680_v0 = vmul.f32 0.5, %v8661_v54 }
 0x8ba   :  { %v8681_v7 = vsel %vm8679_vm10, %v8680_v0, %v8661_v54 }
 0x8bb   :  { %11149 = vtanh.f32 %v8681_v7 }
 0x8c5   :  { %v11150_v13 = vpop.eup %11149 }
 0x8c6   :  { %v8683_v36 = vadd.f32 1.0, %v11150_v13 }
 0x8c8   :  { %v8684_v2 = vmul.f32 0.5, %v8683_v36 }
 0x8ca   :  { %v8685_v24 = vsel %vm8679_vm10, %v8684_v2, %v8661_v54 }
 0x8cb   :  { %v8686_v58 = vsel %vm8672_vm6, %v11150_v13, %v8685_v24 }
 0x8cc   :  { %8688 = vst.msk [vmem:[#allocation9] sm:$0x3] %vm8687_vm7, %v8686_v58 }
 0x8cd   :  { %11162 = shalt.err (!%p11159_p4)
}
 0x8ce   :  { %s11163_s0 = scalar_lea.hbm %s14920_s11, 32 }
 0x8cf   :  { %p11164_p5 = scmp.ne.s32.totalorder %s14920_s11, %s11163_s0  ;;  %p11167_p6 = scmp.lt.u32.totalorder %s11163_s0, %s14920_s11 }
 0x8d1   :  { %p11169_p7 = pnand %p11167_p6, %p11164_p5 }
 0x8d3   :  { %11172 = shalt.err (!%p11169_p7)
}
 0x8d4   :  { %8698 = dma.vmem_to_hbm [thread:$0]  %s8696_s25, 32, %s14920_s11, [#allocation10]  }
 0x8d5   :  { %11173 = dma.done.wait [#allocation10], 32  }
 0x8d6   :  { %11174 = vsyncadd [#allocation10], 4294967264 }
 0x8d7   :  { %8702 = vsyncpa [#allocation10], 1 }

</bundles_post_ra>
